<compile_context>
chip_gen: v5e
topology: v5e:2x2
jax: 0.10.0
libtpu: 0.0.40
codegen_flags: <defaults>
</compile_context>

<pallas_src>
import functools
import math

import numpy as np
import jax
import jax.numpy as jnp
from jax.experimental import pallas as pl
from jax.experimental.pallas import tpu as pltpu

F32 = jnp.float32
BF16 = jnp.bfloat16
MB = 1024 * 1024


def _cparams(semantics, vmem_mb=32):
    return pltpu.CompilerParams(dimension_semantics=semantics,
                                vmem_limit_bytes=vmem_mb * MB)


def _row_tile(m, cap=1024):
    """Largest row tile <= cap that exactly divides m (rows padded to multiples of 8)."""
    if m <= cap:
        return m
    for t in range(cap - cap % 8, 7, -8):
        if m % t == 0:
            return t
    assert m % 8 == 0, f"row count {m} must be padded to a multiple of 8"
    return 8


# ----------------------------------------------------------------------------
# Pallas kernels
# ----------------------------------------------------------------------------

def _rbf_radial_kernel(dist_ref, means_ref, betas_ref, w1_ref, b1_ref, w2_ref, b2_ref,
                       remb_ref, rhid_ref, soft_ref, *, cutoff):
    # rbf_emb (with its masked soft cutoff) + radial_lin MLP + unmasked soft-cutoff
    # scaling, all fused; radial_emb never re-enters the kernel from HBM.
    d = dist_ref[...]
    soft = 0.5 * (jnp.cos(d * (math.pi / cutoff)) + 1.0)
    remb = (soft * (d < cutoff).astype(F32)
            * jnp.exp(-betas_ref[...] * jnp.square(jnp.exp(-d) - means_ref[...])))
    remb_ref[...] = remb
    soft_ref[...] = soft
    hpre = jnp.dot(remb.astype(BF16), w1_ref[...], preferred_element_type=F32) + b1_ref[...]
    hmid = (hpre * jax.nn.sigmoid(hpre)).astype(BF16)
    rhid = jnp.dot(hmid, w2_ref[...], preferred_element_type=F32) + b2_ref[...]
    rhid_ref[...] = rhid * soft


def pallas_rbf_radial(dist, means, betas, w1, b1, w2, b2, cutoff):
    e = dist.shape[0]
    r = means.shape[0]
    h = w1.shape[1]
    te = _row_tile(e)
    assert e % te == 0
    return pl.pallas_call(
        functools.partial(_rbf_radial_kernel, cutoff=cutoff),
        out_shape=(jax.ShapeDtypeStruct((e, r), F32),
                   jax.ShapeDtypeStruct((e, h), F32),
                   jax.ShapeDtypeStruct((e, 1), F32)),
        grid=(e // te,),
        in_specs=[pl.BlockSpec((te, 1), lambda i: (i, 0)),
                  pl.BlockSpec((1, r), lambda i: (0, 0)),
                  pl.BlockSpec((1, r), lambda i: (0, 0)),
                  pl.BlockSpec((r, h), lambda i: (0, 0)),
                  pl.BlockSpec((1, h), lambda i: (0, 0)),
                  pl.BlockSpec((h, h), lambda i: (0, 0)),
                  pl.BlockSpec((1, h), lambda i: (0, 0))],
        out_specs=(pl.BlockSpec((te, r), lambda i: (i, 0)),
                   pl.BlockSpec((te, h), lambda i: (i, 0)),
                   pl.BlockSpec((te, 1), lambda i: (i, 0))),
        compiler_params=_cparams(("parallel",)),
    )(dist.astype(F32), means.reshape(1, r).astype(F32), betas.reshape(1, r).astype(F32),
      w1.astype(BF16), b1.reshape(1, h).astype(F32),
      w2.astype(BF16), b2.reshape(1, h).astype(F32))


def _linear_kernel(x_ref, w_ref, b_ref, o_ref, *, act):
    y = jnp.dot(x_ref[...].astype(BF16), w_ref[...], preferred_element_type=F32) + b_ref[...]
    if act:
        y = y * jax.nn.sigmoid(y)
    o_ref[...] = y


def pallas_linear(x, w, b, act=False):
    m, k = x.shape
    n = w.shape[1]
    tm = _row_tile(m)
    assert m % tm == 0
    return pl.pallas_call(
        functools.partial(_linear_kernel, act=act),
        out_shape=jax.ShapeDtypeStruct((m, n), F32),
        grid=(m // tm,),
        in_specs=[pl.BlockSpec((tm, k), lambda i: (i, 0)),
                  pl.BlockSpec((k, n), lambda i: (0, 0)),
                  pl.BlockSpec((1, n), lambda i: (0, 0))],
        out_specs=pl.BlockSpec((tm, n), lambda i: (i, 0)),
        compiler_params=_cparams(("parallel",)),
    )(x, w.astype(BF16), b.reshape(1, n).astype(F32))


def _mlp2_kernel(x_ref, w1_ref, b1_ref, w2_ref, b2_ref, o_ref):
    # Linear -> SiLU -> Linear with a single wide (3H) second matmul; intermediate
    # stays in vregs/VMEM; activations cast to bf16 in-kernel.
    hpre = jnp.dot(x_ref[...].astype(BF16), w1_ref[...], preferred_element_type=F32) + b1_ref[...]
    hmid = (hpre * jax.nn.sigmoid(hpre)).astype(BF16)
    o_ref[...] = jnp.dot(hmid, w2_ref[...], preferred_element_type=F32) + b2_ref[...]


def pallas_mlp2(x, w1, b1, w2, b2):
    m, k = x.shape
    d1 = w1.shape[1]
    d2 = w2.shape[1]
    tm = _row_tile(m)
    assert m % tm == 0
    return pl.pallas_call(
        _mlp2_kernel,
        out_shape=jax.ShapeDtypeStruct((m, d2), F32),
        grid=(m // tm,),
        in_specs=[pl.BlockSpec((tm, k), lambda i: (i, 0)),
                  pl.BlockSpec((k, d1), lambda i: (0, 0)),
                  pl.BlockSpec((1, d1), lambda i: (0, 0)),
                  pl.BlockSpec((d1, d2), lambda i: (0, 0)),
                  pl.BlockSpec((1, d2), lambda i: (0, 0))],
        out_specs=pl.BlockSpec((tm, d2), lambda i: (i, 0)),
        compiler_params=_cparams(("parallel",)),
    )(x, w1.astype(BF16), b1.reshape(1, d1).astype(F32),
      w2.astype(BF16), b2.reshape(1, d2).astype(F32))


def _neighbor_emb_kernel(ei_ref, ej_ref, rhid_ref, nb_ref, zemb_ref, o_ref):
    # NeighborEmb: gather nb_emb[ei] in-kernel (exact f32 one-hot matmul), multiply by
    # radial_hidden, scatter-add onto ej; accumulator initialised with z_emb.
    @pl.when(pl.program_id(0) == 0)
    def _init():
        o_ref[...] = zemb_ref[...]
    te = rhid_ref.shape[0]
    nrows = o_ref.shape[0]
    iota_n = jax.lax.broadcasted_iota(jnp.int32, (te, nrows), 1)
    gat = (ei_ref[...] == iota_n).astype(F32)
    sca = (ej_ref[...] == iota_n).astype(F32)
    s_j = jax.lax.dot_general(gat, nb_ref[...], (((1,), (0,)), ((), ())),
                              preferred_element_type=F32)
    o_ref[...] += jax.lax.dot_general(sca, s_j * rhid_ref[...],
                                      (((0,), (0,)), ((), ())),
                                      preferred_element_type=F32)


def pallas_neighbor_emb(ei2, ej2, radial_hidden, nb_table, z_emb):
    e, h = radial_hidden.shape
    n = nb_table.shape[0]
    te = _row_tile(e, cap=512)
    assert e % te == 0
    return pl.pallas_call(
        _neighbor_emb_kernel,
        out_shape=jax.ShapeDtypeStruct((n, h), F32),
        grid=(e // te,),
        in_specs=[pl.BlockSpec((te, 1), lambda i: (i, 0)),
                  pl.BlockSpec((te, 1), lambda i: (i, 0)),
                  pl.BlockSpec((te, h), lambda i: (i, 0)),
                  pl.BlockSpec((n, h), lambda i: (0, 0)),
                  pl.BlockSpec((n, h), lambda i: (0, 0))],
        out_specs=pl.BlockSpec((n, h), lambda i: (0, 0)),
        compiler_params=_cparams(("arbitrary",), vmem_mb=48),
    )(ei2, ej2, radial_hidden, nb_table.astype(F32), z_emb.astype(F32))


def _svector_kernel(ei_ref, ej_ref, rhid_ref, ed_ref, slin_ref, o_ref):
    # S_vector: gather s_lin[ei] in-kernel, form the per-edge equivariant message
    # (radial_hidden * s_lin * edge_diff_d) and scatter onto ej -- one kernel.
    @pl.when(pl.program_id(0) == 0)
    def _init():
        o_ref[...] = jnp.zeros_like(o_ref)
    te = rhid_ref.shape[0]
    nrows = o_ref.shape[1]
    iota_n = jax.lax.broadcasted_iota(jnp.int32, (te, nrows), 1)
    gat = (ei_ref[...] == iota_n).astype(F32)
    sca = (ej_ref[...] == iota_n).astype(F32)
    s_j = jax.lax.dot_general(gat, slin_ref[...], (((1,), (0,)), ((), ())),
                              preferred_element_type=F32)
    base = s_j * rhid_ref[...]
    for d in range(3):
        msg = base * ed_ref[d]
        o_ref[d] += jax.lax.dot_general(sca, msg, (((0,), (0,)), ((), ())),
                                        preferred_element_type=F32)


def pallas_svector(ei2, ej2, radial_hidden, ed3, s_lin, nrows):
    e, h = radial_hidden.shape
    te = _row_tile(e, cap=512)
    assert e % te == 0
    return pl.pallas_call(
        _svector_kernel,
        out_shape=jax.ShapeDtypeStruct((3, nrows, h), F32),
        grid=(e // te,),
        in_specs=[pl.BlockSpec((te, 1), lambda i: (i, 0)),
                  pl.BlockSpec((te, 1), lambda i: (i, 0)),
                  pl.BlockSpec((te, h), lambda i: (i, 0)),
                  pl.BlockSpec((3, te, 1), lambda i: (0, i, 0)),
                  pl.BlockSpec((nrows, h), lambda i: (0, 0))],
        out_specs=pl.BlockSpec((3, nrows, h), lambda i: (0, 0, 0)),
        compiler_params=_cparams(("arbitrary",), vmem_mb=48),
    )(ei2, ej2, radial_hidden, ed3, s_lin)


def _scal_lin2_kernel(ei_ref, ej_ref, fr_ref, soft_ref, S_ref,
                      w1_ref, b1_ref, w2_ref, b2_ref, o_ref, *, hq):
    # Both edge scalarizations (S[ei] and S[ej] gathered in-kernel) fused with the tiny
    # 3->H/4->1 MLP (SMEM scalar weights), the +sc0 residual and the soft-cutoff scale;
    # one lane-dense (te, 2H) store.
    te = soft_ref.shape[0]
    nrows = S_ref.shape[1]
    iota_n = jax.lax.broadcasted_iota(jnp.int32, (te, nrows), 1)
    soft = soft_ref[...]
    outs = []
    for idx_ref in (ei_ref, ej_ref):
        g = (idx_ref[...] == iota_n).astype(F32)
        sd = [jax.lax.dot_general(g, S_ref[d], (((1,), (0,)), ((), ())),
                                  preferred_element_type=F32) for d in range(3)]
        sc0 = sd[0] * fr_ref[0, 0] + sd[1] * fr_ref[1, 0] + sd[2] * fr_ref[2, 0]
        sc1 = jnp.abs(sd[0] * fr_ref[0, 1] + sd[1] * fr_ref[1, 1] + sd[2] * fr_ref[2, 1])
        sc2 = sd[0] * fr_ref[0, 2] + sd[1] * fr_ref[1, 2] + sd[2] * fr_ref[2, 2]
        acc = None
        for c in range(hq):
            hid = sc0 * w1_ref[0, c] + sc1 * w1_ref[1, c] + sc2 * w1_ref[2, c] + b1_ref[c]
            hid = hid * jax.nn.sigmoid(hid)
            term = hid * w2_ref[c]
            acc = term if acc is None else acc + term
        outs.append((acc + b2_ref[0] + sc0) * soft)
    o_ref[...] = jnp.concatenate(outs, axis=-1)


def pallas_scal_lin2(ei2, ej2, frame_t, soft_cutoff, S3, w1, b1, w2, b2):
    _, n, h = S3.shape
    e = soft_cutoff.shape[0]
    hq = w1.shape[1]
    te = _row_tile(e, cap=512)
    assert e % te == 0
    smem = pl.BlockSpec(memory_space=pltpu.MemorySpace.SMEM)
    return pl.pallas_call(
        functools.partial(_scal_lin2_kernel, hq=hq),
        out_shape=jax.ShapeDtypeStruct((e, 2 * h), F32),
        grid=(e // te,),
        in_specs=[pl.BlockSpec((te, 1), lambda i: (i, 0)),
                  pl.BlockSpec((te, 1), lambda i: (i, 0)),
                  pl.BlockSpec((3, 3, te, 1), lambda i: (0, 0, i, 0)),
                  pl.BlockSpec((te, 1), lambda i: (i, 0)),
                  pl.BlockSpec((3, n, h), lambda i: (0, 0, 0)),
                  smem, smem, smem, smem],
        out_specs=pl.BlockSpec((te, 2 * h), lambda i: (i, 0)),
        compiler_params=_cparams(("parallel",), vmem_mb=48),
    )(ei2, ej2, frame_t, soft_cutoff, S3,
      w1.astype(F32), b1.astype(F32), w2.reshape(-1).astype(F32), b2.astype(F32))


def _equi_message_kernel(ei_ref, ej_ref, remb_ref, rhid_ref, sc34_ref, ed_ref,
                         xh_ref, vec_ref, rbf_w_ref, rbf_b_ref,
                         iw1a_ref, iw1b_ref, iw1c_ref, ib1_ref, iw2_ref, ib2_ref,
                         dx_ref, dvec_ref, *, h, inv_sqrt_3, inv_sqrt_h):
    # EquiMessagePassing fully fused: rbf_proj + inv_proj (weights row-split so A_i_j
    # is never concatenated), node-table gathers (xh, vec), message formation and the
    # scatter-add -- per-edge intermediates never touch HBM.  Messages and vec stay f32.
    @pl.when(pl.program_id(0) == 0)
    def _init():
        dx_ref[...] = jnp.zeros_like(dx_ref)
        dvec_ref[...] = jnp.zeros_like(dvec_ref)
    te = remb_ref.shape[0]
    nrows = dx_ref.shape[0]
    remb = remb_ref[...]
    rbfh = (jnp.dot(remb.astype(BF16), rbf_w_ref[...], preferred_element_type=F32)
            + rbf_b_ref[...])
    hpre = (jnp.dot(sc34_ref[...].astype(BF16), iw1a_ref[...], preferred_element_type=F32)
            + jnp.dot(rhid_ref[...].astype(BF16), iw1b_ref[...], preferred_element_type=F32)
            + jnp.dot(remb.astype(BF16), iw1c_ref[...], preferred_element_type=F32)
            + ib1_ref[...])
    hmid = (hpre * jax.nn.sigmoid(hpre)).astype(BF16)
    rbfh = rbfh * (jnp.dot(hmid, iw2_ref[...], preferred_element_type=F32) + ib2_ref[...])

    iota_n = jax.lax.broadcasted_iota(jnp.int32, (te, nrows), 1)
    gat = (ei_ref[...] == iota_n).astype(F32)
    sca = (ej_ref[...] == iota_n).astype(F32)
    xh_j = jax.lax.dot_general(gat, xh_ref[...], (((1,), (0,)), ((), ())),
                               preferred_element_type=F32)
    xr = xh_j * rbfh
    x1 = xr[:, :h]
    xh2 = xr[:, h:2 * h] * inv_sqrt_3
    xh3 = xr[:, 2 * h:]
    dx_ref[...] += jax.lax.dot_general(sca, x1, (((0,), (0,)), ((), ())),
                                       preferred_element_type=F32)
    for d in range(3):
        vec_j = jax.lax.dot_general(gat, vec_ref[d], (((1,), (0,)), ((), ())),
                                    preferred_element_type=F32)
        vmsg = (vec_j * xh2 + xh3 * ed_ref[d]) * inv_sqrt_h
        dvec_ref[d] += jax.lax.dot_general(sca, vmsg, (((0,), (0,)), ((), ())),
                                           preferred_element_type=F32)


def pallas_equi_message(ei2, ej2, radial_emb, radial_hidden, scalar34, ed3, xh, vec,
                        rbf_w, rbf_b, iw1a, iw1b, iw1c, ib1, iw2, ib2,
                        nrows, h, inv_sqrt_3, inv_sqrt_h):
    e, r = radial_emb.shape
    h3 = 3 * h
    te = _row_tile(e, cap=512)
    assert e % te == 0
    return pl.pallas_call(
        functools.partial(_equi_message_kernel, h=h,
                          inv_sqrt_3=inv_sqrt_3, inv_sqrt_h=inv_sqrt_h),
        out_shape=(jax.ShapeDtypeStruct((nrows, h), F32),
                   jax.ShapeDtypeStruct((3, nrows, h), F32)),
        grid=(e // te,),
        in_specs=[pl.BlockSpec((te, 1), lambda i: (i, 0)),
                  pl.BlockSpec((te, 1), lambda i: (i, 0)),
                  pl.BlockSpec((te, r), lambda i: (i, 0)),
                  pl.BlockSpec((te, h), lambda i: (i, 0)),
                  pl.BlockSpec((te, 2 * h), lambda i: (i, 0)),
                  pl.BlockSpec((3, te, 1), lambda i: (0, i, 0)),
                  pl.BlockSpec((nrows, h3), lambda i: (0, 0)),
                  pl.BlockSpec((3, nrows, h), lambda i: (0, 0, 0)),
                  pl.BlockSpec((r, h3), lambda i: (0, 0)),
                  pl.BlockSpec((1, h3), lambda i: (0, 0)),
                  pl.BlockSpec((2 * h, h3), lambda i: (0, 0)),
                  pl.BlockSpec((h, h3), lambda i: (0, 0)),
                  pl.BlockSpec((r, h3), lambda i: (0, 0)),
                  pl.BlockSpec((1, h3), lambda i: (0, 0)),
                  pl.BlockSpec((h3, h3), lambda i: (0, 0)),
                  pl.BlockSpec((1, h3), lambda i: (0, 0))],
        out_specs=(pl.BlockSpec((nrows, h), lambda i: (0, 0)),
                   pl.BlockSpec((3, nrows, h), lambda i: (0, 0, 0))),
        compiler_params=_cparams(("arbitrary",), vmem_mb=48),
    )(ei2, ej2, radial_emb, radial_hidden, scalar34, ed3, xh, vec,
      rbf_w.astype(BF16), rbf_b.reshape(1, h3).astype(F32),
      iw1a.astype(BF16), iw1b.astype(BF16), iw1c.astype(BF16),
      ib1.reshape(1, h3).astype(F32), iw2.astype(BF16), ib2.reshape(1, h3).astype(F32))


def _fte_kernel(s_ref, dx_ref, vec_ref, dvec_ref, eqw_ref, w1a_ref, w1b_ref, b1_ref,
                w2_ref, b2_ref, so_ref, vo_ref, *, h, inv_sqrt_2, inv_sqrt_h):
    # Message residual (s+dx, vec+dvec) + full FTE block in one kernel: equi_proj
    # (single wide 2H matmul kept f32 for the equivariant state), norm/dot, xequi_proj
    # MLP (concat folded into split weights, single wide 3H matmul) and both residual
    # updates -- scalar/vdot/vec2 never hit HBM.
    s = s_ref[...] + dx_ref[...]
    eqw = eqw_ref[...]
    acc_sq = jnp.zeros(s.shape, F32)
    acc_dot = jnp.zeros(s.shape, F32)
    vec_d, v2_d = [], []
    for d in range(3):
        v = vec_ref[d] + dvec_ref[d]
        vec_d.append(v)
        vp = jnp.dot(v, eqw, preferred_element_type=F32)
        v1 = vp[:, :h]
        v2 = vp[:, h:]
        v2_d.append(v2)
        acc_sq = acc_sq + v1 * v1
        acc_dot = acc_dot + v1 * v2
    scalar = jnp.sqrt(acc_sq)
    vdot = acc_dot * inv_sqrt_h
    hpre = (jnp.dot(s.astype(BF16), w1a_ref[...], preferred_element_type=F32)
            + jnp.dot(scalar.astype(BF16), w1b_ref[...], preferred_element_type=F32)
            + b1_ref[...])
    hmid = (hpre * jax.nn.sigmoid(hpre)).astype(BF16)
    xv = jnp.dot(hmid, w2_ref[...], preferred_element_type=F32) + b2_ref[...]
    so_ref[...] = s + (xv[:, :h] + xv[:, h:2 * h] + vdot) * inv_sqrt_2
    xv3 = xv[:, 2 * h:]
    for d in range(3):
        vo_ref[d] = vec_d[d] + xv3 * v2_d[d]


def pallas_fte(s, dx, vec, dvec, eq_w, w1a, w1b, b1, w2, b2, inv_sqrt_2, inv_sqrt_h):
    n, h = s.shape
    tn = _row_tile(n)
    assert n % tn == 0
    return pl.pallas_call(
        functools.partial(_fte_kernel, h=h, inv_sqrt_2=inv_sqrt_2, inv_sqrt_h=inv_sqrt_h),
        out_shape=(jax.ShapeDtypeStruct((n, h), F32),
                   jax.ShapeDtypeStruct((3, n, h), F32)),
        grid=(n // tn,),
        in_specs=[pl.BlockSpec((tn, h), lambda i: (i, 0)),
                  pl.BlockSpec((tn, h), lambda i: (i, 0)),
                  pl.BlockSpec((3, tn, h), lambda i: (0, i, 0)),
                  pl.BlockSpec((3, tn, h), lambda i: (0, i, 0)),
                  pl.BlockSpec((h, 2 * h), lambda i: (0, 0)),
                  pl.BlockSpec((h, h), lambda i: (0, 0)),
                  pl.BlockSpec((h, h), lambda i: (0, 0)),
                  pl.BlockSpec((1, h), lambda i: (0, 0)),
                  pl.BlockSpec((h, 3 * h), lambda i: (0, 0)),
                  pl.BlockSpec((1, 3 * h), lambda i: (0, 0))],
        out_specs=(pl.BlockSpec((tn, h), lambda i: (i, 0)),
                   pl.BlockSpec((3, tn, h), lambda i: (0, i, 0))),
        compiler_params=_cparams(("parallel",)),
    )(s, dx, vec, dvec, eq_w.astype(F32),
      w1a.astype(BF16), w1b.astype(BF16), b1.reshape(1, h).astype(F32),
      w2.astype(BF16), b2.reshape(1, 3 * h).astype(F32))


def _energy_kernel(batch_ref, s_ref, w_ref, b_ref, o_ref):
    # last_layer + per-graph pooling fused; per-atom energies never hit HBM.
    @pl.when(pl.program_id(0) == 0)
    def _init():
        o_ref[...] = jnp.zeros_like(o_ref)
    tn = s_ref.shape[0]
    g = o_ref.shape[0]
    per_atom = jnp.dot(s_ref[...], w_ref[...], preferred_element_type=F32) + b_ref[...]
    onehot = (batch_ref[...] ==
              jax.lax.broadcasted_iota(jnp.int32, (tn, g), 1)).astype(F32)
    o_ref[...] += jax.lax.dot_general(onehot, per_atom, (((0,), (0,)), ((), ())),
                                      preferred_element_type=F32)


def pallas_energy(batch, s, w, b, num_graphs):
    n, h = s.shape
    tn = _row_tile(n, cap=512)
    assert n % tn == 0
    return pl.pallas_call(
        _energy_kernel,
        out_shape=jax.ShapeDtypeStruct((num_graphs, 1), F32),
        grid=(n // tn,),
        in_specs=[pl.BlockSpec((tn, 1), lambda i: (i, 0)),
                  pl.BlockSpec((tn, h), lambda i: (i, 0)),
                  pl.BlockSpec((h, 1), lambda i: (0, 0)),
                  pl.BlockSpec((1, 1), lambda i: (0, 0))],
        out_specs=pl.BlockSpec((num_graphs, 1), lambda i: (0, 0)),
        compiler_params=_cparams(("arbitrary",), vmem_mb=48),
    )(batch.reshape(n, 1).astype(jnp.int32), s.astype(F32),
      w.astype(F32), b.reshape(1, 1).astype(F32))


# ----------------------------------------------------------------------------
# Plain-JAX glue helpers
# ----------------------------------------------------------------------------

def _normalize(v):
    n = jnp.sqrt(jnp.sum(v * v, axis=-1, keepdims=True))
    out = v / n
    return jnp.where(jnp.isnan(out), 0.0, out)


# ----------------------------------------------------------------------------
# Parameter init (deterministic, synthetic)
# ----------------------------------------------------------------------------

def init_params(key, H, R, L, cutoff):
    keys = iter(jax.random.split(key, 16 + 12 * L))
    nk = lambda: next(keys)

    def xavier(fan_in, fan_out):
        lim = math.sqrt(6.0 / (fan_in + fan_out))
        return jax.random.uniform(nk(), (fan_in, fan_out), jnp.float32, -lim, lim)

    def small_bias(n):
        return jax.random.uniform(nk(), (n,), jnp.float32, -0.05, 0.05)

    zeros = lambda n: jnp.zeros((n,), jnp.float32)

    p = {}
    p['z_emb'] = jax.random.normal(nk(), (95, H), jnp.float32)
    p['nb_emb'] = jax.random.normal(nk(), (95, H), jnp.float32)
    start, end = math.exp(-cutoff), 1.0
    p['rbf_means'] = jnp.linspace(start, end, R, dtype=jnp.float32)
    p['rbf_betas'] = jnp.full((R,), (2.0 / R * (end - start)) ** (-2), jnp.float32)
    p['radial_lin_w1'] = xavier(R, H);      p['radial_lin_b1'] = small_bias(H)
    p['radial_lin_w2'] = xavier(H, H);      p['radial_lin_b2'] = small_bias(H)
    p['sv_w'] = xavier(H, H);               p['sv_b'] = small_bias(H)
    p['lin_w1'] = xavier(3, H // 4);        p['lin_b1'] = small_bias(H // 4)
    p['lin_w2'] = xavier(H // 4, 1);        p['lin_b2'] = small_bias(1)
    p['last_w'] = xavier(H, 1);             p['last_b'] = small_bias(1)
    layers = []
    for _ in range(L):
        lp = {}
        lp['xp_w1'] = xavier(H, H);          lp['xp_b1'] = zeros(H)
        lp['xp_w2'] = xavier(H, 3 * H);      lp['xp_b2'] = zeros(3 * H)
        lp['rbf_w'] = xavier(R, 3 * H);      lp['rbf_b'] = zeros(3 * H)
        lp['inv_w1'] = xavier(3 * H + R, 3 * H); lp['inv_b1'] = small_bias(3 * H)
        lp['inv_w2'] = xavier(3 * H, 3 * H); lp['inv_b2'] = small_bias(3 * H)
        lp['equi_w'] = xavier(H, 2 * H)
        lp['xe_w1'] = xavier(2 * H, H);      lp['xe_b1'] = zeros(H)
        lp['xe_w2'] = xavier(H, 3 * H);      lp['xe_b2'] = zeros(3 * H)
        layers.append(lp)
    p['layers'] = layers
    return p


# ----------------------------------------------------------------------------
# LEFTNet forward
# ----------------------------------------------------------------------------

def leftnet_forward(params, z, pos, batch, ei, ej, num_graphs, H, R, L, cutoff,
                    y_mean=0.0, y_std=1.0):
    N = z.shape[0]                      # padded atom count (multiple of 8, incl. sink)
    E = ei.shape[0]                     # padded edge count (multiple of 8)
    inv_sqrt_2 = 1.0 / math.sqrt(2.0)
    inv_sqrt_3 = 1.0 / math.sqrt(3.0)
    inv_sqrt_h = 1.0 / math.sqrt(H)

    ei2 = ei.reshape(E, 1).astype(jnp.int32)
    ej2 = ej.reshape(E, 1).astype(jnp.int32)

    z_emb = params['z_emb'][z]                                   # (N, H)
    nb_emb_z = params['nb_emb'][z]                               # (N, H)

    diff = pos[ei] - pos[ej]                                     # (E, 3)
    dist = jnp.sqrt(jnp.sum(diff * diff, axis=-1, keepdims=True))  # (E, 1)

    # rbf_emb + radial_lin MLP + soft-cutoff scaling, fused
    radial_emb, radial_hidden, soft_cutoff = pallas_rbf_radial(
        dist, params['rbf_means'], params['rbf_betas'],
        params['radial_lin_w1'], params['radial_lin_b1'],
        params['radial_lin_w2'], params['radial_lin_b2'], cutoff)

    # NeighborEmb fused with its gather/scatter and the z_emb residual
    s = pallas_neighbor_emb(ei2, ej2, radial_hidden, nb_emb_z, z_emb)   # (N, H)

    vec = jnp.zeros((3, N, H), F32)

    # edge frame (small 3-lane geometry stays in plain JAX)
    edge_diff = _normalize(diff)
    edge_cross = _normalize(jnp.cross(pos[ei], pos[ej]))
    edge_vertical = jnp.cross(edge_diff, edge_cross)
    edge_frame = jnp.stack([edge_diff, edge_cross, edge_vertical], axis=-1)   # (E, 3, 3)
    frame_t = jnp.transpose(edge_frame, (1, 2, 0))[:, :, :, None]             # (3, 3, E, 1)
    ed3 = jnp.transpose(edge_diff, (1, 0))[:, :, None]                        # (3, E, 1)

    # TODO(synk): node_frame (mean-neighbor frame) is computed by the reference but
    # never affects its output; skipped.

    # S_vector (lin1 node-level, then fused gather+message+scatter)
    s_lin = pallas_linear(s, params['sv_w'], params['sv_b'], act=True)        # (N, H)
    S_ij3 = pallas_svector(ei2, ej2, radial_hidden, ed3, s_lin, N)            # (3, N, H)

    # both scalarizations + tiny MLP + soft-cutoff, one lane-dense (E, 2H) output
    scalar34 = pallas_scal_lin2(ei2, ej2, frame_t, soft_cutoff, S_ij3,
                                params['lin_w1'], params['lin_b1'],
                                params['lin_w2'], params['lin_b2'])           # (E, 2H)

    for l in range(L):
        p = params['layers'][l]
        # static row-splits of the concat weights (free)
        iw1a = p['inv_w1'][:2 * H]
        iw1b = p['inv_w1'][2 * H:3 * H]
        iw1c = p['inv_w1'][3 * H:]
        xe_w1a = p['xe_w1'][:H]
        xe_w1b = p['xe_w1'][H:]

        # EquiMessagePassing: x_proj (node-level wide MLP) then the fully fused
        # edge kernel (rbf_proj * inv_proj, gathers, messages, scatter-add)
        xh = pallas_mlp2(s, p['xp_w1'], p['xp_b1'], p['xp_w2'], p['xp_b2'])   # (N, 3H)
        dx, dvec = pallas_equi_message(
            ei2, ej2, radial_emb, radial_hidden, scalar34, ed3, xh, vec,
            p['rbf_w'], p['rbf_b'], iw1a, iw1b, iw1c, p['inv_b1'],
            p['inv_w2'], p['inv_b2'], N, H, inv_sqrt_3, inv_sqrt_h)

        # FTE fused with the message residual adds
        s, vec = pallas_fte(s, dx, vec, dvec, p['equi_w'],
                            xe_w1a, xe_w1b, p['xe_b1'], p['xe_w2'], p['xe_b2'],
                            inv_sqrt_2, inv_sqrt_h)

    # last_layer + per-graph pooling (padded sink atoms have batch id == num_graphs)
    energy = pallas_energy(batch, s, params['last_w'], params['last_b'], num_graphs)[:, 0]
    return energy * y_std + y_mean


# ----------------------------------------------------------------------------
# Main
# ----------------------------------------------------------------------------

if __name__ == "__main__":
    H, R, L = 32, 16, 2          # hidden_channels, num_radial, num_layers
    cutoff = 5.0
    N_real = 8                   # atoms (2 molecules of 4)
    num_graphs = 2

    key = jax.random.PRNGKey(0)
    kz, kpos, kparam = jax.random.split(key, 3)
    z_real = jax.random.randint(kz, (N_real,), 1, 95)
    pos_real = jax.random.uniform(kpos, (N_real, 3), jnp.float32) * 2.0
    batch_real = np.array([0, 0, 0, 0, 1, 1, 1, 1], dtype=np.int32)

    # radius_graph: data-dependent edge count -> built host-side (numpy).
    pos_np = np.asarray(pos_real)
    src, dst = [], []
    for a in range(N_real):
        for b in range(N_real):
            if a != b and batch_real[a] == batch_real[b]:
                if np.linalg.norm(pos_np[a] - pos_np[b]) < cutoff:
                    src.append(a)
                    dst.append(b)
    E_real = len(src)

    # Pad atoms/edges to multiples of 8 rows.  Padded edges MUST point at the dedicated
    # sink atom; its batch id (== num_graphs) excludes it from the energy pooling.
    N_pad = ((N_real + 1 + 7) // 8) * 8
    E_pad = ((max(E_real, 1) + 7) // 8) * 8
    sink = N_real
    z = np.zeros((N_pad,), np.int32); z[:N_real] = np.asarray(z_real)
    pos = np.zeros((N_pad, 3), np.float32); pos[:N_real] = pos_np
    batch = np.full((N_pad,), num_graphs, np.int32); batch[:N_real] = batch_real
    ei = np.full((E_pad,), sink, np.int32); ei[:E_real] = np.asarray(src, np.int32)
    ej = np.full((E_pad,), sink, np.int32); ej[:E_real] = np.asarray(dst, np.int32)

    params = init_params(kparam, H, R, L, cutoff)

    fwd = jax.jit(functools.partial(leftnet_forward, num_graphs=num_graphs,
                                    H=H, R=R, L=L, cutoff=cutoff))
    out = fwd(params, jnp.asarray(z), jnp.asarray(pos), jnp.asarray(batch),
              jnp.asarray(ei), jnp.asarray(ej))
    out = jax.block_until_ready(out)

    assert out.shape == (num_graphs,)
    assert bool(jnp.all(jnp.isfinite(out)))
    print("KERNEL_OK")
</pallas_src>

<mosaic_0001>
module attributes {stable_mosaic.version = 11 : i64} {
  func.func @_rbf_radial_kernel(%arg0: i32, %arg1: memref<24x1xf32, #tpu.memory_space<vmem>>, %arg2: memref<1x16xf32, #tpu.memory_space<vmem>>, %arg3: memref<1x16xf32, #tpu.memory_space<vmem>>, %arg4: memref<16x32xbf16, #tpu.memory_space<vmem>>, %arg5: memref<1x32xf32, #tpu.memory_space<vmem>>, %arg6: memref<32x32xbf16, #tpu.memory_space<vmem>>, %arg7: memref<1x32xf32, #tpu.memory_space<vmem>>, %arg8: memref<24x16xf32, #tpu.memory_space<vmem>>, %arg9: memref<24x32xf32, #tpu.memory_space<vmem>>, %arg10: memref<24x1xf32, #tpu.memory_space<vmem>>) attributes {dimension_semantics = [#tpu.dimension_semantics<parallel>], iteration_bounds = array<i64: 1>, scalar_prefetch = 0 : i64, scratch_operands = 0 : i64, tpu.core_type = #tpu.core_type<tc>, window_params = [{transform_indices = @transform_0, window_bounds = array<i64: 24, 1>}, {pipeline_mode = #tpu.pipeline_mode<synchronous>, transform_indices = @transform_1, window_bounds = array<i64: 1, 16>}, {pipeline_mode = #tpu.pipeline_mode<synchronous>, transform_indices = @transform_2, window_bounds = array<i64: 1, 16>}, {pipeline_mode = #tpu.pipeline_mode<synchronous>, transform_indices = @transform_3, window_bounds = array<i64: 16, 32>}, {pipeline_mode = #tpu.pipeline_mode<synchronous>, transform_indices = @transform_4, window_bounds = array<i64: 1, 32>}, {pipeline_mode = #tpu.pipeline_mode<synchronous>, transform_indices = @transform_5, window_bounds = array<i64: 32, 32>}, {pipeline_mode = #tpu.pipeline_mode<synchronous>, transform_indices = @transform_6, window_bounds = array<i64: 1, 32>}, {transform_indices = @transform_7, window_bounds = array<i64: 24, 16>}, {transform_indices = @transform_8, window_bounds = array<i64: 24, 32>}, {transform_indices = @transform_9, window_bounds = array<i64: 24, 1>}]} {
    %c0 = arith.constant 0 : index
    %c0_0 = arith.constant 0 : index
    %0 = vector.load %arg1[%c0, %c0_0] : memref<24x1xf32, #tpu.memory_space<vmem>>, vector<24x1xf32>
    %cst = arith.constant 0.628318548 : f32
    %1 = vector.broadcast %cst : f32 to vector<24x1xf32>
    %2 = arith.mulf %0, %1 : vector<24x1xf32>
    %3 = math.cos %2 : vector<24x1xf32>
    %cst_1 = arith.constant 1.000000e+00 : f32
    %4 = vector.broadcast %cst_1 : f32 to vector<24x1xf32>
    %5 = arith.addf %3, %4 : vector<24x1xf32>
    %cst_2 = arith.constant 5.000000e-01 : f32
    %6 = vector.broadcast %cst_2 : f32 to vector<24x1xf32>
    %7 = arith.mulf %6, %5 : vector<24x1xf32>
    %cst_3 = arith.constant 5.000000e+00 : f32
    %8 = vector.broadcast %cst_3 : f32 to vector<24x1xf32>
    %9 = arith.cmpf olt, %0, %8 : vector<24x1xf32>
    %10 = arith.extui %9 : vector<24x1xi1> to vector<24x1xi32>
    %11 = arith.sitofp %10 : vector<24x1xi32> to vector<24x1xf32>
    %12 = arith.mulf %7, %11 : vector<24x1xf32>
    %c0_4 = arith.constant 0 : index
    %c0_5 = arith.constant 0 : index
    %13 = vector.load %arg3[%c0_4, %c0_5] : memref<1x16xf32, #tpu.memory_space<vmem>>, vector<1x16xf32>
    %cst_6 = arith.constant 0.000000e+00 : f32
    %14 = vector.broadcast %cst_6 : f32 to vector<1x16xf32>
    %15 = arith.subf %14, %13 : vector<1x16xf32>
    %cst_7 = arith.constant 0.000000e+00 : f32
    %16 = vector.broadcast %cst_7 : f32 to vector<24x1xf32>
    %17 = arith.subf %16, %0 : vector<24x1xf32>
    %18 = math.exp %17 : vector<24x1xf32>
    %c0_8 = arith.constant 0 : index
    %c0_9 = arith.constant 0 : index
    %19 = vector.load %arg2[%c0_8, %c0_9] : memref<1x16xf32, #tpu.memory_space<vmem>>, vector<1x16xf32>
    %20 = vector.broadcast %18 : vector<24x1xf32> to vector<24x16xf32>
    %21 = vector.broadcast %19 : vector<1x16xf32> to vector<24x16xf32>
    %22 = arith.subf %20, %21 : vector<24x16xf32>
    %23 = arith.mulf %22, %22 : vector<24x16xf32>
    %24 = vector.broadcast %15 : vector<1x16xf32> to vector<24x16xf32>
    %25 = arith.mulf %24, %23 : vector<24x16xf32>
    %26 = math.exp %25 : vector<24x16xf32>
    %27 = vector.broadcast %12 : vector<24x1xf32> to vector<24x16xf32>
    %28 = arith.mulf %27, %26 : vector<24x16xf32>
    %c0_10 = arith.constant 0 : index
    %c0_11 = arith.constant 0 : index
    %29 = vector.load %arg8[%c0_10, %c0_11] : memref<24x16xf32, #tpu.memory_space<vmem>>, vector<24x16xf32>
    tpu.vector_store %arg8[%c0_10, %c0_11], %28 {strides = array<i32>} : memref<24x16xf32, #tpu.memory_space<vmem>>, vector<24x16xf32>,
    %c0_12 = arith.constant 0 : index
    %c0_13 = arith.constant 0 : index
    %30 = vector.load %arg10[%c0_12, %c0_13] : memref<24x1xf32, #tpu.memory_space<vmem>>, vector<24x1xf32>
    tpu.vector_store %arg10[%c0_12, %c0_13], %7 {strides = array<i32>} : memref<24x1xf32, #tpu.memory_space<vmem>>, vector<24x1xf32>,
    %31 = arith.truncf %28 : vector<24x16xf32> to vector<24x16xbf16>
    %c0_14 = arith.constant 0 : index
    %c0_15 = arith.constant 0 : index
    %32 = vector.load %arg4[%c0_14, %c0_15] : memref<16x32xbf16, #tpu.memory_space<vmem>>, vector<16x32xbf16>
    %cst_16 = arith.constant dense<0.000000e+00> : vector<24x32xf32>
    %33 = tpu.matmul %31, %32, %cst_16 {dimension_numbers = #tpu.dot_dimension_numbers<[1], [0], [0], [1], [0, 0, 1, 1], [], []>} : vector<24x16xbf16>, vector<16x32xbf16>, vector<24x32xf32> -> vector<24x32xf32>
    %c0_17 = arith.constant 0 : index
    %c0_18 = arith.constant 0 : index
    %34 = vector.load %arg5[%c0_17, %c0_18] : memref<1x32xf32, #tpu.memory_space<vmem>>, vector<1x32xf32>
    %35 = vector.broadcast %34 : vector<1x32xf32> to vector<24x32xf32>
    %36 = arith.addf %33, %35 : vector<24x32xf32>
    %37 = arith.negf %36 : vector<24x32xf32>
    %38 = math.exp %37 : vector<24x32xf32>
    %cst_19 = arith.constant 1.000000e+00 : f32
    %39 = vector.broadcast %cst_19 : f32 to vector<24x32xf32>
    %40 = arith.addf %39, %38 : vector<24x32xf32>
    %41 = arith.divf %39, %40 : vector<24x32xf32>
    %42 = arith.mulf %36, %41 : vector<24x32xf32>
    %43 = arith.truncf %42 : vector<24x32xf32> to vector<24x32xbf16>
    %c0_20 = arith.constant 0 : index
    %c0_21 = arith.constant 0 : index
    %44 = vector.load %arg6[%c0_20, %c0_21] : memref<32x32xbf16, #tpu.memory_space<vmem>>, vector<32x32xbf16>
    %cst_22 = arith.constant dense<0.000000e+00> : vector<24x32xf32>
    %45 = tpu.matmul %43, %44, %cst_22 {dimension_numbers = #tpu.dot_dimension_numbers<[1], [0], [0], [1], [0, 0, 1, 1], [], []>} : vector<24x32xbf16>, vector<32x32xbf16>, vector<24x32xf32> -> vector<24x32xf32>
    %c0_23 = arith.constant 0 : index
    %c0_24 = arith.constant 0 : index
    %46 = vector.load %arg7[%c0_23, %c0_24] : memref<1x32xf32, #tpu.memory_space<vmem>>, vector<1x32xf32>
    %47 = vector.broadcast %46 : vector<1x32xf32> to vector<24x32xf32>
    %48 = arith.addf %45, %47 : vector<24x32xf32>
    %49 = vector.broadcast %7 : vector<24x1xf32> to vector<24x32xf32>
    %50 = arith.mulf %48, %49 : vector<24x32xf32>
    %c0_25 = arith.constant 0 : index
    %c0_26 = arith.constant 0 : index
    %51 = vector.load %arg9[%c0_25, %c0_26] : memref<24x32xf32, #tpu.memory_space<vmem>>, vector<24x32xf32>
    tpu.vector_store %arg9[%c0_25, %c0_26], %50 {strides = array<i32>} : memref<24x32xf32, #tpu.memory_space<vmem>>, vector<24x32xf32>,
    return
  }
  func.func @transform_0(%arg0: i32) -> (i32, i32) {
    %c0_i32 = arith.constant 0 : i32
    %c0_i32_0 = arith.constant 0 : i32
    return %arg0, %c0_i32 : i32, i32
  }
  func.func @transform_1(%arg0: i32) -> (i32, i32) {
    %c0_i32 = arith.constant 0 : i32
    %c0_i32_0 = arith.constant 0 : i32
    %c0_i32_1 = arith.constant 0 : i32
    return %c0_i32, %c0_i32_0 : i32, i32
  }
  func.func @transform_2(%arg0: i32) -> (i32, i32) {
    %c0_i32 = arith.constant 0 : i32
    %c0_i32_0 = arith.constant 0 : i32
    %c0_i32_1 = arith.constant 0 : i32
    return %c0_i32, %c0_i32_0 : i32, i32
  }
  func.func @transform_3(%arg0: i32) -> (i32, i32) {
    %c0_i32 = arith.constant 0 : i32
    %c0_i32_0 = arith.constant 0 : i32
    %c0_i32_1 = arith.constant 0 : i32
    return %c0_i32, %c0_i32_0 : i32, i32
  }
  func.func @transform_4(%arg0: i32) -> (i32, i32) {
    %c0_i32 = arith.constant 0 : i32
    %c0_i32_0 = arith.constant 0 : i32
    %c0_i32_1 = arith.constant 0 : i32
    return %c0_i32, %c0_i32_0 : i32, i32
  }
  func.func @transform_5(%arg0: i32) -> (i32, i32) {
    %c0_i32 = arith.constant 0 : i32
    %c0_i32_0 = arith.constant 0 : i32
    %c0_i32_1 = arith.constant 0 : i32
    return %c0_i32, %c0_i32_0 : i32, i32
  }
  func.func @transform_6(%arg0: i32) -> (i32, i32) {
    %c0_i32 = arith.constant 0 : i32
    %c0_i32_0 = arith.constant 0 : i32
    %c0_i32_1 = arith.constant 0 : i32
    return %c0_i32, %c0_i32_0 : i32, i32
  }
  func.func @transform_7(%arg0: i32) -> (i32, i32) {
    %c0_i32 = arith.constant 0 : i32
    %c0_i32_0 = arith.constant 0 : i32
    return %arg0, %c0_i32 : i32, i32
  }
  func.func @transform_8(%arg0: i32) -> (i32, i32) {
    %c0_i32 = arith.constant 0 : i32
    %c0_i32_0 = arith.constant 0 : i32
    return %arg0, %c0_i32 : i32, i32
  }
  func.func @transform_9(%arg0: i32) -> (i32, i32) {
    %c0_i32 = arith.constant 0 : i32
    %c0_i32_0 = arith.constant 0 : i32
    return %arg0, %c0_i32 : i32, i32
  }
}

module attributes {stable_mosaic.version = 11 : i64} {
  func.func @_neighbor_emb_kernel(%arg0: i32, %arg1: memref<24x1xi32, #tpu.memory_space<vmem>>, %arg2: memref<24x1xi32, #tpu.memory_space<vmem>>, %arg3: memref<24x32xf32, #tpu.memory_space<vmem>>, %arg4: memref<16x32xf32, #tpu.memory_space<vmem>>, %arg5: memref<16x32xf32, #tpu.memory_space<vmem>>, %arg6: memref<16x32xf32, #tpu.memory_space<vmem>>) attributes {dimension_semantics = [#tpu.dimension_semantics<arbitrary>], iteration_bounds = array<i64: 1>, scalar_prefetch = 0 : i64, scratch_operands = 0 : i64, tpu.core_type = #tpu.core_type<tc>, window_params = [{transform_indices = @transform_0, window_bounds = array<i64: 24, 1>}, {transform_indices = @transform_1, window_bounds = array<i64: 24, 1>}, {transform_indices = @transform_2, window_bounds = array<i64: 24, 32>}, {pipeline_mode = #tpu.pipeline_mode<synchronous>, transform_indices = @transform_3, window_bounds = array<i64: 16, 32>}, {pipeline_mode = #tpu.pipeline_mode<synchronous>, transform_indices = @transform_4, window_bounds = array<i64: 16, 32>}, {pipeline_mode = #tpu.pipeline_mode<synchronous>, transform_indices = @transform_5, window_bounds = array<i64: 16, 32>}]} {
    %c0_i32 = arith.constant 0 : i32
    %0 = arith.cmpi eq, %arg0, %c0_i32 : i32
    %1 = arith.extui %0 : i1 to i32
    %c0_i32_0 = arith.constant 0 : i32
    %2 = arith.cmpi ne, %1, %c0_i32_0 : i32
    scf.if %2 {
      %c0_13 = arith.constant 0 : index
      %c0_14 = arith.constant 0 : index
      %22 = vector.load %arg5[%c0_13, %c0_14] : memref<16x32xf32, #tpu.memory_space<vmem>>, vector<16x32xf32>
      %c0_15 = arith.constant 0 : index
      %c0_16 = arith.constant 0 : index
      %23 = vector.load %arg6[%c0_15, %c0_16] : memref<16x32xf32, #tpu.memory_space<vmem>>, vector<16x32xf32>
      tpu.vector_store %arg6[%c0_15, %c0_16], %22 {strides = array<i32>} : memref<16x32xf32, #tpu.memory_space<vmem>>, vector<16x32xf32>,
    } else {
    }
    %3 = tpu.iota {dimensions = array<i32: 1>} : vector<24x16xi32>
    %c0 = arith.constant 0 : index
    %c0_1 = arith.constant 0 : index
    %4 = vector.load %arg1[%c0, %c0_1] : memref<24x1xi32, #tpu.memory_space<vmem>>, vector<24x1xi32>
    %5 = vector.broadcast %4 : vector<24x1xi32> to vector<24x16xi32>
    %6 = arith.cmpi eq, %5, %3 : vector<24x16xi32>
    %7 = arith.extui %6 : vector<24x16xi1> to vector<24x16xi32>
    %8 = arith.sitofp %7 : vector<24x16xi32> to vector<24x16xf32>
    %c0_2 = arith.constant 0 : index
    %c0_3 = arith.constant 0 : index
    %9 = vector.load %arg2[%c0_2, %c0_3] : memref<24x1xi32, #tpu.memory_space<vmem>>, vector<24x1xi32>
    %10 = vector.broadcast %9 : vector<24x1xi32> to vector<24x16xi32>
    %11 = arith.cmpi eq, %10, %3 : vector<24x16xi32>
    %12 = arith.extui %11 : vector<24x16xi1> to vector<24x16xi32>
    %13 = arith.sitofp %12 : vector<24x16xi32> to vector<24x16xf32>
    %c0_4 = arith.constant 0 : index
    %c0_5 = arith.constant 0 : index
    %14 = vector.load %arg4[%c0_4, %c0_5] : memref<16x32xf32, #tpu.memory_space<vmem>>, vector<16x32xf32>
    %cst = arith.constant dense<0.000000e+00> : vector<24x32xf32>
    %15 = tpu.matmul %8, %14, %cst {dimension_numbers = #tpu.dot_dimension_numbers<[1], [0], [0], [1], [0, 0, 1, 1], [], []>} : vector<24x16xf32>, vector<16x32xf32>, vector<24x32xf32> -> vector<24x32xf32>
    %c0_6 = arith.constant 0 : index
    %c0_7 = arith.constant 0 : index
    %16 = vector.load %arg6[%c0_6, %c0_7] : memref<16x32xf32, #tpu.memory_space<vmem>>, vector<16x32xf32>
    %c0_8 = arith.constant 0 : index
    %c0_9 = arith.constant 0 : index
    %17 = vector.load %arg3[%c0_8, %c0_9] : memref<24x32xf32, #tpu.memory_space<vmem>>, vector<24x32xf32>
    %18 = arith.mulf %15, %17 : vector<24x32xf32>
    %cst_10 = arith.constant dense<0.000000e+00> : vector<16x32xf32>
    %19 = tpu.matmul %13, %18, %cst_10 {dimension_numbers = #tpu.dot_dimension_numbers<[0], [0], [1], [1], [0, 1, 1, 1], [], []>} : vector<24x16xf32>, vector<24x32xf32>, vector<16x32xf32> -> vector<16x32xf32>
    %20 = arith.addf %16, %19 : vector<16x32xf32>
    %c0_11 = arith.constant 0 : index
    %c0_12 = arith.constant 0 : index
    %21 = vector.load %arg6[%c0_11, %c0_12] : memref<16x32xf32, #tpu.memory_space<vmem>>, vector<16x32xf32>
    tpu.vector_store %arg6[%c0_11, %c0_12], %20 {strides = array<i32>} : memref<16x32xf32, #tpu.memory_space<vmem>>, vector<16x32xf32>,
    return
  }
  func.func @transform_0(%arg0: i32) -> (i32, i32) {
    %c0_i32 = arith.constant 0 : i32
    %c0_i32_0 = arith.constant 0 : i32
    return %arg0, %c0_i32 : i32, i32
  }
  func.func @transform_1(%arg0: i32) -> (i32, i32) {
    %c0_i32 = arith.constant 0 : i32
    %c0_i32_0 = arith.constant 0 : i32
    return %arg0, %c0_i32 : i32, i32
  }
  func.func @transform_2(%arg0: i32) -> (i32, i32) {
    %c0_i32 = arith.constant 0 : i32
    %c0_i32_0 = arith.constant 0 : i32
    return %arg0, %c0_i32 : i32, i32
  }
  func.func @transform_3(%arg0: i32) -> (i32, i32) {
    %c0_i32 = arith.constant 0 : i32
    %c0_i32_0 = arith.constant 0 : i32
    %c0_i32_1 = arith.constant 0 : i32
    return %c0_i32, %c0_i32_0 : i32, i32
  }
  func.func @transform_4(%arg0: i32) -> (i32, i32) {
    %c0_i32 = arith.constant 0 : i32
    %c0_i32_0 = arith.constant 0 : i32
    %c0_i32_1 = arith.constant 0 : i32
    return %c0_i32, %c0_i32_0 : i32, i32
  }
  func.func @transform_5(%arg0: i32) -> (i32, i32) {
    %c0_i32 = arith.constant 0 : i32
    %c0_i32_0 = arith.constant 0 : i32
    %c0_i32_1 = arith.constant 0 : i32
    return %c0_i32, %c0_i32_0 : i32, i32
  }
}

module attributes {stable_mosaic.version = 11 : i64} {
  func.func @_linear_kernel(%arg0: i32, %arg1: memref<16x32xf32, #tpu.memory_space<vmem>>, %arg2: memref<32x32xbf16, #tpu.memory_space<vmem>>, %arg3: memref<1x32xf32, #tpu.memory_space<vmem>>, %arg4: memref<16x32xf32, #tpu.memory_space<vmem>>) attributes {dimension_semantics = [#tpu.dimension_semantics<parallel>], iteration_bounds = array<i64: 1>, scalar_prefetch = 0 : i64, scratch_operands = 0 : i64, tpu.core_type = #tpu.core_type<tc>, window_params = [{transform_indices = @transform_0, window_bounds = array<i64: 16, 32>}, {pipeline_mode = #tpu.pipeline_mode<synchronous>, transform_indices = @transform_1, window_bounds = array<i64: 32, 32>}, {pipeline_mode = #tpu.pipeline_mode<synchronous>, transform_indices = @transform_2, window_bounds = array<i64: 1, 32>}, {transform_indices = @transform_3, window_bounds = array<i64: 16, 32>}]} {
    %c0 = arith.constant 0 : index
    %c0_0 = arith.constant 0 : index
    %0 = vector.load %arg1[%c0, %c0_0] : memref<16x32xf32, #tpu.memory_space<vmem>>, vector<16x32xf32>
    %1 = arith.truncf %0 : vector<16x32xf32> to vector<16x32xbf16>
    %c0_1 = arith.constant 0 : index
    %c0_2 = arith.constant 0 : index
    %2 = vector.load %arg2[%c0_1, %c0_2] : memref<32x32xbf16, #tpu.memory_space<vmem>>, vector<32x32xbf16>
    %cst = arith.constant dense<0.000000e+00> : vector<16x32xf32>
    %3 = tpu.matmul %1, %2, %cst {dimension_numbers = #tpu.dot_dimension_numbers<[1], [0], [0], [1], [0, 0, 1, 1], [], []>} : vector<16x32xbf16>, vector<32x32xbf16>, vector<16x32xf32> -> vector<16x32xf32>
    %c0_3 = arith.constant 0 : index
    %c0_4 = arith.constant 0 : index
    %4 = vector.load %arg3[%c0_3, %c0_4] : memref<1x32xf32, #tpu.memory_space<vmem>>, vector<1x32xf32>
    %5 = vector.broadcast %4 : vector<1x32xf32> to vector<16x32xf32>
    %6 = arith.addf %3, %5 : vector<16x32xf32>
    %7 = arith.negf %6 : vector<16x32xf32>
    %8 = math.exp %7 : vector<16x32xf32>
    %cst_5 = arith.constant 1.000000e+00 : f32
    %9 = vector.broadcast %cst_5 : f32 to vector<16x32xf32>
    %10 = arith.addf %9, %8 : vector<16x32xf32>
    %11 = arith.divf %9, %10 : vector<16x32xf32>
    %12 = arith.mulf %6, %11 : vector<16x32xf32>
    %c0_6 = arith.constant 0 : index
    %c0_7 = arith.constant 0 : index
    %13 = vector.load %arg4[%c0_6, %c0_7] : memref<16x32xf32, #tpu.memory_space<vmem>>, vector<16x32xf32>
    tpu.vector_store %arg4[%c0_6, %c0_7], %12 {strides = array<i32>} : memref<16x32xf32, #tpu.memory_space<vmem>>, vector<16x32xf32>,
    return
  }
  func.func @transform_0(%arg0: i32) -> (i32, i32) {
    %c0_i32 = arith.constant 0 : i32
    %c0_i32_0 = arith.constant 0 : i32
    return %arg0, %c0_i32 : i32, i32
  }
  func.func @transform_1(%arg0: i32) -> (i32, i32) {
    %c0_i32 = arith.constant 0 : i32
    %c0_i32_0 = arith.constant 0 : i32
    %c0_i32_1 = arith.constant 0 : i32
    return %c0_i32, %c0_i32_0 : i32, i32
  }
  func.func @transform_2(%arg0: i32) -> (i32, i32) {
    %c0_i32 = arith.constant 0 : i32
    %c0_i32_0 = arith.constant 0 : i32
    %c0_i32_1 = arith.constant 0 : i32
    return %c0_i32, %c0_i32_0 : i32, i32
  }
  func.func @transform_3(%arg0: i32) -> (i32, i32) {
    %c0_i32 = arith.constant 0 : i32
    %c0_i32_0 = arith.constant 0 : i32
    return %arg0, %c0_i32 : i32, i32
  }
}

module attributes {stable_mosaic.version = 11 : i64} {
  func.func @_svector_kernel(%arg0: i32, %arg1: memref<24x1xi32, #tpu.memory_space<vmem>>, %arg2: memref<24x1xi32, #tpu.memory_space<vmem>>, %arg3: memref<24x32xf32, #tpu.memory_space<vmem>>, %arg4: memref<3x24x1xf32, #tpu.memory_space<vmem>>, %arg5: memref<16x32xf32, #tpu.memory_space<vmem>>, %arg6: memref<3x16x32xf32, #tpu.memory_space<vmem>>) attributes {dimension_semantics = [#tpu.dimension_semantics<arbitrary>], iteration_bounds = array<i64: 1>, scalar_prefetch = 0 : i64, scratch_operands = 0 : i64, tpu.core_type = #tpu.core_type<tc>, window_params = [{transform_indices = @transform_0, window_bounds = array<i64: 24, 1>}, {transform_indices = @transform_1, window_bounds = array<i64: 24, 1>}, {transform_indices = @transform_2, window_bounds = array<i64: 24, 32>}, {transform_indices = @transform_3, window_bounds = array<i64: 3, 24, 1>}, {pipeline_mode = #tpu.pipeline_mode<synchronous>, transform_indices = @transform_4, window_bounds = array<i64: 16, 32>}, {pipeline_mode = #tpu.pipeline_mode<synchronous>, transform_indices = @transform_5, window_bounds = array<i64: 3, 16, 32>}]} {
    %c0_i32 = arith.constant 0 : i32
    %0 = arith.cmpi eq, %arg0, %c0_i32 : i32
    %1 = arith.extui %0 : i1 to i32
    %c0_i32_0 = arith.constant 0 : i32
    %2 = arith.cmpi ne, %1, %c0_i32_0 : i32
    scf.if %2 {
      %cst_36 = arith.constant 0.000000e+00 : f32
      %51 = vector.broadcast %cst_36 : f32 to vector<3x16x32xf32>
      %c0_37 = arith.constant 0 : index
      %c0_38 = arith.constant 0 : index
      %c0_39 = arith.constant 0 : index
      %52 = vector.load %arg6[%c0_37, %c0_38, %c0_39] : memref<3x16x32xf32, #tpu.memory_space<vmem>>, vector<3x16x32xf32>
      tpu.vector_store %arg6[%c0_37, %c0_38, %c0_39], %51 {strides = array<i32>} : memref<3x16x32xf32, #tpu.memory_space<vmem>>, vector<3x16x32xf32>,
    } else {
    }
    %3 = tpu.iota {dimensions = array<i32: 1>} : vector<24x16xi32>
    %c0 = arith.constant 0 : index
    %c0_1 = arith.constant 0 : index
    %4 = vector.load %arg1[%c0, %c0_1] : memref<24x1xi32, #tpu.memory_space<vmem>>, vector<24x1xi32>
    %5 = vector.broadcast %4 : vector<24x1xi32> to vector<24x16xi32>
    %6 = arith.cmpi eq, %5, %3 : vector<24x16xi32>
    %7 = arith.extui %6 : vector<24x16xi1> to vector<24x16xi32>
    %8 = arith.sitofp %7 : vector<24x16xi32> to vector<24x16xf32>
    %c0_2 = arith.constant 0 : index
    %c0_3 = arith.constant 0 : index
    %9 = vector.load %arg2[%c0_2, %c0_3] : memref<24x1xi32, #tpu.memory_space<vmem>>, vector<24x1xi32>
    %10 = vector.broadcast %9 : vector<24x1xi32> to vector<24x16xi32>
    %11 = arith.cmpi eq, %10, %3 : vector<24x16xi32>
    %12 = arith.extui %11 : vector<24x16xi1> to vector<24x16xi32>
    %13 = arith.sitofp %12 : vector<24x16xi32> to vector<24x16xf32>
    %c0_4 = arith.constant 0 : index
    %c0_5 = arith.constant 0 : index
    %14 = vector.load %arg5[%c0_4, %c0_5] : memref<16x32xf32, #tpu.memory_space<vmem>>, vector<16x32xf32>
    %cst = arith.constant dense<0.000000e+00> : vector<24x32xf32>
    %15 = tpu.matmul %8, %14, %cst {dimension_numbers = #tpu.dot_dimension_numbers<[1], [0], [0], [1], [0, 0, 1, 1], [], []>} : vector<24x16xf32>, vector<16x32xf32>, vector<24x32xf32> -> vector<24x32xf32>
    %c0_6 = arith.constant 0 : index
    %c0_7 = arith.constant 0 : index
    %16 = vector.load %arg3[%c0_6, %c0_7] : memref<24x32xf32, #tpu.memory_space<vmem>>, vector<24x32xf32>
    %17 = arith.mulf %15, %16 : vector<24x32xf32>
    %c0_8 = arith.constant 0 : index
    %c0_9 = arith.constant 0 : index
    %c0_10 = arith.constant 0 : index
    %18 = vector.load %arg4[%c0_8, %c0_9, %c0_10] : memref<3x24x1xf32, #tpu.memory_space<vmem>>, vector<1x24x1xf32>
    %19 = vector.shape_cast %18 : vector<1x24x1xf32> to vector<24x1xf32>
    %20 = vector.broadcast %19 : vector<24x1xf32> to vector<24x32xf32>
    %21 = arith.mulf %17, %20 : vector<24x32xf32>
    %c0_11 = arith.constant 0 : index
    %c0_12 = arith.constant 0 : index
    %c0_13 = arith.constant 0 : index
    %22 = vector.load %arg6[%c0_11, %c0_12, %c0_13] : memref<3x16x32xf32, #tpu.memory_space<vmem>>, vector<1x16x32xf32>
    %23 = vector.shape_cast %22 : vector<1x16x32xf32> to vector<16x32xf32>
    %cst_14 = arith.constant dense<0.000000e+00> : vector<16x32xf32>
    %24 = tpu.matmul %13, %21, %cst_14 {dimension_numbers = #tpu.dot_dimension_numbers<[0], [0], [1], [1], [0, 1, 1, 1], [], []>} : vector<24x16xf32>, vector<24x32xf32>, vector<16x32xf32> -> vector<16x32xf32>
    %25 = arith.addf %23, %24 : vector<16x32xf32>
    %c0_15 = arith.constant 0 : index
    %c0_16 = arith.constant 0 : index
    %c0_17 = arith.constant 0 : index
    %26 = vector.load %arg6[%c0_15, %c0_16, %c0_17] : memref<3x16x32xf32, #tpu.memory_space<vmem>>, vector<1x16x32xf32>
    %27 = vector.shape_cast %26 : vector<1x16x32xf32> to vector<16x32xf32>
    %28 = vector.shape_cast %25 : vector<16x32xf32> to vector<1x16x32xf32>
    tpu.vector_store %arg6[%c0_15, %c0_16, %c0_17], %28 {strides = array<i32>} : memref<3x16x32xf32, #tpu.memory_space<vmem>>, vector<1x16x32xf32>,
    %c1 = arith.constant 1 : index
    %c0_18 = arith.constant 0 : index
    %c0_19 = arith.constant 0 : index
    %29 = vector.load %arg4[%c1, %c0_18, %c0_19] : memref<3x24x1xf32, #tpu.memory_space<vmem>>, vector<1x24x1xf32>
    %30 = vector.shape_cast %29 : vector<1x24x1xf32> to vector<24x1xf32>
    %31 = vector.broadcast %30 : vector<24x1xf32> to vector<24x32xf32>
    %32 = arith.mulf %17, %31 : vector<24x32xf32>
    %c1_20 = arith.constant 1 : index
    %c0_21 = arith.constant 0 : index
    %c0_22 = arith.constant 0 : index
    %33 = vector.load %arg6[%c1_20, %c0_21, %c0_22] : memref<3x16x32xf32, #tpu.memory_space<vmem>>, vector<1x16x32xf32>
    %34 = vector.shape_cast %33 : vector<1x16x32xf32> to vector<16x32xf32>
    %cst_23 = arith.constant dense<0.000000e+00> : vector<16x32xf32>
    %35 = tpu.matmul %13, %32, %cst_23 {dimension_numbers = #tpu.dot_dimension_numbers<[0], [0], [1], [1], [0, 1, 1, 1], [], []>} : vector<24x16xf32>, vector<24x32xf32>, vector<16x32xf32> -> vector<16x32xf32>
    %36 = arith.addf %34, %35 : vector<16x32xf32>
    %c1_24 = arith.constant 1 : index
    %c0_25 = arith.constant 0 : index
    %c0_26 = arith.constant 0 : index
    %37 = vector.load %arg6[%c1_24, %c0_25, %c0_26] : memref<3x16x32xf32, #tpu.memory_space<vmem>>, vector<1x16x32xf32>
    %38 = vector.shape_cast %37 : vector<1x16x32xf32> to vector<16x32xf32>
    %39 = vector.shape_cast %36 : vector<16x32xf32> to vector<1x16x32xf32>
    tpu.vector_store %arg6[%c1_24, %c0_25, %c0_26], %39 {strides = array<i32>} : memref<3x16x32xf32, #tpu.memory_space<vmem>>, vector<1x16x32xf32>,
    %c2 = arith.constant 2 : index
    %c0_27 = arith.constant 0 : index
    %c0_28 = arith.constant 0 : index
    %40 = vector.load %arg4[%c2, %c0_27, %c0_28] : memref<3x24x1xf32, #tpu.memory_space<vmem>>, vector<1x24x1xf32>
    %41 = vector.shape_cast %40 : vector<1x24x1xf32> to vector<24x1xf32>
    %42 = vector.broadcast %41 : vector<24x1xf32> to vector<24x32xf32>
    %43 = arith.mulf %17, %42 : vector<24x32xf32>
    %c2_29 = arith.constant 2 : index
    %c0_30 = arith.constant 0 : index
    %c0_31 = arith.constant 0 : index
    %44 = vector.load %arg6[%c2_29, %c0_30, %c0_31] : memref<3x16x32xf32, #tpu.memory_space<vmem>>, vector<1x16x32xf32>
    %45 = vector.shape_cast %44 : vector<1x16x32xf32> to vector<16x32xf32>
    %cst_32 = arith.constant dense<0.000000e+00> : vector<16x32xf32>
    %46 = tpu.matmul %13, %43, %cst_32 {dimension_numbers = #tpu.dot_dimension_numbers<[0], [0], [1], [1], [0, 1, 1, 1], [], []>} : vector<24x16xf32>, vector<24x32xf32>, vector<16x32xf32> -> vector<16x32xf32>
    %47 = arith.addf %45, %46 : vector<16x32xf32>
    %c2_33 = arith.constant 2 : index
    %c0_34 = arith.constant 0 : index
    %c0_35 = arith.constant 0 : index
    %48 = vector.load %arg6[%c2_33, %c0_34, %c0_35] : memref<3x16x32xf32, #tpu.memory_space<vmem>>, vector<1x16x32xf32>
    %49 = vector.shape_cast %48 : vector<1x16x32xf32> to vector<16x32xf32>
    %50 = vector.shape_cast %47 : vector<16x32xf32> to vector<1x16x32xf32>
    tpu.vector_store %arg6[%c2_33, %c0_34, %c0_35], %50 {strides = array<i32>} : memref<3x16x32xf32, #tpu.memory_space<vmem>>, vector<1x16x32xf32>,
    return
  }
  func.func @transform_0(%arg0: i32) -> (i32, i32) {
    %c0_i32 = arith.constant 0 : i32
    %c0_i32_0 = arith.constant 0 : i32
    return %arg0, %c0_i32 : i32, i32
  }
  func.func @transform_1(%arg0: i32) -> (i32, i32) {
    %c0_i32 = arith.constant 0 : i32
    %c0_i32_0 = arith.constant 0 : i32
    return %arg0, %c0_i32 : i32, i32
  }
  func.func @transform_2(%arg0: i32) -> (i32, i32) {
    %c0_i32 = arith.constant 0 : i32
    %c0_i32_0 = arith.constant 0 : i32
    return %arg0, %c0_i32 : i32, i32
  }
  func.func @transform_3(%arg0: i32) -> (i32, i32, i32) {
    %c0_i32 = arith.constant 0 : i32
    %c0_i32_0 = arith.constant 0 : i32
    %c0_i32_1 = arith.constant 0 : i32
    return %c0_i32, %arg0, %c0_i32_0 : i32, i32, i32
  }
  func.func @transform_4(%arg0: i32) -> (i32, i32) {
    %c0_i32 = arith.constant 0 : i32
    %c0_i32_0 = arith.constant 0 : i32
    %c0_i32_1 = arith.constant 0 : i32
    return %c0_i32, %c0_i32_0 : i32, i32
  }
  func.func @transform_5(%arg0: i32) -> (i32, i32, i32) {
    %c0_i32 = arith.constant 0 : i32
    %c0_i32_0 = arith.constant 0 : i32
    %c0_i32_1 = arith.constant 0 : i32
    %c0_i32_2 = arith.constant 0 : i32
    return %c0_i32, %c0_i32_0, %c0_i32_1 : i32, i32, i32
  }
}

module attributes {stable_mosaic.version = 11 : i64} {
  func.func @_mlp2_kernel(%arg0: i32, %arg1: memref<16x32xf32, #tpu.memory_space<vmem>>, %arg2: memref<32x32xbf16, #tpu.memory_space<vmem>>, %arg3: memref<1x32xf32, #tpu.memory_space<vmem>>, %arg4: memref<32x96xbf16, #tpu.memory_space<vmem>>, %arg5: memref<1x96xf32, #tpu.memory_space<vmem>>, %arg6: memref<16x96xf32, #tpu.memory_space<vmem>>) attributes {dimension_semantics = [#tpu.dimension_semantics<parallel>], iteration_bounds = array<i64: 1>, scalar_prefetch = 0 : i64, scratch_operands = 0 : i64, tpu.core_type = #tpu.core_type<tc>, window_params = [{transform_indices = @transform_0, window_bounds = array<i64: 16, 32>}, {pipeline_mode = #tpu.pipeline_mode<synchronous>, transform_indices = @transform_1, window_bounds = array<i64: 32, 32>}, {pipeline_mode = #tpu.pipeline_mode<synchronous>, transform_indices = @transform_2, window_bounds = array<i64: 1, 32>}, {pipeline_mode = #tpu.pipeline_mode<synchronous>, transform_indices = @transform_3, window_bounds = array<i64: 32, 96>}, {pipeline_mode = #tpu.pipeline_mode<synchronous>, transform_indices = @transform_4, window_bounds = array<i64: 1, 96>}, {transform_indices = @transform_5, window_bounds = array<i64: 16, 96>}]} {
    %c0 = arith.constant 0 : index
    %c0_0 = arith.constant 0 : index
    %0 = vector.load %arg1[%c0, %c0_0] : memref<16x32xf32, #tpu.memory_space<vmem>>, vector<16x32xf32>
    %1 = arith.truncf %0 : vector<16x32xf32> to vector<16x32xbf16>
    %c0_1 = arith.constant 0 : index
    %c0_2 = arith.constant 0 : index
    %2 = vector.load %arg2[%c0_1, %c0_2] : memref<32x32xbf16, #tpu.memory_space<vmem>>, vector<32x32xbf16>
    %cst = arith.constant dense<0.000000e+00> : vector<16x32xf32>
    %3 = tpu.matmul %1, %2, %cst {dimension_numbers = #tpu.dot_dimension_numbers<[1], [0], [0], [1], [0, 0, 1, 1], [], []>} : vector<16x32xbf16>, vector<32x32xbf16>, vector<16x32xf32> -> vector<16x32xf32>
    %c0_3 = arith.constant 0 : index
    %c0_4 = arith.constant 0 : index
    %4 = vector.load %arg3[%c0_3, %c0_4] : memref<1x32xf32, #tpu.memory_space<vmem>>, vector<1x32xf32>
    %5 = vector.broadcast %4 : vector<1x32xf32> to vector<16x32xf32>
    %6 = arith.addf %3, %5 : vector<16x32xf32>
    %7 = arith.negf %6 : vector<16x32xf32>
    %8 = math.exp %7 : vector<16x32xf32>
    %cst_5 = arith.constant 1.000000e+00 : f32
    %9 = vector.broadcast %cst_5 : f32 to vector<16x32xf32>
    %10 = arith.addf %9, %8 : vector<16x32xf32>
    %11 = arith.divf %9, %10 : vector<16x32xf32>
    %12 = arith.mulf %6, %11 : vector<16x32xf32>
    %13 = arith.truncf %12 : vector<16x32xf32> to vector<16x32xbf16>
    %c0_6 = arith.constant 0 : index
    %c0_7 = arith.constant 0 : index
    %14 = vector.load %arg4[%c0_6, %c0_7] : memref<32x96xbf16, #tpu.memory_space<vmem>>, vector<32x96xbf16>
    %cst_8 = arith.constant dense<0.000000e+00> : vector<16x96xf32>
    %15 = tpu.matmul %13, %14, %cst_8 {dimension_numbers = #tpu.dot_dimension_numbers<[1], [0], [0], [1], [0, 0, 1, 1], [], []>} : vector<16x32xbf16>, vector<32x96xbf16>, vector<16x96xf32> -> vector<16x96xf32>
    %c0_9 = arith.constant 0 : index
    %c0_10 = arith.constant 0 : index
    %16 = vector.load %arg5[%c0_9, %c0_10] : memref<1x96xf32, #tpu.memory_space<vmem>>, vector<1x96xf32>
    %17 = vector.broadcast %16 : vector<1x96xf32> to vector<16x96xf32>
    %18 = arith.addf %15, %17 : vector<16x96xf32>
    %c0_11 = arith.constant 0 : index
    %c0_12 = arith.constant 0 : index
    %19 = vector.load %arg6[%c0_11, %c0_12] : memref<16x96xf32, #tpu.memory_space<vmem>>, vector<16x96xf32>
    tpu.vector_store %arg6[%c0_11, %c0_12], %18 {strides = array<i32>} : memref<16x96xf32, #tpu.memory_space<vmem>>, vector<16x96xf32>,
    return
  }
  func.func @transform_0(%arg0: i32) -> (i32, i32) {
    %c0_i32 = arith.constant 0 : i32
    %c0_i32_0 = arith.constant 0 : i32
    return %arg0, %c0_i32 : i32, i32
  }
  func.func @transform_1(%arg0: i32) -> (i32, i32) {
    %c0_i32 = arith.constant 0 : i32
    %c0_i32_0 = arith.constant 0 : i32
    %c0_i32_1 = arith.constant 0 : i32
    return %c0_i32, %c0_i32_0 : i32, i32
  }
  func.func @transform_2(%arg0: i32) -> (i32, i32) {
    %c0_i32 = arith.constant 0 : i32
    %c0_i32_0 = arith.constant 0 : i32
    %c0_i32_1 = arith.constant 0 : i32
    return %c0_i32, %c0_i32_0 : i32, i32
  }
  func.func @transform_3(%arg0: i32) -> (i32, i32) {
    %c0_i32 = arith.constant 0 : i32
    %c0_i32_0 = arith.constant 0 : i32
    %c0_i32_1 = arith.constant 0 : i32
    return %c0_i32, %c0_i32_0 : i32, i32
  }
  func.func @transform_4(%arg0: i32) -> (i32, i32) {
    %c0_i32 = arith.constant 0 : i32
    %c0_i32_0 = arith.constant 0 : i32
    %c0_i32_1 = arith.constant 0 : i32
    return %c0_i32, %c0_i32_0 : i32, i32
  }
  func.func @transform_5(%arg0: i32) -> (i32, i32) {
    %c0_i32 = arith.constant 0 : i32
    %c0_i32_0 = arith.constant 0 : i32
    return %arg0, %c0_i32 : i32, i32
  }
}

module attributes {stable_mosaic.version = 11 : i64} {
  func.func @_scal_lin2_kernel(%arg0: i32, %arg1: memref<24x1xi32, #tpu.memory_space<vmem>>, %arg2: memref<24x1xi32, #tpu.memory_space<vmem>>, %arg3: memref<3x3x24x1xf32, #tpu.memory_space<vmem>>, %arg4: memref<24x1xf32, #tpu.memory_space<vmem>>, %arg5: memref<3x16x32xf32, #tpu.memory_space<vmem>>, %arg6: memref<3x8xf32, #tpu.memory_space<smem>>, %arg7: memref<8xf32, #tpu.memory_space<smem>>, %arg8: memref<8xf32, #tpu.memory_space<smem>>, %arg9: memref<1xf32, #tpu.memory_space<smem>>, %arg10: memref<24x64xf32, #tpu.memory_space<vmem>>) attributes {dimension_semantics = [#tpu.dimension_semantics<parallel>], iteration_bounds = array<i64: 1>, scalar_prefetch = 0 : i64, scratch_operands = 0 : i64, tpu.core_type = #tpu.core_type<tc>, window_params = [{transform_indices = @transform_0, window_bounds = array<i64: 24, 1>}, {transform_indices = @transform_1, window_bounds = array<i64: 24, 1>}, {transform_indices = @transform_2, window_bounds = array<i64: 3, 3, 24, 1>}, {transform_indices = @transform_3, window_bounds = array<i64: 24, 1>}, {pipeline_mode = #tpu.pipeline_mode<synchronous>, transform_indices = @transform_4, window_bounds = array<i64: 3, 16, 32>}, {transform_indices = @transform_5, window_bounds = array<i64: 3, 8>}, {transform_indices = @transform_6, window_bounds = array<i64: 8>}, {transform_indices = @transform_7, window_bounds = array<i64: 8>}, {transform_indices = @transform_8, window_bounds = array<i64: 1>}, {transform_indices = @transform_9, window_bounds = array<i64: 24, 64>}]} {
    %0 = tpu.iota {dimensions = array<i32: 1>} : vector<24x16xi32>
    %c0 = arith.constant 0 : index
    %c0_0 = arith.constant 0 : index
    %1 = vector.load %arg4[%c0, %c0_0] : memref<24x1xf32, #tpu.memory_space<vmem>>, vector<24x1xf32>
    %c0_1 = arith.constant 0 : index
    %c0_2 = arith.constant 0 : index
    %2 = vector.load %arg1[%c0_1, %c0_2] : memref<24x1xi32, #tpu.memory_space<vmem>>, vector<24x1xi32>
    %3 = vector.broadcast %2 : vector<24x1xi32> to vector<24x16xi32>
    %4 = arith.cmpi eq, %3, %0 : vector<24x16xi32>
    %5 = arith.extui %4 : vector<24x16xi1> to vector<24x16xi32>
    %6 = arith.sitofp %5 : vector<24x16xi32> to vector<24x16xf32>
    %c0_3 = arith.constant 0 : index
    %c0_4 = arith.constant 0 : index
    %c0_5 = arith.constant 0 : index
    %7 = vector.load %arg5[%c0_3, %c0_4, %c0_5] : memref<3x16x32xf32, #tpu.memory_space<vmem>>, vector<1x16x32xf32>
    %8 = vector.shape_cast %7 : vector<1x16x32xf32> to vector<16x32xf32>
    %cst = arith.constant dense<0.000000e+00> : vector<24x32xf32>
    %9 = tpu.matmul %6, %8, %cst {dimension_numbers = #tpu.dot_dimension_numbers<[1], [0], [0], [1], [0, 0, 1, 1], [], []>} : vector<24x16xf32>, vector<16x32xf32>, vector<24x32xf32> -> vector<24x32xf32>
    %c1 = arith.constant 1 : index
    %c0_6 = arith.constant 0 : index
    %c0_7 = arith.constant 0 : index
    %10 = vector.load %arg5[%c1, %c0_6, %c0_7] : memref<3x16x32xf32, #tpu.memory_space<vmem>>, vector<1x16x32xf32>
    %11 = vector.shape_cast %10 : vector<1x16x32xf32> to vector<16x32xf32>
    %cst_8 = arith.constant dense<0.000000e+00> : vector<24x32xf32>
    %12 = tpu.matmul %6, %11, %cst_8 {dimension_numbers = #tpu.dot_dimension_numbers<[1], [0], [0], [1], [0, 0, 1, 1], [], []>} : vector<24x16xf32>, vector<16x32xf32>, vector<24x32xf32> -> vector<24x32xf32>
    %c2 = arith.constant 2 : index
    %c0_9 = arith.constant 0 : index
    %c0_10 = arith.constant 0 : index
    %13 = vector.load %arg5[%c2, %c0_9, %c0_10] : memref<3x16x32xf32, #tpu.memory_space<vmem>>, vector<1x16x32xf32>
    %14 = vector.shape_cast %13 : vector<1x16x32xf32> to vector<16x32xf32>
    %cst_11 = arith.constant dense<0.000000e+00> : vector<24x32xf32>
    %15 = tpu.matmul %6, %14, %cst_11 {dimension_numbers = #tpu.dot_dimension_numbers<[1], [0], [0], [1], [0, 0, 1, 1], [], []>} : vector<24x16xf32>, vector<16x32xf32>, vector<24x32xf32> -> vector<24x32xf32>
    %c0_12 = arith.constant 0 : index
    %c0_13 = arith.constant 0 : index
    %c0_14 = arith.constant 0 : index
    %c0_15 = arith.constant 0 : index
    %16 = vector.load %arg3[%c0_12, %c0_13, %c0_14, %c0_15] : memref<3x3x24x1xf32, #tpu.memory_space<vmem>>, vector<1x1x24x1xf32>
    %17 = vector.shape_cast %16 : vector<1x1x24x1xf32> to vector<24x1xf32>
    %18 = vector.broadcast %17 : vector<24x1xf32> to vector<24x32xf32>
    %19 = arith.mulf %9, %18 : vector<24x32xf32>
    %c1_16 = arith.constant 1 : index
    %c0_17 = arith.constant 0 : index
    %c0_18 = arith.constant 0 : index
    %c0_19 = arith.constant 0 : index
    %20 = vector.load %arg3[%c1_16, %c0_17, %c0_18, %c0_19] : memref<3x3x24x1xf32, #tpu.memory_space<vmem>>, vector<1x1x24x1xf32>
    %21 = vector.shape_cast %20 : vector<1x1x24x1xf32> to vector<24x1xf32>
    %22 = vector.broadcast %21 : vector<24x1xf32> to vector<24x32xf32>
    %23 = arith.mulf %12, %22 : vector<24x32xf32>
    %24 = arith.addf %19, %23 : vector<24x32xf32>
    %c2_20 = arith.constant 2 : index
    %c0_21 = arith.constant 0 : index
    %c0_22 = arith.constant 0 : index
    %c0_23 = arith.constant 0 : index
    %25 = vector.load %arg3[%c2_20, %c0_21, %c0_22, %c0_23] : memref<3x3x24x1xf32, #tpu.memory_space<vmem>>, vector<1x1x24x1xf32>
    %26 = vector.shape_cast %25 : vector<1x1x24x1xf32> to vector<24x1xf32>
    %27 = vector.broadcast %26 : vector<24x1xf32> to vector<24x32xf32>
    %28 = arith.mulf %15, %27 : vector<24x32xf32>
    %29 = arith.addf %24, %28 : vector<24x32xf32>
    %c0_24 = arith.constant 0 : index
    %c1_25 = arith.constant 1 : index
    %c0_26 = arith.constant 0 : index
    %c0_27 = arith.constant 0 : index
    %30 = vector.load %arg3[%c0_24, %c1_25, %c0_26, %c0_27] : memref<3x3x24x1xf32, #tpu.memory_space<vmem>>, vector<1x1x24x1xf32>
    %31 = vector.shape_cast %30 : vector<1x1x24x1xf32> to vector<24x1xf32>
    %32 = vector.broadcast %31 : vector<24x1xf32> to vector<24x32xf32>
    %33 = arith.mulf %9, %32 : vector<24x32xf32>
    %c1_28 = arith.constant 1 : index
    %c1_29 = arith.constant 1 : index
    %c0_30 = arith.constant 0 : index
    %c0_31 = arith.constant 0 : index
    %34 = vector.load %arg3[%c1_28, %c1_29, %c0_30, %c0_31] : memref<3x3x24x1xf32, #tpu.memory_space<vmem>>, vector<1x1x24x1xf32>
    %35 = vector.shape_cast %34 : vector<1x1x24x1xf32> to vector<24x1xf32>
    %36 = vector.broadcast %35 : vector<24x1xf32> to vector<24x32xf32>
    %37 = arith.mulf %12, %36 : vector<24x32xf32>
    %38 = arith.addf %33, %37 : vector<24x32xf32>
    %c2_32 = arith.constant 2 : index
    %c1_33 = arith.constant 1 : index
    %c0_34 = arith.constant 0 : index
    %c0_35 = arith.constant 0 : index
    %39 = vector.load %arg3[%c2_32, %c1_33, %c0_34, %c0_35] : memref<3x3x24x1xf32, #tpu.memory_space<vmem>>, vector<1x1x24x1xf32>
    %40 = vector.shape_cast %39 : vector<1x1x24x1xf32> to vector<24x1xf32>
    %41 = vector.broadcast %40 : vector<24x1xf32> to vector<24x32xf32>
    %42 = arith.mulf %15, %41 : vector<24x32xf32>
    %43 = arith.addf %38, %42 : vector<24x32xf32>
    %44 = math.absf %43 : vector<24x32xf32>
    %c0_36 = arith.constant 0 : index
    %c2_37 = arith.constant 2 : index
    %c0_38 = arith.constant 0 : index
    %c0_39 = arith.constant 0 : index
    %45 = vector.load %arg3[%c0_36, %c2_37, %c0_38, %c0_39] : memref<3x3x24x1xf32, #tpu.memory_space<vmem>>, vector<1x1x24x1xf32>
    %46 = vector.shape_cast %45 : vector<1x1x24x1xf32> to vector<24x1xf32>
    %47 = vector.broadcast %46 : vector<24x1xf32> to vector<24x32xf32>
    %48 = arith.mulf %9, %47 : vector<24x32xf32>
    %c1_40 = arith.constant 1 : index
    %c2_41 = arith.constant 2 : index
    %c0_42 = arith.constant 0 : index
    %c0_43 = arith.constant 0 : index
    %49 = vector.load %arg3[%c1_40, %c2_41, %c0_42, %c0_43] : memref<3x3x24x1xf32, #tpu.memory_space<vmem>>, vector<1x1x24x1xf32>
    %50 = vector.shape_cast %49 : vector<1x1x24x1xf32> to vector<24x1xf32>
    %51 = vector.broadcast %50 : vector<24x1xf32> to vector<24x32xf32>
    %52 = arith.mulf %12, %51 : vector<24x32xf32>
    %53 = arith.addf %48, %52 : vector<24x32xf32>
    %c2_44 = arith.constant 2 : index
    %c2_45 = arith.constant 2 : index
    %c0_46 = arith.constant 0 : index
    %c0_47 = arith.constant 0 : index
    %54 = vector.load %arg3[%c2_44, %c2_45, %c0_46, %c0_47] : memref<3x3x24x1xf32, #tpu.memory_space<vmem>>, vector<1x1x24x1xf32>
    %55 = vector.shape_cast %54 : vector<1x1x24x1xf32> to vector<24x1xf32>
    %56 = vector.broadcast %55 : vector<24x1xf32> to vector<24x32xf32>
    %57 = arith.mulf %15, %56 : vector<24x32xf32>
    %58 = arith.addf %53, %57 : vector<24x32xf32>
    %c0_48 = arith.constant 0 : index
    %c0_49 = arith.constant 0 : index
    %59 = memref.load %arg6[%c0_48, %c0_49] : memref<3x8xf32, #tpu.memory_space<smem>>
    %60 = vector.broadcast %59 : f32 to vector<24x32xf32>
    %61 = arith.mulf %29, %60 : vector<24x32xf32>
    %c1_50 = arith.constant 1 : index
    %c0_51 = arith.constant 0 : index
    %62 = memref.load %arg6[%c1_50, %c0_51] : memref<3x8xf32, #tpu.memory_space<smem>>
    %63 = vector.broadcast %62 : f32 to vector<24x32xf32>
    %64 = arith.mulf %44, %63 : vector<24x32xf32>
    %65 = arith.addf %61, %64 : vector<24x32xf32>
    %c2_52 = arith.constant 2 : index
    %c0_53 = arith.constant 0 : index
    %66 = memref.load %arg6[%c2_52, %c0_53] : memref<3x8xf32, #tpu.memory_space<smem>>
    %67 = vector.broadcast %66 : f32 to vector<24x32xf32>
    %68 = arith.mulf %58, %67 : vector<24x32xf32>
    %69 = arith.addf %65, %68 : vector<24x32xf32>
    %c0_54 = arith.constant 0 : index
    %70 = memref.load %arg7[%c0_54] : memref<8xf32, #tpu.memory_space<smem>>
    %71 = vector.broadcast %70 : f32 to vector<24x32xf32>
    %72 = arith.addf %69, %71 : vector<24x32xf32>
    %73 = arith.negf %72 : vector<24x32xf32>
    %74 = math.exp %73 : vector<24x32xf32>
    %cst_55 = arith.constant 1.000000e+00 : f32
    %75 = vector.broadcast %cst_55 : f32 to vector<24x32xf32>
    %76 = arith.addf %75, %74 : vector<24x32xf32>
    %77 = arith.divf %75, %76 : vector<24x32xf32>
    %78 = arith.mulf %72, %77 : vector<24x32xf32>
    %c0_56 = arith.constant 0 : index
    %79 = memref.load %arg8[%c0_56] : memref<8xf32, #tpu.memory_space<smem>>
    %80 = vector.broadcast %79 : f32 to vector<24x32xf32>
    %81 = arith.mulf %78, %80 : vector<24x32xf32>
    %c0_57 = arith.constant 0 : index
    %c1_58 = arith.constant 1 : index
    %82 = memref.load %arg6[%c0_57, %c1_58] : memref<3x8xf32, #tpu.memory_space<smem>>
    %83 = vector.broadcast %82 : f32 to vector<24x32xf32>
    %84 = arith.mulf %29, %83 : vector<24x32xf32>
    %c1_59 = arith.constant 1 : index
    %c1_60 = arith.constant 1 : index
    %85 = memref.load %arg6[%c1_59, %c1_60] : memref<3x8xf32, #tpu.memory_space<smem>>
    %86 = vector.broadcast %85 : f32 to vector<24x32xf32>
    %87 = arith.mulf %44, %86 : vector<24x32xf32>
    %88 = arith.addf %84, %87 : vector<24x32xf32>
    %c2_61 = arith.constant 2 : index
    %c1_62 = arith.constant 1 : index
    %89 = memref.load %arg6[%c2_61, %c1_62] : memref<3x8xf32, #tpu.memory_space<smem>>
    %90 = vector.broadcast %89 : f32 to vector<24x32xf32>
    %91 = arith.mulf %58, %90 : vector<24x32xf32>
    %92 = arith.addf %88, %91 : vector<24x32xf32>
    %c1_63 = arith.constant 1 : index
    %93 = memref.load %arg7[%c1_63] : memref<8xf32, #tpu.memory_space<smem>>
    %94 = vector.broadcast %93 : f32 to vector<24x32xf32>
    %95 = arith.addf %92, %94 : vector<24x32xf32>
    %96 = arith.negf %95 : vector<24x32xf32>
    %97 = math.exp %96 : vector<24x32xf32>
    %cst_64 = arith.constant 1.000000e+00 : f32
    %98 = vector.broadcast %cst_64 : f32 to vector<24x32xf32>
    %99 = arith.addf %98, %97 : vector<24x32xf32>
    %100 = arith.divf %98, %99 : vector<24x32xf32>
    %101 = arith.mulf %95, %100 : vector<24x32xf32>
    %c1_65 = arith.constant 1 : index
    %102 = memref.load %arg8[%c1_65] : memref<8xf32, #tpu.memory_space<smem>>
    %103 = vector.broadcast %102 : f32 to vector<24x32xf32>
    %104 = arith.mulf %101, %103 : vector<24x32xf32>
    %105 = arith.addf %81, %104 : vector<24x32xf32>
    %c0_66 = arith.constant 0 : index
    %c2_67 = arith.constant 2 : index
    %106 = memref.load %arg6[%c0_66, %c2_67] : memref<3x8xf32, #tpu.memory_space<smem>>
    %107 = vector.broadcast %106 : f32 to vector<24x32xf32>
    %108 = arith.mulf %29, %107 : vector<24x32xf32>
    %c1_68 = arith.constant 1 : index
    %c2_69 = arith.constant 2 : index
    %109 = memref.load %arg6[%c1_68, %c2_69] : memref<3x8xf32, #tpu.memory_space<smem>>
    %110 = vector.broadcast %109 : f32 to vector<24x32xf32>
    %111 = arith.mulf %44, %110 : vector<24x32xf32>
    %112 = arith.addf %108, %111 : vector<24x32xf32>
    %c2_70 = arith.constant 2 : index
    %c2_71 = arith.constant 2 : index
    %113 = memref.load %arg6[%c2_70, %c2_71] : memref<3x8xf32, #tpu.memory_space<smem>>
    %114 = vector.broadcast %113 : f32 to vector<24x32xf32>
    %115 = arith.mulf %58, %114 : vector<24x32xf32>
    %116 = arith.addf %112, %115 : vector<24x32xf32>
    %c2_72 = arith.constant 2 : index
    %117 = memref.load %arg7[%c2_72] : memref<8xf32, #tpu.memory_space<smem>>
    %118 = vector.broadcast %117 : f32 to vector<24x32xf32>
    %119 = arith.addf %116, %118 : vector<24x32xf32>
    %120 = arith.negf %119 : vector<24x32xf32>
    %121 = math.exp %120 : vector<24x32xf32>
    %cst_73 = arith.constant 1.000000e+00 : f32
    %122 = vector.broadcast %cst_73 : f32 to vector<24x32xf32>
    %123 = arith.addf %122, %121 : vector<24x32xf32>
    %124 = arith.divf %122, %123 : vector<24x32xf32>
    %125 = arith.mulf %119, %124 : vector<24x32xf32>
    %c2_74 = arith.constant 2 : index
    %126 = memref.load %arg8[%c2_74] : memref<8xf32, #tpu.memory_space<smem>>
    %127 = vector.broadcast %126 : f32 to vector<24x32xf32>
    %128 = arith.mulf %125, %127 : vector<24x32xf32>
    %129 = arith.addf %105, %128 : vector<24x32xf32>
    %c0_75 = arith.constant 0 : index
    %c3 = arith.constant 3 : index
    %130 = memref.load %arg6[%c0_75, %c3] : memref<3x8xf32, #tpu.memory_space<smem>>
    %131 = vector.broadcast %130 : f32 to vector<24x32xf32>
    %132 = arith.mulf %29, %131 : vector<24x32xf32>
    %c1_76 = arith.constant 1 : index
    %c3_77 = arith.constant 3 : index
    %133 = memref.load %arg6[%c1_76, %c3_77] : memref<3x8xf32, #tpu.memory_space<smem>>
    %134 = vector.broadcast %133 : f32 to vector<24x32xf32>
    %135 = arith.mulf %44, %134 : vector<24x32xf32>
    %136 = arith.addf %132, %135 : vector<24x32xf32>
    %c2_78 = arith.constant 2 : index
    %c3_79 = arith.constant 3 : index
    %137 = memref.load %arg6[%c2_78, %c3_79] : memref<3x8xf32, #tpu.memory_space<smem>>
    %138 = vector.broadcast %137 : f32 to vector<24x32xf32>
    %139 = arith.mulf %58, %138 : vector<24x32xf32>
    %140 = arith.addf %136, %139 : vector<24x32xf32>
    %c3_80 = arith.constant 3 : index
    %141 = memref.load %arg7[%c3_80] : memref<8xf32, #tpu.memory_space<smem>>
    %142 = vector.broadcast %141 : f32 to vector<24x32xf32>
    %143 = arith.addf %140, %142 : vector<24x32xf32>
    %144 = arith.negf %143 : vector<24x32xf32>
    %145 = math.exp %144 : vector<24x32xf32>
    %cst_81 = arith.constant 1.000000e+00 : f32
    %146 = vector.broadcast %cst_81 : f32 to vector<24x32xf32>
    %147 = arith.addf %146, %145 : vector<24x32xf32>
    %148 = arith.divf %146, %147 : vector<24x32xf32>
    %149 = arith.mulf %143, %148 : vector<24x32xf32>
    %c3_82 = arith.constant 3 : index
    %150 = memref.load %arg8[%c3_82] : memref<8xf32, #tpu.memory_space<smem>>
    %151 = vector.broadcast %150 : f32 to vector<24x32xf32>
    %152 = arith.mulf %149, %151 : vector<24x32xf32>
    %153 = arith.addf %129, %152 : vector<24x32xf32>
    %c0_83 = arith.constant 0 : index
    %c4 = arith.constant 4 : index
    %154 = memref.load %arg6[%c0_83, %c4] : memref<3x8xf32, #tpu.memory_space<smem>>
    %155 = vector.broadcast %154 : f32 to vector<24x32xf32>
    %156 = arith.mulf %29, %155 : vector<24x32xf32>
    %c1_84 = arith.constant 1 : index
    %c4_85 = arith.constant 4 : index
    %157 = memref.load %arg6[%c1_84, %c4_85] : memref<3x8xf32, #tpu.memory_space<smem>>
    %158 = vector.broadcast %157 : f32 to vector<24x32xf32>
    %159 = arith.mulf %44, %158 : vector<24x32xf32>
    %160 = arith.addf %156, %159 : vector<24x32xf32>
    %c2_86 = arith.constant 2 : index
    %c4_87 = arith.constant 4 : index
    %161 = memref.load %arg6[%c2_86, %c4_87] : memref<3x8xf32, #tpu.memory_space<smem>>
    %162 = vector.broadcast %161 : f32 to vector<24x32xf32>
    %163 = arith.mulf %58, %162 : vector<24x32xf32>
    %164 = arith.addf %160, %163 : vector<24x32xf32>
    %c4_88 = arith.constant 4 : index
    %165 = memref.load %arg7[%c4_88] : memref<8xf32, #tpu.memory_space<smem>>
    %166 = vector.broadcast %165 : f32 to vector<24x32xf32>
    %167 = arith.addf %164, %166 : vector<24x32xf32>
    %168 = arith.negf %167 : vector<24x32xf32>
    %169 = math.exp %168 : vector<24x32xf32>
    %cst_89 = arith.constant 1.000000e+00 : f32
    %170 = vector.broadcast %cst_89 : f32 to vector<24x32xf32>
    %171 = arith.addf %170, %169 : vector<24x32xf32>
    %172 = arith.divf %170, %171 : vector<24x32xf32>
    %173 = arith.mulf %167, %172 : vector<24x32xf32>
    %c4_90 = arith.constant 4 : index
    %174 = memref.load %arg8[%c4_90] : memref<8xf32, #tpu.memory_space<smem>>
    %175 = vector.broadcast %174 : f32 to vector<24x32xf32>
    %176 = arith.mulf %173, %175 : vector<24x32xf32>
    %177 = arith.addf %153, %176 : vector<24x32xf32>
    %c0_91 = arith.constant 0 : index
    %c5 = arith.constant 5 : index
    %178 = memref.load %arg6[%c0_91, %c5] : memref<3x8xf32, #tpu.memory_space<smem>>
    %179 = vector.broadcast %178 : f32 to vector<24x32xf32>
    %180 = arith.mulf %29, %179 : vector<24x32xf32>
    %c1_92 = arith.constant 1 : index
    %c5_93 = arith.constant 5 : index
    %181 = memref.load %arg6[%c1_92, %c5_93] : memref<3x8xf32, #tpu.memory_space<smem>>
    %182 = vector.broadcast %181 : f32 to vector<24x32xf32>
    %183 = arith.mulf %44, %182 : vector<24x32xf32>
    %184 = arith.addf %180, %183 : vector<24x32xf32>
    %c2_94 = arith.constant 2 : index
    %c5_95 = arith.constant 5 : index
    %185 = memref.load %arg6[%c2_94, %c5_95] : memref<3x8xf32, #tpu.memory_space<smem>>
    %186 = vector.broadcast %185 : f32 to vector<24x32xf32>
    %187 = arith.mulf %58, %186 : vector<24x32xf32>
    %188 = arith.addf %184, %187 : vector<24x32xf32>
    %c5_96 = arith.constant 5 : index
    %189 = memref.load %arg7[%c5_96] : memref<8xf32, #tpu.memory_space<smem>>
    %190 = vector.broadcast %189 : f32 to vector<24x32xf32>
    %191 = arith.addf %188, %190 : vector<24x32xf32>
    %192 = arith.negf %191 : vector<24x32xf32>
    %193 = math.exp %192 : vector<24x32xf32>
    %cst_97 = arith.constant 1.000000e+00 : f32
    %194 = vector.broadcast %cst_97 : f32 to vector<24x32xf32>
    %195 = arith.addf %194, %193 : vector<24x32xf32>
    %196 = arith.divf %194, %195 : vector<24x32xf32>
    %197 = arith.mulf %191, %196 : vector<24x32xf32>
    %c5_98 = arith.constant 5 : index
    %198 = memref.load %arg8[%c5_98] : memref<8xf32, #tpu.memory_space<smem>>
    %199 = vector.broadcast %198 : f32 to vector<24x32xf32>
    %200 = arith.mulf %197, %199 : vector<24x32xf32>
    %201 = arith.addf %177, %200 : vector<24x32xf32>
    %c0_99 = arith.constant 0 : index
    %c6 = arith.constant 6 : index
    %202 = memref.load %arg6[%c0_99, %c6] : memref<3x8xf32, #tpu.memory_space<smem>>
    %203 = vector.broadcast %202 : f32 to vector<24x32xf32>
    %204 = arith.mulf %29, %203 : vector<24x32xf32>
    %c1_100 = arith.constant 1 : index
    %c6_101 = arith.constant 6 : index
    %205 = memref.load %arg6[%c1_100, %c6_101] : memref<3x8xf32, #tpu.memory_space<smem>>
    %206 = vector.broadcast %205 : f32 to vector<24x32xf32>
    %207 = arith.mulf %44, %206 : vector<24x32xf32>
    %208 = arith.addf %204, %207 : vector<24x32xf32>
    %c2_102 = arith.constant 2 : index
    %c6_103 = arith.constant 6 : index
    %209 = memref.load %arg6[%c2_102, %c6_103] : memref<3x8xf32, #tpu.memory_space<smem>>
    %210 = vector.broadcast %209 : f32 to vector<24x32xf32>
    %211 = arith.mulf %58, %210 : vector<24x32xf32>
    %212 = arith.addf %208, %211 : vector<24x32xf32>
    %c6_104 = arith.constant 6 : index
    %213 = memref.load %arg7[%c6_104] : memref<8xf32, #tpu.memory_space<smem>>
    %214 = vector.broadcast %213 : f32 to vector<24x32xf32>
    %215 = arith.addf %212, %214 : vector<24x32xf32>
    %216 = arith.negf %215 : vector<24x32xf32>
    %217 = math.exp %216 : vector<24x32xf32>
    %cst_105 = arith.constant 1.000000e+00 : f32
    %218 = vector.broadcast %cst_105 : f32 to vector<24x32xf32>
    %219 = arith.addf %218, %217 : vector<24x32xf32>
    %220 = arith.divf %218, %219 : vector<24x32xf32>
    %221 = arith.mulf %215, %220 : vector<24x32xf32>
    %c6_106 = arith.constant 6 : index
    %222 = memref.load %arg8[%c6_106] : memref<8xf32, #tpu.memory_space<smem>>
    %223 = vector.broadcast %222 : f32 to vector<24x32xf32>
    %224 = arith.mulf %221, %223 : vector<24x32xf32>
    %225 = arith.addf %201, %224 : vector<24x32xf32>
    %c0_107 = arith.constant 0 : index
    %c7 = arith.constant 7 : index
    %226 = memref.load %arg6[%c0_107, %c7] : memref<3x8xf32, #tpu.memory_space<smem>>
    %227 = vector.broadcast %226 : f32 to vector<24x32xf32>
    %228 = arith.mulf %29, %227 : vector<24x32xf32>
    %c1_108 = arith.constant 1 : index
    %c7_109 = arith.constant 7 : index
    %229 = memref.load %arg6[%c1_108, %c7_109] : memref<3x8xf32, #tpu.memory_space<smem>>
    %230 = vector.broadcast %229 : f32 to vector<24x32xf32>
    %231 = arith.mulf %44, %230 : vector<24x32xf32>
    %232 = arith.addf %228, %231 : vector<24x32xf32>
    %c2_110 = arith.constant 2 : index
    %c7_111 = arith.constant 7 : index
    %233 = memref.load %arg6[%c2_110, %c7_111] : memref<3x8xf32, #tpu.memory_space<smem>>
    %234 = vector.broadcast %233 : f32 to vector<24x32xf32>
    %235 = arith.mulf %58, %234 : vector<24x32xf32>
    %236 = arith.addf %232, %235 : vector<24x32xf32>
    %c7_112 = arith.constant 7 : index
    %237 = memref.load %arg7[%c7_112] : memref<8xf32, #tpu.memory_space<smem>>
    %238 = vector.broadcast %237 : f32 to vector<24x32xf32>
    %239 = arith.addf %236, %238 : vector<24x32xf32>
    %240 = arith.negf %239 : vector<24x32xf32>
    %241 = math.exp %240 : vector<24x32xf32>
    %cst_113 = arith.constant 1.000000e+00 : f32
    %242 = vector.broadcast %cst_113 : f32 to vector<24x32xf32>
    %243 = arith.addf %242, %241 : vector<24x32xf32>
    %244 = arith.divf %242, %243 : vector<24x32xf32>
    %245 = arith.mulf %239, %244 : vector<24x32xf32>
    %c7_114 = arith.constant 7 : index
    %246 = memref.load %arg8[%c7_114] : memref<8xf32, #tpu.memory_space<smem>>
    %247 = vector.broadcast %246 : f32 to vector<24x32xf32>
    %248 = arith.mulf %245, %247 : vector<24x32xf32>
    %249 = arith.addf %225, %248 : vector<24x32xf32>
    %c0_115 = arith.constant 0 : index
    %250 = memref.load %arg9[%c0_115] : memref<1xf32, #tpu.memory_space<smem>>
    %251 = vector.broadcast %250 : f32 to vector<24x32xf32>
    %252 = arith.addf %249, %251 : vector<24x32xf32>
    %253 = arith.addf %252, %29 : vector<24x32xf32>
    %254 = vector.broadcast %1 : vector<24x1xf32> to vector<24x32xf32>
    %255 = arith.mulf %253, %254 : vector<24x32xf32>
    %c0_116 = arith.constant 0 : index
    %c0_117 = arith.constant 0 : index
    %256 = vector.load %arg2[%c0_116, %c0_117] : memref<24x1xi32, #tpu.memory_space<vmem>>, vector<24x1xi32>
    %257 = vector.broadcast %256 : vector<24x1xi32> to vector<24x16xi32>
    %258 = arith.cmpi eq, %257, %0 : vector<24x16xi32>
    %259 = arith.extui %258 : vector<24x16xi1> to vector<24x16xi32>
    %260 = arith.sitofp %259 : vector<24x16xi32> to vector<24x16xf32>
    %c0_118 = arith.constant 0 : index
    %c0_119 = arith.constant 0 : index
    %c0_120 = arith.constant 0 : index
    %261 = vector.load %arg5[%c0_118, %c0_119, %c0_120] : memref<3x16x32xf32, #tpu.memory_space<vmem>>, vector<1x16x32xf32>
    %262 = vector.shape_cast %261 : vector<1x16x32xf32> to vector<16x32xf32>
    %cst_121 = arith.constant dense<0.000000e+00> : vector<24x32xf32>
    %263 = tpu.matmul %260, %262, %cst_121 {dimension_numbers = #tpu.dot_dimension_numbers<[1], [0], [0], [1], [0, 0, 1, 1], [], []>} : vector<24x16xf32>, vector<16x32xf32>, vector<24x32xf32> -> vector<24x32xf32>
    %c1_122 = arith.constant 1 : index
    %c0_123 = arith.constant 0 : index
    %c0_124 = arith.constant 0 : index
    %264 = vector.load %arg5[%c1_122, %c0_123, %c0_124] : memref<3x16x32xf32, #tpu.memory_space<vmem>>, vector<1x16x32xf32>
    %265 = vector.shape_cast %264 : vector<1x16x32xf32> to vector<16x32xf32>
    %cst_125 = arith.constant dense<0.000000e+00> : vector<24x32xf32>
    %266 = tpu.matmul %260, %265, %cst_125 {dimension_numbers = #tpu.dot_dimension_numbers<[1], [0], [0], [1], [0, 0, 1, 1], [], []>} : vector<24x16xf32>, vector<16x32xf32>, vector<24x32xf32> -> vector<24x32xf32>
    %c2_126 = arith.constant 2 : index
    %c0_127 = arith.constant 0 : index
    %c0_128 = arith.constant 0 : index
    %267 = vector.load %arg5[%c2_126, %c0_127, %c0_128] : memref<3x16x32xf32, #tpu.memory_space<vmem>>, vector<1x16x32xf32>
    %268 = vector.shape_cast %267 : vector<1x16x32xf32> to vector<16x32xf32>
    %cst_129 = arith.constant dense<0.000000e+00> : vector<24x32xf32>
    %269 = tpu.matmul %260, %268, %cst_129 {dimension_numbers = #tpu.dot_dimension_numbers<[1], [0], [0], [1], [0, 0, 1, 1], [], []>} : vector<24x16xf32>, vector<16x32xf32>, vector<24x32xf32> -> vector<24x32xf32>
    %c0_130 = arith.constant 0 : index
    %c0_131 = arith.constant 0 : index
    %c0_132 = arith.constant 0 : index
    %c0_133 = arith.constant 0 : index
    %270 = vector.load %arg3[%c0_130, %c0_131, %c0_132, %c0_133] : memref<3x3x24x1xf32, #tpu.memory_space<vmem>>, vector<1x1x24x1xf32>
    %271 = vector.shape_cast %270 : vector<1x1x24x1xf32> to vector<24x1xf32>
    %272 = vector.broadcast %271 : vector<24x1xf32> to vector<24x32xf32>
    %273 = arith.mulf %263, %272 : vector<24x32xf32>
    %c1_134 = arith.constant 1 : index
    %c0_135 = arith.constant 0 : index
    %c0_136 = arith.constant 0 : index
    %c0_137 = arith.constant 0 : index
    %274 = vector.load %arg3[%c1_134, %c0_135, %c0_136, %c0_137] : memref<3x3x24x1xf32, #tpu.memory_space<vmem>>, vector<1x1x24x1xf32>
    %275 = vector.shape_cast %274 : vector<1x1x24x1xf32> to vector<24x1xf32>
    %276 = vector.broadcast %275 : vector<24x1xf32> to vector<24x32xf32>
    %277 = arith.mulf %266, %276 : vector<24x32xf32>
    %278 = arith.addf %273, %277 : vector<24x32xf32>
    %c2_138 = arith.constant 2 : index
    %c0_139 = arith.constant 0 : index
    %c0_140 = arith.constant 0 : index
    %c0_141 = arith.constant 0 : index
    %279 = vector.load %arg3[%c2_138, %c0_139, %c0_140, %c0_141] : memref<3x3x24x1xf32, #tpu.memory_space<vmem>>, vector<1x1x24x1xf32>
    %280 = vector.shape_cast %279 : vector<1x1x24x1xf32> to vector<24x1xf32>
    %281 = vector.broadcast %280 : vector<24x1xf32> to vector<24x32xf32>
    %282 = arith.mulf %269, %281 : vector<24x32xf32>
    %283 = arith.addf %278, %282 : vector<24x32xf32>
    %c0_142 = arith.constant 0 : index
    %c1_143 = arith.constant 1 : index
    %c0_144 = arith.constant 0 : index
    %c0_145 = arith.constant 0 : index
    %284 = vector.load %arg3[%c0_142, %c1_143, %c0_144, %c0_145] : memref<3x3x24x1xf32, #tpu.memory_space<vmem>>, vector<1x1x24x1xf32>
    %285 = vector.shape_cast %284 : vector<1x1x24x1xf32> to vector<24x1xf32>
    %286 = vector.broadcast %285 : vector<24x1xf32> to vector<24x32xf32>
    %287 = arith.mulf %263, %286 : vector<24x32xf32>
    %c1_146 = arith.constant 1 : index
    %c1_147 = arith.constant 1 : index
    %c0_148 = arith.constant 0 : index
    %c0_149 = arith.constant 0 : index
    %288 = vector.load %arg3[%c1_146, %c1_147, %c0_148, %c0_149] : memref<3x3x24x1xf32, #tpu.memory_space<vmem>>, vector<1x1x24x1xf32>
    %289 = vector.shape_cast %288 : vector<1x1x24x1xf32> to vector<24x1xf32>
    %290 = vector.broadcast %289 : vector<24x1xf32> to vector<24x32xf32>
    %291 = arith.mulf %266, %290 : vector<24x32xf32>
    %292 = arith.addf %287, %291 : vector<24x32xf32>
    %c2_150 = arith.constant 2 : index
    %c1_151 = arith.constant 1 : index
    %c0_152 = arith.constant 0 : index
    %c0_153 = arith.constant 0 : index
    %293 = vector.load %arg3[%c2_150, %c1_151, %c0_152, %c0_153] : memref<3x3x24x1xf32, #tpu.memory_space<vmem>>, vector<1x1x24x1xf32>
    %294 = vector.shape_cast %293 : vector<1x1x24x1xf32> to vector<24x1xf32>
    %295 = vector.broadcast %294 : vector<24x1xf32> to vector<24x32xf32>
    %296 = arith.mulf %269, %295 : vector<24x32xf32>
    %297 = arith.addf %292, %296 : vector<24x32xf32>
    %298 = math.absf %297 : vector<24x32xf32>
    %c0_154 = arith.constant 0 : index
    %c2_155 = arith.constant 2 : index
    %c0_156 = arith.constant 0 : index
    %c0_157 = arith.constant 0 : index
    %299 = vector.load %arg3[%c0_154, %c2_155, %c0_156, %c0_157] : memref<3x3x24x1xf32, #tpu.memory_space<vmem>>, vector<1x1x24x1xf32>
    %300 = vector.shape_cast %299 : vector<1x1x24x1xf32> to vector<24x1xf32>
    %301 = vector.broadcast %300 : vector<24x1xf32> to vector<24x32xf32>
    %302 = arith.mulf %263, %301 : vector<24x32xf32>
    %c1_158 = arith.constant 1 : index
    %c2_159 = arith.constant 2 : index
    %c0_160 = arith.constant 0 : index
    %c0_161 = arith.constant 0 : index
    %303 = vector.load %arg3[%c1_158, %c2_159, %c0_160, %c0_161] : memref<3x3x24x1xf32, #tpu.memory_space<vmem>>, vector<1x1x24x1xf32>
    %304 = vector.shape_cast %303 : vector<1x1x24x1xf32> to vector<24x1xf32>
    %305 = vector.broadcast %304 : vector<24x1xf32> to vector<24x32xf32>
    %306 = arith.mulf %266, %305 : vector<24x32xf32>
    %307 = arith.addf %302, %306 : vector<24x32xf32>
    %c2_162 = arith.constant 2 : index
    %c2_163 = arith.constant 2 : index
    %c0_164 = arith.constant 0 : index
    %c0_165 = arith.constant 0 : index
    %308 = vector.load %arg3[%c2_162, %c2_163, %c0_164, %c0_165] : memref<3x3x24x1xf32, #tpu.memory_space<vmem>>, vector<1x1x24x1xf32>
    %309 = vector.shape_cast %308 : vector<1x1x24x1xf32> to vector<24x1xf32>
    %310 = vector.broadcast %309 : vector<24x1xf32> to vector<24x32xf32>
    %311 = arith.mulf %269, %310 : vector<24x32xf32>
    %312 = arith.addf %307, %311 : vector<24x32xf32>
    %c0_166 = arith.constant 0 : index
    %c0_167 = arith.constant 0 : index
    %313 = memref.load %arg6[%c0_166, %c0_167] : memref<3x8xf32, #tpu.memory_space<smem>>
    %314 = vector.broadcast %313 : f32 to vector<24x32xf32>
    %315 = arith.mulf %283, %314 : vector<24x32xf32>
    %c1_168 = arith.constant 1 : index
    %c0_169 = arith.constant 0 : index
    %316 = memref.load %arg6[%c1_168, %c0_169] : memref<3x8xf32, #tpu.memory_space<smem>>
    %317 = vector.broadcast %316 : f32 to vector<24x32xf32>
    %318 = arith.mulf %298, %317 : vector<24x32xf32>
    %319 = arith.addf %315, %318 : vector<24x32xf32>
    %c2_170 = arith.constant 2 : index
    %c0_171 = arith.constant 0 : index
    %320 = memref.load %arg6[%c2_170, %c0_171] : memref<3x8xf32, #tpu.memory_space<smem>>
    %321 = vector.broadcast %320 : f32 to vector<24x32xf32>
    %322 = arith.mulf %312, %321 : vector<24x32xf32>
    %323 = arith.addf %319, %322 : vector<24x32xf32>
    %c0_172 = arith.constant 0 : index
    %324 = memref.load %arg7[%c0_172] : memref<8xf32, #tpu.memory_space<smem>>
    %325 = vector.broadcast %324 : f32 to vector<24x32xf32>
    %326 = arith.addf %323, %325 : vector<24x32xf32>
    %327 = arith.negf %326 : vector<24x32xf32>
    %328 = math.exp %327 : vector<24x32xf32>
    %cst_173 = arith.constant 1.000000e+00 : f32
    %329 = vector.broadcast %cst_173 : f32 to vector<24x32xf32>
    %330 = arith.addf %329, %328 : vector<24x32xf32>
    %331 = arith.divf %329, %330 : vector<24x32xf32>
    %332 = arith.mulf %326, %331 : vector<24x32xf32>
    %c0_174 = arith.constant 0 : index
    %333 = memref.load %arg8[%c0_174] : memref<8xf32, #tpu.memory_space<smem>>
    %334 = vector.broadcast %333 : f32 to vector<24x32xf32>
    %335 = arith.mulf %332, %334 : vector<24x32xf32>
    %c0_175 = arith.constant 0 : index
    %c1_176 = arith.constant 1 : index
    %336 = memref.load %arg6[%c0_175, %c1_176] : memref<3x8xf32, #tpu.memory_space<smem>>
    %337 = vector.broadcast %336 : f32 to vector<24x32xf32>
    %338 = arith.mulf %283, %337 : vector<24x32xf32>
    %c1_177 = arith.constant 1 : index
    %c1_178 = arith.constant 1 : index
    %339 = memref.load %arg6[%c1_177, %c1_178] : memref<3x8xf32, #tpu.memory_space<smem>>
    %340 = vector.broadcast %339 : f32 to vector<24x32xf32>
    %341 = arith.mulf %298, %340 : vector<24x32xf32>
    %342 = arith.addf %338, %341 : vector<24x32xf32>
    %c2_179 = arith.constant 2 : index
    %c1_180 = arith.constant 1 : index
    %343 = memref.load %arg6[%c2_179, %c1_180] : memref<3x8xf32, #tpu.memory_space<smem>>
    %344 = vector.broadcast %343 : f32 to vector<24x32xf32>
    %345 = arith.mulf %312, %344 : vector<24x32xf32>
    %346 = arith.addf %342, %345 : vector<24x32xf32>
    %c1_181 = arith.constant 1 : index
    %347 = memref.load %arg7[%c1_181] : memref<8xf32, #tpu.memory_space<smem>>
    %348 = vector.broadcast %347 : f32 to vector<24x32xf32>
    %349 = arith.addf %346, %348 : vector<24x32xf32>
    %350 = arith.negf %349 : vector<24x32xf32>
    %351 = math.exp %350 : vector<24x32xf32>
    %cst_182 = arith.constant 1.000000e+00 : f32
    %352 = vector.broadcast %cst_182 : f32 to vector<24x32xf32>
    %353 = arith.addf %352, %351 : vector<24x32xf32>
    %354 = arith.divf %352, %353 : vector<24x32xf32>
    %355 = arith.mulf %349, %354 : vector<24x32xf32>
    %c1_183 = arith.constant 1 : index
    %356 = memref.load %arg8[%c1_183] : memref<8xf32, #tpu.memory_space<smem>>
    %357 = vector.broadcast %356 : f32 to vector<24x32xf32>
    %358 = arith.mulf %355, %357 : vector<24x32xf32>
    %359 = arith.addf %335, %358 : vector<24x32xf32>
    %c0_184 = arith.constant 0 : index
    %c2_185 = arith.constant 2 : index
    %360 = memref.load %arg6[%c0_184, %c2_185] : memref<3x8xf32, #tpu.memory_space<smem>>
    %361 = vector.broadcast %360 : f32 to vector<24x32xf32>
    %362 = arith.mulf %283, %361 : vector<24x32xf32>
    %c1_186 = arith.constant 1 : index
    %c2_187 = arith.constant 2 : index
    %363 = memref.load %arg6[%c1_186, %c2_187] : memref<3x8xf32, #tpu.memory_space<smem>>
    %364 = vector.broadcast %363 : f32 to vector<24x32xf32>
    %365 = arith.mulf %298, %364 : vector<24x32xf32>
    %366 = arith.addf %362, %365 : vector<24x32xf32>
    %c2_188 = arith.constant 2 : index
    %c2_189 = arith.constant 2 : index
    %367 = memref.load %arg6[%c2_188, %c2_189] : memref<3x8xf32, #tpu.memory_space<smem>>
    %368 = vector.broadcast %367 : f32 to vector<24x32xf32>
    %369 = arith.mulf %312, %368 : vector<24x32xf32>
    %370 = arith.addf %366, %369 : vector<24x32xf32>
    %c2_190 = arith.constant 2 : index
    %371 = memref.load %arg7[%c2_190] : memref<8xf32, #tpu.memory_space<smem>>
    %372 = vector.broadcast %371 : f32 to vector<24x32xf32>
    %373 = arith.addf %370, %372 : vector<24x32xf32>
    %374 = arith.negf %373 : vector<24x32xf32>
    %375 = math.exp %374 : vector<24x32xf32>
    %cst_191 = arith.constant 1.000000e+00 : f32
    %376 = vector.broadcast %cst_191 : f32 to vector<24x32xf32>
    %377 = arith.addf %376, %375 : vector<24x32xf32>
    %378 = arith.divf %376, %377 : vector<24x32xf32>
    %379 = arith.mulf %373, %378 : vector<24x32xf32>
    %c2_192 = arith.constant 2 : index
    %380 = memref.load %arg8[%c2_192] : memref<8xf32, #tpu.memory_space<smem>>
    %381 = vector.broadcast %380 : f32 to vector<24x32xf32>
    %382 = arith.mulf %379, %381 : vector<24x32xf32>
    %383 = arith.addf %359, %382 : vector<24x32xf32>
    %c0_193 = arith.constant 0 : index
    %c3_194 = arith.constant 3 : index
    %384 = memref.load %arg6[%c0_193, %c3_194] : memref<3x8xf32, #tpu.memory_space<smem>>
    %385 = vector.broadcast %384 : f32 to vector<24x32xf32>
    %386 = arith.mulf %283, %385 : vector<24x32xf32>
    %c1_195 = arith.constant 1 : index
    %c3_196 = arith.constant 3 : index
    %387 = memref.load %arg6[%c1_195, %c3_196] : memref<3x8xf32, #tpu.memory_space<smem>>
    %388 = vector.broadcast %387 : f32 to vector<24x32xf32>
    %389 = arith.mulf %298, %388 : vector<24x32xf32>
    %390 = arith.addf %386, %389 : vector<24x32xf32>
    %c2_197 = arith.constant 2 : index
    %c3_198 = arith.constant 3 : index
    %391 = memref.load %arg6[%c2_197, %c3_198] : memref<3x8xf32, #tpu.memory_space<smem>>
    %392 = vector.broadcast %391 : f32 to vector<24x32xf32>
    %393 = arith.mulf %312, %392 : vector<24x32xf32>
    %394 = arith.addf %390, %393 : vector<24x32xf32>
    %c3_199 = arith.constant 3 : index
    %395 = memref.load %arg7[%c3_199] : memref<8xf32, #tpu.memory_space<smem>>
    %396 = vector.broadcast %395 : f32 to vector<24x32xf32>
    %397 = arith.addf %394, %396 : vector<24x32xf32>
    %398 = arith.negf %397 : vector<24x32xf32>
    %399 = math.exp %398 : vector<24x32xf32>
    %cst_200 = arith.constant 1.000000e+00 : f32
    %400 = vector.broadcast %cst_200 : f32 to vector<24x32xf32>
    %401 = arith.addf %400, %399 : vector<24x32xf32>
    %402 = arith.divf %400, %401 : vector<24x32xf32>
    %403 = arith.mulf %397, %402 : vector<24x32xf32>
    %c3_201 = arith.constant 3 : index
    %404 = memref.load %arg8[%c3_201] : memref<8xf32, #tpu.memory_space<smem>>
    %405 = vector.broadcast %404 : f32 to vector<24x32xf32>
    %406 = arith.mulf %403, %405 : vector<24x32xf32>
    %407 = arith.addf %383, %406 : vector<24x32xf32>
    %c0_202 = arith.constant 0 : index
    %c4_203 = arith.constant 4 : index
    %408 = memref.load %arg6[%c0_202, %c4_203] : memref<3x8xf32, #tpu.memory_space<smem>>
    %409 = vector.broadcast %408 : f32 to vector<24x32xf32>
    %410 = arith.mulf %283, %409 : vector<24x32xf32>
    %c1_204 = arith.constant 1 : index
    %c4_205 = arith.constant 4 : index
    %411 = memref.load %arg6[%c1_204, %c4_205] : memref<3x8xf32, #tpu.memory_space<smem>>
    %412 = vector.broadcast %411 : f32 to vector<24x32xf32>
    %413 = arith.mulf %298, %412 : vector<24x32xf32>
    %414 = arith.addf %410, %413 : vector<24x32xf32>
    %c2_206 = arith.constant 2 : index
    %c4_207 = arith.constant 4 : index
    %415 = memref.load %arg6[%c2_206, %c4_207] : memref<3x8xf32, #tpu.memory_space<smem>>
    %416 = vector.broadcast %415 : f32 to vector<24x32xf32>
    %417 = arith.mulf %312, %416 : vector<24x32xf32>
    %418 = arith.addf %414, %417 : vector<24x32xf32>
    %c4_208 = arith.constant 4 : index
    %419 = memref.load %arg7[%c4_208] : memref<8xf32, #tpu.memory_space<smem>>
    %420 = vector.broadcast %419 : f32 to vector<24x32xf32>
    %421 = arith.addf %418, %420 : vector<24x32xf32>
    %422 = arith.negf %421 : vector<24x32xf32>
    %423 = math.exp %422 : vector<24x32xf32>
    %cst_209 = arith.constant 1.000000e+00 : f32
    %424 = vector.broadcast %cst_209 : f32 to vector<24x32xf32>
    %425 = arith.addf %424, %423 : vector<24x32xf32>
    %426 = arith.divf %424, %425 : vector<24x32xf32>
    %427 = arith.mulf %421, %426 : vector<24x32xf32>
    %c4_210 = arith.constant 4 : index
    %428 = memref.load %arg8[%c4_210] : memref<8xf32, #tpu.memory_space<smem>>
    %429 = vector.broadcast %428 : f32 to vector<24x32xf32>
    %430 = arith.mulf %427, %429 : vector<24x32xf32>
    %431 = arith.addf %407, %430 : vector<24x32xf32>
    %c0_211 = arith.constant 0 : index
    %c5_212 = arith.constant 5 : index
    %432 = memref.load %arg6[%c0_211, %c5_212] : memref<3x8xf32, #tpu.memory_space<smem>>
    %433 = vector.broadcast %432 : f32 to vector<24x32xf32>
    %434 = arith.mulf %283, %433 : vector<24x32xf32>
    %c1_213 = arith.constant 1 : index
    %c5_214 = arith.constant 5 : index
    %435 = memref.load %arg6[%c1_213, %c5_214] : memref<3x8xf32, #tpu.memory_space<smem>>
    %436 = vector.broadcast %435 : f32 to vector<24x32xf32>
    %437 = arith.mulf %298, %436 : vector<24x32xf32>
    %438 = arith.addf %434, %437 : vector<24x32xf32>
    %c2_215 = arith.constant 2 : index
    %c5_216 = arith.constant 5 : index
    %439 = memref.load %arg6[%c2_215, %c5_216] : memref<3x8xf32, #tpu.memory_space<smem>>
    %440 = vector.broadcast %439 : f32 to vector<24x32xf32>
    %441 = arith.mulf %312, %440 : vector<24x32xf32>
    %442 = arith.addf %438, %441 : vector<24x32xf32>
    %c5_217 = arith.constant 5 : index
    %443 = memref.load %arg7[%c5_217] : memref<8xf32, #tpu.memory_space<smem>>
    %444 = vector.broadcast %443 : f32 to vector<24x32xf32>
    %445 = arith.addf %442, %444 : vector<24x32xf32>
    %446 = arith.negf %445 : vector<24x32xf32>
    %447 = math.exp %446 : vector<24x32xf32>
    %cst_218 = arith.constant 1.000000e+00 : f32
    %448 = vector.broadcast %cst_218 : f32 to vector<24x32xf32>
    %449 = arith.addf %448, %447 : vector<24x32xf32>
    %450 = arith.divf %448, %449 : vector<24x32xf32>
    %451 = arith.mulf %445, %450 : vector<24x32xf32>
    %c5_219 = arith.constant 5 : index
    %452 = memref.load %arg8[%c5_219] : memref<8xf32, #tpu.memory_space<smem>>
    %453 = vector.broadcast %452 : f32 to vector<24x32xf32>
    %454 = arith.mulf %451, %453 : vector<24x32xf32>
    %455 = arith.addf %431, %454 : vector<24x32xf32>
    %c0_220 = arith.constant 0 : index
    %c6_221 = arith.constant 6 : index
    %456 = memref.load %arg6[%c0_220, %c6_221] : memref<3x8xf32, #tpu.memory_space<smem>>
    %457 = vector.broadcast %456 : f32 to vector<24x32xf32>
    %458 = arith.mulf %283, %457 : vector<24x32xf32>
    %c1_222 = arith.constant 1 : index
    %c6_223 = arith.constant 6 : index
    %459 = memref.load %arg6[%c1_222, %c6_223] : memref<3x8xf32, #tpu.memory_space<smem>>
    %460 = vector.broadcast %459 : f32 to vector<24x32xf32>
    %461 = arith.mulf %298, %460 : vector<24x32xf32>
    %462 = arith.addf %458, %461 : vector<24x32xf32>
    %c2_224 = arith.constant 2 : index
    %c6_225 = arith.constant 6 : index
    %463 = memref.load %arg6[%c2_224, %c6_225] : memref<3x8xf32, #tpu.memory_space<smem>>
    %464 = vector.broadcast %463 : f32 to vector<24x32xf32>
    %465 = arith.mulf %312, %464 : vector<24x32xf32>
    %466 = arith.addf %462, %465 : vector<24x32xf32>
    %c6_226 = arith.constant 6 : index
    %467 = memref.load %arg7[%c6_226] : memref<8xf32, #tpu.memory_space<smem>>
    %468 = vector.broadcast %467 : f32 to vector<24x32xf32>
    %469 = arith.addf %466, %468 : vector<24x32xf32>
    %470 = arith.negf %469 : vector<24x32xf32>
    %471 = math.exp %470 : vector<24x32xf32>
    %cst_227 = arith.constant 1.000000e+00 : f32
    %472 = vector.broadcast %cst_227 : f32 to vector<24x32xf32>
    %473 = arith.addf %472, %471 : vector<24x32xf32>
    %474 = arith.divf %472, %473 : vector<24x32xf32>
    %475 = arith.mulf %469, %474 : vector<24x32xf32>
    %c6_228 = arith.constant 6 : index
    %476 = memref.load %arg8[%c6_228] : memref<8xf32, #tpu.memory_space<smem>>
    %477 = vector.broadcast %476 : f32 to vector<24x32xf32>
    %478 = arith.mulf %475, %477 : vector<24x32xf32>
    %479 = arith.addf %455, %478 : vector<24x32xf32>
    %c0_229 = arith.constant 0 : index
    %c7_230 = arith.constant 7 : index
    %480 = memref.load %arg6[%c0_229, %c7_230] : memref<3x8xf32, #tpu.memory_space<smem>>
    %481 = vector.broadcast %480 : f32 to vector<24x32xf32>
    %482 = arith.mulf %283, %481 : vector<24x32xf32>
    %c1_231 = arith.constant 1 : index
    %c7_232 = arith.constant 7 : index
    %483 = memref.load %arg6[%c1_231, %c7_232] : memref<3x8xf32, #tpu.memory_space<smem>>
    %484 = vector.broadcast %483 : f32 to vector<24x32xf32>
    %485 = arith.mulf %298, %484 : vector<24x32xf32>
    %486 = arith.addf %482, %485 : vector<24x32xf32>
    %c2_233 = arith.constant 2 : index
    %c7_234 = arith.constant 7 : index
    %487 = memref.load %arg6[%c2_233, %c7_234] : memref<3x8xf32, #tpu.memory_space<smem>>
    %488 = vector.broadcast %487 : f32 to vector<24x32xf32>
    %489 = arith.mulf %312, %488 : vector<24x32xf32>
    %490 = arith.addf %486, %489 : vector<24x32xf32>
    %c7_235 = arith.constant 7 : index
    %491 = memref.load %arg7[%c7_235] : memref<8xf32, #tpu.memory_space<smem>>
    %492 = vector.broadcast %491 : f32 to vector<24x32xf32>
    %493 = arith.addf %490, %492 : vector<24x32xf32>
    %494 = arith.negf %493 : vector<24x32xf32>
    %495 = math.exp %494 : vector<24x32xf32>
    %cst_236 = arith.constant 1.000000e+00 : f32
    %496 = vector.broadcast %cst_236 : f32 to vector<24x32xf32>
    %497 = arith.addf %496, %495 : vector<24x32xf32>
    %498 = arith.divf %496, %497 : vector<24x32xf32>
    %499 = arith.mulf %493, %498 : vector<24x32xf32>
    %c7_237 = arith.constant 7 : index
    %500 = memref.load %arg8[%c7_237] : memref<8xf32, #tpu.memory_space<smem>>
    %501 = vector.broadcast %500 : f32 to vector<24x32xf32>
    %502 = arith.mulf %499, %501 : vector<24x32xf32>
    %503 = arith.addf %479, %502 : vector<24x32xf32>
    %c0_238 = arith.constant 0 : index
    %504 = memref.load %arg9[%c0_238] : memref<1xf32, #tpu.memory_space<smem>>
    %505 = vector.broadcast %504 : f32 to vector<24x32xf32>
    %506 = arith.addf %503, %505 : vector<24x32xf32>
    %507 = arith.addf %506, %283 : vector<24x32xf32>
    %508 = vector.broadcast %1 : vector<24x1xf32> to vector<24x32xf32>
    %509 = arith.mulf %507, %508 : vector<24x32xf32>
    %510 = tpu.concatenate %255, %509 in 1 : vector<24x32xf32>, vector<24x32xf32> -> vector<24x64xf32>
    %c0_239 = arith.constant 0 : index
    %c0_240 = arith.constant 0 : index
    %511 = vector.load %arg10[%c0_239, %c0_240] : memref<24x64xf32, #tpu.memory_space<vmem>>, vector<24x64xf32>
    tpu.vector_store %arg10[%c0_239, %c0_240], %510 {strides = array<i32>} : memref<24x64xf32, #tpu.memory_space<vmem>>, vector<24x64xf32>,
    return
  }
  func.func @transform_0(%arg0: i32) -> (i32, i32) {
    %c0_i32 = arith.constant 0 : i32
    %c0_i32_0 = arith.constant 0 : i32
    return %arg0, %c0_i32 : i32, i32
  }
  func.func @transform_1(%arg0: i32) -> (i32, i32) {
    %c0_i32 = arith.constant 0 : i32
    %c0_i32_0 = arith.constant 0 : i32
    return %arg0, %c0_i32 : i32, i32
  }
  func.func @transform_2(%arg0: i32) -> (i32, i32, i32, i32) {
    %c0_i32 = arith.constant 0 : i32
    %c0_i32_0 = arith.constant 0 : i32
    %c0_i32_1 = arith.constant 0 : i32
    %c0_i32_2 = arith.constant 0 : i32
    return %c0_i32, %c0_i32_0, %arg0, %c0_i32_1 : i32, i32, i32, i32
  }
  func.func @transform_3(%arg0: i32) -> (i32, i32) {
    %c0_i32 = arith.constant 0 : i32
    %c0_i32_0 = arith.constant 0 : i32
    return %arg0, %c0_i32 : i32, i32
  }
  func.func @transform_4(%arg0: i32) -> (i32, i32, i32) {
    %c0_i32 = arith.constant 0 : i32
    %c0_i32_0 = arith.constant 0 : i32
    %c0_i32_1 = arith.constant 0 : i32
    %c0_i32_2 = arith.constant 0 : i32
    return %c0_i32, %c0_i32_0, %c0_i32_1 : i32, i32, i32
  }
  func.func @transform_5(%arg0: i32) -> (i32, i32) {
    %c0_i32 = arith.constant 0 : i32
    %c0_i32_0 = arith.constant 0 : i32
    %c0_i32_1 = arith.constant 0 : i32
    return %c0_i32, %c0_i32_0 : i32, i32
  }
  func.func @transform_6(%arg0: i32) -> i32 {
    %c0_i32 = arith.constant 0 : i32
    %c0_i32_0 = arith.constant 0 : i32
    return %c0_i32 : i32
  }
  func.func @transform_7(%arg0: i32) -> i32 {
    %c0_i32 = arith.constant 0 : i32
    %c0_i32_0 = arith.constant 0 : i32
    return %c0_i32 : i32
  }
  func.func @transform_8(%arg0: i32) -> i32 {
    %c0_i32 = arith.constant 0 : i32
    %c0_i32_0 = arith.constant 0 : i32
    return %c0_i32 : i32
  }
  func.func @transform_9(%arg0: i32) -> (i32, i32) {
    %c0_i32 = arith.constant 0 : i32
    %c0_i32_0 = arith.constant 0 : i32
    return %arg0, %c0_i32 : i32, i32
  }
}

module attributes {stable_mosaic.version = 11 : i64} {
  func.func @_equi_message_kernel(%arg0: i32, %arg1: memref<24x1xi32, #tpu.memory_space<vmem>>, %arg2: memref<24x1xi32, #tpu.memory_space<vmem>>, %arg3: memref<24x16xf32, #tpu.memory_space<vmem>>, %arg4: memref<24x32xf32, #tpu.memory_space<vmem>>, %arg5: memref<24x64xf32, #tpu.memory_space<vmem>>, %arg6: memref<3x24x1xf32, #tpu.memory_space<vmem>>, %arg7: memref<16x96xf32, #tpu.memory_space<vmem>>, %arg8: memref<3x16x32xf32, #tpu.memory_space<vmem>>, %arg9: memref<16x96xbf16, #tpu.memory_space<vmem>>, %arg10: memref<1x96xf32, #tpu.memory_space<vmem>>, %arg11: memref<64x96xbf16, #tpu.memory_space<vmem>>, %arg12: memref<32x96xbf16, #tpu.memory_space<vmem>>, %arg13: memref<16x96xbf16, #tpu.memory_space<vmem>>, %arg14: memref<1x96xf32, #tpu.memory_space<vmem>>, %arg15: memref<96x96xbf16, #tpu.memory_space<vmem>>, %arg16: memref<1x96xf32, #tpu.memory_space<vmem>>, %arg17: memref<16x32xf32, #tpu.memory_space<vmem>>, %arg18: memref<3x16x32xf32, #tpu.memory_space<vmem>>) attributes {dimension_semantics = [#tpu.dimension_semantics<arbitrary>], iteration_bounds = array<i64: 1>, scalar_prefetch = 0 : i64, scratch_operands = 0 : i64, tpu.core_type = #tpu.core_type<tc>, window_params = [{transform_indices = @transform_0, window_bounds = array<i64: 24, 1>}, {transform_indices = @transform_1, window_bounds = array<i64: 24, 1>}, {transform_indices = @transform_2, window_bounds = array<i64: 24, 16>}, {transform_indices = @transform_3, window_bounds = array<i64: 24, 32>}, {transform_indices = @transform_4, window_bounds = array<i64: 24, 64>}, {transform_indices = @transform_5, window_bounds = array<i64: 3, 24, 1>}, {pipeline_mode = #tpu.pipeline_mode<synchronous>, transform_indices = @transform_6, window_bounds = array<i64: 16, 96>}, {pipeline_mode = #tpu.pipeline_mode<synchronous>, transform_indices = @transform_7, window_bounds = array<i64: 3, 16, 32>}, {pipeline_mode = #tpu.pipeline_mode<synchronous>, transform_indices = @transform_8, window_bounds = array<i64: 16, 96>}, {pipeline_mode = #tpu.pipeline_mode<synchronous>, transform_indices = @transform_9, window_bounds = array<i64: 1, 96>}, {pipeline_mode = #tpu.pipeline_mode<synchronous>, transform_indices = @transform_10, window_bounds = array<i64: 64, 96>}, {pipeline_mode = #tpu.pipeline_mode<synchronous>, transform_indices = @transform_11, window_bounds = array<i64: 32, 96>}, {pipeline_mode = #tpu.pipeline_mode<synchronous>, transform_indices = @transform_12, window_bounds = array<i64: 16, 96>}, {pipeline_mode = #tpu.pipeline_mode<synchronous>, transform_indices = @transform_13, window_bounds = array<i64: 1, 96>}, {pipeline_mode = #tpu.pipeline_mode<synchronous>, transform_indices = @transform_14, window_bounds = array<i64: 96, 96>}, {pipeline_mode = #tpu.pipeline_mode<synchronous>, transform_indices = @transform_15, window_bounds = array<i64: 1, 96>}, {pipeline_mode = #tpu.pipeline_mode<synchronous>, transform_indices = @transform_16, window_bounds = array<i64: 16, 32>}, {pipeline_mode = #tpu.pipeline_mode<synchronous>, transform_indices = @transform_17, window_bounds = array<i64: 3, 16, 32>}]} {
    %c0_i32 = arith.constant 0 : i32
    %0 = arith.cmpi eq, %arg0, %c0_i32 : i32
    %1 = arith.extui %0 : i1 to i32
    %c0_i32_0 = arith.constant 0 : i32
    %2 = arith.cmpi ne, %1, %c0_i32_0 : i32
    scf.if %2 {
      %cst_83 = arith.constant 0.000000e+00 : f32
      %116 = vector.broadcast %cst_83 : f32 to vector<16x32xf32>
      %c0_84 = arith.constant 0 : index
      %c0_85 = arith.constant 0 : index
      %117 = vector.load %arg17[%c0_84, %c0_85] : memref<16x32xf32, #tpu.memory_space<vmem>>, vector<16x32xf32>
      tpu.vector_store %arg17[%c0_84, %c0_85], %116 {strides = array<i32>} : memref<16x32xf32, #tpu.memory_space<vmem>>, vector<16x32xf32>,
      %cst_86 = arith.constant 0.000000e+00 : f32
      %118 = vector.broadcast %cst_86 : f32 to vector<3x16x32xf32>
      %c0_87 = arith.constant 0 : index
      %c0_88 = arith.constant 0 : index
      %c0_89 = arith.constant 0 : index
      %119 = vector.load %arg18[%c0_87, %c0_88, %c0_89] : memref<3x16x32xf32, #tpu.memory_space<vmem>>, vector<3x16x32xf32>
      tpu.vector_store %arg18[%c0_87, %c0_88, %c0_89], %118 {strides = array<i32>} : memref<3x16x32xf32, #tpu.memory_space<vmem>>, vector<3x16x32xf32>,
    } else {
    }
    %c0 = arith.constant 0 : index
    %c0_1 = arith.constant 0 : index
    %3 = vector.load %arg3[%c0, %c0_1] : memref<24x16xf32, #tpu.memory_space<vmem>>, vector<24x16xf32>
    %4 = arith.truncf %3 : vector<24x16xf32> to vector<24x16xbf16>
    %c0_2 = arith.constant 0 : index
    %c0_3 = arith.constant 0 : index
    %5 = vector.load %arg9[%c0_2, %c0_3] : memref<16x96xbf16, #tpu.memory_space<vmem>>, vector<16x96xbf16>
    %cst = arith.constant dense<0.000000e+00> : vector<24x96xf32>
    %6 = tpu.matmul %4, %5, %cst {dimension_numbers = #tpu.dot_dimension_numbers<[1], [0], [0], [1], [0, 0, 1, 1], [], []>} : vector<24x16xbf16>, vector<16x96xbf16>, vector<24x96xf32> -> vector<24x96xf32>
    %c0_4 = arith.constant 0 : index
    %c0_5 = arith.constant 0 : index
    %7 = vector.load %arg10[%c0_4, %c0_5] : memref<1x96xf32, #tpu.memory_space<vmem>>, vector<1x96xf32>
    %8 = vector.broadcast %7 : vector<1x96xf32> to vector<24x96xf32>
    %9 = arith.addf %6, %8 : vector<24x96xf32>
    %c0_6 = arith.constant 0 : index
    %c0_7 = arith.constant 0 : index
    %10 = vector.load %arg5[%c0_6, %c0_7] : memref<24x64xf32, #tpu.memory_space<vmem>>, vector<24x64xf32>
    %11 = arith.truncf %10 : vector<24x64xf32> to vector<24x64xbf16>
    %c0_8 = arith.constant 0 : index
    %c0_9 = arith.constant 0 : index
    %12 = vector.load %arg11[%c0_8, %c0_9] : memref<64x96xbf16, #tpu.memory_space<vmem>>, vector<64x96xbf16>
    %cst_10 = arith.constant dense<0.000000e+00> : vector<24x96xf32>
    %13 = tpu.matmul %11, %12, %cst_10 {dimension_numbers = #tpu.dot_dimension_numbers<[1], [0], [0], [1], [0, 0, 1, 1], [], []>} : vector<24x64xbf16>, vector<64x96xbf16>, vector<24x96xf32> -> vector<24x96xf32>
    %c0_11 = arith.constant 0 : index
    %c0_12 = arith.constant 0 : index
    %14 = vector.load %arg4[%c0_11, %c0_12] : memref<24x32xf32, #tpu.memory_space<vmem>>, vector<24x32xf32>
    %15 = arith.truncf %14 : vector<24x32xf32> to vector<24x32xbf16>
    %c0_13 = arith.constant 0 : index
    %c0_14 = arith.constant 0 : index
    %16 = vector.load %arg12[%c0_13, %c0_14] : memref<32x96xbf16, #tpu.memory_space<vmem>>, vector<32x96xbf16>
    %cst_15 = arith.constant dense<0.000000e+00> : vector<24x96xf32>
    %17 = tpu.matmul %15, %16, %cst_15 {dimension_numbers = #tpu.dot_dimension_numbers<[1], [0], [0], [1], [0, 0, 1, 1], [], []>} : vector<24x32xbf16>, vector<32x96xbf16>, vector<24x96xf32> -> vector<24x96xf32>
    %18 = arith.addf %13, %17 : vector<24x96xf32>
    %19 = arith.truncf %3 : vector<24x16xf32> to vector<24x16xbf16>
    %c0_16 = arith.constant 0 : index
    %c0_17 = arith.constant 0 : index
    %20 = vector.load %arg13[%c0_16, %c0_17] : memref<16x96xbf16, #tpu.memory_space<vmem>>, vector<16x96xbf16>
    %cst_18 = arith.constant dense<0.000000e+00> : vector<24x96xf32>
    %21 = tpu.matmul %19, %20, %cst_18 {dimension_numbers = #tpu.dot_dimension_numbers<[1], [0], [0], [1], [0, 0, 1, 1], [], []>} : vector<24x16xbf16>, vector<16x96xbf16>, vector<24x96xf32> -> vector<24x96xf32>
    %22 = arith.addf %18, %21 : vector<24x96xf32>
    %c0_19 = arith.constant 0 : index
    %c0_20 = arith.constant 0 : index
    %23 = vector.load %arg14[%c0_19, %c0_20] : memref<1x96xf32, #tpu.memory_space<vmem>>, vector<1x96xf32>
    %24 = vector.broadcast %23 : vector<1x96xf32> to vector<24x96xf32>
    %25 = arith.addf %22, %24 : vector<24x96xf32>
    %26 = arith.negf %25 : vector<24x96xf32>
    %27 = math.exp %26 : vector<24x96xf32>
    %cst_21 = arith.constant 1.000000e+00 : f32
    %28 = vector.broadcast %cst_21 : f32 to vector<24x96xf32>
    %29 = arith.addf %28, %27 : vector<24x96xf32>
    %30 = arith.divf %28, %29 : vector<24x96xf32>
    %31 = arith.mulf %25, %30 : vector<24x96xf32>
    %32 = arith.truncf %31 : vector<24x96xf32> to vector<24x96xbf16>
    %c0_22 = arith.constant 0 : index
    %c0_23 = arith.constant 0 : index
    %33 = vector.load %arg15[%c0_22, %c0_23] : memref<96x96xbf16, #tpu.memory_space<vmem>>, vector<96x96xbf16>
    %cst_24 = arith.constant dense<0.000000e+00> : vector<24x96xf32>
    %34 = tpu.matmul %32, %33, %cst_24 {dimension_numbers = #tpu.dot_dimension_numbers<[1], [0], [0], [1], [0, 0, 1, 1], [], []>} : vector<24x96xbf16>, vector<96x96xbf16>, vector<24x96xf32> -> vector<24x96xf32>
    %c0_25 = arith.constant 0 : index
    %c0_26 = arith.constant 0 : index
    %35 = vector.load %arg16[%c0_25, %c0_26] : memref<1x96xf32, #tpu.memory_space<vmem>>, vector<1x96xf32>
    %36 = vector.broadcast %35 : vector<1x96xf32> to vector<24x96xf32>
    %37 = arith.addf %34, %36 : vector<24x96xf32>
    %38 = arith.mulf %9, %37 : vector<24x96xf32>
    %39 = tpu.iota {dimensions = array<i32: 1>} : vector<24x16xi32>
    %c0_27 = arith.constant 0 : index
    %c0_28 = arith.constant 0 : index
    %40 = vector.load %arg1[%c0_27, %c0_28] : memref<24x1xi32, #tpu.memory_space<vmem>>, vector<24x1xi32>
    %41 = vector.broadcast %40 : vector<24x1xi32> to vector<24x16xi32>
    %42 = arith.cmpi eq, %41, %39 : vector<24x16xi32>
    %43 = arith.extui %42 : vector<24x16xi1> to vector<24x16xi32>
    %44 = arith.sitofp %43 : vector<24x16xi32> to vector<24x16xf32>
    %c0_29 = arith.constant 0 : index
    %c0_30 = arith.constant 0 : index
    %45 = vector.load %arg2[%c0_29, %c0_30] : memref<24x1xi32, #tpu.memory_space<vmem>>, vector<24x1xi32>
    %46 = vector.broadcast %45 : vector<24x1xi32> to vector<24x16xi32>
    %47 = arith.cmpi eq, %46, %39 : vector<24x16xi32>
    %48 = arith.extui %47 : vector<24x16xi1> to vector<24x16xi32>
    %49 = arith.sitofp %48 : vector<24x16xi32> to vector<24x16xf32>
    %c0_31 = arith.constant 0 : index
    %c0_32 = arith.constant 0 : index
    %50 = vector.load %arg7[%c0_31, %c0_32] : memref<16x96xf32, #tpu.memory_space<vmem>>, vector<16x96xf32>
    %cst_33 = arith.constant dense<0.000000e+00> : vector<24x96xf32>
    %51 = tpu.matmul %44, %50, %cst_33 {dimension_numbers = #tpu.dot_dimension_numbers<[1], [0], [0], [1], [0, 0, 1, 1], [], []>} : vector<24x16xf32>, vector<16x96xf32>, vector<24x96xf32> -> vector<24x96xf32>
    %52 = arith.mulf %51, %38 : vector<24x96xf32>
    %53 = vector.extract_strided_slice %52 {offsets = [0, 0], sizes = [24, 32], strides = [1, 1]} : vector<24x96xf32> to vector<24x32xf32>
    %54 = vector.extract_strided_slice %52 {offsets = [0, 32], sizes = [24, 32], strides = [1, 1]} : vector<24x96xf32> to vector<24x32xf32>
    %cst_34 = arith.constant 0.577350259 : f32
    %55 = vector.broadcast %cst_34 : f32 to vector<24x32xf32>
    %56 = arith.mulf %54, %55 : vector<24x32xf32>
    %57 = vector.extract_strided_slice %52 {offsets = [0, 64], sizes = [24, 32], strides = [1, 1]} : vector<24x96xf32> to vector<24x32xf32>
    %c0_35 = arith.constant 0 : index
    %c0_36 = arith.constant 0 : index
    %58 = vector.load %arg17[%c0_35, %c0_36] : memref<16x32xf32, #tpu.memory_space<vmem>>, vector<16x32xf32>
    %cst_37 = arith.constant dense<0.000000e+00> : vector<16x32xf32>
    %59 = tpu.matmul %49, %53, %cst_37 {dimension_numbers = #tpu.dot_dimension_numbers<[0], [0], [1], [1], [0, 1, 1, 1], [], []>} : vector<24x16xf32>, vector<24x32xf32>, vector<16x32xf32> -> vector<16x32xf32>
    %60 = arith.addf %58, %59 : vector<16x32xf32>
    %c0_38 = arith.constant 0 : index
    %c0_39 = arith.constant 0 : index
    %61 = vector.load %arg17[%c0_38, %c0_39] : memref<16x32xf32, #tpu.memory_space<vmem>>, vector<16x32xf32>
    tpu.vector_store %arg17[%c0_38, %c0_39], %60 {strides = array<i32>} : memref<16x32xf32, #tpu.memory_space<vmem>>, vector<16x32xf32>,
    %c0_40 = arith.constant 0 : index
    %c0_41 = arith.constant 0 : index
    %c0_42 = arith.constant 0 : index
    %62 = vector.load %arg8[%c0_40, %c0_41, %c0_42] : memref<3x16x32xf32, #tpu.memory_space<vmem>>, vector<1x16x32xf32>
    %63 = vector.shape_cast %62 : vector<1x16x32xf32> to vector<16x32xf32>
    %cst_43 = arith.constant dense<0.000000e+00> : vector<24x32xf32>
    %64 = tpu.matmul %44, %63, %cst_43 {dimension_numbers = #tpu.dot_dimension_numbers<[1], [0], [0], [1], [0, 0, 1, 1], [], []>} : vector<24x16xf32>, vector<16x32xf32>, vector<24x32xf32> -> vector<24x32xf32>
    %65 = arith.mulf %64, %56 : vector<24x32xf32>
    %c0_44 = arith.constant 0 : index
    %c0_45 = arith.constant 0 : index
    %c0_46 = arith.constant 0 : index
    %66 = vector.load %arg6[%c0_44, %c0_45, %c0_46] : memref<3x24x1xf32, #tpu.memory_space<vmem>>, vector<1x24x1xf32>
    %67 = vector.shape_cast %66 : vector<1x24x1xf32> to vector<24x1xf32>
    %68 = vector.broadcast %67 : vector<24x1xf32> to vector<24x32xf32>
    %69 = arith.mulf %57, %68 : vector<24x32xf32>
    %70 = arith.addf %65, %69 : vector<24x32xf32>
    %cst_47 = arith.constant 0.176776692 : f32
    %71 = vector.broadcast %cst_47 : f32 to vector<24x32xf32>
    %72 = arith.mulf %70, %71 : vector<24x32xf32>
    %c0_48 = arith.constant 0 : index
    %c0_49 = arith.constant 0 : index
    %c0_50 = arith.constant 0 : index
    %73 = vector.load %arg18[%c0_48, %c0_49, %c0_50] : memref<3x16x32xf32, #tpu.memory_space<vmem>>, vector<1x16x32xf32>
    %74 = vector.shape_cast %73 : vector<1x16x32xf32> to vector<16x32xf32>
    %cst_51 = arith.constant dense<0.000000e+00> : vector<16x32xf32>
    %75 = tpu.matmul %49, %72, %cst_51 {dimension_numbers = #tpu.dot_dimension_numbers<[0], [0], [1], [1], [0, 1, 1, 1], [], []>} : vector<24x16xf32>, vector<24x32xf32>, vector<16x32xf32> -> vector<16x32xf32>
    %76 = arith.addf %74, %75 : vector<16x32xf32>
    %c0_52 = arith.constant 0 : index
    %c0_53 = arith.constant 0 : index
    %c0_54 = arith.constant 0 : index
    %77 = vector.load %arg18[%c0_52, %c0_53, %c0_54] : memref<3x16x32xf32, #tpu.memory_space<vmem>>, vector<1x16x32xf32>
    %78 = vector.shape_cast %77 : vector<1x16x32xf32> to vector<16x32xf32>
    %79 = vector.shape_cast %76 : vector<16x32xf32> to vector<1x16x32xf32>
    tpu.vector_store %arg18[%c0_52, %c0_53, %c0_54], %79 {strides = array<i32>} : memref<3x16x32xf32, #tpu.memory_space<vmem>>, vector<1x16x32xf32>,
    %c1 = arith.constant 1 : index
    %c0_55 = arith.constant 0 : index
    %c0_56 = arith.constant 0 : index
    %80 = vector.load %arg8[%c1, %c0_55, %c0_56] : memref<3x16x32xf32, #tpu.memory_space<vmem>>, vector<1x16x32xf32>
    %81 = vector.shape_cast %80 : vector<1x16x32xf32> to vector<16x32xf32>
    %cst_57 = arith.constant dense<0.000000e+00> : vector<24x32xf32>
    %82 = tpu.matmul %44, %81, %cst_57 {dimension_numbers = #tpu.dot_dimension_numbers<[1], [0], [0], [1], [0, 0, 1, 1], [], []>} : vector<24x16xf32>, vector<16x32xf32>, vector<24x32xf32> -> vector<24x32xf32>
    %83 = arith.mulf %82, %56 : vector<24x32xf32>
    %c1_58 = arith.constant 1 : index
    %c0_59 = arith.constant 0 : index
    %c0_60 = arith.constant 0 : index
    %84 = vector.load %arg6[%c1_58, %c0_59, %c0_60] : memref<3x24x1xf32, #tpu.memory_space<vmem>>, vector<1x24x1xf32>
    %85 = vector.shape_cast %84 : vector<1x24x1xf32> to vector<24x1xf32>
    %86 = vector.broadcast %85 : vector<24x1xf32> to vector<24x32xf32>
    %87 = arith.mulf %57, %86 : vector<24x32xf32>
    %88 = arith.addf %83, %87 : vector<24x32xf32>
    %cst_61 = arith.constant 0.176776692 : f32
    %89 = vector.broadcast %cst_61 : f32 to vector<24x32xf32>
    %90 = arith.mulf %88, %89 : vector<24x32xf32>
    %c1_62 = arith.constant 1 : index
    %c0_63 = arith.constant 0 : index
    %c0_64 = arith.constant 0 : index
    %91 = vector.load %arg18[%c1_62, %c0_63, %c0_64] : memref<3x16x32xf32, #tpu.memory_space<vmem>>, vector<1x16x32xf32>
    %92 = vector.shape_cast %91 : vector<1x16x32xf32> to vector<16x32xf32>
    %cst_65 = arith.constant dense<0.000000e+00> : vector<16x32xf32>
    %93 = tpu.matmul %49, %90, %cst_65 {dimension_numbers = #tpu.dot_dimension_numbers<[0], [0], [1], [1], [0, 1, 1, 1], [], []>} : vector<24x16xf32>, vector<24x32xf32>, vector<16x32xf32> -> vector<16x32xf32>
    %94 = arith.addf %92, %93 : vector<16x32xf32>
    %c1_66 = arith.constant 1 : index
    %c0_67 = arith.constant 0 : index
    %c0_68 = arith.constant 0 : index
    %95 = vector.load %arg18[%c1_66, %c0_67, %c0_68] : memref<3x16x32xf32, #tpu.memory_space<vmem>>, vector<1x16x32xf32>
    %96 = vector.shape_cast %95 : vector<1x16x32xf32> to vector<16x32xf32>
    %97 = vector.shape_cast %94 : vector<16x32xf32> to vector<1x16x32xf32>
    tpu.vector_store %arg18[%c1_66, %c0_67, %c0_68], %97 {strides = array<i32>} : memref<3x16x32xf32, #tpu.memory_space<vmem>>, vector<1x16x32xf32>,
    %c2 = arith.constant 2 : index
    %c0_69 = arith.constant 0 : index
    %c0_70 = arith.constant 0 : index
    %98 = vector.load %arg8[%c2, %c0_69, %c0_70] : memref<3x16x32xf32, #tpu.memory_space<vmem>>, vector<1x16x32xf32>
    %99 = vector.shape_cast %98 : vector<1x16x32xf32> to vector<16x32xf32>
    %cst_71 = arith.constant dense<0.000000e+00> : vector<24x32xf32>
    %100 = tpu.matmul %44, %99, %cst_71 {dimension_numbers = #tpu.dot_dimension_numbers<[1], [0], [0], [1], [0, 0, 1, 1], [], []>} : vector<24x16xf32>, vector<16x32xf32>, vector<24x32xf32> -> vector<24x32xf32>
    %101 = arith.mulf %100, %56 : vector<24x32xf32>
    %c2_72 = arith.constant 2 : index
    %c0_73 = arith.constant 0 : index
    %c0_74 = arith.constant 0 : index
    %102 = vector.load %arg6[%c2_72, %c0_73, %c0_74] : memref<3x24x1xf32, #tpu.memory_space<vmem>>, vector<1x24x1xf32>
    %103 = vector.shape_cast %102 : vector<1x24x1xf32> to vector<24x1xf32>
    %104 = vector.broadcast %103 : vector<24x1xf32> to vector<24x32xf32>
    %105 = arith.mulf %57, %104 : vector<24x32xf32>
    %106 = arith.addf %101, %105 : vector<24x32xf32>
    %cst_75 = arith.constant 0.176776692 : f32
    %107 = vector.broadcast %cst_75 : f32 to vector<24x32xf32>
    %108 = arith.mulf %106, %107 : vector<24x32xf32>
    %c2_76 = arith.constant 2 : index
    %c0_77 = arith.constant 0 : index
    %c0_78 = arith.constant 0 : index
    %109 = vector.load %arg18[%c2_76, %c0_77, %c0_78] : memref<3x16x32xf32, #tpu.memory_space<vmem>>, vector<1x16x32xf32>
    %110 = vector.shape_cast %109 : vector<1x16x32xf32> to vector<16x32xf32>
    %cst_79 = arith.constant dense<0.000000e+00> : vector<16x32xf32>
    %111 = tpu.matmul %49, %108, %cst_79 {dimension_numbers = #tpu.dot_dimension_numbers<[0], [0], [1], [1], [0, 1, 1, 1], [], []>} : vector<24x16xf32>, vector<24x32xf32>, vector<16x32xf32> -> vector<16x32xf32>
    %112 = arith.addf %110, %111 : vector<16x32xf32>
    %c2_80 = arith.constant 2 : index
    %c0_81 = arith.constant 0 : index
    %c0_82 = arith.constant 0 : index
    %113 = vector.load %arg18[%c2_80, %c0_81, %c0_82] : memref<3x16x32xf32, #tpu.memory_space<vmem>>, vector<1x16x32xf32>
    %114 = vector.shape_cast %113 : vector<1x16x32xf32> to vector<16x32xf32>
    %115 = vector.shape_cast %112 : vector<16x32xf32> to vector<1x16x32xf32>
    tpu.vector_store %arg18[%c2_80, %c0_81, %c0_82], %115 {strides = array<i32>} : memref<3x16x32xf32, #tpu.memory_space<vmem>>, vector<1x16x32xf32>,
    return
  }
  func.func @transform_0(%arg0: i32) -> (i32, i32) {
    %c0_i32 = arith.constant 0 : i32
    %c0_i32_0 = arith.constant 0 : i32
    return %arg0, %c0_i32 : i32, i32
  }
  func.func @transform_1(%arg0: i32) -> (i32, i32) {
    %c0_i32 = arith.constant 0 : i32
    %c0_i32_0 = arith.constant 0 : i32
    return %arg0, %c0_i32 : i32, i32
  }
  func.func @transform_2(%arg0: i32) -> (i32, i32) {
    %c0_i32 = arith.constant 0 : i32
    %c0_i32_0 = arith.constant 0 : i32
    return %arg0, %c0_i32 : i32, i32
  }
  func.func @transform_3(%arg0: i32) -> (i32, i32) {
    %c0_i32 = arith.constant 0 : i32
    %c0_i32_0 = arith.constant 0 : i32
    return %arg0, %c0_i32 : i32, i32
  }
  func.func @transform_4(%arg0: i32) -> (i32, i32) {
    %c0_i32 = arith.constant 0 : i32
    %c0_i32_0 = arith.constant 0 : i32
    return %arg0, %c0_i32 : i32, i32
  }
  func.func @transform_5(%arg0: i32) -> (i32, i32, i32) {
    %c0_i32 = arith.constant 0 : i32
    %c0_i32_0 = arith.constant 0 : i32
    %c0_i32_1 = arith.constant 0 : i32
    return %c0_i32, %arg0, %c0_i32_0 : i32, i32, i32
  }
  func.func @transform_6(%arg0: i32) -> (i32, i32) {
    %c0_i32 = arith.constant 0 : i32
    %c0_i32_0 = arith.constant 0 : i32
    %c0_i32_1 = arith.constant 0 : i32
    return %c0_i32, %c0_i32_0 : i32, i32
  }
  func.func @transform_7(%arg0: i32) -> (i32, i32, i32) {
    %c0_i32 = arith.constant 0 : i32
    %c0_i32_0 = arith.constant 0 : i32
    %c0_i32_1 = arith.constant 0 : i32
    %c0_i32_2 = arith.constant 0 : i32
    return %c0_i32, %c0_i32_0, %c0_i32_1 : i32, i32, i32
  }
  func.func @transform_8(%arg0: i32) -> (i32, i32) {
    %c0_i32 = arith.constant 0 : i32
    %c0_i32_0 = arith.constant 0 : i32
    %c0_i32_1 = arith.constant 0 : i32
    return %c0_i32, %c0_i32_0 : i32, i32
  }
  func.func @transform_9(%arg0: i32) -> (i32, i32) {
    %c0_i32 = arith.constant 0 : i32
    %c0_i32_0 = arith.constant 0 : i32
    %c0_i32_1 = arith.constant 0 : i32
    return %c0_i32, %c0_i32_0 : i32, i32
  }
  func.func @transform_10(%arg0: i32) -> (i32, i32) {
    %c0_i32 = arith.constant 0 : i32
    %c0_i32_0 = arith.constant 0 : i32
    %c0_i32_1 = arith.constant 0 : i32
    return %c0_i32, %c0_i32_0 : i32, i32
  }
  func.func @transform_11(%arg0: i32) -> (i32, i32) {
    %c0_i32 = arith.constant 0 : i32
    %c0_i32_0 = arith.constant 0 : i32
    %c0_i32_1 = arith.constant 0 : i32
    return %c0_i32, %c0_i32_0 : i32, i32
  }
  func.func @transform_12(%arg0: i32) -> (i32, i32) {
    %c0_i32 = arith.constant 0 : i32
    %c0_i32_0 = arith.constant 0 : i32
    %c0_i32_1 = arith.constant 0 : i32
    return %c0_i32, %c0_i32_0 : i32, i32
  }
  func.func @transform_13(%arg0: i32) -> (i32, i32) {
    %c0_i32 = arith.constant 0 : i32
    %c0_i32_0 = arith.constant 0 : i32
    %c0_i32_1 = arith.constant 0 : i32
    return %c0_i32, %c0_i32_0 : i32, i32
  }
  func.func @transform_14(%arg0: i32) -> (i32, i32) {
    %c0_i32 = arith.constant 0 : i32
    %c0_i32_0 = arith.constant 0 : i32
    %c0_i32_1 = arith.constant 0 : i32
    return %c0_i32, %c0_i32_0 : i32, i32
  }
  func.func @transform_15(%arg0: i32) -> (i32, i32) {
    %c0_i32 = arith.constant 0 : i32
    %c0_i32_0 = arith.constant 0 : i32
    %c0_i32_1 = arith.constant 0 : i32
    return %c0_i32, %c0_i32_0 : i32, i32
  }
  func.func @transform_16(%arg0: i32) -> (i32, i32) {
    %c0_i32 = arith.constant 0 : i32
    %c0_i32_0 = arith.constant 0 : i32
    %c0_i32_1 = arith.constant 0 : i32
    return %c0_i32, %c0_i32_0 : i32, i32
  }
  func.func @transform_17(%arg0: i32) -> (i32, i32, i32) {
    %c0_i32 = arith.constant 0 : i32
    %c0_i32_0 = arith.constant 0 : i32
    %c0_i32_1 = arith.constant 0 : i32
    %c0_i32_2 = arith.constant 0 : i32
    return %c0_i32, %c0_i32_0, %c0_i32_1 : i32, i32, i32
  }
}

module attributes {stable_mosaic.version = 11 : i64} {
  func.func @_fte_kernel(%arg0: i32, %arg1: memref<16x32xf32, #tpu.memory_space<vmem>>, %arg2: memref<16x32xf32, #tpu.memory_space<vmem>>, %arg3: memref<3x16x32xf32, #tpu.memory_space<vmem>>, %arg4: memref<3x16x32xf32, #tpu.memory_space<vmem>>, %arg5: memref<32x64xf32, #tpu.memory_space<vmem>>, %arg6: memref<32x32xbf16, #tpu.memory_space<vmem>>, %arg7: memref<32x32xbf16, #tpu.memory_space<vmem>>, %arg8: memref<1x32xf32, #tpu.memory_space<vmem>>, %arg9: memref<32x96xbf16, #tpu.memory_space<vmem>>, %arg10: memref<1x96xf32, #tpu.memory_space<vmem>>, %arg11: memref<16x32xf32, #tpu.memory_space<vmem>>, %arg12: memref<3x16x32xf32, #tpu.memory_space<vmem>>) attributes {dimension_semantics = [#tpu.dimension_semantics<parallel>], iteration_bounds = array<i64: 1>, scalar_prefetch = 0 : i64, scratch_operands = 0 : i64, tpu.core_type = #tpu.core_type<tc>, window_params = [{transform_indices = @transform_0, window_bounds = array<i64: 16, 32>}, {transform_indices = @transform_1, window_bounds = array<i64: 16, 32>}, {transform_indices = @transform_2, window_bounds = array<i64: 3, 16, 32>}, {transform_indices = @transform_3, window_bounds = array<i64: 3, 16, 32>}, {pipeline_mode = #tpu.pipeline_mode<synchronous>, transform_indices = @transform_4, window_bounds = array<i64: 32, 64>}, {pipeline_mode = #tpu.pipeline_mode<synchronous>, transform_indices = @transform_5, window_bounds = array<i64: 32, 32>}, {pipeline_mode = #tpu.pipeline_mode<synchronous>, transform_indices = @transform_6, window_bounds = array<i64: 32, 32>}, {pipeline_mode = #tpu.pipeline_mode<synchronous>, transform_indices = @transform_7, window_bounds = array<i64: 1, 32>}, {pipeline_mode = #tpu.pipeline_mode<synchronous>, transform_indices = @transform_8, window_bounds = array<i64: 32, 96>}, {pipeline_mode = #tpu.pipeline_mode<synchronous>, transform_indices = @transform_9, window_bounds = array<i64: 1, 96>}, {transform_indices = @transform_10, window_bounds = array<i64: 16, 32>}, {transform_indices = @transform_11, window_bounds = array<i64: 3, 16, 32>}]} {
    %c0 = arith.constant 0 : index
    %c0_0 = arith.constant 0 : index
    %0 = vector.load %arg1[%c0, %c0_0] : memref<16x32xf32, #tpu.memory_space<vmem>>, vector<16x32xf32>
    %c0_1 = arith.constant 0 : index
    %c0_2 = arith.constant 0 : index
    %1 = vector.load %arg2[%c0_1, %c0_2] : memref<16x32xf32, #tpu.memory_space<vmem>>, vector<16x32xf32>
    %2 = arith.addf %0, %1 : vector<16x32xf32>
    %c0_3 = arith.constant 0 : index
    %c0_4 = arith.constant 0 : index
    %3 = vector.load %arg5[%c0_3, %c0_4] : memref<32x64xf32, #tpu.memory_space<vmem>>, vector<32x64xf32>
    %cst = arith.constant 0.000000e+00 : f32
    %4 = vector.broadcast %cst : f32 to vector<16x32xf32>
    %cst_5 = arith.constant 0.000000e+00 : f32
    %5 = vector.broadcast %cst_5 : f32 to vector<16x32xf32>
    %c0_6 = arith.constant 0 : index
    %c0_7 = arith.constant 0 : index
    %c0_8 = arith.constant 0 : index
    %6 = vector.load %arg3[%c0_6, %c0_7, %c0_8] : memref<3x16x32xf32, #tpu.memory_space<vmem>>, vector<1x16x32xf32>
    %7 = vector.shape_cast %6 : vector<1x16x32xf32> to vector<16x32xf32>
    %c0_9 = arith.constant 0 : index
    %c0_10 = arith.constant 0 : index
    %c0_11 = arith.constant 0 : index
    %8 = vector.load %arg4[%c0_9, %c0_10, %c0_11] : memref<3x16x32xf32, #tpu.memory_space<vmem>>, vector<1x16x32xf32>
    %9 = vector.shape_cast %8 : vector<1x16x32xf32> to vector<16x32xf32>
    %10 = arith.addf %7, %9 : vector<16x32xf32>
    %cst_12 = arith.constant dense<0.000000e+00> : vector<16x64xf32>
    %11 = tpu.matmul %10, %3, %cst_12 {dimension_numbers = #tpu.dot_dimension_numbers<[1], [0], [0], [1], [0, 0, 1, 1], [], []>} : vector<16x32xf32>, vector<32x64xf32>, vector<16x64xf32> -> vector<16x64xf32>
    %12 = vector.extract_strided_slice %11 {offsets = [0, 0], sizes = [16, 32], strides = [1, 1]} : vector<16x64xf32> to vector<16x32xf32>
    %13 = vector.extract_strided_slice %11 {offsets = [0, 32], sizes = [16, 32], strides = [1, 1]} : vector<16x64xf32> to vector<16x32xf32>
    %14 = arith.mulf %12, %12 : vector<16x32xf32>
    %15 = arith.addf %4, %14 : vector<16x32xf32>
    %16 = arith.mulf %12, %13 : vector<16x32xf32>
    %17 = arith.addf %5, %16 : vector<16x32xf32>
    %c1 = arith.constant 1 : index
    %c0_13 = arith.constant 0 : index
    %c0_14 = arith.constant 0 : index
    %18 = vector.load %arg3[%c1, %c0_13, %c0_14] : memref<3x16x32xf32, #tpu.memory_space<vmem>>, vector<1x16x32xf32>
    %19 = vector.shape_cast %18 : vector<1x16x32xf32> to vector<16x32xf32>
    %c1_15 = arith.constant 1 : index
    %c0_16 = arith.constant 0 : index
    %c0_17 = arith.constant 0 : index
    %20 = vector.load %arg4[%c1_15, %c0_16, %c0_17] : memref<3x16x32xf32, #tpu.memory_space<vmem>>, vector<1x16x32xf32>
    %21 = vector.shape_cast %20 : vector<1x16x32xf32> to vector<16x32xf32>
    %22 = arith.addf %19, %21 : vector<16x32xf32>
    %cst_18 = arith.constant dense<0.000000e+00> : vector<16x64xf32>
    %23 = tpu.matmul %22, %3, %cst_18 {dimension_numbers = #tpu.dot_dimension_numbers<[1], [0], [0], [1], [0, 0, 1, 1], [], []>} : vector<16x32xf32>, vector<32x64xf32>, vector<16x64xf32> -> vector<16x64xf32>
    %24 = vector.extract_strided_slice %23 {offsets = [0, 0], sizes = [16, 32], strides = [1, 1]} : vector<16x64xf32> to vector<16x32xf32>
    %25 = vector.extract_strided_slice %23 {offsets = [0, 32], sizes = [16, 32], strides = [1, 1]} : vector<16x64xf32> to vector<16x32xf32>
    %26 = arith.mulf %24, %24 : vector<16x32xf32>
    %27 = arith.addf %15, %26 : vector<16x32xf32>
    %28 = arith.mulf %24, %25 : vector<16x32xf32>
    %29 = arith.addf %17, %28 : vector<16x32xf32>
    %c2 = arith.constant 2 : index
    %c0_19 = arith.constant 0 : index
    %c0_20 = arith.constant 0 : index
    %30 = vector.load %arg3[%c2, %c0_19, %c0_20] : memref<3x16x32xf32, #tpu.memory_space<vmem>>, vector<1x16x32xf32>
    %31 = vector.shape_cast %30 : vector<1x16x32xf32> to vector<16x32xf32>
    %c2_21 = arith.constant 2 : index
    %c0_22 = arith.constant 0 : index
    %c0_23 = arith.constant 0 : index
    %32 = vector.load %arg4[%c2_21, %c0_22, %c0_23] : memref<3x16x32xf32, #tpu.memory_space<vmem>>, vector<1x16x32xf32>
    %33 = vector.shape_cast %32 : vector<1x16x32xf32> to vector<16x32xf32>
    %34 = arith.addf %31, %33 : vector<16x32xf32>
    %cst_24 = arith.constant dense<0.000000e+00> : vector<16x64xf32>
    %35 = tpu.matmul %34, %3, %cst_24 {dimension_numbers = #tpu.dot_dimension_numbers<[1], [0], [0], [1], [0, 0, 1, 1], [], []>} : vector<16x32xf32>, vector<32x64xf32>, vector<16x64xf32> -> vector<16x64xf32>
    %36 = vector.extract_strided_slice %35 {offsets = [0, 0], sizes = [16, 32], strides = [1, 1]} : vector<16x64xf32> to vector<16x32xf32>
    %37 = vector.extract_strided_slice %35 {offsets = [0, 32], sizes = [16, 32], strides = [1, 1]} : vector<16x64xf32> to vector<16x32xf32>
    %38 = arith.mulf %36, %36 : vector<16x32xf32>
    %39 = arith.addf %27, %38 : vector<16x32xf32>
    %40 = arith.mulf %36, %37 : vector<16x32xf32>
    %41 = arith.addf %29, %40 : vector<16x32xf32>
    %42 = math.sqrt %39 : vector<16x32xf32>
    %cst_25 = arith.constant 0.176776692 : f32
    %43 = vector.broadcast %cst_25 : f32 to vector<16x32xf32>
    %44 = arith.mulf %41, %43 : vector<16x32xf32>
    %45 = arith.truncf %2 : vector<16x32xf32> to vector<16x32xbf16>
    %c0_26 = arith.constant 0 : index
    %c0_27 = arith.constant 0 : index
    %46 = vector.load %arg6[%c0_26, %c0_27] : memref<32x32xbf16, #tpu.memory_space<vmem>>, vector<32x32xbf16>
    %cst_28 = arith.constant dense<0.000000e+00> : vector<16x32xf32>
    %47 = tpu.matmul %45, %46, %cst_28 {dimension_numbers = #tpu.dot_dimension_numbers<[1], [0], [0], [1], [0, 0, 1, 1], [], []>} : vector<16x32xbf16>, vector<32x32xbf16>, vector<16x32xf32> -> vector<16x32xf32>
    %48 = arith.truncf %42 : vector<16x32xf32> to vector<16x32xbf16>
    %c0_29 = arith.constant 0 : index
    %c0_30 = arith.constant 0 : index
    %49 = vector.load %arg7[%c0_29, %c0_30] : memref<32x32xbf16, #tpu.memory_space<vmem>>, vector<32x32xbf16>
    %cst_31 = arith.constant dense<0.000000e+00> : vector<16x32xf32>
    %50 = tpu.matmul %48, %49, %cst_31 {dimension_numbers = #tpu.dot_dimension_numbers<[1], [0], [0], [1], [0, 0, 1, 1], [], []>} : vector<16x32xbf16>, vector<32x32xbf16>, vector<16x32xf32> -> vector<16x32xf32>
    %51 = arith.addf %47, %50 : vector<16x32xf32>
    %c0_32 = arith.constant 0 : index
    %c0_33 = arith.constant 0 : index
    %52 = vector.load %arg8[%c0_32, %c0_33] : memref<1x32xf32, #tpu.memory_space<vmem>>, vector<1x32xf32>
    %53 = vector.broadcast %52 : vector<1x32xf32> to vector<16x32xf32>
    %54 = arith.addf %51, %53 : vector<16x32xf32>
    %55 = arith.negf %54 : vector<16x32xf32>
    %56 = math.exp %55 : vector<16x32xf32>
    %cst_34 = arith.constant 1.000000e+00 : f32
    %57 = vector.broadcast %cst_34 : f32 to vector<16x32xf32>
    %58 = arith.addf %57, %56 : vector<16x32xf32>
    %59 = arith.divf %57, %58 : vector<16x32xf32>
    %60 = arith.mulf %54, %59 : vector<16x32xf32>
    %61 = arith.truncf %60 : vector<16x32xf32> to vector<16x32xbf16>
    %c0_35 = arith.constant 0 : index
    %c0_36 = arith.constant 0 : index
    %62 = vector.load %arg9[%c0_35, %c0_36] : memref<32x96xbf16, #tpu.memory_space<vmem>>, vector<32x96xbf16>
    %cst_37 = arith.constant dense<0.000000e+00> : vector<16x96xf32>
    %63 = tpu.matmul %61, %62, %cst_37 {dimension_numbers = #tpu.dot_dimension_numbers<[1], [0], [0], [1], [0, 0, 1, 1], [], []>} : vector<16x32xbf16>, vector<32x96xbf16>, vector<16x96xf32> -> vector<16x96xf32>
    %c0_38 = arith.constant 0 : index
    %c0_39 = arith.constant 0 : index
    %64 = vector.load %arg10[%c0_38, %c0_39] : memref<1x96xf32, #tpu.memory_space<vmem>>, vector<1x96xf32>
    %65 = vector.broadcast %64 : vector<1x96xf32> to vector<16x96xf32>
    %66 = arith.addf %63, %65 : vector<16x96xf32>
    %67 = vector.extract_strided_slice %66 {offsets = [0, 0], sizes = [16, 32], strides = [1, 1]} : vector<16x96xf32> to vector<16x32xf32>
    %68 = vector.extract_strided_slice %66 {offsets = [0, 32], sizes = [16, 32], strides = [1, 1]} : vector<16x96xf32> to vector<16x32xf32>
    %69 = arith.addf %67, %68 : vector<16x32xf32>
    %70 = arith.addf %69, %44 : vector<16x32xf32>
    %cst_40 = arith.constant 0.707106769 : f32
    %71 = vector.broadcast %cst_40 : f32 to vector<16x32xf32>
    %72 = arith.mulf %70, %71 : vector<16x32xf32>
    %73 = arith.addf %2, %72 : vector<16x32xf32>
    %c0_41 = arith.constant 0 : index
    %c0_42 = arith.constant 0 : index
    %74 = vector.load %arg11[%c0_41, %c0_42] : memref<16x32xf32, #tpu.memory_space<vmem>>, vector<16x32xf32>
    tpu.vector_store %arg11[%c0_41, %c0_42], %73 {strides = array<i32>} : memref<16x32xf32, #tpu.memory_space<vmem>>, vector<16x32xf32>,
    %75 = vector.extract_strided_slice %66 {offsets = [0, 64], sizes = [16, 32], strides = [1, 1]} : vector<16x96xf32> to vector<16x32xf32>
    %76 = arith.mulf %75, %13 : vector<16x32xf32>
    %77 = arith.addf %10, %76 : vector<16x32xf32>
    %c0_43 = arith.constant 0 : index
    %c0_44 = arith.constant 0 : index
    %c0_45 = arith.constant 0 : index
    %78 = vector.load %arg12[%c0_43, %c0_44, %c0_45] : memref<3x16x32xf32, #tpu.memory_space<vmem>>, vector<1x16x32xf32>
    %79 = vector.shape_cast %78 : vector<1x16x32xf32> to vector<16x32xf32>
    %80 = vector.shape_cast %77 : vector<16x32xf32> to vector<1x16x32xf32>
    tpu.vector_store %arg12[%c0_43, %c0_44, %c0_45], %80 {strides = array<i32>} : memref<3x16x32xf32, #tpu.memory_space<vmem>>, vector<1x16x32xf32>,
    %81 = arith.mulf %75, %25 : vector<16x32xf32>
    %82 = arith.addf %22, %81 : vector<16x32xf32>
    %c1_46 = arith.constant 1 : index
    %c0_47 = arith.constant 0 : index
    %c0_48 = arith.constant 0 : index
    %83 = vector.load %arg12[%c1_46, %c0_47, %c0_48] : memref<3x16x32xf32, #tpu.memory_space<vmem>>, vector<1x16x32xf32>
    %84 = vector.shape_cast %83 : vector<1x16x32xf32> to vector<16x32xf32>
    %85 = vector.shape_cast %82 : vector<16x32xf32> to vector<1x16x32xf32>
    tpu.vector_store %arg12[%c1_46, %c0_47, %c0_48], %85 {strides = array<i32>} : memref<3x16x32xf32, #tpu.memory_space<vmem>>, vector<1x16x32xf32>,
    %86 = arith.mulf %75, %37 : vector<16x32xf32>
    %87 = arith.addf %34, %86 : vector<16x32xf32>
    %c2_49 = arith.constant 2 : index
    %c0_50 = arith.constant 0 : index
    %c0_51 = arith.constant 0 : index
    %88 = vector.load %arg12[%c2_49, %c0_50, %c0_51] : memref<3x16x32xf32, #tpu.memory_space<vmem>>, vector<1x16x32xf32>
    %89 = vector.shape_cast %88 : vector<1x16x32xf32> to vector<16x32xf32>
    %90 = vector.shape_cast %87 : vector<16x32xf32> to vector<1x16x32xf32>
    tpu.vector_store %arg12[%c2_49, %c0_50, %c0_51], %90 {strides = array<i32>} : memref<3x16x32xf32, #tpu.memory_space<vmem>>, vector<1x16x32xf32>,
    return
  }
  func.func @transform_0(%arg0: i32) -> (i32, i32) {
    %c0_i32 = arith.constant 0 : i32
    %c0_i32_0 = arith.constant 0 : i32
    return %arg0, %c0_i32 : i32, i32
  }
  func.func @transform_1(%arg0: i32) -> (i32, i32) {
    %c0_i32 = arith.constant 0 : i32
    %c0_i32_0 = arith.constant 0 : i32
    return %arg0, %c0_i32 : i32, i32
  }
  func.func @transform_2(%arg0: i32) -> (i32, i32, i32) {
    %c0_i32 = arith.constant 0 : i32
    %c0_i32_0 = arith.constant 0 : i32
    %c0_i32_1 = arith.constant 0 : i32
    return %c0_i32, %arg0, %c0_i32_0 : i32, i32, i32
  }
  func.func @transform_3(%arg0: i32) -> (i32, i32, i32) {
    %c0_i32 = arith.constant 0 : i32
    %c0_i32_0 = arith.constant 0 : i32
    %c0_i32_1 = arith.constant 0 : i32
    return %c0_i32, %arg0, %c0_i32_0 : i32, i32, i32
  }
  func.func @transform_4(%arg0: i32) -> (i32, i32) {
    %c0_i32 = arith.constant 0 : i32
    %c0_i32_0 = arith.constant 0 : i32
    %c0_i32_1 = arith.constant 0 : i32
    return %c0_i32, %c0_i32_0 : i32, i32
  }
  func.func @transform_5(%arg0: i32) -> (i32, i32) {
    %c0_i32 = arith.constant 0 : i32
    %c0_i32_0 = arith.constant 0 : i32
    %c0_i32_1 = arith.constant 0 : i32
    return %c0_i32, %c0_i32_0 : i32, i32
  }
  func.func @transform_6(%arg0: i32) -> (i32, i32) {
    %c0_i32 = arith.constant 0 : i32
    %c0_i32_0 = arith.constant 0 : i32
    %c0_i32_1 = arith.constant 0 : i32
    return %c0_i32, %c0_i32_0 : i32, i32
  }
  func.func @transform_7(%arg0: i32) -> (i32, i32) {
    %c0_i32 = arith.constant 0 : i32
    %c0_i32_0 = arith.constant 0 : i32
    %c0_i32_1 = arith.constant 0 : i32
    return %c0_i32, %c0_i32_0 : i32, i32
  }
  func.func @transform_8(%arg0: i32) -> (i32, i32) {
    %c0_i32 = arith.constant 0 : i32
    %c0_i32_0 = arith.constant 0 : i32
    %c0_i32_1 = arith.constant 0 : i32
    return %c0_i32, %c0_i32_0 : i32, i32
  }
  func.func @transform_9(%arg0: i32) -> (i32, i32) {
    %c0_i32 = arith.constant 0 : i32
    %c0_i32_0 = arith.constant 0 : i32
    %c0_i32_1 = arith.constant 0 : i32
    return %c0_i32, %c0_i32_0 : i32, i32
  }
  func.func @transform_10(%arg0: i32) -> (i32, i32) {
    %c0_i32 = arith.constant 0 : i32
    %c0_i32_0 = arith.constant 0 : i32
    return %arg0, %c0_i32 : i32, i32
  }
  func.func @transform_11(%arg0: i32) -> (i32, i32, i32) {
    %c0_i32 = arith.constant 0 : i32
    %c0_i32_0 = arith.constant 0 : i32
    %c0_i32_1 = arith.constant 0 : i32
    return %c0_i32, %arg0, %c0_i32_0 : i32, i32, i32
  }
}

module attributes {stable_mosaic.version = 11 : i64} {
  func.func @_fte_kernel(%arg0: i32, %arg1: memref<16x32xf32, #tpu.memory_space<vmem>>, %arg2: memref<16x32xf32, #tpu.memory_space<vmem>>, %arg3: memref<3x16x32xf32, #tpu.memory_space<vmem>>, %arg4: memref<3x16x32xf32, #tpu.memory_space<vmem>>, %arg5: memref<32x64xf32, #tpu.memory_space<vmem>>, %arg6: memref<32x32xbf16, #tpu.memory_space<vmem>>, %arg7: memref<32x32xbf16, #tpu.memory_space<vmem>>, %arg8: memref<1x32xf32, #tpu.memory_space<vmem>>, %arg9: memref<32x96xbf16, #tpu.memory_space<vmem>>, %arg10: memref<1x96xf32, #tpu.memory_space<vmem>>, %arg11: memref<16x32xf32, #tpu.memory_space<vmem>>, %arg12: memref<3x16x32xf32, #tpu.memory_space<vmem>>) attributes {dimension_semantics = [#tpu.dimension_semantics<parallel>], iteration_bounds = array<i64: 1>, scalar_prefetch = 0 : i64, scratch_operands = 0 : i64, tpu.core_type = #tpu.core_type<tc>, window_params = [{transform_indices = @transform_0, window_bounds = array<i64: 16, 32>}, {transform_indices = @transform_1, window_bounds = array<i64: 16, 32>}, {transform_indices = @transform_2, window_bounds = array<i64: 3, 16, 32>}, {transform_indices = @transform_3, window_bounds = array<i64: 3, 16, 32>}, {pipeline_mode = #tpu.pipeline_mode<synchronous>, transform_indices = @transform_4, window_bounds = array<i64: 32, 64>}, {pipeline_mode = #tpu.pipeline_mode<synchronous>, transform_indices = @transform_5, window_bounds = array<i64: 32, 32>}, {pipeline_mode = #tpu.pipeline_mode<synchronous>, transform_indices = @transform_6, window_bounds = array<i64: 32, 32>}, {pipeline_mode = #tpu.pipeline_mode<synchronous>, transform_indices = @transform_7, window_bounds = array<i64: 1, 32>}, {pipeline_mode = #tpu.pipeline_mode<synchronous>, transform_indices = @transform_8, window_bounds = array<i64: 32, 96>}, {pipeline_mode = #tpu.pipeline_mode<synchronous>, transform_indices = @transform_9, window_bounds = array<i64: 1, 96>}, {transform_indices = @transform_10, window_bounds = array<i64: 16, 32>}, {transform_indices = @transform_11, window_bounds = array<i64: 3, 16, 32>}]} {
    %c0 = arith.constant 0 : index
    %c0_0 = arith.constant 0 : index
    %0 = vector.load %arg1[%c0, %c0_0] : memref<16x32xf32, #tpu.memory_space<vmem>>, vector<16x32xf32>
    %c0_1 = arith.constant 0 : index
    %c0_2 = arith.constant 0 : index
    %1 = vector.load %arg2[%c0_1, %c0_2] : memref<16x32xf32, #tpu.memory_space<vmem>>, vector<16x32xf32>
    %2 = arith.addf %0, %1 : vector<16x32xf32>
    %c0_3 = arith.constant 0 : index
    %c0_4 = arith.constant 0 : index
    %3 = vector.load %arg5[%c0_3, %c0_4] : memref<32x64xf32, #tpu.memory_space<vmem>>, vector<32x64xf32>
    %cst = arith.constant 0.000000e+00 : f32
    %4 = vector.broadcast %cst : f32 to vector<16x32xf32>
    %cst_5 = arith.constant 0.000000e+00 : f32
    %5 = vector.broadcast %cst_5 : f32 to vector<16x32xf32>
    %c0_6 = arith.constant 0 : index
    %c0_7 = arith.constant 0 : index
    %c0_8 = arith.constant 0 : index
    %6 = vector.load %arg3[%c0_6, %c0_7, %c0_8] : memref<3x16x32xf32, #tpu.memory_space<vmem>>, vector<1x16x32xf32>
    %7 = vector.shape_cast %6 : vector<1x16x32xf32> to vector<16x32xf32>
    %c0_9 = arith.constant 0 : index
    %c0_10 = arith.constant 0 : index
    %c0_11 = arith.constant 0 : index
    %8 = vector.load %arg4[%c0_9, %c0_10, %c0_11] : memref<3x16x32xf32, #tpu.memory_space<vmem>>, vector<1x16x32xf32>
    %9 = vector.shape_cast %8 : vector<1x16x32xf32> to vector<16x32xf32>
    %10 = arith.addf %7, %9 : vector<16x32xf32>
    %cst_12 = arith.constant dense<0.000000e+00> : vector<16x64xf32>
    %11 = tpu.matmul %10, %3, %cst_12 {dimension_numbers = #tpu.dot_dimension_numbers<[1], [0], [0], [1], [0, 0, 1, 1], [], []>} : vector<16x32xf32>, vector<32x64xf32>, vector<16x64xf32> -> vector<16x64xf32>
    %12 = vector.extract_strided_slice %11 {offsets = [0, 0], sizes = [16, 32], strides = [1, 1]} : vector<16x64xf32> to vector<16x32xf32>
    %13 = vector.extract_strided_slice %11 {offsets = [0, 32], sizes = [16, 32], strides = [1, 1]} : vector<16x64xf32> to vector<16x32xf32>
    %14 = arith.mulf %12, %12 : vector<16x32xf32>
    %15 = arith.addf %4, %14 : vector<16x32xf32>
    %16 = arith.mulf %12, %13 : vector<16x32xf32>
    %17 = arith.addf %5, %16 : vector<16x32xf32>
    %c1 = arith.constant 1 : index
    %c0_13 = arith.constant 0 : index
    %c0_14 = arith.constant 0 : index
    %18 = vector.load %arg3[%c1, %c0_13, %c0_14] : memref<3x16x32xf32, #tpu.memory_space<vmem>>, vector<1x16x32xf32>
    %19 = vector.shape_cast %18 : vector<1x16x32xf32> to vector<16x32xf32>
    %c1_15 = arith.constant 1 : index
    %c0_16 = arith.constant 0 : index
    %c0_17 = arith.constant 0 : index
    %20 = vector.load %arg4[%c1_15, %c0_16, %c0_17] : memref<3x16x32xf32, #tpu.memory_space<vmem>>, vector<1x16x32xf32>
    %21 = vector.shape_cast %20 : vector<1x16x32xf32> to vector<16x32xf32>
    %22 = arith.addf %19, %21 : vector<16x32xf32>
    %cst_18 = arith.constant dense<0.000000e+00> : vector<16x64xf32>
    %23 = tpu.matmul %22, %3, %cst_18 {dimension_numbers = #tpu.dot_dimension_numbers<[1], [0], [0], [1], [0, 0, 1, 1], [], []>} : vector<16x32xf32>, vector<32x64xf32>, vector<16x64xf32> -> vector<16x64xf32>
    %24 = vector.extract_strided_slice %23 {offsets = [0, 0], sizes = [16, 32], strides = [1, 1]} : vector<16x64xf32> to vector<16x32xf32>
    %25 = vector.extract_strided_slice %23 {offsets = [0, 32], sizes = [16, 32], strides = [1, 1]} : vector<16x64xf32> to vector<16x32xf32>
    %26 = arith.mulf %24, %24 : vector<16x32xf32>
    %27 = arith.addf %15, %26 : vector<16x32xf32>
    %28 = arith.mulf %24, %25 : vector<16x32xf32>
    %29 = arith.addf %17, %28 : vector<16x32xf32>
    %c2 = arith.constant 2 : index
    %c0_19 = arith.constant 0 : index
    %c0_20 = arith.constant 0 : index
    %30 = vector.load %arg3[%c2, %c0_19, %c0_20] : memref<3x16x32xf32, #tpu.memory_space<vmem>>, vector<1x16x32xf32>
    %31 = vector.shape_cast %30 : vector<1x16x32xf32> to vector<16x32xf32>
    %c2_21 = arith.constant 2 : index
    %c0_22 = arith.constant 0 : index
    %c0_23 = arith.constant 0 : index
    %32 = vector.load %arg4[%c2_21, %c0_22, %c0_23] : memref<3x16x32xf32, #tpu.memory_space<vmem>>, vector<1x16x32xf32>
    %33 = vector.shape_cast %32 : vector<1x16x32xf32> to vector<16x32xf32>
    %34 = arith.addf %31, %33 : vector<16x32xf32>
    %cst_24 = arith.constant dense<0.000000e+00> : vector<16x64xf32>
    %35 = tpu.matmul %34, %3, %cst_24 {dimension_numbers = #tpu.dot_dimension_numbers<[1], [0], [0], [1], [0, 0, 1, 1], [], []>} : vector<16x32xf32>, vector<32x64xf32>, vector<16x64xf32> -> vector<16x64xf32>
    %36 = vector.extract_strided_slice %35 {offsets = [0, 0], sizes = [16, 32], strides = [1, 1]} : vector<16x64xf32> to vector<16x32xf32>
    %37 = vector.extract_strided_slice %35 {offsets = [0, 32], sizes = [16, 32], strides = [1, 1]} : vector<16x64xf32> to vector<16x32xf32>
    %38 = arith.mulf %36, %36 : vector<16x32xf32>
    %39 = arith.addf %27, %38 : vector<16x32xf32>
    %40 = arith.mulf %36, %37 : vector<16x32xf32>
    %41 = arith.addf %29, %40 : vector<16x32xf32>
    %42 = math.sqrt %39 : vector<16x32xf32>
    %cst_25 = arith.constant 0.176776692 : f32
    %43 = vector.broadcast %cst_25 : f32 to vector<16x32xf32>
    %44 = arith.mulf %41, %43 : vector<16x32xf32>
    %45 = arith.truncf %2 : vector<16x32xf32> to vector<16x32xbf16>
    %c0_26 = arith.constant 0 : index
    %c0_27 = arith.constant 0 : index
    %46 = vector.load %arg6[%c0_26, %c0_27] : memref<32x32xbf16, #tpu.memory_space<vmem>>, vector<32x32xbf16>
    %cst_28 = arith.constant dense<0.000000e+00> : vector<16x32xf32>
    %47 = tpu.matmul %45, %46, %cst_28 {dimension_numbers = #tpu.dot_dimension_numbers<[1], [0], [0], [1], [0, 0, 1, 1], [], []>} : vector<16x32xbf16>, vector<32x32xbf16>, vector<16x32xf32> -> vector<16x32xf32>
    %48 = arith.truncf %42 : vector<16x32xf32> to vector<16x32xbf16>
    %c0_29 = arith.constant 0 : index
    %c0_30 = arith.constant 0 : index
    %49 = vector.load %arg7[%c0_29, %c0_30] : memref<32x32xbf16, #tpu.memory_space<vmem>>, vector<32x32xbf16>
    %cst_31 = arith.constant dense<0.000000e+00> : vector<16x32xf32>
    %50 = tpu.matmul %48, %49, %cst_31 {dimension_numbers = #tpu.dot_dimension_numbers<[1], [0], [0], [1], [0, 0, 1, 1], [], []>} : vector<16x32xbf16>, vector<32x32xbf16>, vector<16x32xf32> -> vector<16x32xf32>
    %51 = arith.addf %47, %50 : vector<16x32xf32>
    %c0_32 = arith.constant 0 : index
    %c0_33 = arith.constant 0 : index
    %52 = vector.load %arg8[%c0_32, %c0_33] : memref<1x32xf32, #tpu.memory_space<vmem>>, vector<1x32xf32>
    %53 = vector.broadcast %52 : vector<1x32xf32> to vector<16x32xf32>
    %54 = arith.addf %51, %53 : vector<16x32xf32>
    %55 = arith.negf %54 : vector<16x32xf32>
    %56 = math.exp %55 : vector<16x32xf32>
    %cst_34 = arith.constant 1.000000e+00 : f32
    %57 = vector.broadcast %cst_34 : f32 to vector<16x32xf32>
    %58 = arith.addf %57, %56 : vector<16x32xf32>
    %59 = arith.divf %57, %58 : vector<16x32xf32>
    %60 = arith.mulf %54, %59 : vector<16x32xf32>
    %61 = arith.truncf %60 : vector<16x32xf32> to vector<16x32xbf16>
    %c0_35 = arith.constant 0 : index
    %c0_36 = arith.constant 0 : index
    %62 = vector.load %arg9[%c0_35, %c0_36] : memref<32x96xbf16, #tpu.memory_space<vmem>>, vector<32x96xbf16>
    %cst_37 = arith.constant dense<0.000000e+00> : vector<16x96xf32>
    %63 = tpu.matmul %61, %62, %cst_37 {dimension_numbers = #tpu.dot_dimension_numbers<[1], [0], [0], [1], [0, 0, 1, 1], [], []>} : vector<16x32xbf16>, vector<32x96xbf16>, vector<16x96xf32> -> vector<16x96xf32>
    %c0_38 = arith.constant 0 : index
    %c0_39 = arith.constant 0 : index
    %64 = vector.load %arg10[%c0_38, %c0_39] : memref<1x96xf32, #tpu.memory_space<vmem>>, vector<1x96xf32>
    %65 = vector.broadcast %64 : vector<1x96xf32> to vector<16x96xf32>
    %66 = arith.addf %63, %65 : vector<16x96xf32>
    %67 = vector.extract_strided_slice %66 {offsets = [0, 0], sizes = [16, 32], strides = [1, 1]} : vector<16x96xf32> to vector<16x32xf32>
    %68 = vector.extract_strided_slice %66 {offsets = [0, 32], sizes = [16, 32], strides = [1, 1]} : vector<16x96xf32> to vector<16x32xf32>
    %69 = arith.addf %67, %68 : vector<16x32xf32>
    %70 = arith.addf %69, %44 : vector<16x32xf32>
    %cst_40 = arith.constant 0.707106769 : f32
    %71 = vector.broadcast %cst_40 : f32 to vector<16x32xf32>
    %72 = arith.mulf %70, %71 : vector<16x32xf32>
    %73 = arith.addf %2, %72 : vector<16x32xf32>
    %c0_41 = arith.constant 0 : index
    %c0_42 = arith.constant 0 : index
    %74 = vector.load %arg11[%c0_41, %c0_42] : memref<16x32xf32, #tpu.memory_space<vmem>>, vector<16x32xf32>
    tpu.vector_store %arg11[%c0_41, %c0_42], %73 {strides = array<i32>} : memref<16x32xf32, #tpu.memory_space<vmem>>, vector<16x32xf32>,
    %75 = vector.extract_strided_slice %66 {offsets = [0, 64], sizes = [16, 32], strides = [1, 1]} : vector<16x96xf32> to vector<16x32xf32>
    %76 = arith.mulf %75, %13 : vector<16x32xf32>
    %77 = arith.addf %10, %76 : vector<16x32xf32>
    %c0_43 = arith.constant 0 : index
    %c0_44 = arith.constant 0 : index
    %c0_45 = arith.constant 0 : index
    %78 = vector.load %arg12[%c0_43, %c0_44, %c0_45] : memref<3x16x32xf32, #tpu.memory_space<vmem>>, vector<1x16x32xf32>
    %79 = vector.shape_cast %78 : vector<1x16x32xf32> to vector<16x32xf32>
    %80 = vector.shape_cast %77 : vector<16x32xf32> to vector<1x16x32xf32>
    tpu.vector_store %arg12[%c0_43, %c0_44, %c0_45], %80 {strides = array<i32>} : memref<3x16x32xf32, #tpu.memory_space<vmem>>, vector<1x16x32xf32>,
    %81 = arith.mulf %75, %25 : vector<16x32xf32>
    %82 = arith.addf %22, %81 : vector<16x32xf32>
    %c1_46 = arith.constant 1 : index
    %c0_47 = arith.constant 0 : index
    %c0_48 = arith.constant 0 : index
    %83 = vector.load %arg12[%c1_46, %c0_47, %c0_48] : memref<3x16x32xf32, #tpu.memory_space<vmem>>, vector<1x16x32xf32>
    %84 = vector.shape_cast %83 : vector<1x16x32xf32> to vector<16x32xf32>
    %85 = vector.shape_cast %82 : vector<16x32xf32> to vector<1x16x32xf32>
    tpu.vector_store %arg12[%c1_46, %c0_47, %c0_48], %85 {strides = array<i32>} : memref<3x16x32xf32, #tpu.memory_space<vmem>>, vector<1x16x32xf32>,
    %86 = arith.mulf %75, %37 : vector<16x32xf32>
    %87 = arith.addf %34, %86 : vector<16x32xf32>
    %c2_49 = arith.constant 2 : index
    %c0_50 = arith.constant 0 : index
    %c0_51 = arith.constant 0 : index
    %88 = vector.load %arg12[%c2_49, %c0_50, %c0_51] : memref<3x16x32xf32, #tpu.memory_space<vmem>>, vector<1x16x32xf32>
    %89 = vector.shape_cast %88 : vector<1x16x32xf32> to vector<16x32xf32>
    %90 = vector.shape_cast %87 : vector<16x32xf32> to vector<1x16x32xf32>
    tpu.vector_store %arg12[%c2_49, %c0_50, %c0_51], %90 {strides = array<i32>} : memref<3x16x32xf32, #tpu.memory_space<vmem>>, vector<1x16x32xf32>,
    return
  }
  func.func @transform_0(%arg0: i32) -> (i32, i32) {
    %c0_i32 = arith.constant 0 : i32
    %c0_i32_0 = arith.constant 0 : i32
    return %arg0, %c0_i32 : i32, i32
  }
  func.func @transform_1(%arg0: i32) -> (i32, i32) {
    %c0_i32 = arith.constant 0 : i32
    %c0_i32_0 = arith.constant 0 : i32
    return %arg0, %c0_i32 : i32, i32
  }
  func.func @transform_2(%arg0: i32) -> (i32, i32, i32) {
    %c0_i32 = arith.constant 0 : i32
    %c0_i32_0 = arith.constant 0 : i32
    %c0_i32_1 = arith.constant 0 : i32
    return %c0_i32, %arg0, %c0_i32_0 : i32, i32, i32
  }
  func.func @transform_3(%arg0: i32) -> (i32, i32, i32) {
    %c0_i32 = arith.constant 0 : i32
    %c0_i32_0 = arith.constant 0 : i32
    %c0_i32_1 = arith.constant 0 : i32
    return %c0_i32, %arg0, %c0_i32_0 : i32, i32, i32
  }
  func.func @transform_4(%arg0: i32) -> (i32, i32) {
    %c0_i32 = arith.constant 0 : i32
    %c0_i32_0 = arith.constant 0 : i32
    %c0_i32_1 = arith.constant 0 : i32
    return %c0_i32, %c0_i32_0 : i32, i32
  }
  func.func @transform_5(%arg0: i32) -> (i32, i32) {
    %c0_i32 = arith.constant 0 : i32
    %c0_i32_0 = arith.constant 0 : i32
    %c0_i32_1 = arith.constant 0 : i32
    return %c0_i32, %c0_i32_0 : i32, i32
  }
  func.func @transform_6(%arg0: i32) -> (i32, i32) {
    %c0_i32 = arith.constant 0 : i32
    %c0_i32_0 = arith.constant 0 : i32
    %c0_i32_1 = arith.constant 0 : i32
    return %c0_i32, %c0_i32_0 : i32, i32
  }
  func.func @transform_7(%arg0: i32) -> (i32, i32) {
    %c0_i32 = arith.constant 0 : i32
    %c0_i32_0 = arith.constant 0 : i32
    %c0_i32_1 = arith.constant 0 : i32
    return %c0_i32, %c0_i32_0 : i32, i32
  }
  func.func @transform_8(%arg0: i32) -> (i32, i32) {
    %c0_i32 = arith.constant 0 : i32
    %c0_i32_0 = arith.constant 0 : i32
    %c0_i32_1 = arith.constant 0 : i32
    return %c0_i32, %c0_i32_0 : i32, i32
  }
  func.func @transform_9(%arg0: i32) -> (i32, i32) {
    %c0_i32 = arith.constant 0 : i32
    %c0_i32_0 = arith.constant 0 : i32
    %c0_i32_1 = arith.constant 0 : i32
    return %c0_i32, %c0_i32_0 : i32, i32
  }
  func.func @transform_10(%arg0: i32) -> (i32, i32) {
    %c0_i32 = arith.constant 0 : i32
    %c0_i32_0 = arith.constant 0 : i32
    return %arg0, %c0_i32 : i32, i32
  }
  func.func @transform_11(%arg0: i32) -> (i32, i32, i32) {
    %c0_i32 = arith.constant 0 : i32
    %c0_i32_0 = arith.constant 0 : i32
    %c0_i32_1 = arith.constant 0 : i32
    return %c0_i32, %arg0, %c0_i32_0 : i32, i32, i32
  }
}

module attributes {stable_mosaic.version = 11 : i64} {
  func.func @_energy_kernel(%arg0: i32, %arg1: memref<16x1xi32, #tpu.memory_space<vmem>>, %arg2: memref<16x32xf32, #tpu.memory_space<vmem>>, %arg3: memref<32x1xf32, #tpu.memory_space<vmem>>, %arg4: memref<1x1xf32, #tpu.memory_space<vmem>>, %arg5: memref<2x1xf32, #tpu.memory_space<vmem>>) attributes {dimension_semantics = [#tpu.dimension_semantics<arbitrary>], iteration_bounds = array<i64: 1>, scalar_prefetch = 0 : i64, scratch_operands = 0 : i64, tpu.core_type = #tpu.core_type<tc>, window_params = [{transform_indices = @transform_0, window_bounds = array<i64: 16, 1>}, {transform_indices = @transform_1, window_bounds = array<i64: 16, 32>}, {pipeline_mode = #tpu.pipeline_mode<synchronous>, transform_indices = @transform_2, window_bounds = array<i64: 32, 1>}, {pipeline_mode = #tpu.pipeline_mode<synchronous>, transform_indices = @transform_3, window_bounds = array<i64: 1, 1>}, {pipeline_mode = #tpu.pipeline_mode<synchronous>, transform_indices = @transform_4, window_bounds = array<i64: 2, 1>}]} {
    %c0_i32 = arith.constant 0 : i32
    %0 = arith.cmpi eq, %arg0, %c0_i32 : i32
    %1 = arith.extui %0 : i1 to i32
    %c0_i32_0 = arith.constant 0 : i32
    %2 = arith.cmpi ne, %1, %c0_i32_0 : i32
    scf.if %2 {
      %cst_13 = arith.constant 0.000000e+00 : f32
      %19 = vector.broadcast %cst_13 : f32 to vector<2x1xf32>
      %c0_14 = arith.constant 0 : index
      %c0_15 = arith.constant 0 : index
      %20 = vector.load %arg5[%c0_14, %c0_15] : memref<2x1xf32, #tpu.memory_space<vmem>>, vector<2x1xf32>
      tpu.vector_store %arg5[%c0_14, %c0_15], %19 {strides = array<i32>} : memref<2x1xf32, #tpu.memory_space<vmem>>, vector<2x1xf32>,
    } else {
    }
    %c0 = arith.constant 0 : index
    %c0_1 = arith.constant 0 : index
    %3 = vector.load %arg2[%c0, %c0_1] : memref<16x32xf32, #tpu.memory_space<vmem>>, vector<16x32xf32>
    %c0_2 = arith.constant 0 : index
    %c0_3 = arith.constant 0 : index
    %4 = vector.load %arg3[%c0_2, %c0_3] : memref<32x1xf32, #tpu.memory_space<vmem>>, vector<32x1xf32>
    %cst = arith.constant dense<0.000000e+00> : vector<16x1xf32>
    %5 = tpu.matmul %3, %4, %cst {dimension_numbers = #tpu.dot_dimension_numbers<[1], [0], [0], [1], [0, 0, 1, 1], [], []>} : vector<16x32xf32>, vector<32x1xf32>, vector<16x1xf32> -> vector<16x1xf32>
    %c0_4 = arith.constant 0 : index
    %c0_5 = arith.constant 0 : index
    %6 = vector.load %arg4[%c0_4, %c0_5] : memref<1x1xf32, #tpu.memory_space<vmem>>, vector<1x1xf32>
    %7 = vector.broadcast %6 : vector<1x1xf32> to vector<16x1xf32>
    %8 = arith.addf %5, %7 : vector<16x1xf32>
    %c0_6 = arith.constant 0 : index
    %c0_7 = arith.constant 0 : index
    %9 = vector.load %arg1[%c0_6, %c0_7] : memref<16x1xi32, #tpu.memory_space<vmem>>, vector<16x1xi32>
    %10 = tpu.iota {dimensions = array<i32: 1>} : vector<16x2xi32>
    %11 = vector.broadcast %9 : vector<16x1xi32> to vector<16x2xi32>
    %12 = arith.cmpi eq, %11, %10 : vector<16x2xi32>
    %13 = arith.extui %12 : vector<16x2xi1> to vector<16x2xi32>
    %14 = arith.sitofp %13 : vector<16x2xi32> to vector<16x2xf32>
    %c0_8 = arith.constant 0 : index
    %c0_9 = arith.constant 0 : index
    %15 = vector.load %arg5[%c0_8, %c0_9] : memref<2x1xf32, #tpu.memory_space<vmem>>, vector<2x1xf32>
    %cst_10 = arith.constant dense<0.000000e+00> : vector<2x1xf32>
    %16 = tpu.matmul %14, %8, %cst_10 {dimension_numbers = #tpu.dot_dimension_numbers<[0], [0], [1], [1], [0, 1, 1, 1], [], []>} : vector<16x2xf32>, vector<16x1xf32>, vector<2x1xf32> -> vector<2x1xf32>
    %17 = arith.addf %15, %16 : vector<2x1xf32>
    %c0_11 = arith.constant 0 : index
    %c0_12 = arith.constant 0 : index
    %18 = vector.load %arg5[%c0_11, %c0_12] : memref<2x1xf32, #tpu.memory_space<vmem>>, vector<2x1xf32>
    tpu.vector_store %arg5[%c0_11, %c0_12], %17 {strides = array<i32>} : memref<2x1xf32, #tpu.memory_space<vmem>>, vector<2x1xf32>,
    return
  }
  func.func @transform_0(%arg0: i32) -> (i32, i32) {
    %c0_i32 = arith.constant 0 : i32
    %c0_i32_0 = arith.constant 0 : i32
    return %arg0, %c0_i32 : i32, i32
  }
  func.func @transform_1(%arg0: i32) -> (i32, i32) {
    %c0_i32 = arith.constant 0 : i32
    %c0_i32_0 = arith.constant 0 : i32
    return %arg0, %c0_i32 : i32, i32
  }
  func.func @transform_2(%arg0: i32) -> (i32, i32) {
    %c0_i32 = arith.constant 0 : i32
    %c0_i32_0 = arith.constant 0 : i32
    %c0_i32_1 = arith.constant 0 : i32
    return %c0_i32, %c0_i32_0 : i32, i32
  }
  func.func @transform_3(%arg0: i32) -> (i32, i32) {
    %c0_i32 = arith.constant 0 : i32
    %c0_i32_0 = arith.constant 0 : i32
    %c0_i32_1 = arith.constant 0 : i32
    return %c0_i32, %c0_i32_0 : i32, i32
  }
  func.func @transform_4(%arg0: i32) -> (i32, i32) {
    %c0_i32 = arith.constant 0 : i32
    %c0_i32_0 = arith.constant 0 : i32
    %c0_i32_1 = arith.constant 0 : i32
    return %c0_i32, %c0_i32_0 : i32, i32
  }
}

</mosaic_0001>

<bundles_post_ra>
// kernel: leftnet_forward.13
= control target key start
LH: loop header
LB: loop body
LE: loop exit
PB: predicated region body
PF: predicated region fallthrough
CT: control target
= control target key end

     0   :  { %v211_v0 = vmov 0   ;;  %v29_v9 = vlaneseq  ;;  %vm75_vm0 = vcmask 130048   ;;  %v212_v13 = vmov 0.0   ;;  %s304_s0 = inlined_call_operand.vmem [shape: s32[24,1], index: 0, kind: input, shape index: {}]   ;;  %s305_s3 = inlined_call_operand.vmem [shape: f32[16,32], index: 3, kind: input, shape index: {}]   ;;  %s306_s1 = inlined_call_operand.vmem [shape: s32[24,1], index: 1, kind: input, shape index: {}]   ;;  %s307_s2 = inlined_call_operand.vmem [shape: f32[24,32], index: 2, kind: input, shape index: {}]   ;;  %s308_s4 = inlined_call_operand.vmem [shape: f32[16,32], index: 4, kind: input, shape index: {}]   ;;  %s309_s5 = inlined_call_operand.vmem [shape: f32[16,32], index: 5, kind: output, shape index: {}]  }
   0x1   :  { %209 = vset.pattern.permute.xlu1 %v211_v0  ;;  %208 = vset.pattern.permute.xlu0 %v211_v0  ;;  %v32_v1 = vld [vmem:[%s304_s0 + $0x8] sm:$0xff]  ;;  %v31_v2 = vld [vmem:[%s304_s0] sm:$0xff]  ;;  %v33_v5 = vld [vmem:[%s304_s0 + $0x10] sm:$0xff]  ;;  %vm26_vm7 = vcmask 261120   ;;  %vm151_vm8 = vcmask 195584  }
   0x2   :  { %38 = vperm.xlu0 %208, %v32_v1   ;;  %35 = vperm.xlu1 %209, %v31_v2   ;;  %v53_v3 = vld [vmem:[%s306_s1 + $0x8] sm:$0xff]  ;;  %v52_v6 = vld [vmem:[%s306_s1] sm:$0xff]  ;;  %v54_v7 = vld [vmem:[%s306_s1 + $0x10] sm:$0xff]  ;;  %v30_v10 = vand.u32 127, %v29_v9 }
   0x3   :  { %210 = vset.pattern.permute.xlu2 %v211_v0  ;;  %v74_v4 = vld [vmem:[%s305_s3 + $0x8] sm:$0xff]  ;;  %v73_v8 = vld [vmem:[%s305_s3] sm:$0xff]  ;;  %v115_v26 = vld [vmem:[%s307_s2 + $0x10] sm:$0xff] }
   0x4   :  { %59 = vperm.xlu2 %210, %v53_v3   ;;  %99 = vmatpush.msra.mxu0 %v74_v4  ;;  %v114_v25 = vld [vmem:[%s307_s2 + $0x8] sm:$0xff]  ;;  %v113_v31 = vld [vmem:[%s307_s2] sm:$0xff] }
   0x5   :  { %201 = vmatpush.msra.mxu2 %v74_v4  ;;  %v24_v33 = vld [vmem:[%s308_s4] sm:$0xff]  ;;  %v25_v36 = vld [vmem:[%s308_s4 + $0x8] sm:$0xff] }
   0x6   :  { %100 = vmatpush.msra.mxu0 %v73_v8  ;;  %27 = vst.msk [vmem:[%s309_s5] sm:$0xff] %vm26_vm7, %v24_v33 }
   0x7   :  { %202 = vmatpush.msra.mxu2 %v73_v8  ;;  %28 = vst.msk [vmem:[%s309_s5 + $0x8] sm:$0xff] %vm26_vm7, %v25_v36 }
   0xa   :  { %41 = vperm.xlu0 %208, %v33_v5   ;;  %56 = vperm.xlu1 %209, %v52_v6  }
   0xc   :  { %62 = vperm.xlu2 %210, %v54_v7  }
   0xd   :  { %v111_v37 = vld [vmem:[%s309_s5] sm:$0xff] }
   0xe   :  { %v112_v40 = vld [vmem:[%s309_s5 + $0x8] sm:$0xff] }
  0x5e   :  { %v60_v18 = vpop.permute.xlu2 %59 }
  0x5f   :  { %vm65_vm5 = vcmp.eq.s32.totalorder %v60_v18, %v30_v10 }
  0x60   :  { %v194_v21 = vsel %vm65_vm5, 1.0, %v212_v13 }
  0x66   :  { %v63_v22 = vpop.permute.xlu2 %62 }
  0x67   :  { %vm66_vm6 = vcmp.eq.s32.totalorder %v63_v22, %v30_v10 }
  0x68   :  { %v195_v23 = vsel %vm66_vm6, 1.0, %v212_v13 }
  0x74   :  { %v39_v11 = vpop.permute.xlu0 %38  ;;  %v36_v12 = vpop.permute.xlu1 %35 }
  0x75   :  { %vm44_vm1 = vcmp.eq.s32.totalorder %v39_v11, %v30_v10  ;;  %vm43_vm2 = vcmp.eq.s32.totalorder %v36_v12, %v30_v10 }
  0x76   :  { %v191_v14 = vsel %vm44_vm1, 1.0, %v212_v13  ;;  %v190_v15 = vsel %vm43_vm2, 1.0, %v212_v13 }
  0x77   :  { %196 = vmatmul.msk.f32.vlgmr.msra.gmra.mxu0 %vm75_vm0, %v190_v15  ;;  %197 = vmatmul.msk.f32.vlgmr.msra.gmra.mxu2 %vm75_vm0, %v191_v14 }
  0x7c   :  { %v42_v16 = vpop.permute.xlu0 %41  ;;  %v57_v17 = vpop.permute.xlu1 %56 }
  0x7d   :  { %vm45_vm3 = vcmp.eq.s32.totalorder %v42_v16, %v30_v10  ;;  %vm64_vm4 = vcmp.eq.s32.totalorder %v57_v17, %v30_v10 }
  0x7e   :  { %v192_v19 = vsel %vm45_vm3, 1.0, %v212_v13  ;;  %v193_v20 = vsel %vm64_vm4, 1.0, %v212_v13 }
  0x7f   :  { %198 = vmatmul.msk.f32.gmra.mxu2 %vm75_vm0, %v192_v19  ;;  %119 = vxpose.xlu0.b32.start [1/3] (short) (narrow) %v193_v20, 16 }
  0x87   :  { %120 = vxpose.xlu0.b32.cont [2/3] (short) (narrow) %v194_v21, 16 }
  0x8f   :  { %121 = vxpose.xlu0.b32.end [3/3] (short) (narrow) %v195_v23, 16 }
  0xf4   :  { %v102_v30 = vpop.f32.mrf.mxu0 }
  0xf5   :  { %v116_v32 = vmul.f32 %v113_v31, %v102_v30 }
  0xfa   :  { %v105_v24 = vpop.f32.mrf.mxu2 }
  0xfb   :  { %v117_v28 = vmul.f32 %v114_v25, %v105_v24 }
 0x102   :  { %v108_v27 = vpop.f32.mrf.mxu2 }
 0x103   :  { %v118_v29 = vmul.f32 %v115_v26, %v108_v27 }
 0x105   :  { %171 = vmatpush.msra.mxu1 %v118_v29  ;;  %203 = vmatpush.msra.mxu3 %v118_v29 }
 0x107   :  { %172 = vmatpush.msra.mxu1 %v117_v28  ;;  %204 = vmatpush.msra.mxu3 %v117_v28 }
 0x109   :  { %173 = vmatpush.msra.mxu1 %v116_v32  ;;  %205 = vmatpush.msra.mxu3 %v116_v32 }
 0x123   :  { %v135_v34 = vpop.trf.xlu0 }
 0x124   :  { %199 = vmatmul.msk.f32.vlgmr.msra.gmra.mxu1 %vm151_vm8, %v135_v34 }
 0x12b   :  { %v136_v35 = vpop.trf.xlu0 }
 0x12c   :  { %200 = vmatmul.msk.f32.vlgmr.msra.gmra.mxu3 %vm151_vm8, %v136_v35 }
 0x1a1   :  { %v175_v38 = vpop.f32.mrf.mxu1 }
 0x1a2   :  { %v181_v39 = vadd.f32 %v175_v38, %v111_v37 }
 0x1a4   :  { %184 = vst.msk [vmem:[%s309_s5] sm:$0xff] %vm26_vm7, %v181_v39 }
 0x1af   :  { %v178_v41 = vpop.f32.mrf.mxu3 }
 0x1b0   :  { %v182_v42 = vadd.f32 %v178_v41, %v112_v40 }
 0x1b2   :  { %185 = vst.msk [vmem:[%s309_s5 + $0x8] sm:$0xff] %vm26_vm7, %v182_v42 }

// kernel: leftnet_forward.14
= control target key start
LH: loop header
LB: loop body
LE: loop exit
PB: predicated region body
PF: predicated region fallthrough
CT: control target
= control target key end

     0   :  { %vm38_vm0 = vcmask 261120   ;;  %s168_s1 = inlined_call_operand.vmem [shape: bf16[32,32], index: 1, kind: input, shape index: {}]   ;;  %s169_s0 = inlined_call_operand.vmem [shape: f32[16,32], index: 0, kind: input, shape index: {}]   ;;  %s170_s2 = inlined_call_operand.vmem [shape: f32[1,32], index: 2, kind: input, shape index: {}]   ;;  %s171_s3 = inlined_call_operand.vmem [shape: f32[16,32], index: 3, kind: output, shape index: {}]  }
   0x1   :  { %v114_v0 = vld [vmem:[%s168_s1 + $0x8] sm:$0xff]  ;;  %v113_v1 = vld [vmem:[%s168_s1] sm:$0xff] }
   0x2   :  { %48 = vmatpush.bf16.msra.mxu0 %v114_v0  ;;  %v15_v2 = vld [vmem:[%s169_s0] sm:$0xff]  ;;  %v16_v3 = vld [vmem:[%s169_s0 + $0x8] sm:$0xff] }
   0x3   :  { %v17_v4 = vpack.c.bf16 %v16_v3, %v15_v2  ;;  %v115_v5 = vld [vmem:[%s170_s2] ss:$0 sm:$0xff] }
   0x6   :  { %49 = vmatpush.bf16.msra.mxu0 %v113_v1 }
   0x9   :  { %110 = vmatmul.msk.bf16.vlgmr.msra.gmra.mxu0 %vm38_vm0, %v17_v4 }
  0x86   :  { %v51_v6 = vpop.f32.mrf.mxu0 }
  0x87   :  { %v52_v7 = vadd.f32 %v115_v5, %v51_v6 }
  0x89   :  { %v111_v8 = vmul.f32 -1.442695, %v52_v7 }
  0x8b   :  { %116 = vpow2.f32 %v111_v8 }
  0x8e   :  { %v53_v9 = vpop.f32.mrf.mxu0 }
  0x8f   :  { %v54_v10 = vadd.f32 %v115_v5, %v53_v9 }
  0x91   :  { %v117_v11 = vpop.eup %116  ;;  %v112_v12 = vmul.f32 -1.442695, %v54_v10 }
  0x92   :  { %v62_v13 = vadd.f32 1.0, %v117_v11 }
  0x93   :  { %118 = vpow2.f32 %v112_v12 }
  0x94   :  { %120 = vrcp.f32 %v62_v13  ;;  %v75_v19 = vand.u32 2147483648, %v62_v13  ;;  %v73_v21 = vand.u32 2147483647, %v62_v13  ;;  %vm69_vm2 = vweird.f32 %v62_v13 }
  0x96   :  { %v76_v24 = vor.u32 1.1754944e-38, %v75_v19  ;;  %vm74_vm4 = vcmp.eq.f32.partialorder %v73_v21, 8.507059e+37 }
  0x99   :  { %v119_v14 = vpop.eup %118 }
  0x9a   :  { %v121_v15 = vpop.eup %120  ;;  %v63_v16 = vadd.f32 1.0, %v119_v14 }
  0x9b   :  { %v65_v17 = vmul.f32 %v121_v15, %v62_v13  ;;  %vm70_vm1 = vweird.f32 %v121_v15 }
  0x9c   :  { %122 = vrcp.f32 %v63_v16  ;;  %vm71_vm3 = vmor %vm69_vm2, %vm70_vm1  ;;  %v90_v30 = vand.u32 2147483648, %v63_v16  ;;  %v88_v32 = vand.u32 2147483647, %v63_v16  ;;  %vm84_vm6 = vweird.f32 %v63_v16 }
  0x9d   :  { %v66_v18 = vsub.f32 1.0, %v65_v17 }
  0x9e   :  { %v91_v34 = vor.u32 1.1754944e-38, %v90_v30  ;;  %vm89_vm8 = vcmp.eq.f32.partialorder %v88_v32, 8.507059e+37 }
  0x9f   :  { %v67_v20 = vmul.f32 %v121_v15, %v66_v18 }
  0xa1   :  { %v68_v22 = vadd.f32 %v121_v15, %v67_v20 }
  0xa2   :  { %v123_v23 = vpop.eup %122 }
  0xa3   :  { %v72_v25 = vsel %vm71_vm3, %v121_v15, %v68_v22  ;;  %v80_v26 = vmul.f32 %v123_v23, %v63_v16  ;;  %vm85_vm5 = vweird.f32 %v123_v23 }
  0xa4   :  { %v77_v27 = vsel %vm74_vm4, %v76_v24, %v72_v25  ;;  %vm86_vm7 = vmor %vm84_vm6, %vm85_vm5 }
  0xa5   :  { %v94_v28 = vmul.f32 %v77_v27, %v52_v7  ;;  %v81_v29 = vsub.f32 1.0, %v80_v26 }
  0xa7   :  { %96 = vst.msk [vmem:[%s171_s3] sm:$0xff] %vm38_vm0, %v94_v28  ;;  %v82_v31 = vmul.f32 %v123_v23, %v81_v29 }
  0xa9   :  { %v83_v33 = vadd.f32 %v123_v23, %v82_v31 }
  0xab   :  { %v87_v35 = vsel %vm86_vm7, %v123_v23, %v83_v33 }
  0xac   :  { %v92_v36 = vsel %vm89_vm8, %v91_v34, %v87_v35 }
  0xad   :  { %v95_v37 = vmul.f32 %v92_v36, %v54_v10 }
  0xaf   :  { %97 = vst.msk [vmem:[%s171_s3 + $0x8] sm:$0xff] %vm38_vm0, %v95_v37 }

// kernel: leftnet_forward.12
= control target key start
LH: loop header
LB: loop body
LE: loop exit
PB: predicated region body
PF: predicated region fallthrough
CT: control target
= control target key end

     0   :  { %v843_v0 = vmov 0   ;;  %v844_v42 = vmov 683565275   ;;  %v845_v44 = vmov 2475754826   ;;  %s1313_s0 = inlined_call_operand.vmem [shape: f32[24,1], index: 0, kind: input, shape index: {}]   ;;  %s1314_s1 = inlined_call_operand.vmem [shape: f32[1,16], index: 1, kind: input, shape index: {}]   ;;  %s1315_s9 = inlined_call_operand.vmem [shape: f32[24,1], index: 9, kind: output, shape index: {2}]   ;;  %s1316_s4 = inlined_call_operand.vmem [shape: f32[1,32], index: 4, kind: input, shape index: {}]   ;;  %s1317_s2 = inlined_call_operand.vmem [shape: f32[1,16], index: 2, kind: input, shape index: {}]   ;;  %s1318_s3 = inlined_call_operand.vmem [shape: bf16[16,32], index: 3, kind: input, shape index: {}]   ;;  %s1319_s7 = inlined_call_operand.vmem [shape: f32[24,16], index: 7, kind: output, shape index: {0}]   ;;  %s1320_s6 = inlined_call_operand.vmem [shape: f32[1,32], index: 6, kind: input, shape index: {}]   ;;  %s1321_s5 = inlined_call_operand.vmem [shape: bf16[32,32], index: 5, kind: input, shape index: {}]   ;;  %s1322_s8 = inlined_call_operand.vmem [shape: f32[24,32], index: 8, kind: output, shape index: {1}]  }
   0x1   :  { %814 = vset.pattern.permute.xlu1 %v843_v0  ;;  %813 = vset.pattern.permute.xlu0 %v843_v0  ;;  %v906_v1 = vld [vmem:[%s1313_s0 + $0x10] sm:$0xff]  ;;  %v911_v2 = vld [vmem:[%s1313_s0 + $0x8] sm:$0xff]  ;;  %v916_v3 = vld [vmem:[%s1313_s0] sm:$0xff]  ;;  %v846_v46 = vmov 2131351028  }
   0x2   :  { %v520_v4 = vsub.f32 0.0, %v906_v1  ;;  %v920_v5 = vmul.f32 0.62831855, %v911_v2  ;;  %v923_v6 = vmul.f32 0.62831855, %v906_v1  ;;  %v518_v7 = vsub.f32 0.0, %v916_v3  ;;  %815 = vset.pattern.permute.xlu2 %v843_v0 }
   0x3   :  { %v928_v8 = vmul.f32 0.62831855, %v916_v3  ;;  %v519_v14 = vsub.f32 0.0, %v911_v2  ;;  %v847_v49 = vmov 2102212464  }
   0x4   :  { %v525_v9 = vmul.f32 1.442695, %v520_v4  ;;  %v193_v10 = vand.u32 2139095040, %v920_v5  ;;  %v347_v11 = vand.u32 2139095040, %v923_v6  ;;  %v521_v12 = vmul.f32 1.442695, %v518_v7 }
   0x5   :  { %v39_v13 = vand.u32 2139095040, %v928_v8  ;;  %v36_v15 = vand.u32 2147483647, %v928_v8  ;;  %v523_v22 = vmul.f32 1.442695, %v519_v14 }
   0x6   :  { %819 = vpow2.f32 %v525_v9  ;;  %v194_v16 = vshrl.u32 %v193_v10, 23  ;;  %v348_v20 = vshrl.u32 %v347_v11, 23  ;;  %v190_v26 = vand.u32 2147483647, %v920_v5 }
   0x7   :  { %821 = vpow2.f32 %v521_v12  ;;  %v40_v17 = vshrl.u32 %v39_v13, 23  ;;  %v43_v18 = vand.u32 8388607, %v36_v15  ;;  %v848_v51 = vmov 920167782  }
   0x8   :  { %v771_v19 = vadd.s32 4294967169, %v194_v16  ;;  %v774_v28 = vadd.s32 4294967169, %v348_v20  ;;  %823 = vpow2.f32 %v523_v22  ;;  %v944_v34 = vand.u32 8388607, %v190_v26 }
   0x9   :  { %v768_v21 = vadd.s32 4294967169, %v40_v17  ;;  %v44_v23 = vor.u32 8388608, %v43_v18  ;;  %v849_v60 = vmov 1326507024  }
   0xa   :  { %v200_v24 = vadd.s32 1, %v771_v19  ;;  %v946_v35 = vadd.s32 1, %v774_v28  ;;  %v198_v53 = vor.u32 8388608, %v944_v34 }
   0xb   :  { %v46_v25 = vadd.s32 1, %v768_v21  ;;  %v938_v31 = vshll.u32 %v44_v23, 8 }
   0xc   :  { %v820_v27 = vpop.eup %819  ;;  %vm201_vm0 = vcmp.gt.s32.totalorder %v200_v24, 0  ;;  %vm355_vm6 = vcmp.gt.s32.totalorder %v946_v35, 0 }
   0xd   :  { %v822_v29 = vpop.eup %821  ;;  %540 = vperm.xlu1 %814, %v820_v27   ;;  %v202_v30 = vsel %vm201_vm0, %v200_v24, 0  ;;  %vm47_vm1 = vcmp.gt.s32.totalorder %v46_v25, 0  ;;  %v953_v39 = vand.u32 65535, %v938_v31  ;;  %v956_v40 = vshrl.u32 %v938_v31, 16 }
   0xe   :  { %530 = vperm.xlu0 %813, %v822_v29   ;;  %v940_v32 = vand.u32 31, %v202_v30  ;;  %v48_v33 = vsel %vm47_vm1, %v46_v25, 0  ;;  %v948_v37 = vshrl.u32 %v202_v30, 5  ;;  %v824_v48 = vpop.eup %823  ;;  %v1075_v34 = vsel %vm355_vm6, %v946_v35, 0 }
   0xf   :  { %v50_v36 = vand.u32 31, %v48_v33  ;;  %v950_v38 = vshrl.u32 %v48_v33, 5 }
  0x10   :  { %v965_v54 = vsub.s32 32, %v940_v32  ;;  %v207_v58 = vshll.u32 %v844_v42, %v940_v32  ;;  %v210_v62 = vshll.u32 %v845_v44, %v940_v32  ;;  %v213_v14 = vshll.u32 %v846_v46, %v940_v32 }
  0x11   :  { %v51_v41 = vsub.s32 32, %v50_v36  ;;  %v53_v43 = vshll.u32 %v844_v42, %v50_v36  ;;  %v56_v45 = vshll.u32 %v845_v44, %v50_v36  ;;  %v59_v47 = vshll.u32 %v846_v46, %v50_v36 }
  0x12   :  { %v62_v50 = vshll.u32 %v847_v49, %v50_v36  ;;  %v65_v52 = vshll.u32 %v848_v51, %v50_v36  ;;  %vm68_vm2 = vcmp.lt.s32.totalorder %v950_v38, 1  ;;  %vm71_vm3 = vcmp.lt.s32.totalorder %v950_v38, 4 }
  0x13   :  { %v54_v55 = vshrl.u32 %v845_v44, %v51_v41  ;;  %v57_v56 = vshrl.u32 %v846_v46, %v51_v41  ;;  %v60_v57 = vshrl.u32 %v847_v49, %v51_v41  ;;  %v63_v59 = vshrl.u32 %v848_v51, %v51_v41 }
  0x14   :  { %v66_v61 = vshrl.u32 %v849_v60, %v51_v41  ;;  %v52_v9 = vshrl.u32 %v844_v42, %v51_v41  ;;  %vm70_vm4 = vcmp.lt.s32.totalorder %v950_v38, 3  ;;  %vm69_vm5 = vcmp.lt.s32.totalorder %v950_v38, 2 }
  0x15   :  { %v55_v63 = vor.u32 %v54_v55, %v53_v43  ;;  %v58_v4 = vor.u32 %v57_v56, %v56_v45  ;;  %v61_v7 = vor.u32 %v60_v57, %v59_v47  ;;  %v64_v10 = vor.u32 %v63_v59, %v62_v50 }
  0x16   :  { %535 = vperm.xlu0 %813, %v824_v48   ;;  %v67_v11 = vor.u32 %v66_v61, %v65_v52  ;;  %v208_v18 = vshrl.u32 %v845_v44, %v965_v54  ;;  %v211_v19 = vshrl.u32 %v846_v46, %v965_v54  ;;  %v216_v23 = vshll.u32 %v847_v49, %v940_v32 }
  0x17   :  { %v76_v12 = vsel %vm68_vm2, %v55_v63, %v58_v4  ;;  %v80_v13 = vsel %vm68_vm2, %v58_v4, %v61_v7  ;;  %v77_v16 = vsel %vm71_vm3, %v64_v10, 920167782  ;;  %v73_v20 = vsel %vm71_vm3, %v61_v7, 2102212464 }
  0x18   :  { %v81_v17 = vsel %vm71_vm3, %v67_v11, 1326507024  ;;  %v78_v21 = vsel %vm70_vm4, %v61_v7, %v77_v16  ;;  %v72_v24 = vsel %vm68_vm2, %v52_v9, %v55_v63  ;;  %v214_v28 = vshrl.u32 %v847_v49, %v965_v54 }
  0x19   :  { %v82_v22 = vsel %vm70_vm4, %v64_v10, %v81_v17  ;;  %v79_v25 = vsel %vm69_vm5, %v76_v12, %v78_v21  ;;  %v74_v41 = vsel %vm70_vm4, %v58_v4, %v73_v20  ;;  %v1007_v43 = vor.u32 %v208_v18, %v207_v58 }
  0x1a   :  { %v83_v27 = vsel %vm69_vm5, %v80_v13, %v82_v22  ;;  %v109_v33 = vand.u32 65535, %v79_v25  ;;  %v110_v36 = vshrl.u32 %v79_v25, 16  ;;  %v1009_v45 = vor.u32 %v211_v19, %v210_v62 }
  0x1b   :  { %v87_v29 = vand.u32 65535, %v83_v27  ;;  %v88_v30 = vshrl.u32 %v83_v27, 16  ;;  %v1011_v47 = vor.u32 %v214_v28, %v213_v14  ;;  %v217_v55 = vshrl.u32 %v848_v51, %v965_v54 }
  0x1c   :  { %v111_v56 = vmul.u32 %v109_v33, %v953_v39  ;;  %v112_v57 = vmul.u32 %v110_v36, %v953_v39  ;;  %v113_v58 = vmul.u32 %v109_v33, %v956_v40  ;;  %v219_v59 = vshll.u32 %v848_v51, %v940_v32 }
  0x1d   :  { %v89_v48 = vmul.u32 %v87_v29, %v953_v39  ;;  %v90_v50 = vmul.u32 %v88_v30, %v953_v39  ;;  %v91_v52 = vmul.u32 %v87_v29, %v956_v40  ;;  %v92_v61 = vmul.u32 %v88_v30, %v956_v40 }
  0x1e   :  { %v220_v4 = vshrl.u32 %v849_v60, %v965_v54  ;;  %v114_v9 = vmul.u32 %v110_v36, %v956_v40  ;;  %v115_v10 = vshll.u32 %v112_v57, 16  ;;  %v117_v11 = vshll.u32 %v113_v58, 16 }
  0x1f   :  { %v93_v62 = vshll.u32 %v90_v50, 16  ;;  %v95_v63 = vshll.u32 %v91_v52, 16  ;;  %v94_v7 = vshrl.u32 %v90_v50, 16  ;;  %v96_v39 = vshrl.u32 %v91_v52, 16 }
  0x20   :  { %v116_v13 = vshrl.u32 %v112_v57, 16  ;;  %vm119_vm8 = vc.u32 %v111_v56, %v115_v10  ;;  %v121_v14 = vadd.s32 %v115_v10, %v111_v56  ;;  %v218_v16 = vor.u32 %v217_v55, %v216_v23 }
  0x21   :  { %vm97_vm7 = vc.u32 %v89_v48, %v93_v62  ;;  %v99_v12 = vadd.s32 %v93_v62, %v89_v48  ;;  %v120_v18 = vsel %vm119_vm8, 1, %v843_v0  ;;  %vm222_vm10 = vcmp.lt.s32.totalorder %v948_v37, 1 }
  0x22   :  { %v98_v32 = vsel %vm97_vm7, 1, %v843_v0  ;;  %v122_v19 = vadd.s32 %v120_v18, %v114_v9  ;;  %vm123_vm11 = vc.u32 %v121_v14, %v117_v11  ;;  %v221_v20 = vor.u32 %v220_v4, %v219_v59 }
  0x23   :  { %v100_v17 = vadd.s32 %v98_v32, %v92_v61  ;;  %vm101_vm9 = vc.u32 %v99_v12, %v95_v63  ;;  %v124_v22 = vsel %vm123_vm11, 1, %v843_v0  ;;  %vm224_vm12 = vcmp.lt.s32.totalorder %v948_v37, 3 }
  0x24   :  { %v102_v40 = vsel %vm101_vm9, 1, %v843_v0  ;;  %vm225_vm13 = vcmp.lt.s32.totalorder %v948_v37, 4  ;;  %v118_v25 = vshrl.u32 %v113_v58, 16  ;;  %v126_v23 = vadd.s32 %v124_v22, %v122_v19 }
  0x25   :  { %v104_v21 = vadd.s32 %v102_v40, %v100_v17  ;;  %vm223_vm14 = vcmp.lt.s32.totalorder %v948_v37, 2  ;;  %v230_v27 = vsel %vm222_vm10, %v1007_v43, %v1009_v45  ;;  %v1040_v29 = vadd.s32 %v121_v14, %v117_v11 }
  0x26   :  { %v231_v30 = vsel %vm225_vm13, %v218_v16, 920167782  ;;  %v234_v33 = vsel %vm222_vm10, %v1009_v45, %v1011_v47  ;;  %v75_v36 = vsel %vm69_vm5, %v72_v24, %v74_v41  ;;  %v127_v48 = vadd.s32 %v126_v23, %v116_v13 }
  0x27   :  { %v105_v28 = vadd.s32 %v104_v21, %v94_v7  ;;  %v232_v50 = vsel %vm224_vm12, %v1011_v47, %v231_v30  ;;  %v235_v52 = vsel %vm225_vm13, %v221_v20, 1326507024  ;;  %v1063_v38 = vshll.u32 %v198_v53, 8 }
  0x28   :  { %v233_v56 = vsel %vm223_vm14, %v230_v27, %v232_v50  ;;  %v236_v57 = vsel %vm224_vm12, %v218_v16, %v235_v52  ;;  %v128_v24 = vadd.s32 %v127_v48, %v118_v25  ;;  %v129_v61 = vmul.u32 %v938_v31, %v75_v36 }
  0x29   :  { %v1055_v55 = vadd.s32 %v105_v28, %v96_v39  ;;  %v237_v41 = vsel %vm223_vm14, %v234_v33, %v236_v57  ;;  %v263_v58 = vand.u32 65535, %v233_v56  ;;  %v264_v59 = vshrl.u32 %v233_v56, 16 }
  0x2a   :  { %v239_v62 = vand.u32 65535, %v1063_v38  ;;  %v240_v63 = vshrl.u32 %v1063_v38, 16  ;;  %v132_v53 = vadd.s32 1, %v128_v24  ;;  %v241_v4 = vand.u32 65535, %v237_v41 }
  0x2b   :  { %vm131_vm15 = vc.u32 %v1055_v55, %v1040_v29  ;;  %v242_v7 = vshrl.u32 %v237_v41, 16  ;;  %v206_v9 = vshrl.u32 %v844_v42, %v965_v54  ;;  %v227_v16 = vsel %vm225_vm13, %v1011_v47, 2102212464 }
  0x2c   :  { %v265_v10 = vmul.u32 %v263_v58, %v239_v62  ;;  %v266_v31 = vmul.u32 %v264_v59, %v239_v62  ;;  %v267_v11 = vmul.u32 %v263_v58, %v240_v63  ;;  %v133_v39 = vsel %vm131_vm15, %v132_v53, %v128_v24 }
  0x2d   :  { %v243_v12 = vmul.u32 %v241_v4, %v239_v62  ;;  %v244_v13 = vmul.u32 %v242_v7, %v239_v62  ;;  %v245_v32 = vmul.u32 %v241_v4, %v240_v63  ;;  %v134_v14 = vadd.s32 %v133_v39, %v129_v61 }
  0x2e   :  { %v269_v35 = vshll.u32 %v266_v31, 16  ;;  %v246_v17 = vmul.u32 %v242_v7, %v240_v63  ;;  %v268_v19 = vmul.u32 %v264_v59, %v240_v63  ;;  %v358_v20 = vand.u32 31, %v1075_v34 }
  0x2f   :  { %v247_v18 = vshll.u32 %v244_v13, 16  ;;  %v249_v40 = vshll.u32 %v245_v32, 16  ;;  %v135_v54 = vadd.s32 536870912, %v134_v14  ;;  %v226_v21 = vsel %vm222_vm10, %v206_v9, %v1007_v43 }
  0x30   :  { %v271_v22 = vshll.u32 %v267_v11, 16  ;;  %v228_v25 = vsel %vm224_vm12, %v1009_v45, %v227_v16  ;;  %vm273_vm1 = vc.u32 %v265_v10, %v269_v35  ;;  %v275_v30 = vadd.s32 %v269_v35, %v265_v10 }
  0x31   :  { %vm251_vm0 = vc.u32 %v243_v12, %v247_v18  ;;  %v253_v23 = vadd.s32 %v247_v18, %v243_v12  ;;  %v1089_v47 = vshrl.u32 %v135_v54, 30  ;;  %v274_v28 = vsel %vm273_vm1, 1, %v843_v0 }
  0x32   :  { %v252_v27 = vsel %vm251_vm0, 1, %v843_v0  ;;  %v248_v33 = vshrl.u32 %v244_v13, 16  ;;  %v276_v48 = vadd.s32 %v274_v28, %v268_v19  ;;  %v270_v52 = vshrl.u32 %v266_v31, 16 }
  0x33   :  { %v254_v36 = vadd.s32 %v252_v27, %v246_v17  ;;  %vm255_vm2 = vc.u32 %v253_v23, %v249_v40  ;;  %v137_v43 = vshll.u32 %v1089_v47, 30  ;;  %vm277_vm3 = vc.u32 %v275_v30, %v271_v22 }
  0x34   :  { %v256_v50 = vsel %vm255_vm2, 1, %v843_v0  ;;  %v1095_v45 = vsub.s32 32, %v358_v20  ;;  %v250_v56 = vshrl.u32 %v245_v32, 16  ;;  %v278_v24 = vsel %vm277_vm3, 1, %v843_v0 }
  0x35   :  { %v258_v57 = vadd.s32 %v256_v50, %v254_v36  ;;  %v138_v41 = vsub.s32 %v134_v14, %v137_v43  ;;  %v229_v58 = vsel %vm223_vm14, %v226_v21, %v228_v25  ;;  %v272_v59 = vshrl.u32 %v267_v11, 16 }
  0x36   :  { %v280_v61 = vadd.s32 %v278_v24, %v276_v48  ;;  %v1100_v63 = vadd.s32 %v275_v30, %v271_v22  ;;  %v283_v9 = vmul.u32 %v1063_v38, %v229_v58  ;;  %v344_v10 = vand.u32 2147483647, %v923_v6 }
  0x37   :  { %v259_v62 = vadd.s32 %v258_v57, %v248_v33  ;;  %vm139_vm4 = vcmp.lt.s32.totalorder %v138_v41, 0  ;;  %v140_v53 = vsub.s32 0, %v138_v41  ;;  %v364_v12 = vshll.u32 %v845_v44, %v358_v20 }
  0x38   :  { %v281_v4 = vadd.s32 %v280_v61, %v270_v52  ;;  %v365_v37 = vshrl.u32 %v846_v46, %v1095_v45  ;;  %v367_v13 = vshll.u32 %v846_v46, %v358_v20  ;;  %v368_v32 = vshrl.u32 %v847_v49, %v1095_v45 }
  0x39   :  { %v1102_v7 = vadd.s32 %v259_v62, %v250_v56  ;;  %v141_v31 = vsel %vm139_vm4, %v140_v53, %v138_v41  ;;  %v1115_v38 = vshrl.u32 %v1075_v34, 5  ;;  %v370_v16 = vshll.u32 %v847_v49, %v358_v20 }
  0x3a   :  { %v282_v39 = vadd.s32 %v281_v4, %v272_v59  ;;  %v142_v11 = vclz %v141_v31  ;;  %v371_v35 = vshrl.u32 %v848_v51, %v1095_v45  ;;  %v130_v17 = vadd.s32 %v1040_v29, %v1055_v55 }
  0x3b   :  { %vm285_vm5 = vc.u32 %v1102_v7, %v1100_v63  ;;  %v373_v40 = vshll.u32 %v848_v51, %v358_v20  ;;  %v374_v46 = vshrl.u32 %v849_v60, %v1095_v45  ;;  %v351_v34 = vand.u32 8388607, %v344_v10 }
  0x3c   :  { %v286_v14 = vadd.s32 1, %v282_v39  ;;  %v769_v18 = vadd.s32 4294967294, %v142_v11  ;;  %v361_v54 = vshll.u32 %v844_v42, %v358_v20  ;;  %v362_v49 = vshrl.u32 %v845_v44, %v1095_v45 }
  0x3d   :  { %v1130_v22 = vor.u32 %v365_v37, %v364_v12  ;;  %v1132_v29 = vor.u32 %v368_v32, %v367_v13  ;;  %v372_v51 = vor.u32 %v371_v35, %v370_v16  ;;  %v375_v25 = vor.u32 %v374_v46, %v373_v40 }
  0x3e   :  { %v287_v19 = vsel %vm285_vm5, %v286_v14, %v282_v39  ;;  %vm770_vm6 = vcmp.lt.s32.totalorder %v769_v18, 0  ;;  %vm376_vm7 = vcmp.lt.s32.totalorder %v1115_v38, 1  ;;  %vm379_vm8 = vcmp.lt.s32.totalorder %v1115_v38, 4 }
  0x3f   :  { %v288_v21 = vadd.s32 %v287_v19, %v283_v9  ;;  %v145_v55 = vsel %vm770_vm6, 0, %v769_v18  ;;  %v352_v28 = vor.u32 8388608, %v351_v34  ;;  %v1136_v30 = vor.u32 %v362_v49, %v361_v54 }
  0x40   :  { %v146_v60 = vsub.s32 32, %v145_v55  ;;  %v147_v23 = vshll.u32 %v138_v41, %v145_v55  ;;  %v150_v27 = vsub.s32 4294967266, %v145_v55  ;;  %vm378_vm9 = vcmp.lt.s32.totalorder %v1115_v38, 3 }
  0x41   :  { %v289_v20 = vadd.s32 536870912, %v288_v21  ;;  %vm377_vm10 = vcmp.lt.s32.totalorder %v1115_v38, 2  ;;  %v385_v48 = vsel %vm379_vm8, %v372_v51, 920167782  ;;  %v388_v43 = vsel %vm376_vm7, %v1130_v22, %v1132_v29 }
  0x42   :  { %v148_v44 = vshrl.u32 %v130_v17, %v146_v60  ;;  %v151_v33 = vadd.s32 127, %v150_v27  ;;  %v389_v56 = vsel %vm379_vm8, %v375_v25, 1326507024  ;;  %v384_v24 = vsel %vm376_vm7, %v1136_v30, %v1130_v22 }
  0x43   :  { %v1139_v36 = vshrl.u32 %v289_v20, 30  ;;  %v390_v41 = vsel %vm378_vm9, %v372_v51, %v389_v56  ;;  %v1157_v58 = vshll.u32 %v352_v28, 8  ;;  %v386_v62 = vsel %vm378_vm9, %v1132_v29, %v385_v48 }
  0x44   :  { %v149_v50 = vor.u32 %v148_v44, %v147_v23  ;;  %v152_v52 = vshll.u32 %v151_v33, 23  ;;  %v391_v53 = vsel %vm377_vm10, %v388_v43, %v390_v41  ;;  %v160_v11 = vsub.s32 4, %v1089_v47 }
  0x45   :  { %v291_v57 = vshll.u32 %v1139_v36, 30  ;;  %v393_v9 = vand.u32 65535, %v1157_v58  ;;  %v394_v31 = vshrl.u32 %v1157_v58, 16  ;;  %v395_v12 = vand.u32 65535, %v391_v53 }
  0x46   :  { %v153_v59 = vor.u32 4788187, %v152_v52  ;;  %v156_v61 = vcvt.s32.f32 %v149_v50  ;;  %v396_v37 = vshrl.u32 %v391_v53, 16  ;;  %v387_v32 = vsel %vm377_vm10, %v384_v24, %v386_v62 }
  0x47   :  { %v292_v4 = vsub.s32 %v288_v21, %v291_v57  ;;  %v397_v16 = vmul.u32 %v395_v12, %v393_v9  ;;  %v1171_v17 = vmul.u32 %v395_v12, %v394_v31  ;;  %vm38_vm12 = vcmp.lt.s32.totalorder %v928_v8, 0 }
  0x48   :  { %v154_v39 = vand.u32 2147483647, %v153_v59  ;;  %v1169_v35 = vmul.u32 %v396_v37, %v393_v9  ;;  %vm1176_vm13 = vcmp.le.f32.partialorder %v36_v15, 0.7853982  ;;  %v400_v54 = vmul.u32 %v396_v37, %v394_v31 }
  0x49   :  { %vm293_vm11 = vcmp.lt.s32.totalorder %v292_v4, 0  ;;  %v294_v13 = vsub.s32 0, %v292_v4  ;;  %v403_v49 = vshll.u32 %v1171_v17, 16  ;;  %v418_v21 = vshrl.u32 %v387_v32, 16 }
  0x4a   :  { %v157_v14 = vmul.f32 %v156_v61, %v154_v39  ;;  %v401_v34 = vshll.u32 %v1169_v35, 16  ;;  %v161_v51 = vsel %vm38_vm12, %v160_v11, %v1089_v47  ;;  %v417_v27 = vand.u32 65535, %v387_v32 }
  0x4b   :  { %v295_v18 = vsel %vm293_vm11, %v294_v13, %v292_v4  ;;  %v284_v28 = vadd.s32 %v1100_v63, %v1102_v7  ;;  %v360_v44 = vshrl.u32 %v844_v42, %v1095_v45  ;;  %v420_v48 = vmul.u32 %v418_v21, %v393_v9 }
  0x4c   :  { %v158_v46 = vxor.u32 2147483648, %v157_v14  ;;  %v296_v19 = vclz %v295_v18  ;;  %vm405_vm14 = vc.u32 %v397_v16, %v401_v34  ;;  %v407_v23 = vadd.s32 %v401_v34, %v397_v16 }
  0x4d   :  { %v406_v60 = vsel %vm405_vm14, 1, %v843_v0  ;;  %v419_v41 = vmul.u32 %v417_v27, %v393_v9  ;;  %v421_v59 = vmul.u32 %v417_v27, %v394_v31  ;;  %v163_v63 = vsel %vm1176_vm13, 0, %v161_v51 }
  0x4e   :  { %v159_v55 = vsel %vm38_vm12, %v158_v46, %v157_v14  ;;  %v772_v25 = vadd.s32 4294967294, %v296_v19  ;;  %v408_v47 = vadd.s32 %v406_v60, %v400_v54  ;;  %vm409_vm0 = vc.u32 %v407_v23, %v403_v49 }
  0x4f   :  { %v162_v15 = vsel %vm1176_vm13, %v928_v8, %v159_v55  ;;  %v410_v24 = vsel %vm409_vm0, 1, %v843_v0  ;;  %v402_v45 = vshrl.u32 %v1169_v35, 16  ;;  %v422_v53 = vmul.u32 %v418_v21, %v394_v31 }
  0x50   :  { %v164_v20 = vmul.f32 %v162_v15, %v162_v15  ;;  %vm773_vm15 = vcmp.lt.s32.totalorder %v772_v25, 0  ;;  %v423_v39 = vshll.u32 %v420_v48, 16  ;;  %vm192_vm1 = vcmp.lt.s32.totalorder %v920_v5, 0 }
  0x51   :  { %v299_v33 = vsel %vm773_vm15, 0, %v772_v25  ;;  %v412_v11 = vadd.s32 %v410_v24, %v408_v47  ;;  %vm1198_vm2 = vcmp.le.f32.partialorder %v190_v26, 0.7853982  ;;  %v381_v32 = vsel %vm379_vm8, %v1132_v29, 2102212464 }
  0x52   :  { %v165_v43 = vmul.f32 -0.001358992, %v164_v20  ;;  %v172_v50 = vmul.f32 -0.00019511016, %v164_v20  ;;  %v300_v52 = vsub.s32 32, %v299_v33  ;;  %v301_v56 = vshll.u32 %v292_v4, %v299_v33 }
  0x53   :  { %v304_v57 = vsub.s32 4294967266, %v299_v33  ;;  %v425_v14 = vshll.u32 %v421_v59, 16  ;;  %vm427_vm3 = vc.u32 %v419_v41, %v423_v39  ;;  %v180_v35 = vand.u32 3, %v163_v63 }
  0x54   :  { %v166_v7 = vadd.f32 0.041655596, %v165_v43  ;;  %v173_v61 = vadd.f32 0.008332121, %v172_v50  ;;  %v302_v62 = vshrl.u32 %v284_v28, %v300_v52  ;;  %v428_v18 = vsel %vm427_vm3, 1, %v843_v0 }
  0x55   :  { %v305_v42 = vadd.s32 127, %v304_v57  ;;  %v429_v19 = vadd.s32 %v423_v39, %v419_v41  ;;  %v430_v34 = vadd.s32 %v428_v18, %v422_v53  ;;  %v404_v49 = vshrl.u32 %v1171_v17, 16 }
  0x56   :  { %v167_v12 = vmul.f32 %v166_v7, %v164_v20  ;;  %v174_v37 = vmul.f32 %v173_v61, %v164_v20  ;;  %v303_v4 = vor.u32 %v302_v62, %v301_v56  ;;  %v413_v21 = vadd.s32 %v412_v11, %v402_v45 }
  0x57   :  { %v306_v13 = vshll.u32 %v305_v42, 23  ;;  %v380_v29 = vsel %vm376_vm7, %v360_v44, %v1136_v30  ;;  %v424_v51 = vshrl.u32 %v420_v48, 16  ;;  %vm431_vm4 = vc.u32 %v429_v19, %v425_v14 }
  0x58   :  { %v168_v31 = vadd.f32 -0.4999988, %v167_v12  ;;  %v175_v16 = vadd.f32 -0.16666654, %v174_v37  ;;  %v310_v46 = vcvt.s32.f32 %v303_v4  ;;  %v382_v23 = vsel %vm378_vm9, %v1130_v22, %v381_v32 }
  0x59   :  { %v307_v40 = vor.u32 4788187, %v306_v13  ;;  %v432_v27 = vsel %vm431_vm4, 1, %v843_v0  ;;  %vm185_vm5 = vcmp.eq.s32.totalorder %v180_v35, 2  ;;  %v426_v28 = vshrl.u32 %v421_v59, 16 }
  0x5a   :  { %v169_v26 = vmul.f32 %v168_v31, %v164_v20  ;;  %v176_v54 = vmul.f32 %v175_v16, %v164_v20  ;;  %v434_v17 = vadd.s32 %v432_v27, %v430_v34  ;;  %v1214_v43 = vadd.s32 %v413_v21, %v404_v49 }
  0x5b   :  { %v308_v55 = vand.u32 2147483647, %v307_v40  ;;  %v1216_v50 = vadd.s32 %v429_v19, %v425_v14  ;;  %vm182_vm6 = vcmp.eq.s32.totalorder %v180_v35, 0  ;;  %v383_v44 = vsel %vm377_vm10, %v380_v29, %v382_v23 }
  0x5c   :  { %v170_v25 = vadd.f32 1.0, %v169_v26  ;;  %v177_v60 = vadd.f32 1.0, %v176_v54  ;;  %v435_v48 = vadd.s32 %v434_v17, %v424_v51  ;;  %vm179_vm7 = vweird.f32 %v928_v8 }
  0x5d   :  { %v311_v20 = vmul.f32 %v310_v46, %v308_v55  ;;  %vm181_vm8 = vcmp.lt.s32.totalorder %v180_v35, 2  ;;  %v437_v38 = vmul.u32 %v1157_v58, %v383_v44  ;;  %vm439_vm9 = vc.u32 %v1214_v43, %v1216_v50 }
  0x5e   :  { %v178_v33 = vmul.f32 %v177_v60, %v162_v15  ;;  %v186_v47 = vxor.u32 2147483648, %v170_v25  ;;  %v314_v15 = vsub.s32 4, %v1139_v36  ;;  %v436_v56 = vadd.s32 %v435_v48, %v426_v28 }
  0x5f   :  { %v312_v30 = vxor.u32 2147483648, %v311_v20  ;;  %vm504_vm10 = vcmp.lt.f32.partialorder %v916_v3, 5.0  ;;  %vm586_vm11 = vcmask 7168   ;;  %v850_v53 = vmov 0.0  }
  0x60   :  { %v183_v0 = vxor.u32 2147483648, %v178_v33  ;;  %v187_v22 = vsel %vm185_vm5, %v186_v47, %v178_v33  ;;  %v440_v59 = vadd.s32 1, %v436_v56  ;;  %v315_v45 = vsel %vm192_vm1, %v314_v15, %v1139_v36 }
  0x61   :  { %v313_v52 = vsel %vm192_vm1, %v312_v30, %v311_v20  ;;  %v777_v58 = vsel %vm504_vm10, 1.0, %v850_v53  ;;  %v317_v3 = vsel %vm1198_vm2, 0, %v315_v45  ;;  %vm333_vm0 = vweird.f32 %v920_v5 }
  0x62   :  { %v184_v57 = vsel %vm182_vm6, %v170_v25, %v183_v0  ;;  %v316_v24 = vsel %vm1198_vm2, %v920_v5, %v313_v52  ;;  %v441_v42 = vsel %vm439_vm9, %v440_v59, %v436_v56  ;;  %v334_v35 = vand.u32 3, %v317_v3 }
  0x63   :  { %v188_v8 = vsel %vm181_vm8, %v184_v57, %v187_v22  ;;  %v318_v41 = vmul.f32 %v316_v24, %v316_v24  ;;  %v442_v39 = vadd.s32 %v441_v42, %v437_v38  ;;  %vm505_vm1 = vcmp.lt.f32.partialorder %v911_v2, 5.0 }
  0x64   :  { %v189_v63 = vsel %vm179_vm7, nan, %v188_v8  ;;  %vm339_vm12 = vcmp.eq.s32.totalorder %v334_v35, 2  ;;  %vm336_vm14 = vcmp.eq.s32.totalorder %v334_v35, 0  ;;  %vm335_vm15 = vcmp.lt.s32.totalorder %v334_v35, 2 }
  0x65   :  { %v498_v7 = vadd.f32 1.0, %v189_v63  ;;  %v319_v61 = vmul.f32 -0.001358992, %v318_v41  ;;  %v326_v62 = vmul.f32 -0.00019511016, %v318_v41  ;;  %v443_v11 = vadd.s32 536870912, %v442_v39 }
  0x66   :  { %v438_v20 = vadd.s32 %v1216_v50, %v1214_v43  ;;  %v778_v33 = vsel %vm505_vm1, 1.0, %v850_v53  ;;  %vm346_vm3 = vcmp.lt.s32.totalorder %v923_v6, 0  ;;  %vm1253_vm4 = vcmp.le.f32.partialorder %v344_v10, 0.7853982 }
  0x67   :  { %v501_v12 = vmul.f32 0.5, %v498_v7  ;;  %v320_v37 = vadd.f32 0.041655596, %v319_v61  ;;  %v327_v4 = vadd.f32 0.008332121, %v326_v62  ;;  %v444_v14 = vshrl.u32 %v443_v11, 30 }
  0x68   :  { %vm487_vm8 = vweird.f32 %v923_v6  ;;  %vm506_vm9 = vcmp.lt.f32.partialorder %v906_v1, 5.0  ;;  %v516_v1 = vld [vmem:[%s1317_s2] sm:$0x1]  ;;  %vm582_vm10 = vcmask 130048  }
  0x69   :  { %737 = vperm.xlu0 %813, %v501_v12   ;;  %587 = vst.msk [vmem:[%s1315_s9] sm:$0xff] %vm586_vm11, %v501_v12  ;;  %v321_v13 = vmul.f32 %v320_v37, %v318_v41  ;;  %v328_v32 = vmul.f32 %v327_v4, %v318_v41  ;;  %v513_v36 = vmul.f32 %v777_v58, %v501_v12  ;;  %v445_v18 = vshll.u32 %v444_v14, 30 }
  0x6a   :  { %v468_v8 = vsub.s32 4, %v444_v14 }
  0x6b   :  { %v322_v31 = vadd.f32 -0.4999988, %v321_v13  ;;  %v329_v16 = vadd.f32 -0.16666654, %v328_v32  ;;  %566 = vperm.xlu1 %814, %v513_v36   ;;  %v446_v19 = vsub.s32 %v442_v39, %v445_v18 }
  0x6c   :  { %v469_v61 = vsel %vm346_vm3, %v468_v8, %v444_v14 }
  0x6d   :  { %v323_v40 = vmul.f32 %v322_v31, %v318_v41  ;;  %v330_v46 = vmul.f32 %v329_v16, %v318_v41  ;;  %vm447_vm13 = vcmp.lt.s32.totalorder %v446_v19, 0  ;;  %v448_v54 = vsub.s32 0, %v446_v19 }
  0x6e   :  { %v471_v45 = vsel %vm1253_vm4, 0, %v469_v61  ;;  %v801_v61 = vld [vmem:[%s1321_s5 + $0x8] sm:$0xff] }
  0x6f   :  { %v324_v34 = vadd.f32 1.0, %v323_v40  ;;  %v331_v26 = vadd.f32 1.0, %v330_v46  ;;  %v449_v21 = vsel %vm447_vm13, %v448_v54, %v446_v19  ;;  %v488_v37 = vand.u32 3, %v471_v45  ;;  %803 = vmatpush.bf16.msra.mxu2 %v801_v61  ;;  %723 = vmatpush.bf16.msra.mxu1 %v801_v61 }
  0x70   :  { %v450_v51 = vclz %v449_v21  ;;  %v779_v46 = vsel %vm506_vm9, 1.0, %v850_v53 }
  0x71   :  { %v332_v49 = vmul.f32 %v331_v26, %v316_v24  ;;  %v340_v9 = vxor.u32 2147483648, %v324_v34  ;;  %vm493_vm5 = vcmp.eq.s32.totalorder %v488_v37, 2  ;;  %vm490_vm6 = vcmp.eq.s32.totalorder %v488_v37, 0 }
  0x72   :  { %v775_v60 = vadd.s32 4294967294, %v450_v51  ;;  %vm489_vm7 = vcmp.lt.s32.totalorder %v488_v37, 2 }
  0x73   :  { %v337_v55 = vxor.u32 2147483648, %v332_v49  ;;  %v341_v29 = vsel %vm339_vm12, %v340_v9, %v332_v49  ;;  %v517_v49 = vsub.f32 0.0, %v516_v1 }
  0x74   :  { %vm776_vm2 = vcmp.lt.s32.totalorder %v775_v60, 0 }
  0x75   :  { %v338_v25 = vsel %vm336_vm14, %v324_v34, %v337_v55  ;;  %v453_v17 = vsel %vm776_vm2, 0, %v775_v60  ;;  %v553_v55 = vperm.slane %v517_v49, 0 }
  0x76   :  { %v342_v23 = vsel %vm335_vm15, %v338_v25, %v341_v29  ;;  %v454_v47 = vsub.s32 32, %v453_v17  ;;  %v455_v30 = vshll.u32 %v446_v19, %v453_v17  ;;  %v458_v44 = vsub.s32 4294967266, %v453_v17 }
  0x77   :  { %v343_v27 = vsel %vm333_vm0, nan, %v342_v23 }
  0x78   :  { %v499_v28 = vadd.f32 1.0, %v343_v27  ;;  %v456_v0 = vshrl.u32 %v438_v20, %v454_v47  ;;  %v459_v5 = vadd.s32 127, %v458_v44  ;;  %v799_v20 = vld [vmem:[%s1318_s3] sm:$0xff] }
  0x79   :  { %802 = vmatpush.bf16.msra.mxu3 %v799_v20  ;;  %617 = vmatpush.bf16.msra.mxu0 %v799_v20 }
  0x7a   :  { %v502_v48 = vmul.f32 0.5, %v499_v28  ;;  %v457_v2 = vor.u32 %v456_v0, %v455_v30  ;;  %v460_v43 = vshll.u32 %v459_v5, 23 }
  0x7c   :  { %v514_v22 = vmul.f32 %v778_v33, %v502_v48  ;;  %588 = vst.msk [vmem:[%s1315_s9 + $0x8] sm:$0xff] %vm586_vm11, %v502_v48  ;;  %742 = vperm.xlu1 %814, %v502_v48   ;;  %v461_v50 = vor.u32 4788187, %v460_v43  ;;  %v464_v52 = vcvt.s32.f32 %v457_v2 }
  0x7e   :  { %571 = vperm.xlu2 %815, %v514_v22   ;;  %v462_v15 = vand.u32 2147483647, %v461_v50 }
  0x7f   :  { %v541_v27 = vpop.permute.xlu1 %540 }
  0x80   :  { %v465_v56 = vmul.f32 %v464_v52, %v462_v15  ;;  %v531_v26 = vpop.permute.xlu0 %530 }
  0x82   :  { %v466_v24 = vxor.u32 2147483648, %v465_v56 }
  0x84   :  { %v467_v38 = vsel %vm346_vm3, %v466_v24, %v465_v56  ;;  %v817_v56 = vld [vmem:[%s1316_s4] ss:$0 sm:$0xff]  ;;  %vm710_vm3 = vcmask 261120  }
  0x85   :  { %v470_v41 = vsel %vm1253_vm4, %v923_v6, %v467_v38  ;;  %v816_v6 = vld [vmem:[%s1314_s1] ss:$0 sm:$0xff] }
  0x86   :  { %v472_v59 = vmul.f32 %v470_v41, %v470_v41  ;;  %v546_v9 = vsub.f32 %v531_v26, %v816_v6  ;;  %v548_v47 = vsub.f32 %v541_v27, %v816_v6 }
  0x88   :  { %v473_v63 = vmul.f32 -0.001358992, %v472_v59  ;;  %v480_v7 = vmul.f32 -0.00019511016, %v472_v59  ;;  %v536_v54 = vpop.permute.xlu0 %535  ;;  %v549_v29 = vmul.f32 %v546_v9, %v546_v9  ;;  %v551_v5 = vmul.f32 %v548_v47, %v548_v47 }
  0x89   :  { %v547_v53 = vsub.f32 %v536_v54, %v816_v6 }
  0x8a   :  { %v474_v62 = vadd.f32 0.041655596, %v473_v63  ;;  %v481_v42 = vadd.f32 0.008332121, %v480_v7  ;;  %v555_v25 = vmul.f32 %v553_v55, %v549_v29  ;;  %v557_v22 = vmul.f32 %v553_v55, %v551_v5 }
  0x8b   :  { %v550_v21 = vmul.f32 %v547_v53, %v547_v53 }
  0x8c   :  { %v475_v10 = vmul.f32 %v474_v62, %v472_v59  ;;  %v482_v58 = vmul.f32 %v481_v42, %v472_v59  ;;  %v558_v23 = vmul.f32 1.442695, %v555_v25  ;;  %v562_v2 = vmul.f32 1.442695, %v557_v22 }
  0x8d   :  { %v556_v51 = vmul.f32 %v553_v55, %v550_v21 }
  0x8e   :  { %v476_v39 = vadd.f32 -0.4999988, %v475_v10  ;;  %v483_v12 = vadd.f32 -0.16666654, %v482_v58  ;;  %v800_v10 = vld [vmem:[%s1321_s5] sm:$0xff] }
  0x8f   :  { %v560_v60 = vmul.f32 1.442695, %v556_v51  ;;  %804 = vmatpush.bf16.msra.mxu2 %v800_v10  ;;  %724 = vmatpush.bf16.msra.mxu1 %v800_v10 }
  0x90   :  { %v477_v4 = vmul.f32 %v476_v39, %v472_v59  ;;  %v484_v11 = vmul.f32 %v483_v12, %v472_v59 }
  0x91   :  { %825 = vpow2.f32 %v560_v60 }
  0x92   :  { %v478_v3 = vadd.f32 1.0, %v477_v4  ;;  %v485_v13 = vadd.f32 1.0, %v484_v11  ;;  %827 = vpow2.f32 %v558_v23 }
  0x93   :  { %829 = vpow2.f32 %v562_v2 }
  0x94   :  { %v486_v32 = vmul.f32 %v485_v13, %v470_v41  ;;  %v494_v36 = vxor.u32 2147483648, %v478_v3 }
  0x96   :  { %v491_v14 = vxor.u32 2147483648, %v486_v32  ;;  %v495_v31 = vsel %vm493_vm5, %v494_v36, %v486_v32 }
  0x97   :  { %v826_v28 = vpop.eup %825 }
  0x98   :  { %v492_v16 = vsel %vm490_vm6, %v478_v3, %v491_v14  ;;  %v828_v33 = vpop.eup %827 }
  0x99   :  { %v496_v35 = vsel %vm489_vm7, %v492_v16, %v495_v31  ;;  %v830_v43 = vpop.eup %829 }
  0x9a   :  { %v497_v18 = vsel %vm487_vm8, nan, %v496_v35 }
  0x9b   :  { %v500_v40 = vadd.f32 1.0, %v497_v18 }
  0x9d   :  { %v503_v19 = vmul.f32 0.5, %v500_v40 }
  0x9f   :  { %v515_v34 = vmul.f32 %v779_v46, %v503_v19  ;;  %589 = vst.msk [vmem:[%s1315_s9 + $0x10] sm:$0xff] %vm586_vm11, %v503_v19 }
  0xa1   :  { %576 = vperm.xlu2 %815, %v515_v34  }
  0xa9   :  { %747 = vperm.xlu2 %815, %v503_v19  }
  0xd8   :  { %v572_v17 = vpop.permute.xlu2 %571 }
  0xd9   :  { %v580_v30 = vmul.f32 %v826_v28, %v572_v17 }
  0xdb   :  { %584 = vst.msk [vmem:[%s1319_s7 + $0x8] sm:$0xff] %vm582_vm10, %v580_v30  ;;  %v738_v5 = vpop.permute.xlu0 %737 }
  0xdd   :  { %v567_v44 = vpop.permute.xlu1 %566 }
  0xde   :  { %v579_v48 = vmul.f32 %v828_v33, %v567_v44  ;;  %v818_v44 = vld [vmem:[%s1320_s6] ss:$0 sm:$0xff] }
  0xe0   :  { %583 = vst.msk [vmem:[%s1319_s7] sm:$0xff] %vm582_vm10, %v579_v48  ;;  %v590_v0 = vpack.c.bf16 %v580_v30, %v579_v48 }
  0xe2   :  { %784 = vmatmul.msk.bf16.vlgmr.msra.gmra.mxu0 %vm582_vm10, %v590_v0 }
  0xfb   :  { %v577_v50 = vpop.permute.xlu2 %576 }
  0xfc   :  { %v581_v52 = vmul.f32 %v830_v43, %v577_v50  ;;  %v743_v50 = vpop.permute.xlu1 %742 }
  0xfe   :  { %585 = vst.msk [vmem:[%s1319_s7 + $0x10] sm:$0xff] %vm582_vm10, %v581_v52  ;;  %v591_v15 = vpack.c.bf16 %v581_v52, %v581_v52 }
 0x100   :  { %785 = vmatmul.msk.bf16.vlgmr.msra.gmra.mxu3 %vm582_vm10, %v591_v15 }
 0x15f   :  { %v619_v57 = vpop.f32.mrf.mxu0 }
 0x160   :  { %v620_v24 = vadd.f32 %v817_v56, %v619_v57  ;;  %v748_v57 = vpop.permute.xlu2 %747 }
 0x162   :  { %v786_v38 = vmul.f32 -1.442695, %v620_v24 }
 0x164   :  { %831 = vpow2.f32 %v786_v38 }
 0x167   :  { %v621_v8 = vpop.f32.mrf.mxu0 }
 0x168   :  { %v622_v41 = vadd.f32 %v817_v56, %v621_v8 }
 0x16a   :  { %v832_v59 = vpop.eup %831  ;;  %v787_v63 = vmul.f32 -1.442695, %v622_v41 }
 0x16b   :  { %v637_v7 = vadd.f32 1.0, %v832_v59 }
 0x16c   :  { %833 = vpow2.f32 %v787_v63 }
 0x16d   :  { %835 = vrcp.f32 %v637_v7  ;;  %v651_v14 = vand.u32 2147483648, %v637_v7  ;;  %vm645_vm12 = vweird.f32 %v637_v7  ;;  %v649_v31 = vand.u32 2147483647, %v637_v7 }
 0x16f   :  { %v652_v26 = vor.u32 1.1754944e-38, %v651_v14  ;;  %vm650_vm15 = vcmp.eq.f32.partialorder %v649_v31, 8.507059e+37 }
 0x172   :  { %v834_v62 = vpop.eup %833 }
 0x173   :  { %v836_v42 = vpop.eup %835  ;;  %v638_v45 = vadd.f32 1.0, %v834_v62 }
 0x174   :  { %v641_v58 = vmul.f32 %v836_v42, %v637_v7  ;;  %vm646_vm11 = vweird.f32 %v836_v42 }
 0x175   :  { %837 = vrcp.f32 %v638_v45  ;;  %vm647_vm13 = vmor %vm645_vm12, %vm646_vm11  ;;  %v666_v35 = vand.u32 2147483648, %v638_v45  ;;  %v664_v19 = vand.u32 2147483647, %v638_v45  ;;  %vm660_vm0 = vweird.f32 %v638_v45 }
 0x176   :  { %v642_v37 = vsub.f32 1.0, %v641_v58 }
 0x177   :  { %v667_v1 = vor.u32 1.1754944e-38, %v666_v35  ;;  %vm665_vm2 = vcmp.eq.f32.partialorder %v664_v19, 8.507059e+37 }
 0x178   :  { %v643_v11 = vmul.f32 %v836_v42, %v642_v37 }
 0x17a   :  { %v644_v13 = vadd.f32 %v836_v42, %v643_v11 }
 0x17b   :  { %v838_v3 = vpop.eup %837 }
 0x17c   :  { %v656_v32 = vmul.f32 %v838_v3, %v638_v45  ;;  %v648_v40 = vsel %vm647_vm13, %v836_v42, %v644_v13  ;;  %vm661_vm14 = vweird.f32 %v838_v3 }
 0x17d   :  { %v653_v6 = vsel %vm650_vm15, %v652_v26, %v648_v40  ;;  %vm662_vm1 = vmor %vm660_vm0, %vm661_vm14 }
 0x17e   :  { %v657_v16 = vsub.f32 1.0, %v656_v32  ;;  %v685_v9 = vmul.f32 %v653_v6, %v620_v24 }
 0x180   :  { %v658_v46 = vmul.f32 %v838_v3, %v657_v16 }
 0x182   :  { %v659_v54 = vadd.f32 %v838_v3, %v658_v46 }
 0x183   :  { %v624_v39 = vpop.f32.mrf.mxu3 }
 0x184   :  { %v625_v12 = vadd.f32 %v817_v56, %v624_v39  ;;  %v663_v53 = vsel %vm662_vm1, %v838_v3, %v659_v54 }
 0x185   :  { %v668_v49 = vsel %vm665_vm2, %v667_v1, %v663_v53 }
 0x186   :  { %v788_v4 = vmul.f32 -1.442695, %v625_v12  ;;  %v686_v21 = vmul.f32 %v668_v49, %v622_v41 }
 0x188   :  { %839 = vpow2.f32 %v788_v4  ;;  %v688_v55 = vpack.c.bf16 %v686_v21, %v685_v9 }
 0x18a   :  { %797 = vmatmul.msk.bf16.vlgmr.msra.gmra.mxu1 %vm710_vm3, %v688_v55 }
 0x18b   :  { %v626_v36 = vpop.f32.mrf.mxu3 }
 0x18e   :  { %v840_v18 = vpop.eup %839 }
 0x18f   :  { %v639_v34 = vadd.f32 1.0, %v840_v18 }
 0x191   :  { %841 = vrcp.f32 %v639_v34  ;;  %v681_v60 = vand.u32 2147483648, %v639_v34  ;;  %vm675_vm4 = vweird.f32 %v639_v34  ;;  %v679_v27 = vand.u32 2147483647, %v639_v34 }
 0x193   :  { %v682_v28 = vor.u32 1.1754944e-38, %v681_v60  ;;  %vm680_vm7 = vcmp.eq.f32.partialorder %v679_v27, 8.507059e+37 }
 0x197   :  { %v842_v29 = vpop.eup %841 }
 0x198   :  { %v671_v51 = vmul.f32 %v842_v29, %v639_v34  ;;  %vm676_vm5 = vweird.f32 %v842_v29 }
 0x199   :  { %vm677_vm6 = vmor %vm675_vm4, %vm676_vm5 }
 0x19a   :  { %v672_v25 = vsub.f32 1.0, %v671_v51 }
 0x19c   :  { %v673_v23 = vmul.f32 %v842_v29, %v672_v25 }
 0x19e   :  { %v674_v20 = vadd.f32 %v842_v29, %v673_v23 }
 0x1a0   :  { %v678_v17 = vsel %vm677_vm6, %v842_v29, %v674_v20 }
 0x1a1   :  { %v683_v33 = vsel %vm680_vm7, %v682_v28, %v678_v17 }
 0x1a2   :  { %v687_v47 = vmul.f32 %v683_v33, %v625_v12 }
 0x1a4   :  { %v689_v30 = vpack.c.bf16 %v687_v47, %v687_v47 }
 0x1a6   :  { %798 = vmatmul.msk.bf16.vlgmr.msra.gmra.mxu2 %vm710_vm3, %v689_v30 }
 0x207   :  { %v726_v48 = vpop.f32.mrf.mxu1 }
 0x208   :  { %v727_v0 = vadd.f32 %v818_v44, %v726_v48 }
 0x20a   :  { %v750_v22 = vmul.f32 %v738_v5, %v727_v0 }
 0x20c   :  { %753 = vst.msk [vmem:[%s1322_s8] sm:$0xff] %vm710_vm3, %v750_v22 }
 0x20f   :  { %v728_v2 = vpop.f32.mrf.mxu1 }
 0x210   :  { %v729_v43 = vadd.f32 %v818_v44, %v728_v2 }
 0x212   :  { %v751_v52 = vmul.f32 %v743_v50, %v729_v43 }
 0x214   :  { %754 = vst.msk [vmem:[%s1322_s8 + $0x8] sm:$0xff] %vm710_vm3, %v751_v52 }
 0x229   :  { %v731_v15 = vpop.f32.mrf.mxu2 }
 0x22a   :  { %v732_v56 = vadd.f32 %v818_v44, %v731_v15 }
 0x22c   :  { %v752_v24 = vmul.f32 %v748_v57, %v732_v56 }
 0x22e   :  { %755 = vst.msk [vmem:[%s1322_s8 + $0x10] sm:$0xff] %vm710_vm3, %v752_v24 }
 0x231   :  { %v733_v38 = vpop.f32.mrf.mxu2 }

// kernel: leftnet_forward.15
= control target key start
LH: loop header
LB: loop body
LE: loop exit
PB: predicated region body
PF: predicated region fallthrough
CT: control target
= control target key end

     0   :  { %v351_v0 = vmov 0   ;;  %v31_v18 = vlaneseq  ;;  %vm77_vm0 = vcmask 130048   ;;  %v352_v22 = vmov 0.0   ;;  %s524_s0 = inlined_call_operand.vmem [shape: s32[24,1], index: 0, kind: input, shape index: {}]   ;;  %s525_s1 = inlined_call_operand.vmem [shape: s32[24,1], index: 1, kind: input, shape index: {}]   ;;  %s526_s3 = inlined_call_operand.vmem [shape: f32[3,24,1], index: 3, kind: input, shape index: {}]   ;;  %s527_s4 = inlined_call_operand.vmem [shape: f32[16,32], index: 4, kind: input, shape index: {}]   ;;  %s528_s2 = inlined_call_operand.vmem [shape: f32[24,32], index: 2, kind: input, shape index: {}]   ;;  %s529_s5 = inlined_call_operand.vmem [shape: f32[3,16,32], index: 5, kind: output, shape index: {}]  }
   0x1   :  { %349 = vset.pattern.permute.xlu1 %v351_v0  ;;  %348 = vset.pattern.permute.xlu0 %v351_v0  ;;  %v35_v1 = vld [vmem:[%s524_s0 + $0x10] sm:$0xff]  ;;  %v33_v2 = vld [vmem:[%s524_s0] sm:$0xff]  ;;  %v55_v3 = vld [vmem:[%s525_s1 + $0x8] sm:$0xff]  ;;  %vm24_vm7 = vcmask 261120   ;;  %vm174_vm8 = vcmask 195584  }
   0x2   :  { %43 = vperm.xlu1 %349, %v35_v1   ;;  %37 = vperm.xlu0 %348, %v33_v2   ;;  %v54_v4 = vld [vmem:[%s525_s1] sm:$0xff]  ;;  %v34_v5 = vld [vmem:[%s524_s0 + $0x8] sm:$0xff]  ;;  %v56_v6 = vld [vmem:[%s525_s1 + $0x10] sm:$0xff]  ;;  %v32_v19 = vand.u32 127, %v31_v18  ;;  %25 = vst.msk [vmem:[%s529_s5] sm:$0xff] %vm24_vm7, %v352_v22 }
   0x3   :  { %350 = vset.pattern.permute.xlu2 %v351_v0  ;;  %v339_v7 = vld [vmem:[%s526_s3 + $0x40] sm:$0xff]  ;;  %v330_v8 = vld [vmem:[%s526_s3 + $0x28] sm:$0xff]  ;;  %v328_v10 = vld [vmem:[%s526_s3 + $0x18] sm:$0xff]  ;;  %26 = vst.msk [vmem:[%s529_s5 + $0x8] sm:$0xff] %vm24_vm7, %v352_v22 }
   0x4   :  { %61 = vperm.xlu2 %350, %v55_v3   ;;  %v329_v9 = vld [vmem:[%s526_s3 + $0x20] sm:$0xff]  ;;  %v338_v11 = vld [vmem:[%s526_s3 + $0x38] sm:$0xff]  ;;  %v337_v12 = vld [vmem:[%s526_s3 + $0x30] sm:$0xff]  ;;  %27 = vst.msk [vmem:[%s529_s5 + $0x10] sm:$0xff] %vm24_vm7, %v352_v22 }
   0x5   :  { %v120_v13 = vld [vmem:[%s526_s3 + $0x8] sm:$0xff]  ;;  %v121_v14 = vld [vmem:[%s526_s3 + $0x10] sm:$0xff]  ;;  %v119_v15 = vld [vmem:[%s526_s3] sm:$0xff]  ;;  %28 = vst.msk [vmem:[%s529_s5 + $0x18] sm:$0xff] %vm24_vm7, %v352_v22 }
   0x6   :  { %v76_v16 = vld [vmem:[%s527_s4 + $0x8] sm:$0xff]  ;;  %v75_v17 = vld [vmem:[%s527_s4] sm:$0xff]  ;;  %v115_v42 = vld [vmem:[%s528_s2 + $0x10] sm:$0xff]  ;;  %29 = vst.msk [vmem:[%s529_s5 + $0x20] sm:$0xff] %vm24_vm7, %v352_v22 }
   0x7   :  { %101 = vmatpush.msra.mxu0 %v76_v16  ;;  %v114_v41 = vld [vmem:[%s528_s2 + $0x8] sm:$0xff]  ;;  %v113_v43 = vld [vmem:[%s528_s2] sm:$0xff]  ;;  %30 = vst.msk [vmem:[%s529_s5 + $0x28] sm:$0xff] %vm24_vm7, %v352_v22 }
   0x9   :  { %102 = vmatpush.msra.mxu0 %v75_v17  ;;  %v140_v62 = vld [vmem:[%s529_s5] sm:$0xff] }
   0xa   :  { %58 = vperm.xlu1 %349, %v54_v4   ;;  %40 = vperm.xlu0 %348, %v34_v5   ;;  %v141_v4 = vld [vmem:[%s529_s5 + $0x8] sm:$0xff] }
   0xb   :  { %v331_v1 = vld [vmem:[%s529_s5 + $0x10] sm:$0xff] }
   0xc   :  { %64 = vperm.xlu2 %350, %v56_v6  }
   0xd   :  { %v340_v2 = vld [vmem:[%s529_s5 + $0x20] sm:$0xff] }
  0x12   :  { %277 = vperm.xlu1 %349, %v339_v7   ;;  %225 = vperm.xlu0 %348, %v330_v8  }
  0x14   :  { %220 = vperm.xlu2 %350, %v329_v9  }
  0x1a   :  { %215 = vperm.xlu1 %349, %v328_v10   ;;  %272 = vperm.xlu0 %348, %v338_v11   ;;  %v332_v10 = vld [vmem:[%s529_s5 + $0x18] sm:$0xff]  ;;  %v341_v11 = vld [vmem:[%s529_s5 + $0x28] sm:$0xff] }
  0x1c   :  { %267 = vperm.xlu2 %350, %v337_v12  }
  0x22   :  { %129 = vperm.xlu1 %349, %v120_v13   ;;  %134 = vperm.xlu0 %348, %v121_v14  }
  0x24   :  { %124 = vperm.xlu2 %350, %v119_v15  }
  0x5e   :  { %v62_v28 = vpop.permute.xlu2 %61 }
  0x5f   :  { %vm67_vm4 = vcmp.eq.s32.totalorder %v62_v28, %v32_v19 }
  0x60   :  { %v321_v29 = vsel %vm67_vm4, 1.0, %v352_v22 }
  0x66   :  { %v65_v31 = vpop.permute.xlu2 %64 }
  0x67   :  { %vm68_vm6 = vcmp.eq.s32.totalorder %v65_v31, %v32_v19 }
  0x68   :  { %v322_v32 = vsel %vm68_vm6, 1.0, %v352_v22 }
  0x6e   :  { %v221_v36 = vpop.permute.xlu2 %220 }
  0x74   :  { %v44_v20 = vpop.permute.xlu1 %43  ;;  %v38_v21 = vpop.permute.xlu0 %37 }
  0x75   :  { %vm45_vm1 = vcmp.eq.s32.totalorder %v38_v21, %v32_v19  ;;  %vm47_vm5 = vcmp.eq.s32.totalorder %v44_v20, %v32_v19 }
  0x76   :  { %v317_v23 = vsel %vm45_vm1, 1.0, %v352_v22  ;;  %v319_v30 = vsel %vm47_vm5, 1.0, %v352_v22  ;;  %v268_v40 = vpop.permute.xlu2 %267 }
  0x77   :  { %323 = vmatmul.msk.f32.vlgmr.msra.gmra.mxu0 %vm77_vm0, %v317_v23 }
  0x7c   :  { %v59_v24 = vpop.permute.xlu1 %58  ;;  %v41_v25 = vpop.permute.xlu0 %40 }
  0x7d   :  { %vm66_vm2 = vcmp.eq.s32.totalorder %v59_v24, %v32_v19  ;;  %vm46_vm3 = vcmp.eq.s32.totalorder %v41_v25, %v32_v19 }
  0x7e   :  { %v320_v26 = vsel %vm66_vm2, 1.0, %v352_v22  ;;  %v318_v27 = vsel %vm46_vm3, 1.0, %v352_v22  ;;  %v125_v55 = vpop.permute.xlu2 %124 }
  0x7f   :  { %142 = vxpose.xlu0.b32.start [1/3] (short) (narrow) %v320_v26, 16  ;;  %324 = vmatmul.msk.f32.gmra.mxu0 %vm77_vm0, %v318_v27 }
  0x84   :  { %v226_v33 = vpop.permute.xlu0 %225  ;;  %v278_v34 = vpop.permute.xlu1 %277 }
  0x87   :  { %143 = vxpose.xlu0.b32.cont [2/3] (short) (narrow) %v321_v29, 16  ;;  %325 = vmatmul.msk.f32.gmra.mxu0 %vm77_vm0, %v319_v30 }
  0x8c   :  { %v273_v37 = vpop.permute.xlu0 %272  ;;  %v216_v39 = vpop.permute.xlu1 %215 }
  0x8f   :  { %144 = vxpose.xlu0.b32.end [3/3] (short) (narrow) %v322_v32, 16 }
  0x94   :  { %v135_v47 = vpop.permute.xlu0 %134  ;;  %v130_v52 = vpop.permute.xlu1 %129 }
  0xf4   :  { %v104_v35 = vpop.f32.mrf.mxu0 }
  0xf5   :  { %v116_v48 = vmul.f32 %v113_v43, %v104_v35 }
  0xf7   :  { %v137_v57 = vmul.f32 %v125_v55, %v116_v48  ;;  %v228_v58 = vmul.f32 %v216_v39, %v116_v48  ;;  %v280_v59 = vmul.f32 %v268_v40, %v116_v48 }
  0xfc   :  { %v107_v38 = vpop.f32.mrf.mxu0 }
  0xfd   :  { %v117_v45 = vmul.f32 %v114_v41, %v107_v38 }
  0xff   :  { %v138_v53 = vmul.f32 %v130_v52, %v117_v45  ;;  %v229_v54 = vmul.f32 %v221_v36, %v117_v45  ;;  %v281_v56 = vmul.f32 %v273_v37, %v117_v45 }
 0x104   :  { %v110_v44 = vpop.f32.mrf.mxu0 }
 0x105   :  { %v118_v46 = vmul.f32 %v115_v42, %v110_v44 }
 0x107   :  { %v139_v49 = vmul.f32 %v135_v47, %v118_v46  ;;  %v230_v50 = vmul.f32 %v226_v33, %v118_v46  ;;  %v282_v51 = vmul.f32 %v278_v34, %v118_v46 }
 0x109   :  { %194 = vmatpush.msra.mxu1 %v139_v49  ;;  %247 = vmatpush.msra.mxu2 %v230_v50 }
 0x10a   :  { %299 = vmatpush.msra.mxu3 %v282_v51 }
 0x10b   :  { %195 = vmatpush.msra.mxu1 %v138_v53  ;;  %248 = vmatpush.msra.mxu2 %v229_v54 }
 0x10c   :  { %300 = vmatpush.msra.mxu3 %v281_v56 }
 0x10d   :  { %196 = vmatpush.msra.mxu1 %v137_v57  ;;  %249 = vmatpush.msra.mxu2 %v228_v58 }
 0x10e   :  { %301 = vmatpush.msra.mxu3 %v280_v59 }
 0x123   :  { %v158_v60 = vpop.trf.xlu0 }
 0x124   :  { %326 = vmatmul.msk.f32.vlgmr.msra.gmra.mxu1 %vm174_vm8, %v158_v60  ;;  %333 = vmatmul.msk.f32.vlgmr.msra.gmra.mxu2 %vm174_vm8, %v158_v60 }
 0x125   :  { %342 = vmatmul.msk.f32.vlgmr.msra.gmra.mxu3 %vm174_vm8, %v158_v60 }
 0x12b   :  { %v159_v61 = vpop.trf.xlu0 }
 0x12c   :  { %327 = vmatmul.msk.f32.gmra.mxu1 %vm174_vm8, %v159_v61  ;;  %334 = vmatmul.msk.f32.gmra.mxu2 %vm174_vm8, %v159_v61 }
 0x12d   :  { %343 = vmatmul.msk.f32.gmra.mxu3 %vm174_vm8, %v159_v61 }
 0x1a1   :  { %v198_v63 = vpop.f32.mrf.mxu1 }
 0x1a2   :  { %v204_v0 = vadd.f32 %v198_v63, %v140_v62 }
 0x1a4   :  { %207 = vst.msk [vmem:[%s529_s5] sm:$0xff] %vm24_vm7, %v204_v0 }
 0x1a7   :  { %v251_v3 = vpop.f32.mrf.mxu2 }
 0x1a8   :  { %v257_v5 = vadd.f32 %v331_v1, %v251_v3  ;;  %v303_v6 = vpop.f32.mrf.mxu3 }
 0x1a9   :  { %v309_v7 = vadd.f32 %v340_v2, %v303_v6  ;;  %v201_v8 = vpop.f32.mrf.mxu1 }
 0x1aa   :  { %335 = vst.msk [vmem:[%s529_s5 + $0x10] sm:$0xff] %vm24_vm7, %v257_v5  ;;  %v205_v9 = vadd.f32 %v201_v8, %v141_v4 }
 0x1ab   :  { %344 = vst.msk [vmem:[%s529_s5 + $0x20] sm:$0xff] %vm24_vm7, %v309_v7 }
 0x1ac   :  { %208 = vst.msk [vmem:[%s529_s5 + $0x8] sm:$0xff] %vm24_vm7, %v205_v9 }
 0x1af   :  { %v254_v12 = vpop.f32.mrf.mxu2 }
 0x1b0   :  { %v258_v13 = vadd.f32 %v332_v10, %v254_v12  ;;  %v306_v14 = vpop.f32.mrf.mxu3 }
 0x1b1   :  { %v310_v15 = vadd.f32 %v341_v11, %v306_v14 }
 0x1b2   :  { %336 = vst.msk [vmem:[%s529_s5 + $0x18] sm:$0xff] %vm24_vm7, %v258_v13 }
 0x1b3   :  { %345 = vst.msk [vmem:[%s529_s5 + $0x28] sm:$0xff] %vm24_vm7, %v310_v15 }

// kernel: leftnet_forward.17
= control target key start
LH: loop header
LB: loop body
LE: loop exit
PB: predicated region body
PF: predicated region fallthrough
CT: control target
= control target key end

     0   :  { %vm44_vm0 = vcmask 261120   ;;  %vm140_vm9 = vcmask 785408   ;;  %s243_s1 = inlined_call_operand.vmem [shape: bf16[32,32], index: 1, kind: input, shape index: {}]   ;;  %s244_s0 = inlined_call_operand.vmem [shape: f32[16,32], index: 0, kind: input, shape index: {}]   ;;  %s245_s2 = inlined_call_operand.vmem [shape: f32[1,32], index: 2, kind: input, shape index: {}]   ;;  %s246_s4 = inlined_call_operand.vmem [shape: f32[1,96], index: 4, kind: input, shape index: {}]   ;;  %s247_s3 = inlined_call_operand.vmem [shape: bf16[32,96], index: 3, kind: input, shape index: {}]   ;;  %s248_s5 = inlined_call_operand.vmem [shape: f32[16,96], index: 5, kind: output, shape index: {}]  }
   0x1   :  { %v168_v0 = vld [vmem:[%s243_s1 + $0x8] sm:$0xff]  ;;  %v167_v1 = vld [vmem:[%s243_s1] sm:$0xff] }
   0x2   :  { %54 = vmatpush.bf16.msra.mxu0 %v168_v0  ;;  %v21_v2 = vld [vmem:[%s244_s0] sm:$0xff]  ;;  %v22_v3 = vld [vmem:[%s244_s0 + $0x8] sm:$0xff] }
   0x3   :  { %v23_v4 = vpack.c.bf16 %v22_v3, %v21_v2  ;;  %v171_v5 = vld [vmem:[%s245_s2] ss:$0 sm:$0xff]  ;;  %v170_v8 = vld [vmem:[%s247_s3 + $0x8] sm:$0xff] }
   0x4   :  { %132 = vmatpush.bf16.msra.mxu1 %v170_v8  ;;  %v169_v10 = vld [vmem:[%s247_s3] sm:$0xff] }
   0x5   :  { %v172_v41 = vld [vmem:[%s246_s4] ss:$0 sm:$0xff] }
   0x6   :  { %55 = vmatpush.bf16.msra.mxu0 %v167_v1 }
   0x8   :  { %133 = vmatpush.bf16.msra.mxu1 %v169_v10 }
   0x9   :  { %155 = vmatmul.msk.bf16.vlgmr.msra.gmra.mxu0 %vm44_vm0, %v23_v4 }
  0x86   :  { %v57_v6 = vpop.f32.mrf.mxu0 }
  0x87   :  { %v58_v7 = vadd.f32 %v171_v5, %v57_v6 }
  0x89   :  { %v156_v9 = vmul.f32 -1.442695, %v58_v7 }
  0x8b   :  { %173 = vpow2.f32 %v156_v9 }
  0x8e   :  { %v59_v11 = vpop.f32.mrf.mxu0 }
  0x8f   :  { %v60_v12 = vadd.f32 %v171_v5, %v59_v11 }
  0x91   :  { %v174_v13 = vpop.eup %173  ;;  %v157_v14 = vmul.f32 -1.442695, %v60_v12 }
  0x92   :  { %v68_v15 = vadd.f32 1.0, %v174_v13 }
  0x93   :  { %175 = vpow2.f32 %v157_v14 }
  0x94   :  { %177 = vrcp.f32 %v68_v15  ;;  %v81_v25 = vand.u32 2147483648, %v68_v15  ;;  %vm75_vm2 = vweird.f32 %v68_v15  ;;  %v79_v26 = vand.u32 2147483647, %v68_v15 }
  0x96   :  { %v82_v32 = vor.u32 1.1754944e-38, %v81_v25  ;;  %vm80_vm5 = vcmp.eq.f32.partialorder %v79_v26, 8.507059e+37 }
  0x99   :  { %v176_v16 = vpop.eup %175 }
  0x9a   :  { %v178_v17 = vpop.eup %177  ;;  %v69_v18 = vadd.f32 1.0, %v176_v16 }
  0x9b   :  { %v71_v19 = vmul.f32 %v178_v17, %v68_v15  ;;  %vm76_vm1 = vweird.f32 %v178_v17 }
  0x9c   :  { %179 = vrcp.f32 %v69_v18  ;;  %vm77_vm3 = vmor %vm75_vm2, %vm76_vm1  ;;  %v96_v28 = vand.u32 2147483648, %v69_v18  ;;  %v94_v31 = vand.u32 2147483647, %v69_v18  ;;  %vm90_vm6 = vweird.f32 %v69_v18 }
  0x9d   :  { %v72_v20 = vsub.f32 1.0, %v71_v19 }
  0x9e   :  { %v97_v35 = vor.u32 1.1754944e-38, %v96_v28  ;;  %vm95_vm8 = vcmp.eq.f32.partialorder %v94_v31, 8.507059e+37 }
  0x9f   :  { %v73_v21 = vmul.f32 %v178_v17, %v72_v20 }
  0xa1   :  { %v74_v23 = vadd.f32 %v178_v17, %v73_v21 }
  0xa2   :  { %v180_v22 = vpop.eup %179 }
  0xa3   :  { %v86_v24 = vmul.f32 %v180_v22, %v69_v18  ;;  %v78_v29 = vsel %vm77_vm3, %v178_v17, %v74_v23  ;;  %vm91_vm4 = vweird.f32 %v180_v22 }
  0xa4   :  { %v83_v34 = vsel %vm80_vm5, %v82_v32, %v78_v29  ;;  %vm92_vm7 = vmor %vm90_vm6, %vm91_vm4 }
  0xa5   :  { %v87_v27 = vsub.f32 1.0, %v86_v24  ;;  %v100_v38 = vmul.f32 %v83_v34, %v58_v7 }
  0xa7   :  { %v88_v30 = vmul.f32 %v180_v22, %v87_v27 }
  0xa9   :  { %v89_v33 = vadd.f32 %v180_v22, %v88_v30 }
  0xab   :  { %v93_v36 = vsel %vm92_vm7, %v180_v22, %v89_v33 }
  0xac   :  { %v98_v37 = vsel %vm95_vm8, %v97_v35, %v93_v36 }
  0xad   :  { %v101_v39 = vmul.f32 %v98_v37, %v60_v12 }
  0xaf   :  { %v102_v40 = vpack.c.bf16 %v101_v39, %v100_v38 }
  0xb1   :  { %166 = vmatmul.msk.bf16.vlgmr.msra.gmra.mxu1 %vm44_vm0, %v102_v40 }
 0x12e   :  { %v135_v42 = vpop.f32.mrf.mxu1 }
 0x12f   :  { %v136_v43 = vadd.f32 %v172_v41, %v135_v42 }
 0x131   :  { %141 = vst.msk [vmem:[%s248_s5] sm:$0xff] %vm140_vm9, %v136_v43 }
 0x136   :  { %v137_v44 = vpop.f32.mrf.mxu1 }
 0x137   :  { %v138_v45 = vadd.f32 %v172_v41, %v137_v44 }
 0x139   :  { %142 = vst.msk [vmem:[%s248_s5 + $0x8] sm:$0xff] %vm140_vm9, %v138_v45 }

// kernel: leftnet_forward.19
= control target key start
LH: loop header
LB: loop body
LE: loop exit
PB: predicated region body
PF: predicated region fallthrough
CT: control target
= control target key end

     0   :  { %vm54_vm0 = vcmask 261120   ;;  %s550_s29 = smov 32   ;;  %s552_s27 = smov 64   ;;  %s826_s4 = inlined_call_operand.vmem [shape: f32[32,64], index: 4, kind: input, shape index: {}]   ;;  %s827_s2 = inlined_call_operand.vmem [shape: f32[3,16,32], index: 2, kind: input, shape index: {}]   ;;  %s828_s3 = inlined_call_operand.vmem [shape: f32[3,16,32], index: 3, kind: input, shape index: {}]   ;;  %s829_s5 = inlined_call_operand.vmem [shape: bf16[32,32], index: 5, kind: input, shape index: {}]   ;;  %s830_s6 = inlined_call_operand.vmem [shape: bf16[32,32], index: 6, kind: input, shape index: {}]   ;;  %s831_s0 = inlined_call_operand.vmem [shape: f32[16,32], index: 0, kind: input, shape index: {}]   ;;  %s832_s1 = inlined_call_operand.vmem [shape: f32[16,32], index: 1, kind: input, shape index: {}]   ;;  %s833_s7 = inlined_call_operand.vmem [shape: f32[1,32], index: 7, kind: input, shape index: {}]   ;;  %s834_s9 = inlined_call_operand.vmem [shape: f32[1,96], index: 9, kind: input, shape index: {}]   ;;  %s835_s8 = inlined_call_operand.vmem [shape: bf16[32,96], index: 8, kind: input, shape index: {}]   ;;  %s836_s11 = inlined_call_operand.vmem [shape: f32[3,16,32], index: 11, kind: output, shape index: {1}]   ;;  %s837_s10 = inlined_call_operand.vmem [shape: f32[16,32], index: 10, kind: output, shape index: {0}]  }
   0x1   :  { %v47_v0 = vld [vmem:[%s826_s4 + $0x18] sm:$0xff]  ;;  %v46_v1 = vld [vmem:[%s826_s4 + $0x10] sm:$0xff]  ;;  %v45_v2 = vld [vmem:[%s826_s4 + $0x8] sm:$0xff] }
   0x2   :  { %73 = vmatpush.msra.mxu0 %v47_v0  ;;  %525 = vmatpush.msra.mxu2 %v47_v0  ;;  %v48_v3 = vld [vmem:[%s827_s2] sm:$0xff]  ;;  %v49_v5 = vld [vmem:[%s827_s2 + $0x8] sm:$0xff]  ;;  %v474_v7 = vld [vmem:[%s827_s2 + $0x10] sm:$0xff] }
   0x3   :  { %v50_v4 = vld [vmem:[%s828_s3] sm:$0xff]  ;;  %126 = vmatpush.msra.mxu1 %v47_v0  ;;  %529 = vmatpush.msra.mxu3 %v47_v0  ;;  %v51_v6 = vld [vmem:[%s828_s3 + $0x8] sm:$0xff]  ;;  %v476_v8 = vld [vmem:[%s828_s3 + $0x10] sm:$0xff] }
   0x4   :  { %74 = vmatpush.msra.mxu0 %v46_v1  ;;  %526 = vmatpush.msra.mxu2 %v46_v1  ;;  %v475_v9 = vld [vmem:[%s827_s2 + $0x18] sm:$0xff]  ;;  %v44_v11 = vld [vmem:[%s826_s4] sm:$0xff]  ;;  %v649_v12 = vadd.f32 %v50_v4, %v48_v3  ;;  %v651_v13 = vadd.f32 %v51_v6, %v49_v5  ;;  %v653_v14 = vadd.f32 %v476_v8, %v474_v7  ;;  %v481_v19 = vld [vmem:[%s827_s2 + $0x28] sm:$0xff] }
   0x5   :  { %v477_v10 = vld [vmem:[%s828_s3 + $0x18] sm:$0xff]  ;;  %127 = vmatpush.msra.mxu1 %v46_v1  ;;  %530 = vmatpush.msra.mxu3 %v46_v1  ;;  %v480_v16 = vld [vmem:[%s827_s2 + $0x20] sm:$0xff]  ;;  %v483_v20 = vld [vmem:[%s828_s3 + $0x28] sm:$0xff] }
   0x6   :  { %75 = vmatpush.msra.mxu0 %v45_v2  ;;  %527 = vmatpush.msra.mxu2 %v45_v2  ;;  %v655_v15 = vadd.f32 %v477_v10, %v475_v9  ;;  %v482_v17 = vld [vmem:[%s828_s3 + $0x20] sm:$0xff]  ;;  %v681_v21 = vadd.f32 %v483_v20, %v481_v19  ;;  %v520_v25 = vld [vmem:[%s829_s5 + $0x8] sm:$0xff] }
   0x7   :  { %128 = vmatpush.msra.mxu1 %v45_v2  ;;  %531 = vmatpush.msra.mxu3 %v45_v2  ;;  %v671_v18 = vadd.f32 %v482_v17, %v480_v16  ;;  %v522_v26 = vld [vmem:[%s830_s6 + $0x8] sm:$0xff]  ;;  %v38_v28 = vld [vmem:[%s831_s0] sm:$0xff] }
   0x8   :  { %76 = vmatpush.msra.mxu0 %v44_v11  ;;  %528 = vmatpush.msra.mxu2 %v44_v11  ;;  %v39_v29 = vld [vmem:[%s831_s0 + $0x8] sm:$0xff]  ;;  %v519_v32 = vld [vmem:[%s829_s5] sm:$0xff] }
   0x9   :  { %129 = vmatpush.msra.mxu1 %v44_v11  ;;  %532 = vmatpush.msra.mxu3 %v44_v11  ;;  %v40_v33 = vld [vmem:[%s832_s1] sm:$0xff]  ;;  %v41_v34 = vld [vmem:[%s832_s1 + $0x8] sm:$0xff]  ;;  %s551_s1 = smov 96  }
   0xa   :  { %472 = vmatmul.msk.f32.vlgmr.msra.gmra.mxu0 %vm54_vm0, %v649_v12  ;;  %473 = vmatmul.msk.f32.vlgmr.msra.gmra.mxu2 %vm54_vm0, %v651_v13  ;;  %v521_v35 = vld [vmem:[%s830_s6] sm:$0xff]  ;;  %v729_v36 = vadd.f32 %v40_v33, %v38_v28  ;;  %v731_v37 = vadd.f32 %v41_v34, %v39_v29 }
   0xb   :  { %478 = vmatmul.msk.f32.vlgmr.msra.gmra.mxu1 %vm54_vm0, %v653_v14  ;;  %479 = vmatmul.msk.f32.vlgmr.msra.gmra.mxu3 %vm54_vm0, %v655_v15  ;;  %v536_v7 = vld [vmem:[%s833_s7] ss:$0 sm:$0xff] }
   0xc   :  { %179 = vmatpush.msrb.mxu2 %v47_v0  ;;  %292 = vmatpush.bf16.msrb.mxu0 %v520_v25  ;;  %v232_v38 = vpack.c.bf16 %v731_v37, %v729_v36  ;;  %v523_v20 = vld [vmem:[%s835_s8] sm:$0xff] }
   0xd   :  { %263 = vmatpush.bf16.msrb.mxu3 %v522_v26 }
   0xe   :  { %180 = vmatpush.msrb.mxu2 %v46_v1 }
  0x10   :  { %181 = vmatpush.msrb.mxu2 %v45_v2  ;;  %293 = vmatpush.bf16.msrb.mxu0 %v519_v32 }
  0x11   :  { %264 = vmatpush.bf16.msrb.mxu3 %v521_v35 }
  0x12   :  { %182 = vmatpush.msrb.mxu2 %v44_v11  ;;  %v524_v11 = vld [vmem:[%s835_s8 + $0x8] sm:$0xff] }
  0x13   :  { %484 = vmatmul.msk.f32.vlgmr.msrb.gmra.mxu2 %vm54_vm0, %v671_v18  ;;  %503 = vmatmul.msk.bf16.vlgmr.msrb.gmra.mxu0 %vm54_vm0, %v232_v38 }
  0x14   :  { %376 = vmatpush.bf16.msrb.mxu1 %v524_v11 }
  0x18   :  { %377 = vmatpush.bf16.msrb.mxu1 %v523_v20 }
  0x1b   :  { %485 = vmatmul.msk.f32.gmra.mxu2 %vm54_vm0, %v681_v21 }
  0x87   :  { %v685_v22 = vpop.f32.mrf.mxu0 }
  0x88   :  { %v687_v23 = vpop.f32.mrf.mxu1  ;;  %402 = vrot.lane.b32.xlu0 %v685_v22, %s550_s29  ;;  %v84_v30 = vmul.f32 %v685_v22, %v685_v22 }
  0x89   :  { %422 = vrot.lane.b32.xlu1 %v687_v23, %s550_s29  ;;  %v137_v31 = vmul.f32 %v687_v23, %v687_v23 }
  0x8b   :  { %v139_v39 = vadd.f32 %v137_v31, %v84_v30 }
  0x8d   :  { %v693_v24 = vpop.f32.mrf.mxu2 }
  0x8e   :  { %v701_v27 = vpop.f32.mrf.mxu3  ;;  %v85_v43 = vmul.f32 %v693_v24, %v693_v24 }
  0x8f   :  { %v138_v44 = vmul.f32 %v701_v27, %v701_v27 }
  0x90   :  { %404 = vrot.lane.b32.xlu0 %v693_v24, %s550_s29  ;;  %v295_v6 = vpop.f32.mrf.mxu0 }
  0x91   :  { %424 = vrot.lane.b32.xlu1 %v701_v27, %s550_s29  ;;  %v140_v46 = vadd.f32 %v138_v44, %v85_v43 }
  0x96   :  { %v735_v40 = vpop.f32.mrf.mxu2 }
  0x97   :  { %v190_v41 = vmul.f32 %v735_v40, %v735_v40  ;;  %443 = vrot.lane.b32.xlu2 %v735_v40, %s550_s29 }
  0x98   :  { %90 = vrot.lane.b32.xlu0 %v685_v22, %s551_s1  ;;  %v297_v17 = vpop.f32.mrf.mxu0 }
  0x99   :  { %v192_v42 = vadd.f32 %v190_v41, %v139_v39  ;;  %92 = vrot.lane.b32.xlu1 %v693_v24, %s551_s1 }
  0x9b   :  { %538 = vrsqrt.f32 %v192_v42  ;;  %vm213_vm1 = vcmp.eq.f32.partialorder %v192_v42, inf  ;;  %v216_v0 = vand.u32 2147483648, %v192_v42  ;;  %vm215_vm3 = vcmp.eq.f32.partialorder %v192_v42, 0.0 }
  0x9e   :  { %v750_v45 = vpop.f32.mrf.mxu2 }
  0x9f   :  { %v191_v47 = vmul.f32 %v750_v45, %v750_v45  ;;  %445 = vrot.lane.b32.xlu2 %v750_v45, %s550_s29 }
  0xa0   :  { %145 = vrot.lane.b32.xlu0 %v701_v27, %s551_s1 }
  0xa1   :  { %v539_v48 = vpop.eup %538  ;;  %v193_v49 = vadd.f32 %v191_v47, %v140_v46  ;;  %196 = vrot.lane.b32.xlu1 %v735_v40, %s551_s1 }
  0xa2   :  { %v207_v50 = vmul.f32 %v539_v48, %v192_v42 }
  0xa3   :  { %540 = vrsqrt.f32 %v193_v49  ;;  %vm225_vm2 = vcmp.eq.f32.partialorder %v193_v49, inf  ;;  %v228_v1 = vand.u32 2147483648, %v193_v49  ;;  %vm227_vm4 = vcmp.eq.f32.partialorder %v193_v49, 0.0 }
  0xa4   :  { %v208_v51 = vmul.f32 %v539_v48, %v207_v50 }
  0xa6   :  { %v209_v52 = vmul.f32 0.5, %v208_v51 }
  0xa7   :  { %143 = vrot.lane.b32.xlu2 %v687_v23, %s551_s1 }
  0xa8   :  { %v210_v53 = vsub.f32 1.5, %v209_v52 }
  0xa9   :  { %v541_v54 = vpop.eup %540 }
  0xaa   :  { %v219_v55 = vmul.f32 %v541_v54, %v193_v49  ;;  %v211_v56 = vmul.f32 %v539_v48, %v210_v53 }
  0xac   :  { %v220_v57 = vmul.f32 %v541_v54, %v219_v55  ;;  %v212_v59 = vmul.f32 %v211_v56, %v192_v42 }
  0xae   :  { %v221_v58 = vmul.f32 0.5, %v220_v57  ;;  %v214_v62 = vsel %vm213_vm1, %v192_v42, %v212_v59 }
  0xaf   :  { %198 = vrot.lane.b32.xlu2 %v750_v45, %s551_s1  ;;  %v217_v3 = vsel %vm215_vm3, %v216_v0, %v214_v62 }
  0xb0   :  { %v222_v60 = vsub.f32 1.5, %v221_v58 }
  0xb2   :  { %v223_v61 = vmul.f32 %v541_v54, %v222_v60  ;;  %v537_v60 = vld [vmem:[%s834_s9] ss:$0 sm:$0xff] }
  0xb4   :  { %v224_v63 = vmul.f32 %v223_v61, %v193_v49 }
  0xb6   :  { %v226_v2 = vsel %vm225_vm2, %v193_v49, %v224_v63 }
  0xb7   :  { %v229_v4 = vsel %vm227_vm4, %v228_v1, %v226_v2 }
  0xb8   :  { %v237_v5 = vpack.c.bf16 %v229_v4, %v217_v3 }
  0xba   :  { %494 = vmatmul.msk.bf16.vlgmr.msrb.gmra.mxu3 %vm54_vm0, %v237_v5 }
  0xf1   :  { %v444_v3 = vpop.permute.xlu2 %443 }
  0xfa   :  { %v403_v61 = vpop.permute.xlu0 %402 }
  0xfb   :  { %v423_v62 = vpop.permute.xlu1 %422 }
 0x13d   :  { %v266_v8 = vpop.f32.mrf.mxu3 }
 0x13e   :  { %v296_v9 = vadd.f32 %v295_v6, %v266_v8  ;;  %v425_v6 = vpop.permute.xlu1 %424 }
 0x140   :  { %v304_v10 = vadd.f32 %v536_v7, %v296_v9 }
 0x142   :  { %v504_v16 = vmul.f32 -1.442695, %v304_v10 }
 0x144   :  { %542 = vpow2.f32 %v504_v16 }
 0x145   :  { %v268_v19 = vpop.f32.mrf.mxu3 }
 0x146   :  { %v298_v25 = vadd.f32 %v297_v17, %v268_v19 }
 0x148   :  { %v305_v26 = vadd.f32 %v536_v7, %v298_v25  ;;  %v405_v7 = vpop.permute.xlu0 %404 }
 0x14a   :  { %v543_v28 = vpop.eup %542  ;;  %v505_v29 = vmul.f32 -1.442695, %v305_v26 }
 0x14b   :  { %v312_v30 = vadd.f32 1.0, %v543_v28 }
 0x14c   :  { %544 = vpow2.f32 %v505_v29 }
 0x14d   :  { %546 = vrcp.f32 %v312_v30  ;;  %v325_v43 = vand.u32 2147483648, %v312_v30  ;;  %vm319_vm6 = vweird.f32 %v312_v30  ;;  %v323_v44 = vand.u32 2147483647, %v312_v30 }
 0x14f   :  { %v326_v51 = vor.u32 1.1754944e-38, %v325_v43  ;;  %vm324_vm9 = vcmp.eq.f32.partialorder %v323_v44, 8.507059e+37 }
 0x150   :  { %v91_v28 = vpop.permute.xlu0 %90 }
 0x152   :  { %v545_v31 = vpop.eup %544 }
 0x153   :  { %v547_v32 = vpop.eup %546  ;;  %v313_v33 = vadd.f32 1.0, %v545_v31 }
 0x154   :  { %v315_v34 = vmul.f32 %v547_v32, %v312_v30  ;;  %vm320_vm5 = vweird.f32 %v547_v32 }
 0x155   :  { %548 = vrcp.f32 %v313_v33  ;;  %vm321_vm7 = vmor %vm319_vm6, %vm320_vm5  ;;  %v340_v47 = vand.u32 2147483648, %v313_v33  ;;  %v338_v50 = vand.u32 2147483647, %v313_v33  ;;  %vm334_vm10 = vweird.f32 %v313_v33 }
 0x156   :  { %v316_v35 = vsub.f32 1.0, %v315_v34 }
 0x157   :  { %v341_v54 = vor.u32 1.1754944e-38, %v340_v47  ;;  %vm339_vm12 = vcmp.eq.f32.partialorder %v338_v50, 8.507059e+37 }
 0x158   :  { %v317_v38 = vmul.f32 %v547_v32, %v316_v35 }
 0x15a   :  { %v318_v41 = vadd.f32 %v547_v32, %v317_v38 }
 0x15b   :  { %v549_v39 = vpop.eup %548 }
 0x15c   :  { %v330_v42 = vmul.f32 %v549_v39, %v313_v33  ;;  %v322_v48 = vsel %vm321_vm7, %v547_v32, %v318_v41  ;;  %vm335_vm8 = vweird.f32 %v549_v39  ;;  %v96_v32 = vmul.f32 %v91_v28, %v685_v22  ;;  %v146_v33 = vpop.permute.xlu0 %145 }
 0x15d   :  { %v327_v53 = vsel %vm324_vm9, %v326_v51, %v322_v48  ;;  %vm336_vm11 = vmor %vm334_vm10, %vm335_vm8 }
 0x15e   :  { %v331_v46 = vsub.f32 1.0, %v330_v42  ;;  %v344_v57 = vmul.f32 %v327_v53, %v304_v10  ;;  %v446_v10 = vpop.permute.xlu2 %445 }
 0x160   :  { %v332_v49 = vmul.f32 %v549_v39, %v331_v46 }
 0x162   :  { %v333_v52 = vadd.f32 %v549_v39, %v332_v49 }
 0x164   :  { %v337_v55 = vsel %vm336_vm11, %v549_v39, %v333_v52  ;;  %v150_v39 = vmul.f32 %v146_v33, %v701_v27 }
 0x165   :  { %v342_v56 = vsel %vm339_vm12, %v341_v54, %v337_v55 }
 0x166   :  { %v345_v58 = vmul.f32 %v342_v56, %v305_v26  ;;  %v144_v17 = vpop.permute.xlu2 %143  ;;  %v93_v26 = vpop.permute.xlu1 %92 }
 0x168   :  { %v346_v59 = vpack.c.bf16 %v345_v58, %v344_v57 }
 0x16a   :  { %514 = vmatmul.msk.bf16.vlgmr.msrb.gmra.mxu1 %vm54_vm0, %v346_v59 }
 0x16e   :  { %v199_v19 = vpop.permute.xlu2 %198  ;;  %v197_v31 = vpop.permute.xlu1 %196 }
 0x16f   :  { %v202_v34 = vmul.f32 %v197_v31, %v735_v40  ;;  %v203_v22 = vmul.f32 %v199_v19, %v750_v45 }
 0x1e7   :  { %v379_v63 = vpop.f32.mrf.mxu1 }
 0x1e8   :  { %v380_v0 = vadd.f32 %v537_v60, %v379_v63 }
 0x1ea   :  { %386 = vrot.lane.b32.xlu0 %v380_v0, %s551_s1  ;;  %v428_v1 = vmul.f32 %v423_v62, %v380_v0  ;;  %v408_v2 = vmul.f32 %v403_v61, %v380_v0  ;;  %v449_v11 = vmul.f32 %v444_v3, %v380_v0 }
 0x1ec   :  { %432 = vrot.lane.b32.xlu1 %v428_v1, %s552_s27  ;;  %412 = vrot.lane.b32.xlu2 %v408_v2, %s552_s27 }
 0x1ef   :  { %v381_v4 = vpop.f32.mrf.mxu1 }
 0x1f0   :  { %v382_v5 = vadd.f32 %v537_v60, %v381_v4 }
 0x1f2   :  { %v409_v8 = vmul.f32 %v405_v7, %v382_v5  ;;  %v429_v9 = vmul.f32 %v425_v6, %v382_v5  ;;  %v450_v16 = vmul.f32 %v446_v10, %v382_v5 }
 0x1f4   :  { %414 = vrot.lane.b32.xlu0 %v409_v8, %s552_s27  ;;  %388 = vrot.lane.b32.xlu1 %v382_v5, %s551_s1 }
 0x1f5   :  { %434 = vrot.lane.b32.xlu2 %v429_v9, %s552_s27 }
 0x1fc   :  { %453 = vrot.lane.b32.xlu0 %v449_v11, %s552_s27  ;;  %455 = vrot.lane.b32.xlu1 %v450_v16, %s552_s27 }
 0x246   :  { %v413_v20 = vpop.permute.xlu2 %412 }
 0x247   :  { %v418_v25 = vadd.f32 %v413_v20, %v649_v12  ;;  %v149_v12 = vmul.f32 %v144_v17, %v687_v23 }
 0x249   :  { %420 = vst.msk [vmem:[%s836_s11] sm:$0xff] %vm54_vm0, %v418_v25  ;;  %v151_v35 = vadd.f32 %v149_v12, %v96_v32 }
 0x24b   :  { %v204_v38 = vadd.f32 %v202_v34, %v151_v35 }
 0x24d   :  { %v230_v42 = vmul.f32 0.17677669, %v204_v38 }
 0x24f   :  { %v435_v29 = vpop.permute.xlu2 %434 }
 0x250   :  { %v439_v30 = vadd.f32 %v435_v29, %v655_v15  ;;  %v97_v15 = vmul.f32 %v93_v26, %v693_v24 }
 0x252   :  { %516 = vst.msk [vmem:[%s836_s11 + $0x18] sm:$0xff] %vm54_vm0, %v439_v30  ;;  %v152_v46 = vadd.f32 %v150_v39, %v97_v15 }
 0x254   :  { %v205_v23 = vadd.f32 %v203_v22, %v152_v46 }
 0x256   :  { %v231_v50 = vmul.f32 0.17677669, %v205_v23 }
 0x25c   :  { %v387_v41 = vpop.permute.xlu0 %386 }
 0x25d   :  { %v392_v43 = vadd.f32 %v387_v41, %v380_v0 }
 0x25e   :  { %v433_v44 = vpop.permute.xlu1 %432 }
 0x25f   :  { %v394_v47 = vadd.f32 %v392_v43, %v230_v42  ;;  %v438_v48 = vadd.f32 %v433_v44, %v653_v14 }
 0x261   :  { %v396_v49 = vmul.f32 0.70710677, %v394_v47  ;;  %515 = vst.msk [vmem:[%s836_s11 + $0x10] sm:$0xff] %vm54_vm0, %v438_v48 }
 0x263   :  { %v398_v27 = vadd.f32 %v396_v49, %v729_v36 }
 0x265   :  { %400 = vst.msk [vmem:[%s837_s10] sm:$0xff] %vm54_vm0, %v398_v27 }
 0x266   :  { %v415_v24 = vpop.permute.xlu0 %414  ;;  %v389_v40 = vpop.permute.xlu1 %388 }
 0x267   :  { %v419_v14 = vadd.f32 %v415_v24, %v651_v13  ;;  %v393_v45 = vadd.f32 %v389_v40, %v382_v5 }
 0x269   :  { %421 = vst.msk [vmem:[%s836_s11 + $0x8] sm:$0xff] %vm54_vm0, %v419_v14  ;;  %v395_v51 = vadd.f32 %v393_v45, %v231_v50 }
 0x26b   :  { %v397_v52 = vmul.f32 0.70710677, %v395_v51 }
 0x26d   :  { %v399_v36 = vadd.f32 %v397_v52, %v731_v37 }
 0x26e   :  { %v454_v53 = vpop.permute.xlu0 %453  ;;  %v456_v54 = vpop.permute.xlu1 %455 }
 0x26f   :  { %401 = vst.msk [vmem:[%s837_s10 + $0x8] sm:$0xff] %vm54_vm0, %v399_v36  ;;  %v459_v13 = vadd.f32 %v454_v53, %v671_v18  ;;  %v460_v55 = vadd.f32 %v456_v54, %v681_v21 }
 0x271   :  { %517 = vst.msk [vmem:[%s836_s11 + $0x20] sm:$0xff] %vm54_vm0, %v459_v13 }
 0x272   :  { %518 = vst.msk [vmem:[%s836_s11 + $0x28] sm:$0xff] %vm54_vm0, %v460_v55 }

// kernel: leftnet_forward.16
= control target key start
LH: loop header
LB: loop body
LE: loop exit
PB: predicated region body
PF: predicated region fallthrough
CT: control target
= control target key end

     0   :  { %s4303_s0 = inlined_call_operand.vmem [shape: s32[24,1], index: 0, kind: input, shape index: {}]   ;;  %s4304_s1 = inlined_call_operand.vmem [shape: s32[24,1], index: 1, kind: input, shape index: {}]   ;;  %s4305_s2 = inlined_call_operand.vmem [shape: f32[3,3,24,1], index: 2, kind: input, shape index: {}]   ;;  %s4306_s3 = inlined_call_operand.vmem [shape: f32[24,1], index: 3, kind: input, shape index: {}]   ;;  %s4307_s4 = inlined_call_operand.vmem [shape: f32[3,16,32], index: 4, kind: input, shape index: {}]   ;;  %s4308_s5 = inlined_call_operand.vmem [shape: f32[3,8], index: 5, kind: input, shape index: {}]   ;;  %s4309_s6 = inlined_call_operand.vmem [shape: f32[8], index: 6, kind: input, shape index: {}]   ;;  %s4310_s7 = inlined_call_operand.vmem [shape: f32[8], index: 7, kind: input, shape index: {}]   ;;  %s4311_s8 = inlined_call_operand.<no memory space> [shape: f32[1], index: 8, kind: input, shape index: {}]   ;;  %s4312_s9 = inlined_call_operand.vmem [shape: f32[24,64], index: 9, kind: output, shape index: {}]  }
   0x1   :  { %4385 = sst [smem:[#allocation58_spill]] %s4311_s8 }
   0x2   :  { %4386 = sst [smem:[#allocation59_spill]] %s4312_s9 }
   0x3   :  { %15 = vsyncpa [#allocation4], 0 }
   0x4   :  { %16 = vsyncpa [#allocation6], 0  ;;  %s41_s11 = sshll.u32 %s4309_s6, 4  ;;  %s32_s14 = sshll.u32 %s4308_s5, 4  ;;  %s42_s11 = int_to_ptr.vmem [resolvable:$true] %s41_s11  ;;  %s33_s14 = int_to_ptr.vmem [resolvable:$true] %s32_s14 }
   0x5   :  { %s2426_s15 = smov [#allocation5]   ;;  %s2427_s16 = smov [#allocation3]  }
   0x6   :  { %44 = dma.vmem_to_smem %s42_s11, 16, %s2426_s15, [#allocation6]  }
   0x7   :  { %35 = dma.vmem_to_smem %s33_s14, 64, %s2427_s16, [#allocation4]  }
   0x8   :  { %s50_s19 = sshll.u32 %s4310_s7, 4  ;;  %s2428_s20 = smov [#allocation7]   ;;  %s51_s19 = int_to_ptr.vmem [resolvable:$true] %s50_s19 }
   0x9   :  { %53 = dma.vmem_to_smem %s51_s19, 16, %s2428_s20, [#allocation6]  }
   0xa   :  { %2422 = dma.done.wait [#allocation4], 64  }
   0xb   :  { %2423 = vsyncadd [#allocation4], 4294967232 }
   0xc   :  { %2424 = dma.done.wait [#allocation6], 32  }
   0xd   :  { %2425 = vsyncadd [#allocation6], 4294967264 }
   0xe   :  { %68 = sfence }
   0xf   :  { %v1185_v0 = vld [vmem:[%s4304_s1 + $0x8] sm:$0xff]  ;;  %v74_v2 = vld [vmem:[%s4303_s0] sm:$0xff]  ;;  %v2429_v3 = vmov 0   ;;  %v1186_v4 = vld [vmem:[%s4304_s1 + $0x10] sm:$0xff]  ;;  %v69_v43 = vlaneseq  ;;  %vm97_vm0 = vcmask 130048   ;;  %v2430_v47 = vmov 0.0  }
  0x10   :  { %v75_v1 = vld [vmem:[%s4303_s0 + $0x8] sm:$0xff]  ;;  %2193 = vset.pattern.permute.xlu2 %v2429_v3  ;;  %2192 = vset.pattern.permute.xlu1 %v2429_v3  ;;  %v76_v5 = vld [vmem:[%s4303_s0 + $0x10] sm:$0xff]  ;;  %v1184_v6 = vld [vmem:[%s4304_s1] sm:$0xff]  ;;  %s2669_s24 = sld [smem:[#allocation3 + $0x80]] }
  0x11   :  { %2191 = vset.pattern.permute.xlu0 %v2429_v3  ;;  %1191 = vperm.xlu2 %2193, %v1185_v0   ;;  %v193_v7 = vld [vmem:[%s4305_s2 + $0x10] sm:$0xff]  ;;  %v191_v8 = vld [vmem:[%s4305_s2] sm:$0xff]  ;;  %v192_v9 = vld [vmem:[%s4305_s2 + $0x8] sm:$0xff]  ;;  %v70_v44 = vand.u32 127, %v69_v43  ;;  %s2671_s7 = sld [smem:[#allocation3 + $0x1]] }
  0x12   :  { %81 = vperm.xlu0 %2191, %v75_v1   ;;  %78 = vperm.xlu1 %2192, %v74_v2   ;;  %v2062_v10 = vld [vmem:[%s4305_s2 + $0x58] sm:$0xff]  ;;  %v2060_v11 = vld [vmem:[%s4305_s2 + $0x48] sm:$0xff]  ;;  %v2061_v12 = vld [vmem:[%s4305_s2 + $0x50] sm:$0xff]  ;;  %s2673_s25 = sld [smem:[#allocation3 + $0x81]] }
  0x13   :  { %v2067_v13 = vld [vmem:[%s4305_s2 + $0x20] sm:$0xff]  ;;  %v2063_v14 = vld [vmem:[%s4305_s2 + $0x90] sm:$0xff]  ;;  %v2066_v15 = vld [vmem:[%s4305_s2 + $0x18] sm:$0xff]  ;;  %s2677_s26 = sld [smem:[#allocation3 + $0x101]] }
  0x14   :  { %v2070_v16 = vld [vmem:[%s4305_s2 + $0x68] sm:$0xff]  ;;  %v2069_v18 = vld [vmem:[%s4305_s2 + $0x60] sm:$0xff]  ;;  %v2073_v19 = vld [vmem:[%s4305_s2 + $0xb0] sm:$0xff]  ;;  %s2679_s27 = sld [smem:[#allocation3 + $0x2]] }
  0x15   :  { %v2068_v17 = vld [vmem:[%s4305_s2 + $0x28] sm:$0xff]  ;;  %v2071_v20 = vld [vmem:[%s4305_s2 + $0x70] sm:$0xff]  ;;  %v2065_v22 = vld [vmem:[%s4305_s2 + $0xa0] sm:$0xff]  ;;  %s2681_s28 = sld [smem:[#allocation3 + $0x82]] }
  0x16   :  { %v2072_v21 = vld [vmem:[%s4305_s2 + $0xa8] sm:$0xff]  ;;  %v2074_v23 = vld [vmem:[%s4305_s2 + $0xb8] sm:$0xff]  ;;  %v2077_v25 = vld [vmem:[%s4305_s2 + $0x40] sm:$0xff]  ;;  %s2683_s29 = sld [smem:[#allocation5]] }
  0x17   :  { %v2064_v24 = vld [vmem:[%s4305_s2 + $0x98] sm:$0xff]  ;;  %v2075_v26 = vld [vmem:[%s4305_s2 + $0x30] sm:$0xff]  ;;  %v2080_v28 = vld [vmem:[%s4305_s2 + $0x88] sm:$0xff]  ;;  %s2687_s30 = sld [smem:[#allocation5 + $0x1]] }
  0x18   :  { %v2076_v27 = vld [vmem:[%s4305_s2 + $0x38] sm:$0xff]  ;;  %v2079_v30 = vld [vmem:[%s4305_s2 + $0x80] sm:$0xff]  ;;  %v96_v31 = vld [vmem:[%s4307_s4 + $0x8] sm:$0xff]  ;;  %s2689_s10 = sld [smem:[#allocation3 + $0x102]] }
  0x19   :  { %1194 = vperm.xlu2 %2193, %v1186_v4   ;;  %v2078_v29 = vld [vmem:[%s4305_s2 + $0x78] sm:$0xff]  ;;  %121 = vmatpush.msra.mxu0 %v96_v31  ;;  %v2083_v33 = vld [vmem:[%s4305_s2 + $0xd0] sm:$0xff]  ;;  %v2081_v34 = vld [vmem:[%s4305_s2 + $0xc0] sm:$0xff]  ;;  %s2691_s11 = sld [smem:[#allocation5 + $0x2]]  ;;  %v2781_v43 = vstv %s2677_s26 }
  0x1a   :  { %84 = vperm.xlu0 %2191, %v76_v5   ;;  %1188 = vperm.xlu1 %2192, %v1184_v6   ;;  %v2051_v32 = vld [vmem:[%s4307_s4 + $0x18] sm:$0xff]  ;;  %v2082_v35 = vld [vmem:[%s4305_s2 + $0xc8] sm:$0xff]  ;;  %v95_v36 = vld [vmem:[%s4307_s4] sm:$0xff]  ;;  %s2695_s12 = sld [smem:[#allocation3 + $0x3]] }
  0x1b   :  { %2181 = vmatpush.msra.mxu2 %v96_v31  ;;  %150 = vmatpush.msra.mxu1 %v2051_v32  ;;  %v2050_v37 = vld [vmem:[%s4307_s4 + $0x10] sm:$0xff]  ;;  %v72_v39 = vld [vmem:[%s4306_s3 + $0x8] sm:$0xff]  ;;  %v71_v40 = vld [vmem:[%s4306_s3] sm:$0xff]  ;;  %s2697_s13 = sld [smem:[#allocation3 + $0x83]] }
  0x1c   :  { %2183 = vmatpush.msra.mxu3 %v2051_v32  ;;  %v73_v38 = vld [vmem:[%s4306_s3 + $0x10] sm:$0xff]  ;;  %122 = vmatpush.msra.mxu0 %v95_v36  ;;  %v2056_v41 = vld [vmem:[%s4307_s4 + $0x28] sm:$0xff]  ;;  %v2055_v42 = vld [vmem:[%s4307_s4 + $0x20] sm:$0xff]  ;;  %s2663_s3 = sld [smem:[#allocation3]] }
  0x1d   :  { %2182 = vmatpush.msra.mxu2 %v95_v36  ;;  %151 = vmatpush.msra.mxu1 %v2050_v37  ;;  %s2665_s4 = sld [smem:[#allocation3 + $0x100]] }
  0x1e   :  { %2184 = vmatpush.msra.mxu3 %v2050_v37  ;;  %1254 = vmatpush.msrb.mxu0 %v2051_v32  ;;  %s2699_s14 = sld [smem:[#allocation3 + $0x103]] }
  0x1f   :  { %1280 = vmatpush.msrb.mxu1 %v2056_v41  ;;  %179 = vmatpush.msrb.mxu2 %v2056_v41  ;;  %s2703_s0 = sld [smem:[#allocation5 + $0x3]] }
  0x20   :  { %1228 = vmatpush.msrb.mxu3 %v96_v31  ;;  %1255 = vmatpush.msrb.mxu0 %v2050_v37  ;;  %s2705_s1 = sld [smem:[#allocation3 + $0x4]] }
  0x21   :  { %206 = vperm.xlu2 %2193, %v193_v7   ;;  %1281 = vmatpush.msrb.mxu1 %v2055_v42  ;;  %s2707_s15 = sld [smem:[#allocation3 + $0x84]] }
  0x22   :  { %196 = vperm.xlu0 %2191, %v191_v8   ;;  %201 = vperm.xlu1 %2192, %v192_v9   ;;  %s2709_s16 = sld [smem:[#allocation3 + $0x104]] }
  0x23   :  { %1229 = vmatpush.msrb.mxu3 %v95_v36  ;;  %180 = vmatpush.msrb.mxu2 %v2055_v42  ;;  %s2716_s17 = sld [smem:[#allocation5 + $0x4]]  ;;  %v2778_v42 = vstv %s2671_s7 }
  0x24   :  { %s2721_s18 = sld [smem:[#allocation3 + $0x5]]  ;;  %4393 = vst [vmem:[#allocation16_spill] sm:$0xff] %v2778_v42 }
  0x25   :  { %s2723_s19 = sld [smem:[#allocation3 + $0x85]] }
  0x26   :  { %s2733_s20 = sld [smem:[#allocation3 + $0x105]] }
  0x27   :  { %s2735_s2 = sld [smem:[#allocation5 + $0x5]] }
  0x28   :  { %s2737_s6 = sld [smem:[#allocation3 + $0x6]] }
  0x29   :  { %228 = vperm.xlu2 %2193, %v2062_v10   ;;  %s2744_s21 = sld [smem:[#allocation3 + $0x86]] }
  0x2a   :  { %218 = vperm.xlu0 %2191, %v2060_v11   ;;  %223 = vperm.xlu1 %2192, %v2061_v12   ;;  %s2749_s5 = sld [smem:[#allocation3 + $0x106]] }
  0x2b   :  { %s2751_s22 = sld [smem:[#allocation5 + $0x6]] }
  0x2c   :  { %s2759_s23 = sld [smem:[#allocation3 + $0x7]] }
  0x2d   :  { %4388 = sst [smem:[#allocation11_spill]] %s2735_s2 }
  0x2e   :  { %s2761_s9 = sld [smem:[#allocation3 + $0x87]] }
  0x2f   :  { %s2763_s8 = sld [smem:[#allocation3 + $0x107]] }
  0x30   :  { %s2775_s2 = sld [smem:[#allocation7]] }
  0x31   :  { %273 = vperm.xlu2 %2193, %v2067_v13   ;;  %4389 = sst [smem:[#allocation12_spill]] %s2751_s22 }
  0x32   :  { %243 = vperm.xlu0 %2191, %v2063_v14   ;;  %268 = vperm.xlu1 %2192, %v2066_v15   ;;  %s2771_s22 = sld [smem:[#allocation5 + $0x7]] }
  0x33   :  { %s4400_s7 = sld [smem:[#allocation11_spill]] }
  0x34   :  { %s2831_s26 = sld [smem:[#allocation7 + $0x4]] }
  0x39   :  { %295 = vperm.xlu2 %2193, %v2070_v16  }
  0x3a   :  { %278 = vperm.xlu0 %2191, %v2068_v17   ;;  %290 = vperm.xlu1 %2192, %v2069_v18  }
  0x41   :  { %320 = vperm.xlu2 %2193, %v2073_v19  }
  0x42   :  { %300 = vperm.xlu0 %2191, %v2071_v20   ;;  %315 = vperm.xlu1 %2192, %v2072_v21  }
  0x49   :  { %253 = vperm.xlu2 %2193, %v2065_v22  }
  0x4a   :  { %325 = vperm.xlu0 %2191, %v2074_v23   ;;  %248 = vperm.xlu1 %2192, %v2064_v24  }
  0x51   :  { %353 = vperm.xlu2 %2193, %v2077_v25  }
  0x52   :  { %343 = vperm.xlu0 %2191, %v2075_v26   ;;  %348 = vperm.xlu1 %2192, %v2076_v27  }
  0x59   :  { %375 = vperm.xlu2 %2193, %v2080_v28  }
  0x5a   :  { %365 = vperm.xlu0 %2191, %v2078_v29   ;;  %370 = vperm.xlu1 %2192, %v2079_v30  }
  0x61   :  { %400 = vperm.xlu2 %2193, %v2083_v33  }
  0x62   :  { %390 = vperm.xlu0 %2191, %v2081_v34   ;;  %395 = vperm.xlu1 %2192, %v2082_v35  }
  0x69   :  { %1178 = vperm.xlu2 %2193, %v73_v38   ;;  %v2766_v38 = vstv %s2663_s3  ;;  %s2795_s3 = sld [smem:[#allocation7 + $0x1]] }
  0x6a   :  { %1173 = vperm.xlu1 %2192, %v72_v39   ;;  %1168 = vperm.xlu0 %2191, %v71_v40   ;;  %4390 = vst [vmem:[#allocation13_spill] sm:$0xff] %v2766_v38  ;;  %v2769_v39 = vstv %s2665_s4  ;;  %s2806_s4 = sld [smem:[#allocation7 + $0x2]] }
  0x6b   :  { %v1192_v52 = vpop.permute.xlu2 %1191  ;;  %4391 = vst [vmem:[#allocation14_spill] sm:$0xff] %v2769_v39 }
  0x6c   :  { %vm1197_vm5 = vcmp.eq.s32.totalorder %v1192_v52, %v70_v44  ;;  %v2804_v52 = vstv %s2681_s28  ;;  %s2873_s28 = sld [smem:[#allocation7 + $0x6]] }
  0x6d   :  { %v2146_v55 = vsel %vm1197_vm5, 1.0, %v2430_v47 }
  0x73   :  { %v1195_v56 = vpop.permute.xlu2 %1194 }
  0x74   :  { %vm1198_vm6 = vcmp.eq.s32.totalorder %v1195_v56, %v70_v44 }
  0x75   :  { %v2147_v57 = vsel %vm1198_vm6, 1.0, %v2430_v47 }
  0x7b   :  { %v2645_v63 = vpop.permute.xlu2 %206 }
  0x83   :  { %v2651_v2 = vpop.permute.xlu2 %228 }
  0x84   :  { %v82_v45 = vpop.permute.xlu0 %81  ;;  %v79_v46 = vpop.permute.xlu1 %78 }
  0x85   :  { %vm87_vm1 = vcmp.eq.s32.totalorder %v82_v45, %v70_v44  ;;  %vm86_vm2 = vcmp.eq.s32.totalorder %v79_v46, %v70_v44  ;;  %v2787_v45 = vstv %s2689_s10  ;;  %s2431_s10 = smov 32  }
  0x86   :  { %v2045_v48 = vsel %vm87_vm1, 1.0, %v2430_v47  ;;  %v2044_v49 = vsel %vm86_vm2, 1.0, %v2430_v47 }
  0x87   :  { %2047 = vmatmul.msk.f32.vlgmr.msra.gmra.mxu0 %vm97_vm0, %v2044_v49  ;;  %2048 = vmatmul.msk.f32.vlgmr.msra.gmra.mxu2 %vm97_vm0, %v2045_v48 }
  0x88   :  { %2052 = vmatmul.msk.f32.vlgmr.msra.gmra.mxu1 %vm97_vm0, %v2044_v49  ;;  %2053 = vmatmul.msk.f32.vlgmr.msra.gmra.mxu3 %vm97_vm0, %v2045_v48 }
  0x8b   :  { %v2657_v5 = vpop.permute.xlu2 %273 }
  0x8c   :  { %v85_v50 = vpop.permute.xlu0 %84  ;;  %v1189_v51 = vpop.permute.xlu1 %1188 }
  0x8d   :  { %vm88_vm3 = vcmp.eq.s32.totalorder %v85_v50, %v70_v44  ;;  %vm1196_vm4 = vcmp.eq.s32.totalorder %v1189_v51, %v70_v44  ;;  %v2784_v44 = vstv %s2679_s27  ;;  %v2798_v50 = vstv %s2695_s12  ;;  %s2854_s27 = sld [smem:[#allocation7 + $0x5]] }
  0x8e   :  { %v2046_v53 = vsel %vm88_vm3, 1.0, %v2430_v47  ;;  %v2145_v54 = vsel %vm1196_vm4, 1.0, %v2430_v47  ;;  %v2801_v51 = vstv %s2699_s14 }
  0x8f   :  { %2049 = vmatmul.msk.f32.gmra.mxu2 %vm97_vm0, %v2046_v53  ;;  %2151 = vmatmul.msk.f32.vlgmr.msrb.gmra.mxu0 %vm97_vm0, %v2145_v54 }
  0x90   :  { %2054 = vmatmul.msk.f32.gmra.mxu3 %vm97_vm0, %v2046_v53  ;;  %2154 = vmatmul.msk.f32.vlgmr.msrb.gmra.mxu1 %vm97_vm0, %v2145_v54 }
  0x93   :  { %v2667_v8 = vpop.permute.xlu2 %295 }
  0x94   :  { %v2635_v58 = vpop.permute.xlu0 %196  ;;  %v2637_v59 = vpop.permute.xlu1 %201 }
  0x97   :  { %2057 = vmatmul.msk.f32.vlgmr.msrb.gmra.mxu2 %vm97_vm0, %v2044_v49  ;;  %2152 = vmatmul.msk.f32.gmra.mxu0 %vm97_vm0, %v2146_v55  ;;  %v2793_v49 = vstv %s2673_s25  ;;  %s4402_s25 = sld [smem:[#allocation12_spill]] }
  0x98   :  { %2148 = vmatmul.msk.f32.vlgmr.msrb.gmra.mxu3 %vm97_vm0, %v2145_v54  ;;  %2155 = vmatmul.msk.f32.gmra.mxu1 %vm97_vm0, %v2146_v55  ;;  %4395 = vst [vmem:[#allocation18_spill] sm:$0xff] %v2793_v49  ;;  %v2812_v54 = vstv %s2705_s1 }
  0x99   :  { %4397 = vst [vmem:[#allocation20_spill] sm:$0xff] %v2812_v54 }
  0x9b   :  { %v2693_v11 = vpop.permute.xlu2 %320 }
  0x9c   :  { %v2639_v60 = vpop.permute.xlu0 %218  ;;  %v2641_v61 = vpop.permute.xlu1 %223 }
  0x9f   :  { %2058 = vmatmul.msk.f32.gmra.mxu2 %vm97_vm0, %v2045_v48  ;;  %2153 = vmatmul.msk.f32.gmra.mxu0 %vm97_vm0, %v2147_v57  ;;  %v2790_v48 = vstv %s2669_s24  ;;  %s2817_s24 = sld [smem:[#allocation7 + $0x3]] }
  0xa0   :  { %2149 = vmatmul.msk.f32.gmra.mxu3 %vm97_vm0, %v2146_v55  ;;  %2156 = vmatmul.msk.f32.gmra.mxu1 %vm97_vm0, %v2147_v57  ;;  %4394 = vst [vmem:[#allocation17_spill] sm:$0xff] %v2790_v48  ;;  %v2815_v55 = vstv %s2707_s15 }
  0xa1   :  { %4398 = vst [vmem:[#allocation21_spill] sm:$0xff] %v2815_v55 }
  0xa3   :  { %v2725_v22 = vpop.permute.xlu2 %253 }
  0xa4   :  { %v2643_v62 = vpop.permute.xlu0 %243  ;;  %v2647_v0 = vpop.permute.xlu1 %268 }
  0xa7   :  { %2059 = vmatmul.msk.f32.gmra.mxu2 %vm97_vm0, %v2046_v53  ;;  %v2809_v53 = vstv %s2697_s13  ;;  %s4630_s13 = sld [smem:[#allocation59_spill]] }
  0xa8   :  { %2150 = vmatmul.msk.f32.gmra.mxu3 %vm97_vm0, %v2147_v57  ;;  %4396 = vst [vmem:[#allocation19_spill] sm:$0xff] %v2809_v53  ;;  %v2820_v57 = vstv %s2709_s16 }
  0xa9   :  { %4399 = vst [vmem:[#allocation22_spill] sm:$0xff] %v2820_v57  ;;  %v2889_v57 = vstv %s2775_s2 }
  0xaa   :  { %4418 = vst [vmem:[#allocation39_spill] sm:$0xff] %v2889_v57 }
  0xab   :  { %v2773_v40 = vpop.permute.xlu2 %353 }
  0xac   :  { %v2649_v1 = vpop.permute.xlu0 %278  ;;  %v2653_v3 = vpop.permute.xlu1 %290  ;;  %4392 = vst [vmem:[#allocation15_spill] sm:$0xff] %v2773_v40 }
  0xb4   :  { %v2655_v4 = vpop.permute.xlu0 %300  ;;  %v2659_v6 = vpop.permute.xlu1 %315 }
  0xbc   :  { %v2661_v7 = vpop.permute.xlu0 %325  ;;  %v2675_v9 = vpop.permute.xlu1 %248 }
  0xc4   :  { %v2685_v10 = vpop.permute.xlu0 %343  ;;  %v2701_v12 = vpop.permute.xlu1 %348 }
  0xcc   :  { %v2711_v14 = vpop.permute.xlu0 %365  ;;  %v2739_v27 = vpop.permute.xlu1 %370 }
 0x104   :  { %v124_v13 = vpop.f32.mrf.mxu0 }
 0x105   :  { %v209_v15 = vmul.f32 %v2635_v58, %v124_v13  ;;  %v281_v16 = vmul.f32 %v2647_v0, %v124_v13  ;;  %v356_v17 = vmul.f32 %v2685_v10, %v124_v13  ;;  %v153_v18 = vpop.f32.mrf.mxu1  ;;  %v2823_v13 = vstv %s2721_s18 }
 0x106   :  { %v231_v19 = vmul.f32 %v2639_v60, %v153_v18  ;;  %v303_v20 = vmul.f32 %v2653_v3, %v153_v18  ;;  %v378_v21 = vmul.f32 %v2711_v14, %v153_v18  ;;  %4401 = vst [vmem:[#allocation23_spill] sm:$0xff] %v2823_v13  ;;  %v2837_v18 = vstv %s2744_s21 }
 0x107   :  { %4406 = vst [vmem:[#allocation27_spill] sm:$0xff] %v2837_v18 }
 0x108   :  { %v2727_v23 = vadd.f32 %v231_v19, %v209_v15  ;;  %v2729_v24 = vadd.f32 %v303_v20, %v281_v16  ;;  %v2731_v25 = vadd.f32 %v378_v21, %v356_v17  ;;  %v2826_v15 = vstv %s2723_s19 }
 0x109   :  { %4403 = vst [vmem:[#allocation24_spill] sm:$0xff] %v2826_v15  ;;  %v2829_v16 = vstv %s2733_s20  ;;  %v2834_v17 = vstv %s2737_s6  ;;  %v2840_v19 = vstv %s2749_s5  ;;  %v2843_v20 = vstv %s2759_s23 }
 0x10a   :  { %4387 = vst [vmem:[#allocation10_spill] sm:$0xff] %v2729_v24  ;;  %v127_v26 = vpop.f32.mrf.mxu2  ;;  %v2846_v21 = vstv %s2683_s29 }
 0x10b   :  { %v210_v28 = vmul.f32 %v2637_v59, %v127_v26  ;;  %v282_v29 = vmul.f32 %v2657_v5, %v127_v26  ;;  %v357_v30 = vmul.f32 %v2701_v12, %v127_v26  ;;  %v156_v31 = vpop.f32.mrf.mxu3  ;;  %4404 = vst [vmem:[#allocation25_spill] sm:$0xff] %v2829_v16  ;;  %v2849_v26 = vstv %s2687_s30  ;;  %s4433_s30 = sld [smem:[#allocation58_spill]] }
 0x10c   :  { %v232_v32 = vmul.f32 %v2641_v61, %v156_v31  ;;  %v304_v33 = vmul.f32 %v2667_v8, %v156_v31  ;;  %v379_v34 = vmul.f32 %v2739_v27, %v156_v31  ;;  %v1257_v46 = vpop.f32.mrf.mxu0  ;;  %4405 = vst [vmem:[#allocation26_spill] sm:$0xff] %v2834_v17  ;;  %v2863_v31 = vstv %s2716_s17 }
 0x10d   :  { %v1283_v56 = vpop.f32.mrf.mxu1  ;;  %4407 = vst [vmem:[#allocation28_spill] sm:$0xff] %v2840_v19  ;;  %v1295_v24 = vmul.f32 %v1257_v46, %v2639_v60  ;;  %v2876_v19 = vstv %s2763_s8  ;;  %v1328_v18 = vmul.f32 %v1257_v46, %v2711_v14  ;;  %s2919_s8 = sld [smem:[#allocation7 + $0x7]] }
 0x10e   :  { %v2753_v35 = vadd.f32 %v232_v32, %v210_v28  ;;  %v2755_v36 = vadd.f32 %v304_v33, %v282_v29  ;;  %v2757_v37 = vadd.f32 %v379_v34, %v357_v30  ;;  %4408 = vst [vmem:[#allocation29_spill] sm:$0xff] %v2843_v20  ;;  %v2852_v28 = vstv %s2691_s11  ;;  %v391_v34 = vpop.permute.xlu0 %390 }
 0x10f   :  { %4409 = vst [vmem:[#allocation30_spill] sm:$0xff] %v2849_v26  ;;  %v2857_v29 = vstv %s2761_s9  ;;  %v2860_v30 = vstv %s2703_s0  ;;  %v2866_v32 = vstv %s4400_s7  ;;  %v2869_v33 = vstv %s4402_s25 }
 0x110   :  { %4410 = vst [vmem:[#allocation31_spill] sm:$0xff] %v2852_v28  ;;  %v1310_v20 = vmul.f32 %v1257_v46, %v2653_v3  ;;  %v1334_v17 = vmul.f32 %v1283_v56, %v391_v34 }
 0x111   :  { %4411 = vst [vmem:[#allocation32_spill] sm:$0xff] %v2857_v29  ;;  %v2879_v29 = vstv %s2771_s22 }
 0x112   :  { %v130_v41 = vpop.f32.mrf.mxu2  ;;  %4412 = vst [vmem:[#allocation33_spill] sm:$0xff] %v2860_v30  ;;  %v2892_v30 = vstv %s2795_s3 }
 0x113   :  { %v159_v47 = vpop.f32.mrf.mxu3  ;;  %4413 = vst [vmem:[#allocation34_spill] sm:$0xff] %v2863_v31  ;;  %v1301_v31 = vmul.f32 %v1283_v56, %v2643_v62  ;;  %v211_v16 = vmul.f32 %v2645_v63, %v130_v41 }
 0x114   :  { %4414 = vst [vmem:[#allocation35_spill] sm:$0xff] %v2866_v32  ;;  %v1316_v32 = vmul.f32 %v1283_v56, %v2659_v6  ;;  %v233_v57 = vmul.f32 %v2651_v2, %v159_v47  ;;  %v1260_v15 = vpop.f32.mrf.mxu0 }
 0x115   :  { %4415 = vst [vmem:[#allocation36_spill] sm:$0xff] %v2869_v33  ;;  %v1286_v28 = vpop.f32.mrf.mxu1 }
 0x116   :  { %4416 = vst [vmem:[#allocation37_spill] sm:$0xff] %v2876_v19  ;;  %v2898_v19 = vpop.permute.xlu2 %375 }
 0x117   :  { %4417 = vst [vmem:[#allocation38_spill] sm:$0xff] %v2879_v29  ;;  %v283_v29 = vmul.f32 %v2649_v1, %v130_v41 }
 0x118   :  { %4419 = vst [vmem:[#allocation40_spill] sm:$0xff] %v2892_v30  ;;  %v305_v30 = vmul.f32 %v2655_v4, %v159_v47 }
 0x11a   :  { %v2884_v33 = vpop.f32.mrf.mxu2 }
 0x11b   :  { %v403_v60 = vmul.f32 %v391_v34, %v2884_v33  ;;  %v1231_v3 = vpop.f32.mrf.mxu3  ;;  %v358_v34 = vmul.f32 %v2773_v40, %v130_v41  ;;  %v2914_v41 = vstv %s2831_s26  ;;  %v2917_v40 = vstv %s2854_s27 }
 0x11c   :  { %v1292_v14 = vmul.f32 %v1231_v3, %v2635_v58  ;;  %v1307_v46 = vmul.f32 %v1231_v3, %v2647_v0  ;;  %v1325_v56 = vmul.f32 %v1231_v3, %v2685_v10  ;;  %v380_v58 = vmul.f32 %v2898_v19, %v159_v47  ;;  %4421 = vst [vmem:[#allocation42_spill] sm:$0xff] %v2914_v41 }
 0x11d   :  { %v2904_v13 = vadd.f32 %v403_v60, %v2731_v25  ;;  %v2908_v10 = vstv %s2806_s4  ;;  %v2911_v3 = vstv %s2817_s24  ;;  %4422 = vst [vmem:[#allocation43_spill] sm:$0xff] %v2917_v40  ;;  %v1296_v25 = vmul.f32 %v1260_v15, %v2641_v61 }
 0x11e   :  { %v1298_v55 = vadd.f32 %v1295_v24, %v1292_v14  ;;  %v1313_v0 = vadd.f32 %v1310_v20, %v1307_v46  ;;  %v1331_v54 = vadd.f32 %v1328_v18, %v1325_v56  ;;  %v1311_v60 = vmul.f32 %v1260_v15, %v2667_v8  ;;  %v396_v56 = vpop.permute.xlu1 %395 }
 0x11f   :  { %4420 = vst [vmem:[#allocation41_spill] sm:$0xff] %v2904_v13  ;;  %v2925_v20 = vadd.f32 %v233_v57, %v211_v16  ;;  %v2927_v18 = vadd.f32 %v305_v30, %v283_v29  ;;  %v1329_v14 = vmul.f32 %v1260_v15, %v2739_v27  ;;  %v2931_v46 = vstv %s2873_s28 }
 0x120   :  { %v2923_v47 = vadd.f32 %v1301_v31, %v1298_v55  ;;  %v1319_v24 = vadd.f32 %v1316_v32, %v1313_v0  ;;  %4426 = vst [vmem:[#allocation47_spill] sm:$0xff] %v2931_v46  ;;  %v2933_v13 = vadd.f32 %v380_v58, %v358_v34  ;;  %v1302_v40 = vmul.f32 %v1286_v28, %v2675_v9 }
 0x121   :  { %4424 = vst [vmem:[#allocation45_spill] sm:$0xff] %v2925_v20  ;;  %v2938_v61 = vadd.f32 %v1334_v17, %v1331_v54  ;;  %v1317_v55 = vmul.f32 %v1286_v28, %v2693_v11  ;;  %v1335_v32 = vmul.f32 %v1286_v28, %v396_v56  ;;  %v256_v34 = vmul.f32 %v2643_v62, %v2884_v33 }
 0x122   :  { %4423 = vst [vmem:[#allocation44_spill] sm:$0xff] %v2923_v47  ;;  %v2936_v41 = vand.u32 2147483647, %v1319_v24  ;;  %v185_v8 = vpop.f32.mrf.mxu2  ;;  %v1340_v30 = vmul.f32 %v2923_v47, %v2766_v38  ;;  %v1421_v54 = vmul.f32 %v2923_v47, %v2778_v42  ;;  %v1263_v24 = vpop.f32.mrf.mxu0 }
 0x123   :  { %4425 = vst [vmem:[#allocation46_spill] sm:$0xff] %v2927_v18  ;;  %v257_v57 = vmul.f32 %v2675_v9, %v185_v8  ;;  %v329_v16 = vmul.f32 %v2693_v11, %v185_v8  ;;  %v404_v27 = vmul.f32 %v396_v56, %v185_v8  ;;  %v1234_v15 = vpop.f32.mrf.mxu3  ;;  %v1349_v0 = vmul.f32 %v2938_v61, %v2769_v39  ;;  %v4447_v18 = vld [vmem:[#allocation27_spill] sm:$0xff] }
 0x124   :  { %4427 = vst [vmem:[#allocation48_spill] sm:$0xff] %v2933_v13  ;;  %v1308_v29 = vmul.f32 %v1234_v15, %v2657_v5  ;;  %v1343_v31 = vmul.f32 %v2936_v41, %v2790_v48  ;;  %v1424_v5 = vmul.f32 %v2936_v41, %v2793_v49  ;;  %v1326_v56 = vmul.f32 %v1234_v15, %v2701_v12 }
 0x125   :  { %v2951_v17 = vadd.f32 %v257_v57, %v2753_v35  ;;  %v2954_v9 = vadd.f32 %v329_v16, %v2755_v36  ;;  %v2957_v11 = vadd.f32 %v404_v27, %v2757_v37  ;;  %v2966_v35 = vstv %s2919_s8 }
 0x126   :  { %v1346_v58 = vadd.f32 %v1343_v31, %v1340_v30  ;;  %4431 = vst [vmem:[#allocation52_spill] sm:$0xff] %v2966_v35  ;;  %v1427_v8 = vadd.f32 %v1424_v5, %v1421_v54  ;;  %v1430_v36 = vmul.f32 %v2938_v61, %v2781_v43  ;;  %v1508_v37 = vmul.f32 %v2936_v41, %v2804_v52 }
 0x127   :  { %4428 = vst [vmem:[#allocation49_spill] sm:$0xff] %v2951_v17  ;;  %v1293_v57 = vmul.f32 %v1234_v15, %v2637_v59  ;;  %v1314_v28 = vadd.f32 %v1311_v60, %v1308_v29  ;;  %v2976_v16 = vmul.f32 %v2659_v6, %v2884_v33  ;;  %v2981_v27 = vstv %s4433_s30  ;;  %v1289_v60 = vpop.f32.mrf.mxu1 }
 0x128   :  { %4429 = vst [vmem:[#allocation50_spill] sm:$0xff] %v2954_v9  ;;  %v1352_v62 = vadd.f32 %v1349_v0, %v1346_v58  ;;  %v1433_v30 = vadd.f32 %v1430_v36, %v1427_v8  ;;  %v1505_v31 = vmul.f32 %v2923_v47, %v2784_v44  ;;  %v2986_v54 = vadd.f32 %v256_v34, %v2727_v23  ;;  %v4444_v9 = vld [vmem:[#allocation22_spill] sm:$0xff] }
 0x129   :  { %4430 = vst [vmem:[#allocation51_spill] sm:$0xff] %v2957_v11  ;;  %v1297_v59 = vmul.f32 %v1263_v24, %v2651_v2  ;;  %v1312_v12 = vmul.f32 %v1263_v24, %v2655_v4  ;;  %v1330_v33 = vmul.f32 %v1263_v24, %v2898_v19  ;;  %v1592_v58 = vmul.f32 %v2936_v41, %v2809_v53  ;;  %v401_v4 = vpop.permute.xlu2 %400  ;;  %v4437_v11 = vld [vmem:[#allocation31_spill] sm:$0xff] }
 0x12a   :  { %4432 = vst [vmem:[#allocation53_spill] sm:$0xff] %v2976_v16  ;;  %v2991_v6 = vadd.f32 %v1352_v62, %v2846_v21  ;;  %v2995_v29 = vadd.f32 %v1433_v30, %v2849_v26  ;;  %v1511_v5 = vadd.f32 %v1508_v37, %v1505_v31  ;;  %v1299_v23 = vadd.f32 %v1296_v25, %v1293_v57 }
 0x12b   :  { %4434 = vst [vmem:[#allocation54_spill] sm:$0xff] %v2981_v27  ;;  %v1237_v15 = vpop.f32.mrf.mxu3  ;;  %v1320_v34 = vadd.f32 %v1317_v55, %v1314_v28  ;;  %v1332_v0 = vadd.f32 %v1329_v14, %v1326_v56  ;;  %v1303_v8 = vmul.f32 %v1289_v60, %v2725_v22  ;;  %v1514_v19 = vmul.f32 %v2938_v61, %v2787_v45 }
 0x12c   :  { %4435 = vst [vmem:[#allocation55_spill] sm:$0xff] %v2986_v54  ;;  %v2157_v2 = vmul.f32 -1.442695, %v2991_v6  ;;  %v2160_v36 = vmul.f32 -1.442695, %v2995_v29  ;;  %v1589_v24 = vmul.f32 %v2923_v47, %v2798_v50  ;;  %v1318_v37 = vmul.f32 %v1289_v60, %v2661_v7 }
 0x12d   :  { %v3007_v62 = vmul.f32 %v1289_v60, %v401_v4  ;;  %v1294_v25 = vmul.f32 %v1237_v15, %v2645_v63  ;;  %v1517_v14 = vadd.f32 %v1514_v19, %v1511_v5  ;;  %v1598_v57 = vmul.f32 %v2938_v61, %v2801_v51  ;;  %v4438_v63 = vld [vmem:[#allocation20_spill] sm:$0xff]  ;;  %v4439_v5 = vld [vmem:[#allocation21_spill] sm:$0xff]  ;;  %v4440_v19 = vld [vmem:[#allocation15_spill] sm:$0xff] }
 0x12e   :  { %2194 = vpow2.f32 %v2157_v2  ;;  %v1595_v55 = vadd.f32 %v1592_v58, %v1589_v24  ;;  %v3012_v28 = vadd.f32 %v1302_v40, %v1299_v23  ;;  %v3014_v56 = vand.u32 2147483647, %v1320_v34  ;;  %v4441_v23 = vld [vmem:[#allocation23_spill] sm:$0xff] }
 0x12f   :  { %2196 = vpow2.f32 %v2160_v36  ;;  %v3016_v30 = vadd.f32 %v1335_v32, %v1332_v0  ;;  %v1309_v31 = vmul.f32 %v1237_v15, %v2649_v1  ;;  %v3020_v60 = vadd.f32 %v1517_v14, %v4437_v11  ;;  %v4442_v32 = vld [vmem:[#allocation24_spill] sm:$0xff]  ;;  %v188_v1 = vpop.f32.mrf.mxu2  ;;  %v4443_v14 = vld [vmem:[#allocation33_spill] sm:$0xff] }
 0x130   :  { %4436 = vst [vmem:[#allocation56_spill] sm:$0xff] %v3012_v28  ;;  %v1601_v17 = vadd.f32 %v1598_v57, %v1595_v55  ;;  %v1673_v2 = vmul.f32 %v2923_v47, %v4438_v63  ;;  %v1676_v58 = vmul.f32 %v2936_v41, %v4439_v5  ;;  %v1300_v36 = vadd.f32 %v1297_v59, %v1294_v25  ;;  %v4445_v25 = vld [vmem:[#allocation25_spill] sm:$0xff] }
 0x131   :  { %v1327_v40 = vmul.f32 %v1237_v15, %v4440_v19  ;;  %v1757_v34 = vmul.f32 %v2923_v47, %v4441_v23  ;;  %v1760_v0 = vmul.f32 %v2936_v41, %v4442_v32  ;;  %v2163_v24 = vmul.f32 -1.442695, %v3020_v60  ;;  %v4446_v19 = vld [vmem:[#allocation26_spill] sm:$0xff] }
 0x132   :  { %v3033_v55 = vadd.f32 %v1601_v17, %v4443_v14  ;;  %v1679_v57 = vadd.f32 %v1676_v58, %v1673_v2  ;;  %v1682_v54 = vmul.f32 %v2938_v61, %v4444_v9  ;;  %v1766_v15 = vmul.f32 %v2938_v61, %v4445_v25 }
 0x133   :  { %v1763_v59 = vadd.f32 %v1760_v0, %v1757_v34  ;;  %v1841_v13 = vmul.f32 %v2923_v47, %v4446_v19  ;;  %v1844_v20 = vmul.f32 %v2936_v41, %v4447_v18  ;;  %2198 = vpow2.f32 %v2163_v24 }
 0x134   :  { %v2195_v16 = vpop.eup %2194  ;;  %v2166_v17 = vmul.f32 -1.442695, %v3033_v55  ;;  %v1685_v2 = vadd.f32 %v1682_v54, %v1679_v57  ;;  %v3047_v58 = vmul.f32 %v2725_v22, %v188_v1  ;;  %v3052_v32 = vmul.f32 %v2661_v7, %v188_v1  ;;  %v4452_v22 = vld [vmem:[#allocation28_spill] sm:$0xff]  ;;  %v4454_v7 = vld [vmem:[#allocation34_spill] sm:$0xff] }
 0x135   :  { %v2197_v27 = vpop.eup %2196  ;;  %v3043_v35 = vadd.f32 1.0, %v2195_v16  ;;  %v1769_v0 = vadd.f32 %v1766_v15, %v1763_v59  ;;  %v1847_v25 = vadd.f32 %v1844_v20, %v1841_v13  ;;  %v3054_v19 = vmul.f32 %v401_v4, %v188_v1  ;;  %v4451_v16 = vld [vmem:[#allocation32_spill] sm:$0xff]  ;;  %v4455_v20 = vld [vmem:[#allocation29_spill] sm:$0xff] }
 0x136   :  { %4448 = vst [vmem:[#allocation20_spill] sm:$0xff] %v3047_v58  ;;  %v3049_v34 = vadd.f32 1.0, %v2197_v27  ;;  %v1928_v24 = vmul.f32 %v2936_v41, %v4451_v16  ;;  %v1315_v18 = vadd.f32 %v1312_v12, %v1309_v31  ;;  %v3059_v23 = vadd.f32 %v1330_v33, %v1327_v40  ;;  %v4456_v12 = vld [vmem:[#allocation35_spill] sm:$0xff] }
 0x137   :  { %4449 = vst [vmem:[#allocation21_spill] sm:$0xff] %v3052_v32  ;;  %2200 = vrcp.f32 %v3043_v35  ;;  %v1850_v27 = vmul.f32 %v2938_v61, %v4452_v22  ;;  %v3064_v54 = vadd.f32 %v1303_v8, %v1300_v36  ;;  %v3067_v13 = vadd.f32 %v1685_v2, %v4454_v7 }
 0x138   :  { %4450 = vst [vmem:[#allocation15_spill] sm:$0xff] %v3054_v19  ;;  %2202 = vrcp.f32 %v3049_v34  ;;  %v1925_v4 = vmul.f32 %v2923_v47, %v4455_v20  ;;  %v1379_v1 = vand.u32 2147483647, %v3043_v35  ;;  %v1381_v41 = vand.u32 2147483648, %v3043_v35  ;;  %v4457_v19 = vld [vmem:[#allocation36_spill] sm:$0xff] }
 0x139   :  { %4453 = vst [vmem:[#allocation57_spill] sm:$0xff] %v3064_v54  ;;  %2204 = vpow2.f32 %v2166_v17  ;;  %v3074_v33 = vadd.f32 %v1769_v0, %v4456_v12  ;;  %v1853_v31 = vadd.f32 %v1850_v27, %v1847_v25  ;;  %v2199_v40 = vpop.eup %2198  ;;  %v1460_v57 = vand.u32 2147483647, %v3049_v34  ;;  %v4458_v25 = vld [vmem:[#allocation37_spill] sm:$0xff] }
 0x13a   :  { %v1462_v8 = vand.u32 2147483648, %v3049_v34  ;;  %v2169_v36 = vmul.f32 -1.442695, %v3067_v13  ;;  %v1931_v59 = vadd.f32 %v1928_v24, %v1925_v4  ;;  %v3079_v15 = vadd.f32 %v1318_v37, %v1315_v18 }
 0x13b   :  { %v3081_v17 = vadd.f32 1.0, %v2199_v40  ;;  %v2172_v2 = vmul.f32 -1.442695, %v3074_v33  ;;  %v3085_v32 = vadd.f32 %v1853_v31, %v4457_v19  ;;  %vm1375_vm7 = vweird.f32 %v3043_v35 }
 0x13c   :  { %vm1456_vm8 = vweird.f32 %v3049_v34  ;;  %2206 = vpow2.f32 %v2169_v36  ;;  %v1934_v27 = vmul.f32 %v2938_v61, %v4458_v25  ;;  %vm3092_vm9 = vcmp.eq.f32.partialorder %v1379_v1, 8.507059e+37 }
 0x13d   :  { %v2201_v0 = vpop.eup %2200  ;;  %v1382_v24 = vor.u32 1.1754944e-38, %v1381_v41  ;;  %2208 = vrcp.f32 %v3081_v17  ;;  %vm3098_vm10 = vcmp.eq.f32.partialorder %v1460_v57, 8.507059e+37  ;;  %v1463_v36 = vor.u32 1.1754944e-38, %v1462_v8 }
 0x13e   :  { %v2203_v58 = vpop.eup %2202  ;;  %v1371_v18 = vmul.f32 %v2201_v0, %v3043_v35  ;;  %v1937_v54 = vadd.f32 %v1934_v27, %v1931_v59  ;;  %v1341_v61 = vmul.f32 %v3012_v28, %v2766_v38  ;;  %2210 = vpow2.f32 %v2172_v2  ;;  %v4463_v2 = vld [vmem:[#allocation38_spill] sm:$0xff] }
 0x13f   :  { %v2205_v4 = vpop.eup %2204  ;;  %v1452_v31 = vmul.f32 %v2203_v58, %v3049_v34  ;;  %v2175_v41 = vmul.f32 -1.442695, %v3085_v32  ;;  %v1544_v20 = vand.u32 2147483647, %v3081_v17  ;;  %v1344_v57 = vmul.f32 %v3014_v56, %v2790_v48 }
 0x140   :  { %v1372_v25 = vsub.f32 1.0, %v1371_v18  ;;  %v3104_v1 = vadd.f32 1.0, %v2205_v4  ;;  %v1350_v19 = vmul.f32 %v3016_v30, %v2769_v39  ;;  %vm1376_vm11 = vweird.f32 %v2201_v0 }
 0x141   :  { %v1453_v16 = vsub.f32 1.0, %v1452_v31  ;;  %v1546_v59 = vand.u32 2147483648, %v3081_v17  ;;  %vm1457_vm12 = vweird.f32 %v2203_v58  ;;  %v3115_v4 = vadd.f32 %v1937_v54, %v4463_v2  ;;  %vm1377_vm14 = vmor %vm1375_vm7, %vm1376_vm11 }
 0x142   :  { %v1373_v8 = vmul.f32 %v2201_v0, %v1372_v25  ;;  %2212 = vrcp.f32 %v3104_v1  ;;  %v2207_v27 = vpop.eup %2206  ;;  %vm1540_vm13 = vweird.f32 %v3081_v17  ;;  %v3122_v25 = vmul.f32 %v3012_v28, %v2778_v42  ;;  %vm1458_vm0 = vmor %vm1456_vm8, %vm1457_vm12 }
 0x143   :  { %v1454_v18 = vmul.f32 %v2203_v58, %v1453_v16  ;;  %2214 = vpow2.f32 %v2175_v41  ;;  %v2209_v31 = vpop.eup %2208  ;;  %v3118_v48 = vadd.f32 1.0, %v2207_v27  ;;  %vm3127_vm15 = vcmp.eq.f32.partialorder %v1544_v20, 8.507059e+37 }
 0x144   :  { %v1374_v38 = vadd.f32 %v2201_v0, %v1373_v8  ;;  %v1536_v16 = vmul.f32 %v2209_v31, %v3081_v17  ;;  %v1628_v54 = vand.u32 2147483647, %v3104_v1  ;;  %v2211_v8 = vpop.eup %2210  ;;  %v1547_v27 = vor.u32 1.1754944e-38, %v1546_v59 }
 0x145   :  { %v1455_v39 = vadd.f32 %v2203_v58, %v1454_v18  ;;  %v1630_v42 = vand.u32 2147483648, %v3104_v1  ;;  %2216 = vrcp.f32 %v3118_v48  ;;  %vm1624_vm1 = vweird.f32 %v3104_v1 }
 0x146   :  { %v1378_v2 = vsel %vm1377_vm14, %v2201_v0, %v1374_v38  ;;  %v1537_v18 = vsub.f32 1.0, %v1536_v16  ;;  %v2178_v47 = vmul.f32 -1.442695, %v3115_v4  ;;  %v3144_v0 = vadd.f32 1.0, %v2211_v8  ;;  %v4469_v16 = vld [vmem:[#allocation40_spill] sm:$0xff] }
 0x147   :  { %v1383_v35 = vsel %vm3092_vm9, %v1382_v24, %v1378_v2  ;;  %v1459_v20 = vsel %vm1458_vm0, %v2203_v58, %v1455_v39  ;;  %v1347_v59 = vadd.f32 %v1344_v57, %v1341_v61  ;;  %vm1541_vm2 = vweird.f32 %v2209_v31 }
 0x148   :  { %v2213_v12 = vpop.eup %2212  ;;  %v1415_v38 = vmul.f32 %v1383_v35, %v2991_v6  ;;  %v1464_v34 = vsel %vm3098_vm10, %v1463_v36, %v1459_v20  ;;  %v1538_v37 = vmul.f32 %v2209_v31, %v1537_v18  ;;  %vm3148_vm3 = vcmp.eq.f32.partialorder %v1628_v54, 8.507059e+37  ;;  %v4468_v36 = vld [vmem:[#allocation39_spill] sm:$0xff]  ;;  %vm1542_vm6 = vmor %vm1540_vm13, %vm1541_vm2 }
 0x149   :  { %v2215_v22 = vpop.eup %2214  ;;  %v1496_v7 = vmul.f32 %v1464_v34, %v2995_v29  ;;  %v1620_v39 = vmul.f32 %v2213_v12, %v3104_v1  ;;  %v1631_v24 = vor.u32 1.1754944e-38, %v1630_v42  ;;  %v1712_v6 = vand.u32 2147483647, %v3118_v48 }
 0x14a   :  { %v1714_v40 = vand.u32 2147483648, %v3118_v48  ;;  %2218 = vrcp.f32 %v3144_v0  ;;  %v1418_v61 = vmul.f32 %v1415_v38, %v4468_v36  ;;  %v1539_v57 = vadd.f32 %v2209_v31, %v1538_v37 }
 0x14b   :  { %v1621_v2 = vsub.f32 1.0, %v1620_v39  ;;  %vm1625_vm4 = vweird.f32 %v2213_v12  ;;  %vm1708_vm5 = vweird.f32 %v3118_v48  ;;  %v2217_v29 = vpop.eup %2216  ;;  %v1499_v54 = vmul.f32 %v1496_v7, %v4469_v16 }
 0x14c   :  { %v3160_v42 = vadd.f32 1.0, %v2215_v22  ;;  %2220 = vpow2.f32 %v2178_v47  ;;  %v1353_v8 = vadd.f32 %v1350_v19, %v1347_v59  ;;  %v1543_v35 = vsel %vm1542_vm6, %v2209_v31, %v1539_v57  ;;  %vm1626_vm8 = vmor %vm1624_vm1, %vm1625_vm4 }
 0x14d   :  { %v1622_v20 = vmul.f32 %v2213_v12, %v1621_v2  ;;  %v1704_v18 = vmul.f32 %v2217_v29, %v3118_v48  ;;  %v1796_v38 = vand.u32 2147483647, %v3144_v0  ;;  %v1548_v34 = vsel %vm3127_vm15, %v1547_v27, %v1543_v35 }
 0x14e   :  { %vm3166_vm7 = vcmp.eq.f32.partialorder %v1712_v6, 8.507059e+37  ;;  %v1715_v7 = vor.u32 1.1754944e-38, %v1714_v40  ;;  %v1798_v17 = vand.u32 2147483648, %v3144_v0  ;;  %v1580_v22 = vmul.f32 %v1548_v34, %v3020_v60 }
 0x14f   :  { %v1623_v47 = vadd.f32 %v2213_v12, %v1622_v20  ;;  %v1705_v19 = vsub.f32 1.0, %v1704_v18  ;;  %2222 = vrcp.f32 %v3160_v42  ;;  %v1502_v59 = vadd.f32 %v1499_v54, %v1418_v61 }
 0x150   :  { %v2219_v31 = vpop.eup %2218  ;;  %vm1709_vm9 = vweird.f32 %v2217_v29  ;;  %vm1792_vm10 = vweird.f32 %v3144_v0  ;;  %v3178_v41 = vadd.f32 %v1353_v8, %v2846_v21  ;;  %vm3181_vm11 = vcmp.eq.f32.partialorder %v1796_v38, 8.507059e+37 }
 0x151   :  { %v1627_v27 = vsel %vm1626_vm8, %v2213_v12, %v1623_v47  ;;  %v1706_v39 = vmul.f32 %v2217_v29, %v1705_v19  ;;  %v1788_v60 = vmul.f32 %v2219_v31, %v3144_v0  ;;  %v1799_v1 = vor.u32 1.1754944e-38, %v1798_v17  ;;  %vm1710_vm12 = vmor %vm1708_vm5, %vm1709_vm9 }
 0x152   :  { %v2221_v40 = vpop.eup %2220  ;;  %v1632_v61 = vsel %vm3148_vm3, %v1631_v24, %v1627_v27  ;;  %v1880_v57 = vand.u32 2147483647, %v3160_v42  ;;  %v1882_v2 = vand.u32 2147483648, %v3160_v42  ;;  %v1583_v54 = vmul.f32 %v1580_v22, %v2908_v10 }
 0x153   :  { %v1664_v12 = vmul.f32 %v1632_v61, %v3033_v55  ;;  %v1707_v8 = vadd.f32 %v2217_v29, %v1706_v39  ;;  %v1789_v35 = vsub.f32 1.0, %v1788_v60  ;;  %vm1793_vm13 = vweird.f32 %v2219_v31 }
 0x154   :  { %vm1876_vm14 = vweird.f32 %v3160_v42  ;;  %v3195_v58 = vadd.f32 1.0, %v2221_v40  ;;  %v2158_v24 = vmul.f32 -1.442695, %v3178_v41  ;;  %v1586_v18 = vadd.f32 %v1583_v54, %v1502_v59  ;;  %vm1794_vm0 = vmor %vm1792_vm10, %vm1793_vm13 }
 0x155   :  { %v2223_v20 = vpop.eup %2222  ;;  %v1711_v38 = vsel %vm1710_vm12, %v2217_v29, %v1707_v8  ;;  %v1790_v34 = vmul.f32 %v2219_v31, %v1789_v35  ;;  %v1425_v55 = vmul.f32 %v3014_v56, %v2793_v49  ;;  %vm3203_vm15 = vcmp.eq.f32.partialorder %v1880_v57, 8.507059e+37 }
 0x156   :  { %v1716_v17 = vsel %vm3166_vm7, %v1715_v7, %v1711_v38  ;;  %v1872_v48 = vmul.f32 %v2223_v20, %v3160_v42  ;;  %2224 = vrcp.f32 %v3195_v58  ;;  %v1667_v47 = vmul.f32 %v1664_v12, %v2911_v3 }
 0x157   :  { %v1748_v19 = vmul.f32 %v1716_v17, %v3067_v13  ;;  %v1791_v29 = vadd.f32 %v2219_v31, %v1790_v34  ;;  %v1883_v59 = vor.u32 1.1754944e-38, %v1882_v2  ;;  %2226 = vpow2.f32 %v2158_v24  ;;  %v4476_v2 = vld [vmem:[#allocation42_spill] sm:$0xff] }
 0x158   :  { %v1873_v37 = vsub.f32 1.0, %v1872_v48  ;;  %v1431_v7 = vmul.f32 %v3016_v30, %v2781_v43  ;;  %v1506_v27 = vmul.f32 %v3012_v28, %v2784_v44  ;;  %v1670_v39 = vadd.f32 %v1667_v47, %v1586_v18 }
 0x159   :  { %v1795_v60 = vsel %vm1794_vm0, %v2219_v31, %v1791_v29  ;;  %v1428_v40 = vadd.f32 %v1425_v55, %v3122_v25  ;;  %v1509_v13 = vmul.f32 %v3014_v56, %v2804_v52  ;;  %vm1877_vm1 = vweird.f32 %v2223_v20  ;;  %v4477_v29 = vld [vmem:[#allocation43_spill] sm:$0xff] }
 0x15a   :  { %v1800_v61 = vsel %vm3181_vm11, %v1799_v1, %v1795_v60  ;;  %v1874_v0 = vmul.f32 %v2223_v20, %v1873_v37  ;;  %v1964_v57 = vand.u32 2147483647, %v3195_v58  ;;  %v1751_v54 = vmul.f32 %v1748_v19, %v4476_v2  ;;  %vm1878_vm2 = vmor %vm1876_vm14, %vm1877_vm1 }
 0x15b   :  { %v1832_v12 = vmul.f32 %v1800_v61, %v3074_v33  ;;  %v1434_v8 = vadd.f32 %v1431_v7, %v1428_v40  ;;  %v1512_v35 = vadd.f32 %v1509_v13, %v1506_v27  ;;  %v1515_v25 = vmul.f32 %v3016_v30, %v2787_v45 }
 0x15c   :  { %v2225_v24 = vpop.eup %2224  ;;  %v1875_v31 = vadd.f32 %v2223_v20, %v1874_v0  ;;  %v1590_v18 = vmul.f32 %v3012_v28, %v2798_v50  ;;  %v1593_v6 = vmul.f32 %v3014_v56, %v2809_v53  ;;  %v1754_v1 = vadd.f32 %v1751_v54, %v1670_v39 }
 0x15d   :  { %v1956_v38 = vmul.f32 %v2225_v24, %v3195_v58  ;;  %v1966_v33 = vand.u32 2147483648, %v3195_v58  ;;  %v3236_v34 = vadd.f32 %v1434_v8, %v2849_v26  ;;  %v2227_v55 = vpop.eup %2226  ;;  %v1518_v48 = vadd.f32 %v1515_v25, %v1512_v35 }
 0x15e   :  { %v1879_v17 = vsel %vm1878_vm2, %v2223_v20, %v1875_v31  ;;  %v1596_v47 = vadd.f32 %v1593_v6, %v1590_v18  ;;  %v1599_v19 = vmul.f32 %v3016_v30, %v2801_v51  ;;  %v1835_v37 = vmul.f32 %v1832_v12, %v4477_v29  ;;  %v4478_v18 = vld [vmem:[#allocation23_spill] sm:$0xff] }
 0x15f   :  { %v1884_v42 = vsel %vm3203_vm15, %v1883_v59, %v1879_v17  ;;  %v1957_v7 = vsub.f32 1.0, %v1956_v38  ;;  %v3243_v27 = vadd.f32 1.0, %v2227_v55  ;;  %v2161_v60 = vmul.f32 -1.442695, %v3236_v34  ;;  %v4480_v17 = vld [vmem:[#allocation26_spill] sm:$0xff] }
 0x160   :  { %v1916_v39 = vmul.f32 %v1884_v42, %v3085_v32  ;;  %v3248_v40 = vadd.f32 %v1518_v48, %v4437_v11  ;;  %v1602_v20 = vadd.f32 %v1599_v19, %v1596_v47  ;;  %v1838_v13 = vadd.f32 %v1835_v37, %v1754_v1  ;;  %v4479_v1 = vld [vmem:[#allocation24_spill] sm:$0xff]  ;;  %v4481_v48 = vld [vmem:[#allocation27_spill] sm:$0xff] }
 0x161   :  { %v1958_v61 = vmul.f32 %v2225_v24, %v1957_v7  ;;  %vm1961_vm3 = vweird.f32 %v2225_v24  ;;  %2228 = vrcp.f32 %v3243_v27  ;;  %v3253_v22 = vadd.f32 %v3007_v62, %v3059_v23 }
 0x162   :  { %vm1960_vm4 = vweird.f32 %v3195_v58  ;;  %2230 = vpow2.f32 %v2161_v60  ;;  %v2164_v32 = vmul.f32 -1.442695, %v3248_v40  ;;  %v1919_v59 = vmul.f32 %v1916_v39, %v2931_v46  ;;  %v4482_v39 = vld [vmem:[#allocation25_spill] sm:$0xff] }
 0x163   :  { %v1959_v0 = vadd.f32 %v2225_v24, %v1958_v61  ;;  %vm1965_vm5 = vcmp.eq.f32.partialorder %v1964_v57, 8.507059e+37  ;;  %v3259_v54 = vadd.f32 %v1602_v20, %v4443_v14  ;;  %vm1962_vm6 = vmor %vm1960_vm4, %vm1961_vm3  ;;  %v1967_v12 = vor.u32 1.1754944e-38, %v1966_v33 }
 0x164   :  { %2232 = vpow2.f32 %v2164_v32  ;;  %v1674_v8 = vmul.f32 %v3012_v28, %v4438_v63  ;;  %v1677_v62 = vmul.f32 %v3014_v56, %v4439_v5  ;;  %v1922_v23 = vadd.f32 %v1919_v59, %v1838_v13  ;;  %v4483_v13 = vld [vmem:[#allocation52_spill] sm:$0xff] }
 0x165   :  { %v1963_v58 = vsel %vm1962_vm6, %v2225_v24, %v1959_v0  ;;  %v2167_v35 = vmul.f32 -1.442695, %v3259_v54  ;;  %v1683_v31 = vmul.f32 %v3016_v30, %v4444_v9  ;;  %v1758_v6 = vmul.f32 %v3012_v28, %v4478_v18 }
 0x166   :  { %v1968_v57 = vsel %vm1965_vm5, %v1967_v12, %v1963_v58  ;;  %v1680_v25 = vadd.f32 %v1677_v62, %v1674_v8  ;;  %v1761_v38 = vmul.f32 %v3014_v56, %v4479_v1  ;;  %v1842_v24 = vmul.f32 %v3012_v28, %v4480_v17  ;;  %v4484_v8 = vld [vmem:[#allocation34_spill] sm:$0xff] }
 0x167   :  { %v2229_v33 = vpop.eup %2228  ;;  %v2000_v55 = vmul.f32 %v1968_v57, %v3115_v4  ;;  %2234 = vpow2.f32 %v2167_v35  ;;  %v1845_v47 = vmul.f32 %v3014_v56, %v4481_v48  ;;  %v1767_v60 = vmul.f32 %v3016_v30, %v4482_v39 }
 0x168   :  { %v2231_v19 = vpop.eup %2230  ;;  %v1386_v37 = vmul.f32 %v2229_v33, %v3243_v27  ;;  %v1686_v42 = vadd.f32 %v1683_v31, %v1680_v25  ;;  %v1764_v7 = vadd.f32 %v1761_v38, %v1758_v6  ;;  %v3281_v20 = vand.u32 2147483647, %v3079_v15  ;;  %v4485_v15 = vld [vmem:[#allocation28_spill] sm:$0xff] }
 0x169   :  { %v2003_v4 = vmul.f32 %v2000_v55, %v4483_v13  ;;  %v3284_v61 = vadd.f32 1.0, %v2231_v19  ;;  %v1848_v32 = vadd.f32 %v1845_v47, %v1842_v24  ;;  %v1394_v12 = vand.u32 2147483647, %v3243_v27  ;;  %v4486_v24 = vld [vmem:[#allocation54_spill] sm:$0xff]  ;;  %v4487_v19 = vld [vmem:[#allocation35_spill] sm:$0xff] }
 0x16a   :  { %v2233_v59 = vpop.eup %2232  ;;  %v1387_v0 = vsub.f32 1.0, %v1386_v37  ;;  %v3288_v62 = vadd.f32 %v1686_v42, %v4484_v8  ;;  %v1770_v58 = vadd.f32 %v1767_v60, %v1764_v7  ;;  %v1396_v31 = vand.u32 2147483648, %v3243_v27 }
 0x16b   :  { %v2006_v35 = vadd.f32 %v2003_v4, %v1922_v23  ;;  %2236 = vrcp.f32 %v3284_v61  ;;  %v1851_v57 = vmul.f32 %v3016_v30, %v4485_v15  ;;  %vm1391_vm7 = vweird.f32 %v2229_v33  ;;  %v4488_v4 = vld [vmem:[#allocation44_spill] sm:$0xff] }
 0x16c   :  { %v1388_v25 = vmul.f32 %v2229_v33, %v1387_v0  ;;  %v3294_v6 = vadd.f32 1.0, %v2233_v59  ;;  %v2170_v38 = vmul.f32 -1.442695, %v3288_v62  ;;  %vm1390_vm8 = vweird.f32 %v3243_v27 }
 0x16d   :  { %v2235_v55 = vpop.eup %2234  ;;  %v2009_v47 = vadd.f32 %v2006_v35, %v4486_v24  ;;  %v3300_v23 = vadd.f32 %v1770_v58, %v4487_v19  ;;  %v1854_v37 = vadd.f32 %v1851_v57, %v1848_v32  ;;  %v1475_v7 = vand.u32 2147483647, %v3284_v61  ;;  %vm1392_vm9 = vmor %vm1390_vm8, %vm1391_vm7  ;;  %v3308_v35 = vpop.permute.xlu0 %1168  ;;  %v4490_v58 = vld [vmem:[#allocation36_spill] sm:$0xff] }
 0x16e   :  { %v1389_v42 = vadd.f32 %v2229_v33, %v1388_v25  ;;  %v1477_v60 = vand.u32 2147483648, %v3284_v61  ;;  %2238 = vrcp.f32 %v3294_v6  ;;  %vm1395_vm10 = vcmp.eq.f32.partialorder %v1394_v12, 8.507059e+37  ;;  %4489 = vst [vmem:[#allocation42_spill] sm:$0xff] %v3308_v35 }
 0x16f   :  { %v2012_v59 = vadd.f32 %v2009_v47, %v4488_v4  ;;  %v1397_v0 = vor.u32 1.1754944e-38, %v1396_v31  ;;  %v3306_v15 = vadd.f32 1.0, %v2235_v55  ;;  %2240 = vpow2.f32 %v2170_v38  ;;  %v4491_v47 = vld [vmem:[#allocation29_spill] sm:$0xff] }
 0x170   :  { %v1393_v27 = vsel %vm1392_vm9, %v2229_v33, %v1389_v42  ;;  %v2173_v32 = vmul.f32 -1.442695, %v3300_v23  ;;  %v3312_v57 = vadd.f32 %v1854_v37, %v4490_v58  ;;  %vm1471_vm11 = vweird.f32 %v3284_v61 }
 0x171   :  { %v2237_v25 = vpop.eup %2236  ;;  %v2015_v24 = vmul.f32 %v2012_v59, %v3308_v35  ;;  %v1398_v19 = vsel %vm1395_vm10, %v1397_v0, %v1393_v27  ;;  %v1926_v12 = vmul.f32 %v3012_v28, %v4491_v47  ;;  %vm3319_vm12 = vcmp.eq.f32.partialorder %v1475_v7, 8.507059e+37  ;;  %v4494_v0 = vld [vmem:[#allocation32_spill] sm:$0xff]  ;;  %v4495_v28 = vld [vmem:[#allocation37_spill] sm:$0xff] }
 0x172   :  { %v1467_v31 = vmul.f32 %v2237_v25, %v3284_v61  ;;  %v1478_v33 = vor.u32 1.1754944e-38, %v1477_v60  ;;  %2242 = vrcp.f32 %v3306_v15  ;;  %vm1555_vm13 = vweird.f32 %v3294_v6 }
 0x173   :  { %2021 = vrot.lane.b32.xlu0 %v2015_v24, %s2431_s10  ;;  %v1559_v38 = vand.u32 2147483647, %v3294_v6  ;;  %v1561_v37 = vand.u32 2147483648, %v3294_v6  ;;  %2244 = vpow2.f32 %v2173_v32  ;;  %v1416_v4 = vmul.f32 %v1398_v19, %v3178_v41 }
 0x174   :  { %v2239_v42 = vpop.eup %2238  ;;  %v1468_v7 = vsub.f32 1.0, %v1467_v31  ;;  %v2176_v59 = vmul.f32 -1.442695, %v3312_v57  ;;  %v1929_v60 = vmul.f32 %v3014_v56, %v4494_v0  ;;  %vm1472_vm14 = vweird.f32 %v2237_v25 }
 0x175   :  { %v1551_v27 = vmul.f32 %v2239_v42, %v3294_v6  ;;  %v1643_v24 = vand.u32 2147483647, %v3306_v15  ;;  %v1645_v35 = vand.u32 2147483648, %v3306_v15  ;;  %v2241_v58 = vpop.eup %2240  ;;  %v1935_v41 = vmul.f32 %v3016_v30, %v4495_v28  ;;  %vm1473_vm1 = vmor %vm1471_vm11, %vm1472_vm14 }
 0x176   :  { %v1469_v47 = vmul.f32 %v2237_v25, %v1468_v7  ;;  %2246 = vpow2.f32 %v2176_v59  ;;  %v1932_v32 = vadd.f32 %v1929_v60, %v1926_v12  ;;  %vm3337_vm15 = vcmp.eq.f32.partialorder %v1559_v38, 8.507059e+37 }
 0x177   :  { %v1552_v19 = vsub.f32 1.0, %v1551_v27  ;;  %v1562_v56 = vor.u32 1.1754944e-38, %v1561_v37  ;;  %v3341_v0 = vadd.f32 1.0, %v2241_v58  ;;  %v1419_v13 = vmul.f32 %v1416_v4, %v4468_v36  ;;  %v4500_v37 = vld [vmem:[#allocation13_spill] sm:$0xff] }
 0x178   :  { %v2243_v17 = vpop.eup %2242  ;;  %v1470_v48 = vadd.f32 %v2237_v25, %v1469_v47  ;;  %vm1639_vm0 = vweird.f32 %v3306_v15  ;;  %v1938_v7 = vadd.f32 %v1935_v41, %v1932_v32  ;;  %vm1556_vm2 = vweird.f32 %v2239_v42  ;;  %v4501_v4 = vld [vmem:[#allocation57_spill] sm:$0xff] }
 0x179   :  { %v2245_v59 = vpop.eup %2244  ;;  %v1553_v30 = vmul.f32 %v2239_v42, %v1552_v19  ;;  %v1635_v12 = vmul.f32 %v2243_v17, %v3306_v15  ;;  %2248 = vrcp.f32 %v3341_v0  ;;  %vm3350_vm3 = vcmp.eq.f32.partialorder %v1643_v24, 8.507059e+37  ;;  %vm1557_vm4 = vmor %vm1555_vm13, %vm1556_vm2 }
 0x17a   :  { %v1474_v58 = vsel %vm1473_vm1, %v2237_v25, %v1470_v48  ;;  %v1646_v47 = vor.u32 1.1754944e-38, %v1645_v35  ;;  %v1342_v60 = vmul.f32 %v4501_v4, %v4500_v37  ;;  %v3358_v41 = vadd.f32 1.0, %v2245_v59  ;;  %v4502_v48 = vld [vmem:[#allocation38_spill] sm:$0xff]  ;;  %v4503_v35 = vld [vmem:[#allocation17_spill] sm:$0xff] }
 0x17b   :  { %v1479_v27 = vsel %vm3319_vm12, %v1478_v33, %v1474_v58  ;;  %v1554_v61 = vadd.f32 %v2239_v42, %v1553_v30  ;;  %v1636_v32 = vsub.f32 1.0, %v1635_v12  ;;  %v3364_v25 = vadd.f32 %v1938_v7, %v4502_v48  ;;  %v4504_v37 = vld [vmem:[#allocation14_spill] sm:$0xff] }
 0x17c   :  { %v2247_v19 = vpop.eup %2246  ;;  %v1497_v36 = vmul.f32 %v1479_v27, %v3236_v34  ;;  %v1345_v24 = vmul.f32 %v3281_v20, %v4503_v35  ;;  %v1351_v55 = vmul.f32 %v3253_v22, %v4504_v37  ;;  %vm1640_vm5 = vweird.f32 %v2243_v17 }
 0x17d   :  { %v1558_v33 = vsel %vm1557_vm4, %v2239_v42, %v1554_v61  ;;  %v1637_v30 = vmul.f32 %v2243_v17, %v1636_v32  ;;  %2250 = vrcp.f32 %v3358_v41  ;;  %v1727_v6 = vand.u32 2147483647, %v3341_v0  ;;  %vm3382_vm6 = vmor %vm1639_vm0, %vm1640_vm5  ;;  %v4507_v32 = vld [vmem:[#allocation16_spill] sm:$0xff] }
 0x17e   :  { %v1500_v59 = vmul.f32 %v1497_v36, %v4469_v16  ;;  %v1563_v34 = vsel %vm3337_vm15, %v1562_v56, %v1558_v33  ;;  %v1729_v7 = vand.u32 2147483648, %v3341_v0  ;;  %v3377_v48 = vadd.f32 1.0, %v2247_v19 }
 0x17f   :  { %v2249_v12 = vpop.eup %2248  ;;  %v1581_v58 = vmul.f32 %v1563_v34, %v3248_v40  ;;  %v1638_v27 = vadd.f32 %v2243_v17, %v1637_v30  ;;  %v2179_v42 = vmul.f32 -1.442695, %v3364_v25  ;;  %v1811_v31 = vand.u32 2147483647, %v3358_v41 }
 0x180   :  { %v1719_v36 = vmul.f32 %v2249_v12, %v3341_v0  ;;  %v1813_v56 = vand.u32 2147483648, %v3358_v41  ;;  %v1423_v40 = vmul.f32 %v4501_v4, %v4507_v32  ;;  %v1503_v33 = vadd.f32 %v1500_v59, %v1419_v13 }
 0x181   :  { %v1642_v19 = vsel %vm3382_vm6, %v2243_v17, %v1638_v27  ;;  %vm1723_vm7 = vweird.f32 %v3341_v0  ;;  %2252 = vrcp.f32 %v3377_v48  ;;  %vm3395_vm8 = vcmp.eq.f32.partialorder %v1727_v6, 8.507059e+37 }
 0x182   :  { %v1720_v15 = vsub.f32 1.0, %v1719_v36  ;;  %v1730_v34 = vor.u32 1.1754944e-38, %v1729_v7  ;;  %vm1807_vm9 = vweird.f32 %v3358_v41  ;;  %v1584_v37 = vmul.f32 %v1581_v58, %v2908_v10 }
 0x183   :  { %v2251_v16 = vpop.eup %2250  ;;  %v1647_v13 = vsel %vm3350_vm3, %v1646_v47, %v1642_v19  ;;  %vm1724_vm10 = vweird.f32 %v2249_v12  ;;  %2254 = vpow2.f32 %v2179_v42  ;;  %vm3404_vm11 = vcmp.eq.f32.partialorder %v1811_v31, 8.507059e+37 }
 0x184   :  { %v1721_v17 = vmul.f32 %v2249_v12, %v1720_v15  ;;  %v1803_v59 = vmul.f32 %v2251_v16, %v3358_v41  ;;  %v1814_v6 = vor.u32 1.1754944e-38, %v1813_v56  ;;  %v1587_v61 = vadd.f32 %v1584_v37, %v1503_v33  ;;  %vm1725_vm12 = vmor %vm1723_vm7, %vm1724_vm10 }
 0x185   :  { %v1895_v7 = vand.u32 2147483647, %v3377_v48  ;;  %v1348_v36 = vadd.f32 %v1345_v24, %v1342_v60  ;;  %v1426_v58 = vmul.f32 %v3281_v20, %v2793_v49  ;;  %v1665_v38 = vmul.f32 %v1647_v13, %v3259_v54 }
 0x186   :  { %v1722_v47 = vadd.f32 %v2249_v12, %v1721_v17  ;;  %v1804_v19 = vsub.f32 1.0, %v1803_v59  ;;  %v1897_v42 = vand.u32 2147483648, %v3377_v48  ;;  %v1432_v37 = vmul.f32 %v3253_v22, %v2781_v43 }
 0x187   :  { %v2253_v15 = vpop.eup %2252  ;;  %v1354_v31 = vadd.f32 %v1351_v55, %v1348_v36  ;;  %v1429_v56 = vadd.f32 %v1426_v58, %v1423_v40  ;;  %v1510_v60 = vmul.f32 %v3281_v20, %v2804_v52  ;;  %vm1808_vm13 = vweird.f32 %v2251_v16 }
 0x188   :  { %v1726_v24 = vsel %vm1725_vm12, %v2249_v12, %v1722_v47  ;;  %v1805_v33 = vmul.f32 %v2251_v16, %v1804_v19  ;;  %v1887_v54 = vmul.f32 %v2253_v15, %v3377_v48  ;;  %v1507_v40 = vmul.f32 %v4501_v4, %v2784_v44  ;;  %vm1809_vm14 = vmor %vm1807_vm9, %vm1808_vm13 }
 0x189   :  { %v2255_v13 = vpop.eup %2254  ;;  %v1731_v17 = vsel %vm3395_vm8, %v1730_v34, %v1726_v24  ;;  %v3424_v0 = vadd.f32 %v1354_v31, %v2846_v21  ;;  %v1435_v55 = vadd.f32 %v1432_v37, %v1429_v56  ;;  %v1668_v59 = vmul.f32 %v1665_v38, %v2911_v3  ;;  %v4512_v38 = vld [vmem:[#allocation45_spill] sm:$0xff]  ;;  %v4513_v37 = vld [vmem:[#allocation20_spill] sm:$0xff] }
 0x18a   :  { %v1806_v36 = vadd.f32 %v2251_v16, %v1805_v33  ;;  %v1888_v58 = vsub.f32 1.0, %v1887_v54  ;;  %v3429_v12 = vadd.f32 1.0, %v2255_v13  ;;  %v1749_v47 = vmul.f32 %v1731_v17, %v3288_v62 }
 0x18b   :  { %v2159_v30 = vmul.f32 -1.442695, %v3424_v0  ;;  %v3436_v34 = vadd.f32 %v1435_v55, %v2849_v26  ;;  %v1513_v19 = vadd.f32 %v1510_v60, %v1507_v40  ;;  %vm1892_vm15 = vweird.f32 %v2253_v15 }
 0x18c   :  { %v1810_v31 = vsel %vm1809_vm14, %v2251_v16, %v1806_v36  ;;  %v1889_v56 = vmul.f32 %v2253_v15, %v1888_v58  ;;  %2256 = vrcp.f32 %v3429_v12  ;;  %v3441_v24 = vadd.f32 %v4513_v37, %v4512_v38 }
 0x18d   :  { %v1671_v33 = vadd.f32 %v1668_v59, %v1587_v61  ;;  %v1815_v62 = vsel %vm3404_vm11, %v1814_v6, %v1810_v31  ;;  %v1516_v41 = vmul.f32 %v3253_v22, %v2787_v45  ;;  %vm1891_vm0 = vweird.f32 %v3377_v48 }
 0x18e   :  { %4514 = vst [vmem:[#allocation44_spill] sm:$0xff] %v3441_v24  ;;  %v1890_v54 = vadd.f32 %v2253_v15, %v1889_v56  ;;  %vm1896_vm1 = vcmp.eq.f32.partialorder %v1895_v7, 8.507059e+37  ;;  %2258 = vpow2.f32 %v2159_v30  ;;  %v1752_v16 = vmul.f32 %v1749_v47, %v4476_v2  ;;  %vm1893_vm2 = vmor %vm1891_vm0, %vm1892_vm15 }
 0x18f   :  { %v1898_v60 = vor.u32 1.1754944e-38, %v1897_v42  ;;  %v2162_v13 = vmul.f32 -1.442695, %v3436_v34  ;;  %v1519_v17 = vadd.f32 %v1516_v41, %v1513_v19  ;;  %v1833_v61 = vmul.f32 %v1815_v62, %v3300_v23 }
 0x190   :  { %v1894_v55 = vsel %vm1893_vm2, %v2253_v15, %v1890_v54  ;;  %v1591_v27 = vmul.f32 %v4501_v4, %v2798_v50  ;;  %v1594_v6 = vmul.f32 %v3281_v20, %v2809_v53  ;;  %v1755_v40 = vadd.f32 %v1752_v16, %v1671_v33 }
 0x191   :  { %v1899_v48 = vsel %vm1896_vm1, %v1898_v60, %v1894_v55  ;;  %2260 = vpow2.f32 %v2162_v13  ;;  %v3456_v7 = vadd.f32 %v1519_v17, %v4437_v11  ;;  %v1600_v36 = vmul.f32 %v3253_v22, %v2801_v51 }
 0x192   :  { %v2257_v59 = vpop.eup %2256  ;;  %v1597_v42 = vadd.f32 %v1594_v6, %v1591_v27  ;;  %v1675_v23 = vmul.f32 %v4501_v4, %v4438_v63  ;;  %v1678_v15 = vmul.f32 %v3281_v20, %v4439_v5  ;;  %v1917_v58 = vmul.f32 %v1899_v48, %v3312_v57 }
 0x193   :  { %v1971_v47 = vmul.f32 %v2257_v59, %v3429_v12  ;;  %v1979_v30 = vand.u32 2147483647, %v3429_v12  ;;  %v2165_v19 = vmul.f32 -1.442695, %v3456_v7  ;;  %v1836_v56 = vmul.f32 %v1833_v61, %v4477_v29 }
 0x194   :  { %v2259_v31 = vpop.eup %2258  ;;  %v1603_v38 = vadd.f32 %v1600_v36, %v1597_v42  ;;  %v1681_v37 = vadd.f32 %v1678_v15, %v1675_v23  ;;  %v1684_v33 = vmul.f32 %v3253_v22, %v4444_v9  ;;  %v1981_v41 = vand.u32 2147483648, %v3429_v12  ;;  %v4515_v42 = vld [vmem:[#allocation46_spill] sm:$0xff]  ;;  %v4516_v36 = vld [vmem:[#allocation21_spill] sm:$0xff] }
 0x195   :  { %v1972_v62 = vsub.f32 1.0, %v1971_v47  ;;  %v3472_v54 = vadd.f32 1.0, %v2259_v31  ;;  %2262 = vpow2.f32 %v2165_v19  ;;  %v1839_v57 = vadd.f32 %v1836_v56, %v1755_v40 }
 0x196   :  { %v3475_v16 = vadd.f32 %v1603_v38, %v4443_v14  ;;  %v1687_v60 = vadd.f32 %v1684_v33, %v1681_v37  ;;  %v1762_v13 = vmul.f32 %v3281_v20, %v4479_v1  ;;  %v1920_v61 = vmul.f32 %v1917_v58, %v2931_v46  ;;  %v4534_v1 = vld [vmem:[#allocation32_spill] sm:$0xff] }
 0x197   :  { %v2261_v17 = vpop.eup %2260  ;;  %v1973_v55 = vmul.f32 %v2257_v59, %v1972_v62  ;;  %vm1976_vm3 = vweird.f32 %v2257_v59  ;;  %2264 = vrcp.f32 %v3472_v54  ;;  %v1759_v48 = vmul.f32 %v4501_v4, %v4478_v18 }
 0x198   :  { %v3481_v27 = vadd.f32 1.0, %v2261_v17  ;;  %v2168_v6 = vmul.f32 -1.442695, %v3475_v16  ;;  %v3485_v40 = vadd.f32 %v1687_v60, %v4484_v8  ;;  %v333_v23 = vadd.f32 %v4516_v36, %v4515_v42  ;;  %v4519_v42 = vld [vmem:[#allocation15_spill] sm:$0xff] }
 0x199   :  { %v1974_v15 = vadd.f32 %v2257_v59, %v1973_v55  ;;  %vm1975_vm4 = vweird.f32 %v3429_v12  ;;  %vm1980_vm5 = vcmp.eq.f32.partialorder %v1979_v30, 8.507059e+37  ;;  %v1923_v58 = vadd.f32 %v1920_v61, %v1839_v57  ;;  %v4517_v61 = vld [vmem:[#allocation27_spill] sm:$0xff] }
 0x19a   :  { %vm1977_vm6 = vmor %vm1975_vm4, %vm1976_vm3  ;;  %v1982_v47 = vor.u32 1.1754944e-38, %v1981_v41  ;;  %2266 = vrcp.f32 %v3481_v27  ;;  %v1765_v19 = vadd.f32 %v1762_v13, %v1759_v48  ;;  %v2171_v38 = vmul.f32 -1.442695, %v3485_v40  ;;  %v4518_v48 = vld [vmem:[#allocation48_spill] sm:$0xff] }
 0x19b   :  { %v2263_v31 = vpop.eup %2262  ;;  %v1978_v56 = vsel %vm1977_vm6, %v2257_v59, %v1974_v15  ;;  %2268 = vpow2.f32 %v2168_v6  ;;  %v1768_v37 = vmul.f32 %v3253_v22, %v4482_v39  ;;  %v1409_v62 = vand.u32 2147483647, %v3472_v54 }
 0x19c   :  { %v1983_v33 = vsel %vm1980_vm5, %v1982_v47, %v1978_v56  ;;  %v1411_v12 = vand.u32 2147483648, %v3472_v54  ;;  %v3498_v30 = vadd.f32 1.0, %v2263_v31  ;;  %v1490_v60 = vand.u32 2147483647, %v3481_v27 }
 0x19d   :  { %v3500_v57 = vpop.eup %2264  ;;  %v2001_v41 = vmul.f32 %v1983_v33, %v3364_v25  ;;  %v1492_v59 = vand.u32 2147483648, %v3481_v27  ;;  %2270 = vpow2.f32 %v2171_v38  ;;  %v1771_v17 = vadd.f32 %v1768_v37, %v1765_v19  ;;  %v4520_v25 = vld [vmem:[#allocation52_spill] sm:$0xff]  ;;  %v4521_v38 = vld [vmem:[#allocation26_spill] sm:$0xff] }
 0x19e   :  { %v1401_v13 = vmul.f32 %v3500_v57, %v3472_v54  ;;  %2272 = vrcp.f32 %v3498_v30  ;;  %v1846_v55 = vmul.f32 %v3281_v20, %v4517_v61  ;;  %v3510_v6 = vand.u32 2147483647, %v333_v23  ;;  %v4526_v61 = vld [vmem:[#allocation35_spill] sm:$0xff] }
 0x19f   :  { %v3514_v36 = vadd.f32 %v4519_v42, %v4518_v48  ;;  %v2004_v15 = vmul.f32 %v2001_v41, %v4520_v25  ;;  %vm1405_vm7 = vweird.f32 %v3472_v54  ;;  %v1412_v56 = vor.u32 1.1754944e-38, %v1411_v12 }
 0x1a0   :  { %v2267_v47 = vpop.eup %2266  ;;  %v1402_v31 = vsub.f32 1.0, %v1401_v13  ;;  %vm1486_vm8 = vweird.f32 %v3481_v27  ;;  %v1843_v19 = vmul.f32 %v4501_v4, %v4521_v38  ;;  %vm3521_vm9 = vcmp.eq.f32.partialorder %v1409_v62, 8.507059e+37  ;;  %v4527_v62 = vld [vmem:[#allocation54_spill] sm:$0xff] }
 0x1a1   :  { %v2269_v37 = vpop.eup %2268  ;;  %v2007_v33 = vadd.f32 %v2004_v15, %v1923_v58  ;;  %v1482_v48 = vmul.f32 %v2267_v47, %v3481_v27  ;;  %vm3526_vm10 = vcmp.eq.f32.partialorder %v1490_v60, 8.507059e+37  ;;  %v1493_v42 = vor.u32 1.1754944e-38, %v1492_v59 }
 0x1a2   :  { %v1403_v12 = vmul.f32 %v3500_v57, %v1402_v31  ;;  %v3531_v13 = vadd.f32 1.0, %v2269_v37  ;;  %v3534_v25 = vadd.f32 %v1771_v17, %v4526_v61  ;;  %v1849_v38 = vadd.f32 %v1846_v55, %v1843_v19  ;;  %v4528_v37 = vld [vmem:[#allocation28_spill] sm:$0xff] }
 0x1a3   :  { %v2271_v58 = vpop.eup %2270  ;;  %v2010_v15 = vadd.f32 %v2007_v33, %v4527_v62  ;;  %vm1406_vm11 = vweird.f32 %v3500_v57  ;;  %v1483_v46 = vsub.f32 1.0, %v1482_v48  ;;  %vm1570_vm12 = vweird.f32 %v3498_v30  ;;  %v4529_v55 = vld [vmem:[#allocation56_spill] sm:$0xff]  ;;  %v3549_v48 = vpop.permute.xlu1 %1173 }
 0x1a4   :  { %v3539_v60 = vpop.eup %2272  ;;  %v1404_v59 = vadd.f32 %v3500_v57, %v1403_v12  ;;  %v1574_v31 = vand.u32 2147483647, %v3498_v30  ;;  %2274 = vrcp.f32 %v3531_v13  ;;  %v1852_v17 = vmul.f32 %v3253_v22, %v4528_v37  ;;  %4530 = vst [vmem:[#allocation57_spill] sm:$0xff] %v3549_v48  ;;  %vm3553_vm14 = vmor %vm1405_vm7, %vm1406_vm11 }
 0x1a5   :  { %v2013_v19 = vadd.f32 %v2010_v15, %v4529_v55  ;;  %v1484_v61 = vmul.f32 %v2267_v47, %v1483_v46  ;;  %vm1487_vm13 = vweird.f32 %v2267_v47  ;;  %v1566_v33 = vmul.f32 %v3539_v60, %v3498_v30 }
 0x1a6   :  { %v1576_v62 = vand.u32 2147483648, %v3498_v30  ;;  %v3558_v8 = vadd.f32 1.0, %v2271_v58  ;;  %v2174_v37 = vmul.f32 -1.442695, %v3534_v25  ;;  %v1855_v15 = vadd.f32 %v1852_v17, %v1849_v38  ;;  %vm1488_vm15 = vmor %vm1486_vm8, %vm1487_vm13  ;;  %v4533_v58 = vld [vmem:[#allocation29_spill] sm:$0xff] }
 0x1a7   :  { %v2016_v46 = vmul.f32 %v2013_v19, %v3549_v48  ;;  %v1408_v55 = vsel %vm3553_vm14, %v3500_v57, %v1404_v59  ;;  %v1485_v39 = vadd.f32 %v2267_v47, %v1484_v61  ;;  %v1567_v18 = vsub.f32 1.0, %v1566_v33 }
 0x1a8   :  { %v1658_v54 = vand.u32 2147483647, %v3531_v13  ;;  %2276 = vrcp.f32 %v3558_v8  ;;  %v1927_v29 = vmul.f32 %v4501_v4, %v4533_v58  ;;  %v1930_v38 = vmul.f32 %v3281_v20, %v4534_v1  ;;  %v4537_v20 = vld [vmem:[#allocation36_spill] sm:$0xff] }
 0x1a9   :  { %2023 = vrot.lane.b32.xlu1 %v2016_v46, %s2431_s10  ;;  %v1489_v17 = vsel %vm1488_vm15, %v2267_v47, %v1485_v39  ;;  %v1568_v57 = vmul.f32 %v3539_v60, %v1567_v18  ;;  %vm1571_vm0 = vweird.f32 %v3539_v60  ;;  %vm3576_vm1 = vcmp.eq.f32.partialorder %v1574_v31, 8.507059e+37 }
 0x1aa   :  { %v2275_v61 = vpop.eup %2274  ;;  %v1413_v59 = vsel %vm3521_vm9, %v1412_v56, %v1408_v55  ;;  %v1494_v19 = vsel %vm3526_vm10, %v1493_v42, %v1489_v17  ;;  %2278 = vpow2.f32 %v2174_v37  ;;  %v3585_v33 = vadd.f32 %v1855_v15, %v4537_v20  ;;  %vm3592_vm2 = vmor %vm1570_vm12, %vm1571_vm0  ;;  %v4542_v55 = vld [vmem:[#allocation13_spill] sm:$0xff] }
 0x1ab   :  { %v1569_v39 = vadd.f32 %v3539_v60, %v1568_v57  ;;  %v1577_v18 = vor.u32 1.1754944e-38, %v1576_v62  ;;  %v1650_v47 = vmul.f32 %v2275_v61, %v3531_v13  ;;  %v1660_v31 = vand.u32 2147483648, %v3531_v13 }
 0x1ac   :  { %vm1654_vm3 = vweird.f32 %v3531_v13  ;;  %vm3597_vm4 = vcmp.eq.f32.partialorder %v1658_v54, 8.507059e+37  ;;  %v2177_v23 = vmul.f32 -1.442695, %v3585_v33  ;;  %v1933_v41 = vadd.f32 %v1930_v38, %v1927_v29 }
 0x1ad   :  { %v1417_v42 = vmul.f32 %v1413_v59, %v3424_v0  ;;  %v1498_v62 = vmul.f32 %v1494_v19, %v3436_v34  ;;  %v1573_v30 = vsel %vm3592_vm2, %v3539_v60, %v1569_v39  ;;  %v1651_v37 = vsub.f32 1.0, %v1650_v47  ;;  %v4543_v19 = vld [vmem:[#allocation14_spill] sm:$0xff] }
 0x1ae   :  { %v2277_v15 = vpop.eup %2276  ;;  %2280 = vpow2.f32 %v2177_v23  ;;  %v1936_v46 = vmul.f32 %v3253_v22, %v4495_v28  ;;  %v413_v54 = vmul.f32 %v4542_v55, %v3441_v24  ;;  %v418_v29 = vmul.f32 %v4503_v35, %v3510_v6  ;;  %v4546_v55 = vld [vmem:[#allocation38_spill] sm:$0xff] }
 0x1af   :  { %v1652_v38 = vmul.f32 %v2275_v61, %v1651_v37  ;;  %vm1655_vm5 = vweird.f32 %v2275_v61  ;;  %v1661_v0 = vor.u32 1.1754944e-38, %v1660_v31  ;;  %v1734_v34 = vmul.f32 %v2277_v15, %v3558_v8  ;;  %v4544_v37 = vld [vmem:[#allocation39_spill] sm:$0xff]  ;;  %v4545_v31 = vld [vmem:[#allocation40_spill] sm:$0xff] }
 0x1b0   :  { %v2279_v17 = vpop.eup %2278  ;;  %v1742_v60 = vand.u32 2147483647, %v3558_v8  ;;  %v1939_v57 = vadd.f32 %v1936_v46, %v1933_v41  ;;  %v421_v59 = vadd.f32 %v418_v29, %v413_v54  ;;  %v426_v39 = vmul.f32 %v4543_v19, %v3514_v36  ;;  %vm1656_vm6 = vmor %vm1654_vm3, %vm1655_vm5 }
 0x1b1   :  { %v1578_v22 = vsel %vm3576_vm1, %v1577_v18, %v1573_v30  ;;  %v1653_v47 = vadd.f32 %v2275_v61, %v1652_v38  ;;  %v1735_v12 = vsub.f32 1.0, %v1734_v34  ;;  %v3619_v23 = vadd.f32 1.0, %v2279_v17 }
 0x1b2   :  { %v1420_v48 = vmul.f32 %v1417_v42, %v4544_v37  ;;  %v1501_v35 = vmul.f32 %v1498_v62, %v4545_v31  ;;  %v3626_v41 = vadd.f32 %v1939_v57, %v4546_v55  ;;  %v429_v46 = vadd.f32 %v426_v39, %v421_v59 }
 0x1b3   :  { %v1657_v54 = vsel %vm1656_vm6, %v2275_v61, %v1653_v47  ;;  %v1736_v29 = vmul.f32 %v2277_v15, %v1735_v12  ;;  %2282 = vrcp.f32 %v3619_v23  ;;  %v509_v27 = vmul.f32 %v2793_v49, %v3510_v6 }
 0x1b4   :  { %v2281_v18 = vpop.eup %2280  ;;  %v1582_v30 = vmul.f32 %v1578_v22, %v3456_v7  ;;  %v1662_v42 = vsel %vm3597_vm4, %v1661_v0, %v1657_v54  ;;  %vm1739_vm7 = vweird.f32 %v2277_v15  ;;  %v1744_v13 = vand.u32 2147483648, %v3558_v8  ;;  %v4549_v22 = vld [vmem:[#allocation10_spill] sm:$0xff] }
 0x1b5   :  { %v1737_v62 = vadd.f32 %v2277_v15, %v1736_v29  ;;  %v3635_v38 = vadd.f32 1.0, %v2281_v18  ;;  %v2180_v61 = vmul.f32 -1.442695, %v3626_v41  ;;  %v504_v34 = vmul.f32 %v4507_v32, %v3441_v24 }
 0x1b6   :  { %v1504_v17 = vadd.f32 %v1501_v35, %v1420_v48  ;;  %vm1738_vm8 = vweird.f32 %v3558_v8  ;;  %v1828_v57 = vand.u32 2147483648, %v3619_v23  ;;  %v3643_v7 = vadd.f32 %v2846_v21, %v429_v46  ;;  %v4550_v35 = vld [vmem:[#allocation53_spill] sm:$0xff] }
 0x1b7   :  { %v1666_v56 = vmul.f32 %v1662_v42, %v3475_v16  ;;  %vm3646_vm9 = vmor %vm1738_vm8, %vm1739_vm7  ;;  %v1826_v59 = vand.u32 2147483647, %v3619_v23  ;;  %2284 = vrcp.f32 %v3635_v38  ;;  %v512_v39 = vadd.f32 %v509_v27, %v504_v34 }
 0x1b8   :  { %v331_v48 = vadd.f32 %v4550_v35, %v4549_v22  ;;  %v1585_v8 = vmul.f32 %v1582_v30, %v2908_v10  ;;  %v1741_v47 = vsel %vm3646_vm9, %v2277_v15, %v1737_v62  ;;  %2286 = vpow2.f32 %v2180_v61 }
 0x1b9   :  { %v2283_v12 = vpop.eup %2282  ;;  %vm1743_vm10 = vcmp.eq.f32.partialorder %v1742_v60, 8.507059e+37  ;;  %v1745_v16 = vor.u32 1.1754944e-38, %v1744_v13  ;;  %v2088_v46 = vmul.f32 -1.442695, %v3643_v7  ;;  %v517_v54 = vmul.f32 %v2781_v43, %v3514_v36 }
 0x1ba   :  { %v1588_v29 = vadd.f32 %v1585_v8, %v1504_v17  ;;  %v1818_v27 = vmul.f32 %v2283_v12, %v3619_v23  ;;  %vm1822_vm11 = vweird.f32 %v3619_v23  ;;  %v1829_v18 = vor.u32 1.1754944e-38, %v1828_v57 }
 0x1bb   :  { %v1669_v30 = vmul.f32 %v1666_v56, %v2911_v3  ;;  %v1746_v42 = vsel %vm1743_vm10, %v1745_v16, %v1741_v47  ;;  %vm3663_vm12 = vcmp.eq.f32.partialorder %v1826_v59, 8.507059e+37  ;;  %2288 = vpow2.f32 %v2088_v46 }
 0x1bc   :  { %v520_v60 = vadd.f32 %v517_v54, %v512_v39  ;;  %v1819_v13 = vsub.f32 1.0, %v1818_v27  ;;  %vm1906_vm13 = vweird.f32 %v3635_v38  ;;  %v1910_v62 = vand.u32 2147483647, %v3635_v38 }
 0x1bd   :  { %v598_v61 = vmul.f32 %v2784_v44, %v3441_v24  ;;  %v603_v34 = vmul.f32 %v2804_v52, %v3510_v6  ;;  %v2285_v17 = vpop.eup %2284  ;;  %vm1823_vm14 = vweird.f32 %v2283_v12  ;;  %v1912_v57 = vand.u32 2147483648, %v3635_v38 }
 0x1be   :  { %v3675_v56 = vadd.f32 %v2849_v26, %v520_v60  ;;  %v697_v0 = vmul.f32 %v2809_v53, %v3510_v6  ;;  %v2287_v59 = vpop.eup %2286  ;;  %v1820_v39 = vmul.f32 %v2283_v12, %v1819_v13  ;;  %v1902_v22 = vmul.f32 %v2285_v17, %v3635_v38  ;;  %vm1824_vm15 = vmor %vm1822_vm11, %vm1823_vm14 }
 0x1bf   :  { %v606_v35 = vadd.f32 %v603_v34, %v598_v61  ;;  %v611_v8 = vmul.f32 %v2787_v45, %v3514_v36  ;;  %v1672_v47 = vadd.f32 %v1669_v30, %v1588_v29  ;;  %v3682_v16 = vadd.f32 1.0, %v2287_v59 }
 0x1c0   :  { %v2095_v46 = vmul.f32 -1.442695, %v3675_v56  ;;  %v692_v54 = vmul.f32 %v2798_v50, %v3441_v24  ;;  %v1750_v27 = vmul.f32 %v1746_v42, %v3485_v40  ;;  %v1821_v60 = vadd.f32 %v2283_v12, %v1820_v39 }
 0x1c1   :  { %v1903_v53 = vsub.f32 1.0, %v1902_v22  ;;  %v614_v26 = vadd.f32 %v611_v8, %v606_v35  ;;  %v2289_v13 = vpop.eup %2288  ;;  %vm1907_vm0 = vweird.f32 %v2285_v17  ;;  %2290 = vrcp.f32 %v3682_v16 }
 0x1c2   :  { %v700_v29 = vadd.f32 %v697_v0, %v692_v54  ;;  %v791_v30 = vmul.f32 %v4439_v5, %v3510_v6  ;;  %v1825_v61 = vsel %vm1824_vm15, %v2283_v12, %v1821_v60  ;;  %v3694_v59 = vadd.f32 1.0, %v2289_v13  ;;  %vm3714_vm1 = vmor %vm1906_vm13, %vm1907_vm0 }
 0x1c3   :  { %v1904_v34 = vmul.f32 %v2285_v17, %v1903_v53  ;;  %2292 = vpow2.f32 %v2095_v46  ;;  %v1994_v40 = vand.u32 2147483647, %v3682_v16  ;;  %v3698_v42 = vadd.f32 %v4437_v11, %v614_v26  ;;  %v4559_v26 = vld [vmem:[#allocation23_spill] sm:$0xff] }
 0x1c4   :  { %v705_v23 = vmul.f32 %v2801_v51, %v3514_v36  ;;  %v786_v39 = vmul.f32 %v4438_v63, %v3441_v24  ;;  %v1830_v0 = vsel %vm3663_vm12, %v1829_v18, %v1825_v61  ;;  %v1996_v53 = vand.u32 2147483648, %v3682_v16 }
 0x1c5   :  { %v1905_v22 = vadd.f32 %v2285_v17, %v1904_v34  ;;  %2294 = vrcp.f32 %v3694_v59  ;;  %v3708_v12 = vand.u32 2147483647, %v331_v48  ;;  %v1753_v35 = vmul.f32 %v1750_v27, %v4476_v2 }
 0x1c6   :  { %v2103_v8 = vmul.f32 -1.442695, %v3698_v42  ;;  %v708_v15 = vadd.f32 %v705_v23, %v700_v29  ;;  %vm1911_vm2 = vcmp.eq.f32.partialorder %v1910_v62, 8.507059e+37  ;;  %v1913_v46 = vor.u32 1.1754944e-38, %v1912_v57 }
 0x1c7   :  { %v1909_v18 = vsel %vm3714_vm1, %v2285_v17, %v1905_v22  ;;  %v794_v54 = vadd.f32 %v791_v30, %v786_v39  ;;  %v2291_v48 = vpop.eup %2290  ;;  %v1756_v60 = vadd.f32 %v1753_v35, %v1672_v47  ;;  %v1834_v27 = vmul.f32 %v1830_v0, %v3534_v25  ;;  %v4557_v0 = vld [vmem:[#allocation24_spill] sm:$0xff]  ;;  %v4558_v22 = vld [vmem:[#allocation43_spill] sm:$0xff] }
 0x1c8   :  { %2296 = vpow2.f32 %v2103_v8  ;;  %v799_v38 = vmul.f32 %v4444_v9, %v3514_v36  ;;  %v1986_v61 = vmul.f32 %v2291_v48, %v3682_v16  ;;  %vm1990_vm3 = vweird.f32 %v3682_v16 }
 0x1c9   :  { %v2293_v13 = vpop.eup %2292  ;;  %vm3726_vm4 = vcmp.eq.f32.partialorder %v1994_v40, 8.507059e+37  ;;  %v1997_v62 = vor.u32 1.1754944e-38, %v1996_v53  ;;  %v1914_v17 = vsel %vm1911_vm2, %v1913_v46, %v1909_v18  ;;  %v3733_v47 = vadd.f32 %v4443_v14, %v708_v15  ;;  %v4560_v46 = vld [vmem:[#allocation25_spill] sm:$0xff] }
 0x1ca   :  { %v3730_v57 = vadd.f32 1.0, %v2293_v13  ;;  %v802_v25 = vadd.f32 %v799_v38, %v794_v54  ;;  %v1987_v34 = vsub.f32 1.0, %v1986_v61  ;;  %v486_v23 = vand.u32 2147483647, %v3694_v59 }
 0x1cb   :  { %v2295_v30 = vpop.eup %2294  ;;  %v488_v39 = vand.u32 2147483648, %v3694_v59  ;;  %v885_v40 = vmul.f32 %v4557_v0, %v3510_v6  ;;  %v1837_v35 = vmul.f32 %v1834_v27, %v4558_v22  ;;  %v880_v8 = vmul.f32 %v4559_v26, %v3441_v24  ;;  %v4561_v0 = vld [vmem:[#allocation34_spill] sm:$0xff] }
 0x1cc   :  { %v478_v53 = vmul.f32 %v2295_v30, %v3694_v59  ;;  %2298 = vrcp.f32 %v3730_v57  ;;  %v1918_v15 = vmul.f32 %v1914_v17, %v3585_v33  ;;  %v1988_v18 = vmul.f32 %v2291_v48, %v1987_v34 }
 0x1cd   :  { %vm1991_vm5 = vweird.f32 %v2291_v48  ;;  %v893_v54 = vmul.f32 %v4560_v46, %v3514_v36  ;;  %v2111_v61 = vmul.f32 -1.442695, %v3733_v47  ;;  %v3749_v27 = vadd.f32 %v4561_v0, %v802_v25 }
 0x1ce   :  { %v2297_v38 = vpop.eup %2296  ;;  %v479_v13 = vsub.f32 1.0, %v478_v53  ;;  %v888_v22 = vadd.f32 %v885_v40, %v880_v8  ;;  %v1840_v14 = vadd.f32 %v1837_v35, %v1756_v60  ;;  %v1989_v9 = vadd.f32 %v2291_v48, %v1988_v18  ;;  %vm1992_vm7 = vmor %vm1990_vm3, %vm1991_vm5  ;;  %v4562_v53 = vld [vmem:[#allocation47_spill] sm:$0xff] }
 0x1cf   :  { %vm483_vm6 = vweird.f32 %v2295_v30  ;;  %v3751_v11 = vadd.f32 1.0, %v2297_v38  ;;  %2300 = vpow2.f32 %v2111_v61  ;;  %v2119_v17 = vmul.f32 -1.442695, %v3749_v27 }
 0x1d0   :  { %v480_v33 = vmul.f32 %v2295_v30, %v479_v13  ;;  %v896_v34 = vadd.f32 %v893_v54, %v888_v22  ;;  %v1921_v46 = vmul.f32 %v1918_v15, %v4562_v53  ;;  %v1993_v26 = vsel %vm1992_vm7, %v2291_v48, %v1989_v9  ;;  %v4570_v54 = vld [vmem:[#allocation27_spill] sm:$0xff] }
 0x1d1   :  { %vm482_vm8 = vweird.f32 %v3694_v59  ;;  %2302 = vrcp.f32 %v3751_v11  ;;  %v1998_v25 = vsel %vm3726_vm4, %v1997_v62, %v1993_v26  ;;  %v577_v16 = vand.u32 2147483647, %v3730_v57 }
 0x1d2   :  { %v2299_v60 = vpop.eup %2298  ;;  %v481_v40 = vadd.f32 %v2295_v30, %v480_v33  ;;  %2304 = vpow2.f32 %v2119_v17  ;;  %v1924_v35 = vadd.f32 %v1921_v46, %v1840_v14  ;;  %v2002_v8 = vmul.f32 %v1998_v25, %v3626_v41  ;;  %vm3764_vm9 = vmor %vm482_vm8, %vm483_vm6  ;;  %v4567_v14 = vld [vmem:[#allocation35_spill] sm:$0xff]  ;;  %v4568_v41 = vld [vmem:[#allocation52_spill] sm:$0xff] }
 0x1d3   :  { %vm3768_vm10 = vcmp.eq.f32.partialorder %v486_v23, 8.507059e+37  ;;  %v569_v59 = vmul.f32 %v2299_v60, %v3730_v57  ;;  %v489_v29 = vor.u32 1.1754944e-38, %v488_v39  ;;  %v579_v62 = vand.u32 2147483648, %v3730_v57  ;;  %v4569_v46 = vld [vmem:[#allocation26_spill] sm:$0xff] }
 0x1d4   :  { %v485_v48 = vsel %vm3764_vm9, %v2295_v30, %v481_v40  ;;  %v3777_v26 = vadd.f32 %v4567_v14, %v896_v34  ;;  %v2005_v15 = vmul.f32 %v2002_v8, %v4568_v41  ;;  %v974_v23 = vmul.f32 %v4569_v46, %v3441_v24  ;;  %v4574_v46 = vld [vmem:[#allocation28_spill] sm:$0xff] }
 0x1d5   :  { %v570_v18 = vsub.f32 1.0, %v569_v59  ;;  %v979_v38 = vmul.f32 %v4570_v54, %v3510_v6  ;;  %v2301_v13 = vpop.eup %2300  ;;  %vm573_vm11 = vweird.f32 %v3730_v57  ;;  %vm574_vm12 = vweird.f32 %v2299_v60 }
 0x1d6   :  { %vm3785_vm13 = vcmp.eq.f32.partialorder %v577_v16, 8.507059e+37  ;;  %v2127_v39 = vmul.f32 -1.442695, %v3777_v26  ;;  %v2008_v33 = vadd.f32 %v2005_v15, %v1924_v35  ;;  %v3790_v34 = vadd.f32 1.0, %v2301_v13  ;;  %v4573_v16 = vld [vmem:[#allocation54_spill] sm:$0xff]  ;;  %vm575_vm14 = vmor %vm573_vm11, %vm574_vm12  ;;  %v3809_v13 = vpop.permute.xlu2 %1178 }
 0x1d7   :  { %v2303_v61 = vpop.eup %2302  ;;  %v571_v17 = vmul.f32 %v2299_v60, %v570_v18  ;;  %v982_v25 = vadd.f32 %v979_v38, %v974_v23  ;;  %v490_v8 = vsel %vm3768_vm10, %v489_v29, %v485_v48  ;;  %v580_v22 = vor.u32 1.1754944e-38, %v579_v62  ;;  %4575 = vst [vmem:[#allocation45_spill] sm:$0xff] %v3809_v13 }
 0x1d8   :  { %v2305_v40 = vpop.eup %2304  ;;  %v663_v59 = vmul.f32 %v2303_v61, %v3751_v11  ;;  %2306 = vpow2.f32 %v2127_v39  ;;  %v2011_v14 = vadd.f32 %v2008_v33, %v4573_v16  ;;  %v987_v35 = vmul.f32 %v4574_v46, %v3514_v36 }
 0x1d9   :  { %v572_v41 = vadd.f32 %v2299_v60, %v571_v17  ;;  %2308 = vrcp.f32 %v3790_v34  ;;  %v671_v9 = vand.u32 2147483647, %v3751_v11  ;;  %v673_v48 = vand.u32 2147483648, %v3751_v11 }
 0x1da   :  { %v664_v15 = vsub.f32 1.0, %v663_v59  ;;  %v3804_v29 = vadd.f32 1.0, %v2305_v40  ;;  %v2014_v62 = vadd.f32 %v2011_v14, %v4501_v4  ;;  %v990_v23 = vadd.f32 %v987_v35, %v982_v25 }
 0x1db   :  { %v576_v18 = vsel %vm575_vm14, %v2299_v60, %v572_v41  ;;  %v1073_v38 = vmul.f32 %v4534_v1, %v3510_v6  ;;  %v494_v39 = vmul.f32 %v490_v8, %v3643_v7  ;;  %vm668_vm15 = vweird.f32 %v2303_v61 }
 0x1dc   :  { %v581_v57 = vsel %vm3785_vm13, %v580_v22, %v576_v18  ;;  %v665_v33 = vmul.f32 %v2303_v61, %v664_v15  ;;  %v2017_v17 = vmul.f32 %v2014_v62, %v3809_v13  ;;  %2310 = vrcp.f32 %v3804_v29 }
 0x1dd   :  { %v585_v40 = vmul.f32 %v581_v57, %v3675_v56  ;;  %v1068_v4 = vmul.f32 %v4533_v58, %v3441_v24  ;;  %vm667_vm0 = vweird.f32 %v3751_v11  ;;  %v765_v7 = vand.u32 2147483647, %v3790_v34 }
 0x1de   :  { %v2307_v60 = vpop.eup %2306  ;;  %v666_v6 = vadd.f32 %v2303_v61, %v665_v33  ;;  %v767_v14 = vand.u32 2147483648, %v3790_v34  ;;  %2025 = vrot.lane.b32.xlu2 %v2017_v17, %s2431_s10  ;;  %vm669_vm1 = vmor %vm667_vm0, %vm668_vm15  ;;  %vm672_vm2 = vcmp.eq.f32.partialorder %v671_v9, 8.507059e+37  ;;  %v3826_v56 = vadd.f32 %v4537_v20, %v990_v23 }
 0x1df   :  { %v2309_v41 = vpop.eup %2308  ;;  %v3823_v30 = vadd.f32 1.0, %v2307_v60  ;;  %v1076_v25 = vadd.f32 %v1073_v38, %v1068_v4  ;;  %v499_v8 = vmul.f32 %v4544_v37, %v494_v39  ;;  %v674_v59 = vor.u32 1.1754944e-38, %v673_v48 }
 0x1e0   :  { %v670_v22 = vsel %vm669_vm1, %v2303_v61, %v666_v6  ;;  %v757_v11 = vmul.f32 %v2309_v41, %v3790_v34  ;;  %v590_v35 = vmul.f32 %v4545_v31, %v585_v40  ;;  %vm761_vm3 = vweird.f32 %v3790_v34 }
 0x1e1   :  { %2312 = vrcp.f32 %v3823_v30  ;;  %v1081_v15 = vmul.f32 %v4495_v28, %v3514_v36  ;;  %v675_v9 = vsel %vm672_vm2, %v674_v59, %v670_v22  ;;  %vm3835_vm4 = vcmp.eq.f32.partialorder %v765_v7, 8.507059e+37  ;;  %v4578_v7 = vld [vmem:[#allocation55_spill] sm:$0xff] }
 0x1e2   :  { %v758_v62 = vsub.f32 1.0, %v757_v11  ;;  %v768_v23 = vor.u32 1.1754944e-38, %v767_v14  ;;  %v2311_v61 = vpop.eup %2310  ;;  %vm855_vm5 = vweird.f32 %v3804_v29  ;;  %v859_v48 = vand.u32 2147483647, %v3804_v29  ;;  %v4579_v14 = vld [vmem:[#allocation13_spill] sm:$0xff] }
 0x1e3   :  { %v2135_v38 = vmul.f32 -1.442695, %v3826_v56  ;;  %v1084_v39 = vadd.f32 %v1081_v15, %v1076_v25  ;;  %vm762_vm6 = vweird.f32 %v2309_v41  ;;  %v851_v33 = vmul.f32 %v2311_v61, %v3804_v29  ;;  %v4580_v25 = vld [vmem:[#allocation17_spill] sm:$0xff] }
 0x1e4   :  { %v759_v57 = vmul.f32 %v2309_v41, %v758_v62  ;;  %v861_v36 = vand.u32 2147483648, %v3804_v29  ;;  %v593_v17 = vadd.f32 %v590_v35, %v499_v8  ;;  %v679_v40 = vmul.f32 %v675_v9, %v3698_v42  ;;  %vm763_vm7 = vmor %vm761_vm3, %vm762_vm6 }
 0x1e5   :  { %2314 = vpow2.f32 %v2135_v38  ;;  %v3846_v4 = vadd.f32 %v4546_v55, %v1084_v39  ;;  %v852_v6 = vsub.f32 1.0, %v851_v33  ;;  %v411_v22 = vmul.f32 %v4579_v14, %v4578_v7  ;;  %v4581_v38 = vld [vmem:[#allocation41_spill] sm:$0xff] }
 0x1e6   :  { %v760_v60 = vadd.f32 %v2309_v41, %v759_v57  ;;  %v416_v59 = vmul.f32 %v4580_v25, %v3708_v12  ;;  %vm856_vm8 = vweird.f32 %v2311_v61  ;;  %v502_v42 = vmul.f32 %v4507_v32, %v4578_v7 }
 0x1e7   :  { %v2313_v11 = vpop.eup %2312  ;;  %v2143_v8 = vmul.f32 -1.442695, %v3846_v4  ;;  %v507_v35 = vmul.f32 %v2793_v49, %v3708_v12  ;;  %v853_v9 = vmul.f32 %v2311_v61, %v852_v6  ;;  %v424_v39 = vmul.f32 %v4543_v19, %v4581_v38  ;;  %vm857_vm9 = vmor %vm855_vm5, %vm856_vm8 }
 0x1e8   :  { %v764_v15 = vsel %vm763_vm7, %v2309_v41, %v760_v60  ;;  %v945_v62 = vmul.f32 %v2313_v11, %v3823_v30  ;;  %v419_v57 = vadd.f32 %v416_v59, %v411_v22  ;;  %v684_v13 = vmul.f32 %v2908_v10, %v679_v40 }
 0x1e9   :  { %v769_v34 = vsel %vm3835_vm4, %v768_v23, %v764_v15  ;;  %2316 = vpow2.f32 %v2143_v8  ;;  %v510_v33 = vadd.f32 %v507_v35, %v502_v42  ;;  %v854_v32 = vadd.f32 %v2311_v61, %v853_v9 }
 0x1ea   :  { %v773_v24 = vmul.f32 %v769_v34, %v3733_v47  ;;  %v946_v55 = vsub.f32 1.0, %v945_v62  ;;  %vm860_vm10 = vcmp.eq.f32.partialorder %v859_v48, 8.507059e+37  ;;  %v862_v41 = vor.u32 1.1754944e-38, %v861_v36 }
 0x1eb   :  { %v2315_v49 = vpop.eup %2314  ;;  %v953_v60 = vand.u32 2147483647, %v3823_v30  ;;  %v427_v18 = vadd.f32 %v424_v39, %v419_v57  ;;  %v687_v23 = vadd.f32 %v684_v13, %v593_v17  ;;  %v858_v6 = vsel %vm857_vm9, %v2311_v61, %v854_v32  ;;  %v4584_v39 = vld [vmem:[#allocation30_spill] sm:$0xff] }
 0x1ec   :  { %v947_v22 = vmul.f32 %v2313_v11, %v946_v55  ;;  %v3870_v59 = vadd.f32 1.0, %v2315_v49  ;;  %v863_v40 = vsel %vm860_vm10, %v862_v41, %v858_v6  ;;  %vm950_vm11 = vweird.f32 %v2313_v11 }
 0x1ed   :  { %v955_v47 = vand.u32 2147483648, %v3823_v30  ;;  %v3874_v8 = vadd.f32 %v2846_v21, %v427_v18  ;;  %v778_v29 = vmul.f32 %v2911_v3, %v773_v24  ;;  %v515_v48 = vmul.f32 %v2781_v43, %v4581_v38 }
 0x1ee   :  { %v948_v42 = vadd.f32 %v2313_v11, %v947_v22  ;;  %2318 = vrcp.f32 %v3870_v59  ;;  %v867_v32 = vmul.f32 %v863_v40, %v3749_v27  ;;  %vm949_vm12 = vweird.f32 %v3823_v30 }
 0x1ef   :  { %v2317_v13 = vpop.eup %2316  ;;  %v2086_v49 = vmul.f32 -1.442695, %v3874_v8  ;;  %v601_v55 = vmul.f32 %v2804_v52, %v3708_v12  ;;  %v781_v61 = vadd.f32 %v778_v29, %v687_v23  ;;  %vm3885_vm13 = vmor %vm949_vm12, %vm950_vm11  ;;  %v518_v17 = vadd.f32 %v515_v48, %v510_v33 }
 0x1f0   :  { %v3889_v24 = vadd.f32 1.0, %v2317_v13  ;;  %v596_v35 = vmul.f32 %v2784_v44, %v4578_v7  ;;  %v952_v27 = vsel %vm3885_vm13, %v2313_v11, %v948_v42  ;;  %v1047_v30 = vand.u32 2147483647, %v3870_v59 }
 0x1f1   :  { %v1049_v15 = vand.u32 2147483648, %v3870_v59  ;;  %2320 = vpow2.f32 %v2086_v49  ;;  %vm954_vm14 = vcmp.eq.f32.partialorder %v953_v60, 8.507059e+37  ;;  %v956_v9 = vor.u32 1.1754944e-38, %v955_v47  ;;  %v4585_v60 = vld [vmem:[#allocation19_spill] sm:$0xff] }
 0x1f2   :  { %2322 = vrcp.f32 %v3889_v24  ;;  %v872_v62 = vmul.f32 %v4476_v2, %v867_v32  ;;  %v3900_v34 = vadd.f32 %v4584_v39, %v518_v17  ;;  %v604_v57 = vadd.f32 %v601_v55, %v596_v35 }
 0x1f3   :  { %v609_v33 = vmul.f32 %v2787_v45, %v4581_v38  ;;  %v957_v11 = vsel %vm954_vm14, %v956_v9, %v952_v27  ;;  %vm1043_vm15 = vweird.f32 %v3870_v59  ;;  %v690_v18 = vmul.f32 %v2798_v50, %v4578_v7  ;;  %v4588_v27 = vld [vmem:[#allocation31_spill] sm:$0xff] }
 0x1f4   :  { %v2319_v41 = vpop.eup %2318  ;;  %v695_v23 = vmul.f32 %v4585_v60, %v3708_v12  ;;  %v875_v6 = vadd.f32 %v872_v62, %v781_v61  ;;  %vm3910_vm0 = vcmp.eq.f32.partialorder %v1047_v30, 8.507059e+37  ;;  %v1050_v47 = vor.u32 1.1754944e-38, %v1049_v15 }
 0x1f5   :  { %v1039_v22 = vmul.f32 %v2319_v41, %v3870_v59  ;;  %v2093_v29 = vmul.f32 -1.442695, %v3900_v34  ;;  %v612_v42 = vadd.f32 %v609_v33, %v604_v57  ;;  %v703_v13 = vmul.f32 %v2801_v51, %v4581_v38  ;;  %v4589_v33 = vld [vmem:[#allocation22_spill] sm:$0xff] }
 0x1f6   :  { %v698_v48 = vadd.f32 %v695_v23, %v690_v18  ;;  %v961_v49 = vmul.f32 %v957_v11, %v3777_v26  ;;  %v784_v61 = vmul.f32 %v4438_v63, %v4578_v7  ;;  %v789_v36 = vmul.f32 %v4439_v5, %v3708_v12 }
 0x1f7   :  { %v2321_v32 = vpop.eup %2320  ;;  %v1040_v55 = vsub.f32 1.0, %v1039_v22  ;;  %2324 = vpow2.f32 %v2093_v29  ;;  %v3925_v30 = vadd.f32 %v4588_v27, %v612_v42  ;;  %vm1044_vm1 = vweird.f32 %v2319_v41  ;;  %v4590_v29 = vld [vmem:[#allocation33_spill] sm:$0xff] }
 0x1f8   :  { %v2323_v17 = vpop.eup %2322  ;;  %v3922_v35 = vadd.f32 1.0, %v2321_v32  ;;  %v706_v15 = vadd.f32 %v703_v13, %v698_v48  ;;  %v792_v26 = vadd.f32 %v789_v36, %v784_v61  ;;  %vm1137_vm2 = vweird.f32 %v3889_v24  ;;  %v4591_v48 = vld [vmem:[#allocation43_spill] sm:$0xff]  ;;  %vm1045_vm3 = vmor %vm1043_vm15, %vm1044_vm1 }
 0x1f9   :  { %v1041_v9 = vmul.f32 %v2319_v41, %v1040_v55  ;;  %v1133_v62 = vmul.f32 %v2323_v17, %v3889_v24  ;;  %v1141_v57 = vand.u32 2147483647, %v3889_v24  ;;  %v797_v11 = vmul.f32 %v4589_v33, %v4581_v38 }
 0x1fa   :  { %2326 = vrcp.f32 %v3922_v35  ;;  %v2101_v22 = vmul.f32 -1.442695, %v3925_v30  ;;  %v3935_v42 = vadd.f32 %v4590_v29, %v706_v15  ;;  %v966_v13 = vmul.f32 %v4591_v48, %v961_v49  ;;  %v4592_v49 = vld [vmem:[#allocation23_spill] sm:$0xff]  ;;  %v4593_v48 = vld [vmem:[#allocation24_spill] sm:$0xff] }
 0x1fb   :  { %v1042_v18 = vadd.f32 %v2319_v41, %v1041_v9  ;;  %v1134_v23 = vsub.f32 1.0, %v1133_v62  ;;  %vm1138_vm4 = vweird.f32 %v2323_v17  ;;  %v1143_v32 = vand.u32 2147483648, %v3889_v24  ;;  %v4594_v24 = vld [vmem:[#allocation25_spill] sm:$0xff] }
 0x1fc   :  { %v800_v55 = vadd.f32 %v797_v11, %v792_v26  ;;  %2328 = vpow2.f32 %v2101_v22  ;;  %v2109_v9 = vmul.f32 -1.442695, %v3935_v42  ;;  %v878_v59 = vmul.f32 %v4592_v49, %v4578_v7  ;;  %vm1139_vm5 = vmor %vm1137_vm2, %vm1138_vm4 }
 0x1fd   :  { %v1046_v61 = vsel %vm1045_vm3, %v2319_v41, %v1042_v18  ;;  %v1135_v36 = vmul.f32 %v2323_v17, %v1134_v23  ;;  %v2325_v62 = vpop.eup %2324  ;;  %v883_v29 = vmul.f32 %v4593_v48, %v3708_v12  ;;  %vm1142_vm6 = vcmp.eq.f32.partialorder %v1141_v57, 8.507059e+37 }
 0x1fe   :  { %v1051_v33 = vsel %vm3910_vm0, %v1050_v47, %v1046_v61  ;;  %v3945_v15 = vadd.f32 %v4561_v0, %v800_v55  ;;  %v3952_v11 = vadd.f32 1.0, %v2325_v62  ;;  %2330 = vpow2.f32 %v2109_v9 }
 0x1ff   :  { %v1055_v26 = vmul.f32 %v1051_v33, %v3826_v56  ;;  %v1136_v41 = vadd.f32 %v2323_v17, %v1135_v36  ;;  %v1144_v40 = vor.u32 1.1754944e-38, %v1143_v32  ;;  %v886_v23 = vadd.f32 %v883_v29, %v878_v59 }
 0x200   :  { %v2327_v18 = vpop.eup %2326  ;;  %v2117_v47 = vmul.f32 -1.442695, %v3945_v15  ;;  %v969_v22 = vadd.f32 %v966_v13, %v875_v6  ;;  %v977_v56 = vmul.f32 %v4570_v54, %v3708_v12  ;;  %v456_v36 = vand.u32 2147483647, %v3922_v35 }
 0x201   :  { %v1140_v55 = vsel %vm1139_vm5, %v2323_v17, %v1136_v41  ;;  %v448_v61 = vmul.f32 %v2327_v18, %v3922_v35  ;;  %2332 = vrcp.f32 %v3952_v11  ;;  %v891_v9 = vmul.f32 %v4594_v24, %v4581_v38  ;;  %v4595_v17 = vld [vmem:[#allocation26_spill] sm:$0xff] }
 0x202   :  { %v1145_v33 = vsel %vm1142_vm6, %v1144_v40, %v1140_v55  ;;  %v2329_v57 = vpop.eup %2328  ;;  %v1060_v32 = vmul.f32 %v4562_v53, %v1055_v26  ;;  %v458_v6 = vand.u32 2147483648, %v3922_v35  ;;  %v972_v29 = vmul.f32 %v4595_v17, %v4578_v7  ;;  %v4596_v24 = vld [vmem:[#allocation50_spill] sm:$0xff] }
 0x203   :  { %v449_v62 = vsub.f32 1.0, %v448_v61  ;;  %v1149_v13 = vmul.f32 %v1145_v33, %v3846_v4  ;;  %v3970_v59 = vadd.f32 1.0, %v2329_v57  ;;  %2334 = vpow2.f32 %v2117_v47 }
 0x204   :  { %v894_v41 = vadd.f32 %v891_v9, %v886_v23  ;;  %v2331_v40 = vpop.eup %2330  ;;  %vm453_vm7 = vweird.f32 %v2327_v18  ;;  %v547_v54 = vand.u32 2147483647, %v3952_v11  ;;  %v980_v0 = vadd.f32 %v977_v56, %v972_v29  ;;  %v4599_v9 = vld [vmem:[#allocation52_spill] sm:$0xff] }
 0x205   :  { %v450_v55 = vmul.f32 %v2327_v18, %v449_v62  ;;  %v3974_v26 = vand.u32 2147483647, %v4596_v24  ;;  %v1063_v61 = vadd.f32 %v1060_v32, %v969_v22  ;;  %vm452_vm8 = vweird.f32 %v3922_v35  ;;  %v4600_v22 = vld [vmem:[#allocation35_spill] sm:$0xff] }
 0x206   :  { %2336 = vrcp.f32 %v3970_v59  ;;  %vm3978_vm9 = vcmp.eq.f32.partialorder %v456_v36, 8.507059e+37  ;;  %v549_v47 = vand.u32 2147483648, %v3952_v11  ;;  %v3983_v23 = vadd.f32 1.0, %v2331_v40  ;;  %vm454_vm10 = vmor %vm452_vm8, %vm453_vm7 }
 0x207   :  { %v451_v17 = vadd.f32 %v2327_v18, %v450_v55  ;;  %v2333_v33 = vpop.eup %2332  ;;  %v1154_v56 = vmul.f32 %v4599_v9, %v1149_v13  ;;  %v459_v24 = vor.u32 1.1754944e-38, %v458_v6  ;;  %vm543_vm11 = vweird.f32 %v3952_v11 }
 0x208   :  { %v3988_v35 = vadd.f32 %v4600_v22, %v894_v41  ;;  %v539_v36 = vmul.f32 %v2333_v33, %v3952_v11  ;;  %vm3991_vm12 = vcmp.eq.f32.partialorder %v547_v54, 8.507059e+37  ;;  %v641_v62 = vand.u32 2147483647, %v3970_v59 }
 0x209   :  { %v455_v57 = vsel %vm454_vm10, %v2327_v18, %v451_v17  ;;  %v643_v29 = vand.u32 2147483648, %v3970_v59  ;;  %v2335_v40 = vpop.eup %2334  ;;  %v1157_v13 = vadd.f32 %v1154_v56, %v1063_v61  ;;  %2338 = vrcp.f32 %v3983_v23 }
 0x20a   :  { %v460_v6 = vsel %vm3978_vm9, %v459_v24, %v455_v57  ;;  %v985_v18 = vmul.f32 %v4574_v46, %v4581_v38  ;;  %v540_v54 = vsub.f32 1.0, %v539_v36  ;;  %v550_v41 = vor.u32 1.1754944e-38, %v549_v47 }
 0x20b   :  { %v492_v17 = vmul.f32 %v460_v6, %v3874_v8  ;;  %vm637_vm13 = vweird.f32 %v3970_v59  ;;  %v737_v9 = vand.u32 2147483648, %v3983_v23  ;;  %v4005_v22 = vadd.f32 1.0, %v2335_v40 }
 0x20c   :  { %v2337_v55 = vpop.eup %2336  ;;  %v2125_v61 = vmul.f32 -1.442695, %v3988_v35  ;;  %v988_v4 = vadd.f32 %v985_v18, %v980_v0  ;;  %v541_v56 = vmul.f32 %v2333_v33, %v540_v54  ;;  %vm544_vm14 = vweird.f32 %v2333_v33 }
 0x20d   :  { %v633_v24 = vmul.f32 %v2337_v55, %v3970_v59  ;;  %vm4009_vm15 = vcmp.eq.f32.partialorder %v641_v62, 8.507059e+37  ;;  %v735_v8 = vand.u32 2147483647, %v3983_v23  ;;  %v4015_v47 = vadd.f32 %v4573_v16, %v1157_v13  ;;  %vm545_vm2 = vmor %vm543_vm11, %vm544_vm14 }
 0x20e   :  { %v644_v36 = vor.u32 1.1754944e-38, %v643_v29  ;;  %2340 = vrcp.f32 %v4005_v22  ;;  %v1066_v40 = vmul.f32 %v4533_v58, %v4578_v7  ;;  %v497_v0 = vmul.f32 %v4544_v37, %v492_v17 }
 0x20f   :  { %v542_v6 = vadd.f32 %v2333_v33, %v541_v56  ;;  %v634_v18 = vsub.f32 1.0, %v633_v24  ;;  %vm638_vm0 = vweird.f32 %v2337_v55  ;;  %vm731_vm1 = vweird.f32 %v3983_v23  ;;  %v2339_v62 = vpop.eup %2338 }
 0x210   :  { %v738_v54 = vor.u32 1.1754944e-38, %v737_v9  ;;  %2342 = vpow2.f32 %v2125_v61  ;;  %v4025_v29 = vadd.f32 %v4537_v20, %v988_v4  ;;  %v1071_v13 = vmul.f32 %v4534_v1, %v3708_v12  ;;  %vm639_vm4 = vmor %vm637_vm13, %vm638_vm0 }
 0x211   :  { %v546_v58 = vsel %vm545_vm2, %v2333_v33, %v542_v6  ;;  %v635_v7 = vmul.f32 %v2337_v55, %v634_v18  ;;  %v727_v17 = vmul.f32 %v2339_v62, %v3983_v23  ;;  %vm4030_vm3 = vcmp.eq.f32.partialorder %v735_v8, 8.507059e+37 }
 0x212   :  { %v829_v24 = vand.u32 2147483647, %v4005_v22  ;;  %v551_v11 = vsel %vm3991_vm12, %v550_v41, %v546_v58  ;;  %v831_v9 = vand.u32 2147483648, %v4005_v22  ;;  %v2133_v61 = vmul.f32 -1.442695, %v4025_v29  ;;  %v4607_v58 = vld [vmem:[#allocation49_spill] sm:$0xff] }
 0x213   :  { %v1079_v12 = vmul.f32 %v4495_v28, %v4581_v38  ;;  %v583_v33 = vmul.f32 %v551_v11, %v3900_v34  ;;  %v636_v4 = vadd.f32 %v2337_v55, %v635_v7  ;;  %v728_v6 = vsub.f32 1.0, %v727_v17  ;;  %v4608_v11 = vld [vmem:[#allocation51_spill] sm:$0xff] }
 0x214   :  { %v1074_v8 = vadd.f32 %v1071_v13, %v1066_v40  ;;  %v2341_v18 = vpop.eup %2340  ;;  %vm732_vm5 = vweird.f32 %v2339_v62  ;;  %2344 = vpow2.f32 %v2133_v61  ;;  %v412_v32 = vmul.f32 %v4579_v14, %v4607_v58 }
 0x215   :  { %v417_v41 = vmul.f32 %v4580_v25, %v3974_v26  ;;  %v588_v38 = vmul.f32 %v4545_v31, %v583_v33  ;;  %v640_v28 = vsel %vm639_vm4, %v2337_v55, %v636_v4  ;;  %v729_v34 = vmul.f32 %v2339_v62, %v728_v6  ;;  %vm733_vm6 = vmor %vm731_vm1, %vm732_vm5  ;;  %v4609_v33 = vld [vmem:[#allocation38_spill] sm:$0xff] }
 0x216   :  { %v821_v7 = vmul.f32 %v2341_v18, %v4005_v22  ;;  %v2343_v40 = vpop.eup %2342  ;;  %v645_v13 = vsel %vm4009_vm15, %v644_v36, %v640_v28  ;;  %v1082_v59 = vadd.f32 %v1079_v12, %v1074_v8  ;;  %v425_v61 = vmul.f32 %v4543_v19, %v4608_v11 }
 0x217   :  { %v420_v17 = vadd.f32 %v417_v41, %v412_v32  ;;  %v591_v1 = vadd.f32 %v588_v38, %v497_v0  ;;  %v677_v14 = vmul.f32 %v645_v13, %v3925_v30  ;;  %v730_v20 = vadd.f32 %v2339_v62, %v729_v34  ;;  %v4610_v0 = vld [vmem:[#allocation18_spill] sm:$0xff]  ;;  %v4611_v41 = vld [vmem:[#allocation16_spill] sm:$0xff] }
 0x218   :  { %v822_v25 = vsub.f32 1.0, %v821_v7  ;;  %vm826_vm7 = vweird.f32 %v2341_v18  ;;  %v4059_v55 = vadd.f32 1.0, %v2343_v40  ;;  %v4062_v57 = vadd.f32 %v4609_v33, %v1082_v59  ;;  %v4612_v13 = vld [vmem:[#allocation44_spill] sm:$0xff] }
 0x219   :  { %v428_v28 = vadd.f32 %v425_v61, %v420_v17  ;;  %v682_v36 = vmul.f32 %v2908_v10, %v677_v14  ;;  %v734_v12 = vsel %vm733_vm6, %v2339_v62, %v730_v20  ;;  %v508_v30 = vmul.f32 %v4610_v0, %v3974_v26 }
 0x21a   :  { %v823_v19 = vmul.f32 %v2341_v18, %v822_v25  ;;  %v2345_v4 = vpop.eup %2344  ;;  %v739_v6 = vsel %vm4030_vm3, %v738_v54, %v734_v12  ;;  %vm825_vm8 = vweird.f32 %v4005_v22  ;;  %vm830_vm9 = vcmp.eq.f32.partialorder %v829_v24, 8.507059e+37 }
 0x21b   :  { %2346 = vrcp.f32 %v4059_v55  ;;  %v685_v23 = vadd.f32 %v682_v36, %v591_v1  ;;  %v771_v8 = vmul.f32 %v739_v6, %v3935_v42  ;;  %v503_v20 = vmul.f32 %v4611_v41, %v4607_v58  ;;  %vm827_vm10 = vmor %vm825_vm8, %vm826_vm7 }
 0x21c   :  { %v824_v32 = vadd.f32 %v2341_v18, %v823_v19  ;;  %v832_v62 = vor.u32 1.1754944e-38, %v831_v9  ;;  %v4075_v38 = vadd.f32 1.0, %v2345_v4  ;;  %v2141_v56 = vmul.f32 -1.442695, %v4062_v57 }
 0x21d   :  { %v4079_v54 = vadd.f32 %v2846_v21, %v428_v28  ;;  %v776_v22 = vmul.f32 %v2911_v3, %v771_v8  ;;  %v923_v1 = vand.u32 2147483647, %v4059_v55  ;;  %v511_v42 = vadd.f32 %v508_v30, %v503_v20 }
 0x21e   :  { %v828_v24 = vsel %vm827_vm10, %v2341_v18, %v824_v32  ;;  %2348 = vrcp.f32 %v4075_v38  ;;  %v1165_v59 = vadd.f32 %v4015_v47, %v4612_v13  ;;  %vm919_vm11 = vweird.f32 %v4059_v55 }
 0x21f   :  { %v833_v34 = vsel %vm830_vm9, %v832_v62, %v828_v24  ;;  %v779_v7 = vadd.f32 %v776_v22, %v685_v23  ;;  %2350 = vpow2.f32 %v2141_v56  ;;  %v2087_v21 = vmul.f32 -1.442695, %v4079_v54 }
 0x220   :  { %v865_v40 = vmul.f32 %v833_v34, %v3945_v15  ;;  %v516_v18 = vmul.f32 %v2781_v43, %v4608_v11  ;;  %vm4093_vm12 = vcmp.eq.f32.partialorder %v923_v1, 8.507059e+37  ;;  %v925_v15 = vand.u32 2147483648, %v4059_v55 }
 0x221   :  { %v2347_v9 = vpop.eup %2346  ;;  %2352 = vpow2.f32 %v2087_v21  ;;  %v597_v47 = vmul.f32 %v2784_v44, %v4607_v58  ;;  %v602_v28 = vmul.f32 %v2804_v52, %v3974_v26  ;;  %v691_v12 = vmul.f32 %v2798_v50, %v4607_v58 }
 0x222   :  { %v870_v17 = vmul.f32 %v4476_v2, %v865_v40  ;;  %v915_v61 = vmul.f32 %v2347_v9, %v4059_v55  ;;  %v519_v25 = vadd.f32 %v516_v18, %v511_v42  ;;  %v696_v19 = vmul.f32 %v4585_v60, %v3974_v26 }
 0x223   :  { %vm920_vm13 = vweird.f32 %v2347_v9  ;;  %v605_v4 = vadd.f32 %v602_v28, %v597_v47  ;;  %v610_v44 = vmul.f32 %v2787_v45, %v4608_v11  ;;  %v704_v50 = vmul.f32 %v2801_v51, %v4608_v11  ;;  %v4619_v28 = vld [vmem:[#allocation45_spill] sm:$0xff] }
 0x224   :  { %v873_v36 = vadd.f32 %v870_v17, %v779_v7  ;;  %v916_v43 = vsub.f32 1.0, %v915_v61  ;;  %v2349_v0 = vpop.eup %2348  ;;  %v4107_v30 = vadd.f32 %v4584_v39, %v519_v25  ;;  %v699_v8 = vadd.f32 %v696_v19, %v691_v12  ;;  %vm921_vm14 = vmor %vm919_vm11, %vm920_vm13  ;;  %v4617_v17 = vld [vmem:[#allocation33_spill] sm:$0xff]  ;;  %v4620_v12 = vld [vmem:[#allocation22_spill] sm:$0xff] }
 0x225   :  { %v2351_v6 = vpop.eup %2350  ;;  %v1009_v52 = vmul.f32 %v2349_v0, %v4075_v38  ;;  %v1017_v32 = vand.u32 2147483647, %v4075_v38  ;;  %v613_v39 = vadd.f32 %v610_v44, %v605_v4  ;;  %v926_v62 = vor.u32 1.1754944e-38, %v925_v15 }
 0x226   :  { %v917_v23 = vmul.f32 %v2347_v9, %v916_v43  ;;  %v4115_v60 = vadd.f32 1.0, %v2351_v6  ;;  %v2094_v41 = vmul.f32 -1.442695, %v4107_v30  ;;  %v707_v22 = vadd.f32 %v704_v50, %v699_v8 }
 0x227   :  { %v1010_v56 = vsub.f32 1.0, %v1009_v52  ;;  %v2353_v45 = vpop.eup %2352  ;;  %vm1014_vm15 = vweird.f32 %v2349_v0  ;;  %v1019_v24 = vand.u32 2147483648, %v4075_v38  ;;  %v790_v51 = vmul.f32 %v4439_v5, %v3974_v26 }
 0x228   :  { %v918_v20 = vadd.f32 %v2347_v9, %v917_v23  ;;  %2354 = vrcp.f32 %v4115_v60  ;;  %v4125_v34 = vadd.f32 1.0, %v2353_v45  ;;  %vm1013_vm0 = vweird.f32 %v4075_v38 }
 0x229   :  { %v1011_v42 = vmul.f32 %v2349_v0, %v1010_v56  ;;  %2356 = vpow2.f32 %v2094_v41  ;;  %vm4130_vm1 = vcmp.eq.f32.partialorder %v1017_v32, 8.507059e+37  ;;  %v4135_v40 = vadd.f32 %v4588_v27, %v613_v39  ;;  %vm1015_vm2 = vmor %vm1013_vm0, %vm1014_vm15  ;;  %v4618_v27 = vld [vmem:[#allocation43_spill] sm:$0xff] }
 0x22a   :  { %v922_v1 = vsel %vm921_vm14, %v2347_v9, %v918_v20  ;;  %2358 = vrcp.f32 %v4125_v34  ;;  %v785_v9 = vmul.f32 %v4438_v63, %v4607_v58  ;;  %v1020_v21 = vor.u32 1.1754944e-38, %v1019_v24 }
 0x22b   :  { %v927_v7 = vsel %vm4093_vm12, %v926_v62, %v922_v1  ;;  %v1012_v5 = vadd.f32 %v2349_v0, %v1011_v42  ;;  %v1111_v38 = vand.u32 2147483647, %v4115_v60  ;;  %v2102_v18 = vmul.f32 -1.442695, %v4135_v40  ;;  %v4624_v1 = vld [vmem:[#allocation34_spill] sm:$0xff] }
 0x22c   :  { %v959_v13 = vmul.f32 %v927_v7, %v3988_v35  ;;  %v4145_v61 = vadd.f32 %v4617_v17, %v707_v22  ;;  %v1113_v35 = vand.u32 2147483648, %v4115_v60  ;;  %v793_v25 = vadd.f32 %v790_v51, %v785_v9  ;;  %v4623_v22 = vld [vmem:[#allocation25_spill] sm:$0xff] }
 0x22d   :  { %v1016_v15 = vsel %vm1015_vm2, %v2349_v0, %v1012_v5  ;;  %v1183_v43 = vmul.f32 %v4619_v28, %v1165_v59  ;;  %2360 = vpow2.f32 %v2102_v18  ;;  %v798_v19 = vmul.f32 %v4620_v12, %v4608_v11 }
 0x22e   :  { %v964_v14 = vmul.f32 %v4618_v27, %v959_v13  ;;  %v2355_v47 = vpop.eup %2354  ;;  %v1021_v63 = vsel %vm4130_vm1, %v1020_v21, %v1016_v15  ;;  %vm2030_vm3 = vcmask 261120   ;;  %vm1107_vm4 = vweird.f32 %v4115_v60 }
 0x22f   :  { %v2357_v4 = vpop.eup %2356  ;;  %v1053_v6 = vmul.f32 %v1021_v63, %v4025_v29  ;;  %v1103_v0 = vmul.f32 %v2355_v47, %v4115_v60  ;;  %vm2034_vm5 = vcmask 523264   ;;  %v2110_v59 = vmul.f32 -1.442695, %v4145_v61 }
 0x230   :  { %v967_v44 = vadd.f32 %v964_v14, %v873_v36  ;;  %v4157_v23 = vadd.f32 1.0, %v2357_v4  ;;  %v801_v52 = vadd.f32 %v798_v19, %v793_v25  ;;  %v884_v8 = vmul.f32 %v4593_v48, %v3974_v26  ;;  %v2359_v50 = vpop.eup %2358  ;;  %v4628_v19 = vld [vmem:[#allocation26_spill] sm:$0xff] }
 0x231   :  { %v1058_v32 = vmul.f32 %v4562_v53, %v1053_v6  ;;  %v1104_v41 = vsub.f32 1.0, %v1103_v0  ;;  %vm4163_vm6 = vcmp.eq.f32.partialorder %v1111_v38, 8.507059e+37  ;;  %v1114_v29 = vor.u32 1.1754944e-38, %v1113_v35  ;;  %v4627_v35 = vld [vmem:[#allocation27_spill] sm:$0xff] }
 0x232   :  { %v463_v39 = vmul.f32 %v2359_v50, %v4125_v34  ;;  %v471_v20 = vand.u32 2147483647, %v4125_v34  ;;  %2362 = vrcp.f32 %v4157_v23  ;;  %v879_v62 = vmul.f32 %v4592_v49, %v4607_v58 }
 0x233   :  { %v1061_v56 = vadd.f32 %v1058_v32, %v967_v44  ;;  %v1105_v48 = vmul.f32 %v2355_v47, %v1104_v41  ;;  %vm1108_vm7 = vweird.f32 %v2355_v47  ;;  %v892_v45 = vmul.f32 %v4623_v22, %v4608_v11  ;;  %v2361_v24 = vpop.eup %2360 }
 0x234   :  { %v464_v51 = vsub.f32 1.0, %v463_v39  ;;  %2364 = vpow2.f32 %v2110_v59  ;;  %v4175_v42 = vadd.f32 %v4624_v1, %v801_v52  ;;  %v887_v7 = vadd.f32 %v884_v8, %v879_v62  ;;  %vm1109_vm9 = vmor %vm1107_vm4, %vm1108_vm7  ;;  %v4629_v52 = vld [vmem:[#allocation35_spill] sm:$0xff] }
 0x235   :  { %v1106_v55 = vadd.f32 %v2355_v47, %v1105_v48  ;;  %vm467_vm8 = vweird.f32 %v4125_v34  ;;  %v473_v13 = vand.u32 2147483648, %v4125_v34  ;;  %v4179_v5 = vadd.f32 1.0, %v2361_v24 }
 0x236   :  { %v465_v49 = vmul.f32 %v2359_v50, %v464_v51  ;;  %vm468_vm10 = vweird.f32 %v2359_v50  ;;  %v2118_v9 = vmul.f32 -1.442695, %v4175_v42  ;;  %v895_v21 = vadd.f32 %v892_v45, %v887_v7 }
 0x237   :  { %v1110_v38 = vsel %vm1109_vm9, %v2355_v47, %v1106_v55  ;;  %vm4184_vm11 = vcmp.eq.f32.partialorder %v471_v20, 8.507059e+37  ;;  %v562_v17 = vand.u32 2147483647, %v4157_v23  ;;  %2366 = vrcp.f32 %v4179_v5  ;;  %vm469_vm12 = vmor %vm467_vm8, %vm468_vm10 }
 0x238   :  { %v2363_v14 = vpop.eup %2362  ;;  %v1115_v15 = vsel %vm4163_vm6, %v1114_v29, %v1110_v38  ;;  %v466_v60 = vadd.f32 %v2359_v50, %v465_v49  ;;  %2368 = vpow2.f32 %v2118_v9  ;;  %v978_v25 = vmul.f32 %v4627_v35, %v3974_v26  ;;  %v2026_v28 = vpop.permute.xlu2 %2025 }
 0x239   :  { %v1147_v47 = vmul.f32 %v1115_v15, %v4062_v57  ;;  %v474_v63 = vor.u32 1.1754944e-38, %v473_v13  ;;  %v554_v12 = vmul.f32 %v2363_v14, %v4157_v23  ;;  %v973_v4 = vmul.f32 %v4628_v19, %v4607_v58  ;;  %v4631_v57 = vld [vmem:[#allocation52_spill] sm:$0xff] }
 0x23a   :  { %v2365_v44 = vpop.eup %2364  ;;  %v2033_v6 = vsel %vm2030_vm3, %v1183_v43, %v2026_v28  ;;  %v470_v0 = vsel %vm469_vm12, %v2359_v50, %v466_v60  ;;  %v564_v59 = vand.u32 2147483648, %v4157_v23  ;;  %v4203_v8 = vadd.f32 %v4629_v52, %v895_v21  ;;  %v4634_v21 = vld [vmem:[#allocation55_spill] sm:$0xff]  ;;  %v4637_v60 = vld [vmem:[#allocation42_spill] sm:$0xff]  ;;  %v4638_v28 = vld [vmem:[#allocation36_spill] sm:$0xff] }
 0x23b   :  { %2037 = vst.msk [vmem:[%s4630_s13 + $0x10] sm:$0xff] %vm2034_vm5, %v2033_v6  ;;  %v1152_v34 = vmul.f32 %v4631_v57, %v1147_v47  ;;  %v555_v32 = vsub.f32 1.0, %v554_v12  ;;  %vm558_vm13 = vweird.f32 %v4157_v23  ;;  %v4211_v41 = vadd.f32 1.0, %v2365_v44 }
 0x23c   :  { %v475_v43 = vsel %vm4184_vm11, %v474_v63, %v470_v0  ;;  %vm4215_vm14 = vcmp.eq.f32.partialorder %v562_v17, 8.507059e+37  ;;  %v2126_v36 = vmul.f32 -1.442695, %v4203_v8  ;;  %v981_v29 = vadd.f32 %v978_v25, %v973_v4 }
 0x23d   :  { %v2367_v39 = vpop.eup %2366  ;;  %v1155_v20 = vadd.f32 %v1152_v34, %v1061_v56  ;;  %v556_v62 = vmul.f32 %v2363_v14, %v555_v32  ;;  %vm559_vm15 = vweird.f32 %v2363_v14  ;;  %2370 = vrcp.f32 %v4211_v41  ;;  %v4639_v34 = vld [vmem:[#allocation32_spill] sm:$0xff] }
 0x23e   :  { %v2369_v48 = vpop.eup %2368  ;;  %v565_v22 = vor.u32 1.1754944e-38, %v564_v59  ;;  %v648_v45 = vmul.f32 %v2367_v39, %v4179_v5  ;;  %v656_v24 = vand.u32 2147483647, %v4179_v5  ;;  %v986_v51 = vmul.f32 %v4574_v46, %v4608_v11  ;;  %vm560_vm0 = vmor %vm558_vm13, %vm559_vm15  ;;  %v2022_v46 = vpop.permute.xlu0 %2021 }
 0x23f   :  { %v1160_v1 = vadd.f32 %v4573_v16, %v1155_v20  ;;  %v493_v7 = vmul.f32 %v475_v43, %v4079_v54  ;;  %v557_v55 = vadd.f32 %v2363_v14, %v556_v62  ;;  %v4227_v13 = vadd.f32 1.0, %v2369_v48  ;;  %v4640_v62 = vld [vmem:[#allocation29_spill] sm:$0xff] }
 0x240   :  { %v649_v56 = vsub.f32 1.0, %v648_v45  ;;  %v658_v49 = vand.u32 2147483648, %v4179_v5  ;;  %2372 = vpow2.f32 %v2126_v36  ;;  %v989_v9 = vadd.f32 %v986_v51, %v981_v29 }
 0x241   :  { %v1163_v38 = vadd.f32 %v1160_v1, %v4634_v21  ;;  %v561_v18 = vsel %vm560_vm0, %v2363_v14, %v557_v55  ;;  %vm652_vm1 = vweird.f32 %v4179_v5  ;;  %2374 = vrcp.f32 %v4227_v13 }
 0x242   :  { %v566_v54 = vsel %vm4215_vm14, %v565_v22, %v561_v18  ;;  %v650_v17 = vmul.f32 %v2367_v39, %v649_v56  ;;  %vm653_vm2 = vweird.f32 %v2367_v39  ;;  %vm4237_vm4 = vcmp.eq.f32.partialorder %v656_v24, 8.507059e+37 }
 0x243   :  { %v2371_v15 = vpop.eup %2370  ;;  %v1181_v35 = vmul.f32 %v4637_v60, %v1163_v38  ;;  %v498_v25 = vmul.f32 %v4544_v37, %v493_v7  ;;  %v584_v14 = vmul.f32 %v566_v54, %v4107_v30  ;;  %v4245_v47 = vadd.f32 %v4638_v28, %v989_v9  ;;  %vm654_vm6 = vmor %vm652_vm1, %vm653_vm2  ;;  %v4643_v7 = vld [vmem:[#allocation37_spill] sm:$0xff] }
 0x244   :  { %v651_v63 = vadd.f32 %v2367_v39, %v650_v17  ;;  %v659_v12 = vor.u32 1.1754944e-38, %v658_v49  ;;  %v742_v19 = vmul.f32 %v2371_v15, %v4211_v41  ;;  %v750_v4 = vand.u32 2147483647, %v4211_v41 }
 0x245   :  { %v2031_v44 = vsel %vm2030_vm3, %v1181_v35, %v2022_v46  ;;  %v589_v6 = vmul.f32 %v4545_v31, %v584_v14  ;;  %v752_v37 = vand.u32 2147483648, %v4211_v41  ;;  %v2134_v30 = vmul.f32 -1.442695, %v4245_v47 }
 0x246   :  { %v2373_v0 = vpop.eup %2372  ;;  %2035 = vst.msk [vmem:[%s4630_s13] sm:$0xff] %vm2034_vm5, %v2031_v44  ;;  %v655_v59 = vsel %vm654_vm6, %v2367_v39, %v651_v63  ;;  %v743_v52 = vsub.f32 1.0, %v742_v19  ;;  %vm747_vm7 = vweird.f32 %v2371_v15  ;;  %v1072_v32 = vmul.f32 %v4639_v34, %v3974_v26 }
 0x247   :  { %v2375_v31 = vpop.eup %2374  ;;  %v592_v43 = vadd.f32 %v589_v6, %v498_v25  ;;  %v660_v5 = vsel %vm4237_vm4, %v659_v12, %v655_v59  ;;  %v912_v50 = vadd.f32 1.0, %v2373_v0  ;;  %2376 = vpow2.f32 %v2134_v30 }
 0x248   :  { %v678_v36 = vmul.f32 %v660_v5, %v4135_v40  ;;  %v744_v29 = vmul.f32 %v2371_v15, %v743_v52  ;;  %v836_v20 = vmul.f32 %v2375_v31, %v4227_v13  ;;  %v1067_v39 = vmul.f32 %v4640_v62, %v4607_v58 }
 0x249   :  { %vm746_vm8 = vweird.f32 %v4211_v41  ;;  %vm4268_vm9 = vcmp.eq.f32.partialorder %v750_v4, 8.507059e+37  ;;  %2378 = vrcp.f32 %v912_v50  ;;  %v753_v40 = vor.u32 1.1754944e-38, %v752_v37 }
 0x24a   :  { %v683_v26 = vmul.f32 %v2908_v10, %v678_v36  ;;  %v745_v22 = vadd.f32 %v2371_v15, %v744_v29  ;;  %v837_v45 = vsub.f32 1.0, %v836_v20  ;;  %v1075_v24 = vadd.f32 %v1072_v32, %v1067_v39  ;;  %vm748_vm10 = vmor %vm746_vm8, %vm747_vm7 }
 0x24b   :  { %v844_v51 = vand.u32 2147483647, %v4227_v13  ;;  %v846_v1 = vand.u32 2147483648, %v4227_v13  ;;  %v1080_v41 = vmul.f32 %v4643_v7, %v4608_v11  ;;  %vm841_vm11 = vweird.f32 %v2375_v31 }
 0x24c   :  { %v686_v55 = vadd.f32 %v683_v26, %v592_v43  ;;  %v749_v56 = vsel %vm748_vm10, %v2371_v15, %v745_v22  ;;  %v838_v49 = vmul.f32 %v2375_v31, %v837_v45  ;;  %vm840_vm12 = vweird.f32 %v4227_v13 }
 0x24d   :  { %v2377_v9 = vpop.eup %2376  ;;  %v754_v10 = vsel %vm4268_vm9, %v753_v40, %v749_v56  ;;  %v1083_v21 = vadd.f32 %v1080_v41, %v1075_v24  ;;  %vm842_vm13 = vmor %vm840_vm12, %vm841_vm11  ;;  %v847_v17 = vor.u32 1.1754944e-38, %v846_v1  ;;  %vm845_vm14 = vcmp.eq.f32.partialorder %v844_v51, 8.507059e+37  ;;  %v2024_v56 = vpop.permute.xlu1 %2023 }
 0x24e   :  { %v772_v38 = vmul.f32 %v754_v10, %v4145_v61  ;;  %v839_v18 = vadd.f32 %v2375_v31, %v838_v49  ;;  %v1006_v46 = vadd.f32 1.0, %v2377_v9  ;;  %v940_v28 = vand.u32 2147483648, %v912_v50  ;;  %v4644_v49 = vld [vmem:[#allocation57_spill] sm:$0xff] }
 0x24f   :  { %v2379_v54 = vpop.eup %2378  ;;  %v4283_v11 = vadd.f32 %v4609_v33, %v1083_v21  ;;  %v938_v33 = vand.u32 2147483647, %v912_v50  ;;  %vm934_vm0 = vweird.f32 %v912_v50 }
 0x250   :  { %v777_v23 = vmul.f32 %v2911_v3, %v772_v38  ;;  %v843_v15 = vsel %vm842_vm13, %v2375_v31, %v839_v18  ;;  %v930_v60 = vmul.f32 %v2379_v54, %v912_v50  ;;  %2380 = vrcp.f32 %v1006_v46 }
 0x251   :  { %v848_v35 = vsel %vm845_vm14, %v847_v17, %v843_v15  ;;  %v2142_v13 = vmul.f32 -1.442695, %v4283_v11  ;;  %vm935_vm15 = vweird.f32 %v2379_v54  ;;  %v941_v44 = vor.u32 1.1754944e-38, %v940_v28 }
 0x252   :  { %v780_v25 = vadd.f32 %v777_v23, %v686_v55  ;;  %v866_v61 = vmul.f32 %v848_v35, %v4175_v42  ;;  %v931_v14 = vsub.f32 1.0, %v930_v60  ;;  %vm936_vm1 = vmor %vm934_vm0, %vm935_vm15  ;;  %vm939_vm2 = vcmp.eq.f32.partialorder %v938_v33, 8.507059e+37 }
 0x253   :  { %2382 = vpow2.f32 %v2142_v13  ;;  %v1032_v52 = vand.u32 2147483647, %v1006_v46  ;;  %vm1028_vm6 = vweird.f32 %v1006_v46 }
 0x254   :  { %v871_v63 = vmul.f32 %v4476_v2, %v866_v61  ;;  %v932_v12 = vmul.f32 %v2379_v54, %v931_v14  ;;  %v1034_v2 = vand.u32 2147483648, %v1006_v46 }
 0x255   :  { %vm1033_vm8 = vcmp.eq.f32.partialorder %v1032_v52, 8.507059e+37 }
 0x256   :  { %v874_v19 = vadd.f32 %v871_v63, %v780_v25  ;;  %v933_v3 = vadd.f32 %v2379_v54, %v932_v12  ;;  %v2381_v4 = vpop.eup %2380  ;;  %v1035_v50 = vor.u32 1.1754944e-38, %v1034_v2 }
 0x257   :  { %v1024_v37 = vmul.f32 %v2381_v4, %v1006_v46  ;;  %vm1029_vm4 = vweird.f32 %v2381_v4 }
 0x258   :  { %v937_v6 = vsel %vm936_vm1, %v2379_v54, %v933_v3  ;;  %vm1030_vm7 = vmor %vm1028_vm6, %vm1029_vm4 }
 0x259   :  { %v942_v42 = vsel %vm939_vm2, %v941_v44, %v937_v6  ;;  %v1025_v0 = vsub.f32 1.0, %v1024_v37  ;;  %v2383_v59 = vpop.eup %2382 }
 0x25a   :  { %v960_v30 = vmul.f32 %v942_v42, %v4203_v8  ;;  %v1100_v31 = vadd.f32 1.0, %v2383_v59 }
 0x25b   :  { %v1026_v32 = vmul.f32 %v2381_v4, %v1025_v0 }
 0x25c   :  { %v965_v34 = vmul.f32 %v4618_v27, %v960_v30  ;;  %2384 = vrcp.f32 %v1100_v31  ;;  %v1128_v26 = vand.u32 2147483648, %v1100_v31  ;;  %v1126_v45 = vand.u32 2147483647, %v1100_v31 }
 0x25d   :  { %v1027_v5 = vadd.f32 %v2381_v4, %v1026_v32  ;;  %vm1122_vm10 = vweird.f32 %v1100_v31 }
 0x25e   :  { %v968_v43 = vadd.f32 %v965_v34, %v874_v19  ;;  %v1129_v40 = vor.u32 1.1754944e-38, %v1128_v26  ;;  %vm1127_vm12 = vcmp.eq.f32.partialorder %v1126_v45, 8.507059e+37 }
 0x25f   :  { %v1031_v36 = vsel %vm1030_vm7, %v2381_v4, %v1027_v5 }
 0x260   :  { %v1036_v29 = vsel %vm1033_vm8, %v1035_v50, %v1031_v36 }
 0x261   :  { %v1054_v8 = vmul.f32 %v1036_v29, %v4245_v47 }
 0x262   :  { %v2385_v20 = vpop.eup %2384 }
 0x263   :  { %v1059_v62 = vmul.f32 %v4562_v53, %v1054_v8  ;;  %v1118_v39 = vmul.f32 %v2385_v20, %v1100_v31  ;;  %vm1123_vm9 = vweird.f32 %v2385_v20 }
 0x264   :  { %vm1124_vm11 = vmor %vm1122_vm10, %vm1123_vm9 }
 0x265   :  { %v1062_v48 = vadd.f32 %v1059_v62, %v968_v43  ;;  %v1119_v27 = vsub.f32 1.0, %v1118_v39 }
 0x267   :  { %v1120_v22 = vmul.f32 %v2385_v20, %v1119_v27 }
 0x269   :  { %v1121_v24 = vadd.f32 %v2385_v20, %v1120_v22 }
 0x26b   :  { %v1125_v51 = vsel %vm1124_vm11, %v2385_v20, %v1121_v24 }
 0x26c   :  { %v1130_v1 = vsel %vm1127_vm12, %v1129_v40, %v1125_v51 }
 0x26d   :  { %v1148_v7 = vmul.f32 %v1130_v1, %v4283_v11 }
 0x26f   :  { %v1153_v47 = vmul.f32 %v4631_v57, %v1148_v7 }
 0x271   :  { %v1156_v41 = vadd.f32 %v1153_v47, %v1062_v48 }
 0x273   :  { %v1161_v53 = vadd.f32 %v4573_v16, %v1156_v41 }
 0x275   :  { %v1164_v55 = vadd.f32 %v1161_v53, %v4607_v58 }
 0x277   :  { %v1182_v9 = vmul.f32 %v4644_v49, %v1164_v55 }
 0x279   :  { %v2032_v10 = vsel %vm2030_vm3, %v1182_v9, %v2024_v56 }
 0x27a   :  { %2036 = vst.msk [vmem:[%s4630_s13 + $0x8] sm:$0xff] %vm2034_vm5, %v2032_v10 }
 0x27b   :  { %2042 = vsyncpa [#allocation4], 1 }
 0x27c   :  { %2043 = vsyncpa [#allocation6], 1 }

// kernel: leftnet_forward.22
= control target key start
LH: loop header
LB: loop body
LE: loop exit
PB: predicated region body
PF: predicated region fallthrough
CT: control target
= control target key end

     0   :  { %vm55_vm0 = vcmask 261120   ;;  %s854_s0 = inlined_call_operand.vmem [shape: f32[16,32], index: 0, kind: input, shape index: {}]   ;;  %s855_s1 = inlined_call_operand.vmem [shape: f32[16,32], index: 1, kind: input, shape index: {}]   ;;  %s856_s2 = inlined_call_operand.vmem [shape: f32[3,16,32], index: 2, kind: input, shape index: {}]   ;;  %s857_s3 = inlined_call_operand.vmem [shape: f32[3,16,32], index: 3, kind: input, shape index: {}]   ;;  %s858_s4 = inlined_call_operand.vmem [shape: f32[32,64], index: 4, kind: input, shape index: {}]   ;;  %s859_s5 = inlined_call_operand.vmem [shape: bf16[32,32], index: 5, kind: input, shape index: {}]   ;;  %s860_s6 = inlined_call_operand.vmem [shape: bf16[32,32], index: 6, kind: input, shape index: {}]   ;;  %s861_s7 = inlined_call_operand.vmem [shape: f32[1,32], index: 7, kind: input, shape index: {}]   ;;  %s862_s8 = inlined_call_operand.vmem [shape: bf16[32,96], index: 8, kind: input, shape index: {}]   ;;  %s863_s9 = inlined_call_operand.vmem [shape: f32[1,96], index: 9, kind: input, shape index: {}]   ;;  %s864_s10 = inlined_call_operand.vmem [shape: f32[16,32], index: 10, kind: output, shape index: {0}]   ;;  %s865_s11 = inlined_call_operand.hbm [shape: f32[3,16,32], index: 11, kind: output, shape index: {1}]  }
   0x1   :  { %v48_v0 = vld [vmem:[%s858_s4 + $0x18] sm:$0xff]  ;;  %v47_v1 = vld [vmem:[%s858_s4 + $0x10] sm:$0xff]  ;;  %v46_v2 = vld [vmem:[%s858_s4 + $0x8] sm:$0xff] }
   0x2   :  { %74 = vmatpush.msra.mxu0 %v48_v0  ;;  %536 = vmatpush.msra.mxu2 %v48_v0  ;;  %v49_v3 = vld [vmem:[%s856_s2] sm:$0xff]  ;;  %v50_v5 = vld [vmem:[%s856_s2 + $0x8] sm:$0xff]  ;;  %v489_v7 = vld [vmem:[%s856_s2 + $0x10] sm:$0xff] }
   0x3   :  { %v51_v4 = vld [vmem:[%s857_s3] sm:$0xff]  ;;  %127 = vmatpush.msra.mxu1 %v48_v0  ;;  %540 = vmatpush.msra.mxu3 %v48_v0  ;;  %v52_v6 = vld [vmem:[%s857_s3 + $0x8] sm:$0xff]  ;;  %v491_v8 = vld [vmem:[%s857_s3 + $0x10] sm:$0xff] }
   0x4   :  { %75 = vmatpush.msra.mxu0 %v47_v1  ;;  %537 = vmatpush.msra.mxu2 %v47_v1  ;;  %v490_v9 = vld [vmem:[%s856_s2 + $0x18] sm:$0xff]  ;;  %v45_v11 = vld [vmem:[%s858_s4] sm:$0xff]  ;;  %v692_v12 = vadd.f32 %v51_v4, %v49_v3  ;;  %v694_v13 = vadd.f32 %v52_v6, %v50_v5  ;;  %v696_v14 = vadd.f32 %v491_v8, %v489_v7 }
   0x5   :  { %v492_v10 = vld [vmem:[%s857_s3 + $0x18] sm:$0xff]  ;;  %128 = vmatpush.msra.mxu1 %v47_v1  ;;  %541 = vmatpush.msra.mxu3 %v47_v1 }
   0x6   :  { %76 = vmatpush.msra.mxu0 %v46_v2  ;;  %538 = vmatpush.msra.mxu2 %v46_v2  ;;  %v698_v15 = vadd.f32 %v492_v10, %v490_v9 }
   0x7   :  { %129 = vmatpush.msra.mxu1 %v46_v2  ;;  %542 = vmatpush.msra.mxu3 %v46_v2 }
   0x8   :  { %17 = vsyncpa [#allocation3], 0  ;;  %77 = vmatpush.msra.mxu0 %v45_v11  ;;  %539 = vmatpush.msra.mxu2 %v45_v11  ;;  %v495_v16 = vld [vmem:[%s856_s2 + $0x20] sm:$0xff]  ;;  %v496_v19 = vld [vmem:[%s856_s2 + $0x28] sm:$0xff]  ;;  %s590_s29 = smov 32   ;;  %s592_s27 = smov 64  }
   0x9   :  { %130 = vmatpush.msra.mxu1 %v45_v11  ;;  %543 = vmatpush.msra.mxu3 %v45_v11  ;;  %v497_v17 = vld [vmem:[%s857_s3 + $0x20] sm:$0xff]  ;;  %v498_v20 = vld [vmem:[%s857_s3 + $0x28] sm:$0xff]  ;;  %s473_s12 = sshll.u32 %s865_s11, 4  ;;  %s594_s11 = smov 128   ;;  %s474_s12 = int_to_ptr.hbm [resolvable:$true] %s473_s12 }
   0xa   :  { %487 = vmatmul.msk.f32.vlgmr.msra.gmra.mxu0 %vm55_vm0, %v692_v12  ;;  %488 = vmatmul.msk.f32.vlgmr.msra.gmra.mxu2 %vm55_vm0, %v694_v13  ;;  %v714_v18 = vadd.f32 %v497_v17, %v495_v16  ;;  %v724_v21 = vadd.f32 %v498_v20, %v496_v19  ;;  %v531_v25 = vld [vmem:[%s859_s5 + $0x8] sm:$0xff]  ;;  %v39_v28 = vld [vmem:[%s854_s0] sm:$0xff]  ;;  %s595_s15 = smov 8  }
   0xb   :  { %493 = vmatmul.msk.f32.vlgmr.msra.gmra.mxu1 %vm55_vm0, %v696_v14  ;;  %494 = vmatmul.msk.f32.vlgmr.msra.gmra.mxu3 %vm55_vm0, %v698_v15  ;;  %v533_v26 = vld [vmem:[%s860_s6 + $0x8] sm:$0xff]  ;;  %v530_v32 = vld [vmem:[%s859_s5] sm:$0xff] }
   0xc   :  { %180 = vmatpush.msrb.mxu2 %v48_v0  ;;  %v40_v29 = vld [vmem:[%s854_s0 + $0x8] sm:$0xff]  ;;  %293 = vmatpush.bf16.msrb.mxu0 %v531_v25  ;;  %v41_v33 = vld [vmem:[%s855_s1] sm:$0xff] }
   0xd   :  { %v42_v34 = vld [vmem:[%s855_s1 + $0x8] sm:$0xff]  ;;  %264 = vmatpush.bf16.msrb.mxu3 %v533_v26  ;;  %v532_v35 = vld [vmem:[%s860_s6] sm:$0xff]  ;;  %v772_v36 = vadd.f32 %v41_v33, %v39_v28  ;;  %s591_s1 = smov 96  }
   0xe   :  { %181 = vmatpush.msrb.mxu2 %v47_v1  ;;  %v774_v37 = vadd.f32 %v42_v34, %v40_v29  ;;  %v550_v7 = vld [vmem:[%s861_s7] ss:$0 sm:$0xff] }
   0xf   :  { %v534_v20 = vld [vmem:[%s862_s8] sm:$0xff] }
  0x10   :  { %182 = vmatpush.msrb.mxu2 %v46_v2  ;;  %v233_v38 = vpack.c.bf16 %v774_v37, %v772_v36  ;;  %294 = vmatpush.bf16.msrb.mxu0 %v530_v32 }
  0x11   :  { %265 = vmatpush.bf16.msrb.mxu3 %v532_v35 }
  0x12   :  { %183 = vmatpush.msrb.mxu2 %v45_v11  ;;  %v535_v11 = vld [vmem:[%s862_s8 + $0x8] sm:$0xff] }
  0x13   :  { %499 = vmatmul.msk.f32.vlgmr.msrb.gmra.mxu2 %vm55_vm0, %v714_v18  ;;  %518 = vmatmul.msk.bf16.vlgmr.msrb.gmra.mxu0 %vm55_vm0, %v233_v38 }
  0x14   :  { %377 = vmatpush.bf16.msrb.mxu1 %v535_v11 }
  0x18   :  { %378 = vmatpush.bf16.msrb.mxu1 %v534_v20 }
  0x1b   :  { %500 = vmatmul.msk.f32.gmra.mxu2 %vm55_vm0, %v724_v21 }
  0x87   :  { %v728_v22 = vpop.f32.mrf.mxu0 }
  0x88   :  { %v730_v23 = vpop.f32.mrf.mxu1  ;;  %403 = vrot.lane.b32.xlu0 %v728_v22, %s590_s29  ;;  %v85_v30 = vmul.f32 %v728_v22, %v728_v22 }
  0x89   :  { %423 = vrot.lane.b32.xlu1 %v730_v23, %s590_s29  ;;  %v138_v31 = vmul.f32 %v730_v23, %v730_v23 }
  0x8b   :  { %v140_v39 = vadd.f32 %v138_v31, %v85_v30 }
  0x8d   :  { %v736_v24 = vpop.f32.mrf.mxu2 }
  0x8e   :  { %v744_v27 = vpop.f32.mrf.mxu3  ;;  %v86_v43 = vmul.f32 %v736_v24, %v736_v24 }
  0x8f   :  { %v139_v44 = vmul.f32 %v744_v27, %v744_v27 }
  0x90   :  { %405 = vrot.lane.b32.xlu0 %v736_v24, %s590_s29  ;;  %v296_v6 = vpop.f32.mrf.mxu0 }
  0x91   :  { %425 = vrot.lane.b32.xlu1 %v744_v27, %s590_s29  ;;  %v141_v46 = vadd.f32 %v139_v44, %v86_v43 }
  0x96   :  { %v778_v40 = vpop.f32.mrf.mxu2 }
  0x97   :  { %v191_v41 = vmul.f32 %v778_v40, %v778_v40  ;;  %444 = vrot.lane.b32.xlu2 %v778_v40, %s590_s29 }
  0x98   :  { %91 = vrot.lane.b32.xlu0 %v728_v22, %s591_s1  ;;  %v298_v17 = vpop.f32.mrf.mxu0 }
  0x99   :  { %v193_v42 = vadd.f32 %v191_v41, %v140_v39  ;;  %93 = vrot.lane.b32.xlu1 %v736_v24, %s591_s1 }
  0x9b   :  { %552 = vrsqrt.f32 %v193_v42  ;;  %vm214_vm1 = vcmp.eq.f32.partialorder %v193_v42, inf  ;;  %v217_v0 = vand.u32 2147483648, %v193_v42  ;;  %vm216_vm3 = vcmp.eq.f32.partialorder %v193_v42, 0.0 }
  0x9e   :  { %v793_v45 = vpop.f32.mrf.mxu2 }
  0x9f   :  { %v192_v47 = vmul.f32 %v793_v45, %v793_v45  ;;  %446 = vrot.lane.b32.xlu2 %v793_v45, %s590_s29  ;;  %s593_s29 = smov [#allocation2]  }
  0xa0   :  { %146 = vrot.lane.b32.xlu0 %v744_v27, %s591_s1  ;;  %s471_s2 = sshll.u32 %s593_s29, 4  ;;  %s472_s2 = int_to_ptr.vmem [resolvable:$true] %s471_s2 }
  0xa1   :  { %v553_v48 = vpop.eup %552  ;;  %v194_v49 = vadd.f32 %v192_v47, %v141_v46  ;;  %197 = vrot.lane.b32.xlu1 %v778_v40, %s591_s1 }
  0xa2   :  { %v208_v50 = vmul.f32 %v553_v48, %v193_v42 }
  0xa3   :  { %554 = vrsqrt.f32 %v194_v49  ;;  %vm226_vm2 = vcmp.eq.f32.partialorder %v194_v49, inf  ;;  %v229_v1 = vand.u32 2147483648, %v194_v49  ;;  %vm228_vm4 = vcmp.eq.f32.partialorder %v194_v49, 0.0 }
  0xa4   :  { %v209_v51 = vmul.f32 %v553_v48, %v208_v50 }
  0xa6   :  { %v210_v52 = vmul.f32 0.5, %v209_v51 }
  0xa7   :  { %144 = vrot.lane.b32.xlu2 %v730_v23, %s591_s1 }
  0xa8   :  { %v211_v53 = vsub.f32 1.5, %v210_v52 }
  0xa9   :  { %v555_v54 = vpop.eup %554 }
  0xaa   :  { %v220_v55 = vmul.f32 %v555_v54, %v194_v49  ;;  %v212_v56 = vmul.f32 %v553_v48, %v211_v53 }
  0xac   :  { %v221_v57 = vmul.f32 %v555_v54, %v220_v55  ;;  %v213_v59 = vmul.f32 %v212_v56, %v193_v42 }
  0xae   :  { %v222_v58 = vmul.f32 0.5, %v221_v57  ;;  %v215_v62 = vsel %vm214_vm1, %v193_v42, %v213_v59 }
  0xaf   :  { %199 = vrot.lane.b32.xlu2 %v793_v45, %s591_s1  ;;  %v218_v3 = vsel %vm216_vm3, %v217_v0, %v215_v62 }
  0xb0   :  { %v223_v60 = vsub.f32 1.5, %v222_v58 }
  0xb2   :  { %v224_v61 = vmul.f32 %v555_v54, %v223_v60  ;;  %v551_v60 = vld [vmem:[%s863_s9] ss:$0 sm:$0xff] }
  0xb4   :  { %v225_v63 = vmul.f32 %v224_v61, %v194_v49 }
  0xb6   :  { %v227_v2 = vsel %vm226_vm2, %v194_v49, %v225_v63 }
  0xb7   :  { %v230_v4 = vsel %vm228_vm4, %v229_v1, %v227_v2 }
  0xb8   :  { %v238_v5 = vpack.c.bf16 %v230_v4, %v218_v3 }
  0xba   :  { %509 = vmatmul.msk.bf16.vlgmr.msrb.gmra.mxu3 %vm55_vm0, %v238_v5 }
  0xf1   :  { %v445_v3 = vpop.permute.xlu2 %444 }
  0xfa   :  { %v404_v61 = vpop.permute.xlu0 %403 }
  0xfb   :  { %v424_v62 = vpop.permute.xlu1 %423 }
 0x13d   :  { %v267_v8 = vpop.f32.mrf.mxu3 }
 0x13e   :  { %v297_v9 = vadd.f32 %v296_v6, %v267_v8  ;;  %v426_v6 = vpop.permute.xlu1 %425 }
 0x140   :  { %v305_v10 = vadd.f32 %v550_v7, %v297_v9 }
 0x142   :  { %v519_v16 = vmul.f32 -1.442695, %v305_v10 }
 0x144   :  { %556 = vpow2.f32 %v519_v16 }
 0x145   :  { %v269_v19 = vpop.f32.mrf.mxu3 }
 0x146   :  { %v299_v25 = vadd.f32 %v298_v17, %v269_v19 }
 0x148   :  { %v306_v26 = vadd.f32 %v550_v7, %v299_v25  ;;  %v406_v7 = vpop.permute.xlu0 %405 }
 0x14a   :  { %v557_v28 = vpop.eup %556  ;;  %v520_v29 = vmul.f32 -1.442695, %v306_v26 }
 0x14b   :  { %v313_v30 = vadd.f32 1.0, %v557_v28 }
 0x14c   :  { %558 = vpow2.f32 %v520_v29 }
 0x14d   :  { %560 = vrcp.f32 %v313_v30  ;;  %v326_v43 = vand.u32 2147483648, %v313_v30  ;;  %vm320_vm6 = vweird.f32 %v313_v30  ;;  %v324_v44 = vand.u32 2147483647, %v313_v30 }
 0x14f   :  { %v327_v51 = vor.u32 1.1754944e-38, %v326_v43  ;;  %vm325_vm9 = vcmp.eq.f32.partialorder %v324_v44, 8.507059e+37 }
 0x150   :  { %v92_v28 = vpop.permute.xlu0 %91 }
 0x152   :  { %v559_v31 = vpop.eup %558 }
 0x153   :  { %v561_v32 = vpop.eup %560  ;;  %v314_v33 = vadd.f32 1.0, %v559_v31 }
 0x154   :  { %v316_v34 = vmul.f32 %v561_v32, %v313_v30  ;;  %vm321_vm5 = vweird.f32 %v561_v32 }
 0x155   :  { %562 = vrcp.f32 %v314_v33  ;;  %vm322_vm7 = vmor %vm320_vm6, %vm321_vm5  ;;  %v341_v47 = vand.u32 2147483648, %v314_v33  ;;  %v339_v50 = vand.u32 2147483647, %v314_v33  ;;  %vm335_vm10 = vweird.f32 %v314_v33 }
 0x156   :  { %v317_v35 = vsub.f32 1.0, %v316_v34 }
 0x157   :  { %v342_v54 = vor.u32 1.1754944e-38, %v341_v47  ;;  %vm340_vm12 = vcmp.eq.f32.partialorder %v339_v50, 8.507059e+37 }
 0x158   :  { %v318_v38 = vmul.f32 %v561_v32, %v317_v35 }
 0x15a   :  { %v319_v41 = vadd.f32 %v561_v32, %v318_v38 }
 0x15b   :  { %v563_v39 = vpop.eup %562 }
 0x15c   :  { %v331_v42 = vmul.f32 %v563_v39, %v314_v33  ;;  %v323_v48 = vsel %vm322_vm7, %v561_v32, %v319_v41  ;;  %vm336_vm8 = vweird.f32 %v563_v39  ;;  %v97_v32 = vmul.f32 %v92_v28, %v728_v22  ;;  %v147_v33 = vpop.permute.xlu0 %146 }
 0x15d   :  { %v328_v53 = vsel %vm325_vm9, %v327_v51, %v323_v48  ;;  %vm337_vm11 = vmor %vm335_vm10, %vm336_vm8 }
 0x15e   :  { %v332_v46 = vsub.f32 1.0, %v331_v42  ;;  %v345_v57 = vmul.f32 %v328_v53, %v305_v10  ;;  %v447_v10 = vpop.permute.xlu2 %446 }
 0x160   :  { %v333_v49 = vmul.f32 %v563_v39, %v332_v46 }
 0x162   :  { %v334_v52 = vadd.f32 %v563_v39, %v333_v49 }
 0x164   :  { %v338_v55 = vsel %vm337_vm11, %v563_v39, %v334_v52 }
 0x165   :  { %v343_v56 = vsel %vm340_vm12, %v342_v54, %v338_v55 }
 0x166   :  { %v346_v58 = vmul.f32 %v343_v56, %v306_v26  ;;  %v145_v17 = vpop.permute.xlu2 %144  ;;  %v94_v26 = vpop.permute.xlu1 %93 }
 0x167   :  { %v150_v34 = vmul.f32 %v145_v17, %v730_v23  ;;  %v98_v42 = vmul.f32 %v94_v26, %v736_v24 }
 0x168   :  { %v347_v59 = vpack.c.bf16 %v346_v58, %v345_v57 }
 0x169   :  { %v152_v38 = vadd.f32 %v150_v34, %v97_v32 }
 0x16a   :  { %529 = vmatmul.msk.bf16.vlgmr.msrb.gmra.mxu1 %vm55_vm0, %v347_v59 }
 0x16e   :  { %v200_v19 = vpop.permute.xlu2 %199  ;;  %v198_v31 = vpop.permute.xlu1 %197 }
 0x16f   :  { %v203_v35 = vmul.f32 %v198_v31, %v778_v40  ;;  %v204_v22 = vmul.f32 %v200_v19, %v793_v45 }
 0x171   :  { %v205_v39 = vadd.f32 %v203_v35, %v152_v38 }
 0x173   :  { %v231_v43 = vmul.f32 0.17677669, %v205_v39 }
 0x1e7   :  { %v380_v63 = vpop.f32.mrf.mxu1 }
 0x1e8   :  { %v381_v0 = vadd.f32 %v551_v60, %v380_v63 }
 0x1ea   :  { %387 = vrot.lane.b32.xlu0 %v381_v0, %s591_s1  ;;  %v429_v1 = vmul.f32 %v424_v62, %v381_v0  ;;  %v409_v2 = vmul.f32 %v404_v61, %v381_v0  ;;  %v450_v11 = vmul.f32 %v445_v3, %v381_v0 }
 0x1ec   :  { %433 = vrot.lane.b32.xlu1 %v429_v1, %s592_s27  ;;  %413 = vrot.lane.b32.xlu2 %v409_v2, %s592_s27 }
 0x1ef   :  { %v382_v4 = vpop.f32.mrf.mxu1 }
 0x1f0   :  { %v383_v5 = vadd.f32 %v551_v60, %v382_v4 }
 0x1f2   :  { %v410_v8 = vmul.f32 %v406_v7, %v383_v5  ;;  %v430_v9 = vmul.f32 %v426_v6, %v383_v5  ;;  %v451_v16 = vmul.f32 %v447_v10, %v383_v5 }
 0x1f4   :  { %415 = vrot.lane.b32.xlu0 %v410_v8, %s592_s27  ;;  %389 = vrot.lane.b32.xlu1 %v383_v5, %s591_s1 }
 0x1f5   :  { %435 = vrot.lane.b32.xlu2 %v430_v9, %s592_s27 }
 0x1fc   :  { %454 = vrot.lane.b32.xlu0 %v450_v11, %s592_s27  ;;  %456 = vrot.lane.b32.xlu1 %v451_v16, %s592_s27 }
 0x246   :  { %v414_v20 = vpop.permute.xlu2 %413 }
 0x247   :  { %v419_v25 = vadd.f32 %v414_v20, %v692_v12  ;;  %v151_v12 = vmul.f32 %v147_v33, %v744_v27 }
 0x249   :  { %421 = vst.msk [vmem:[#allocation2] sm:$0xff] %vm55_vm0, %v419_v25  ;;  %v153_v46 = vadd.f32 %v151_v12, %v98_v42 }
 0x24b   :  { %v206_v23 = vadd.f32 %v204_v22, %v153_v46 }
 0x24d   :  { %v232_v51 = vmul.f32 0.17677669, %v206_v23 }
 0x24f   :  { %v436_v29 = vpop.permute.xlu2 %435 }
 0x250   :  { %v440_v30 = vadd.f32 %v436_v29, %v698_v15 }
 0x252   :  { %443 = vst.msk [vmem:[#allocation2 + $0x18] sm:$0xff] %vm55_vm0, %v440_v30 }
 0x25c   :  { %v388_v41 = vpop.permute.xlu0 %387 }
 0x25d   :  { %v393_v44 = vadd.f32 %v388_v41, %v381_v0 }
 0x25e   :  { %v434_v15 = vpop.permute.xlu1 %433 }
 0x25f   :  { %v395_v47 = vadd.f32 %v393_v44, %v231_v43  ;;  %v439_v48 = vadd.f32 %v434_v15, %v696_v14 }
 0x261   :  { %v397_v49 = vmul.f32 0.70710677, %v395_v47  ;;  %442 = vst.msk [vmem:[#allocation2 + $0x10] sm:$0xff] %vm55_vm0, %v439_v48 }
 0x263   :  { %v399_v40 = vadd.f32 %v397_v49, %v772_v36 }
 0x265   :  { %401 = vst.msk [vmem:[%s864_s10] sm:$0xff] %vm55_vm0, %v399_v40 }
 0x266   :  { %v416_v24 = vpop.permute.xlu0 %415  ;;  %v390_v27 = vpop.permute.xlu1 %389 }
 0x267   :  { %v420_v50 = vadd.f32 %v416_v24, %v694_v13  ;;  %v394_v52 = vadd.f32 %v390_v27, %v383_v5 }
 0x269   :  { %422 = vst.msk [vmem:[#allocation2 + $0x8] sm:$0xff] %vm55_vm0, %v420_v50  ;;  %v396_v14 = vadd.f32 %v394_v52, %v232_v51 }
 0x26b   :  { %v398_v45 = vmul.f32 0.70710677, %v396_v14 }
 0x26d   :  { %v400_v36 = vadd.f32 %v398_v45, %v774_v37 }
 0x26e   :  { %v455_v53 = vpop.permute.xlu0 %454  ;;  %v457_v54 = vpop.permute.xlu1 %456 }
 0x26f   :  { %402 = vst.msk [vmem:[%s864_s10 + $0x8] sm:$0xff] %vm55_vm0, %v400_v36  ;;  %v460_v13 = vadd.f32 %v455_v53, %v714_v18  ;;  %v461_v55 = vadd.f32 %v457_v54, %v724_v21 }
 0x271   :  { %463 = vst.msk [vmem:[#allocation2 + $0x20] sm:$0xff] %vm55_vm0, %v460_v13 }
 0x272   :  { %464 = vst.msk [vmem:[#allocation2 + $0x28] sm:$0xff] %vm55_vm0, %v461_v55 }
 0x273   :  { %479 = dma.vmem_to_hbm [thread:$0]  %s472_s2, 768, %s474_s12, [#allocation3], %s594_s11, %s594_s11, %s595_s15  }
 0x274   :  { %588 = dma.done.wait [#allocation3], 768  }
 0x275   :  { %589 = vsyncadd [#allocation3], 4294966528 }
 0x276   :  { %486 = vsyncpa [#allocation3], 1 }

// kernel: leftnet_forward.18
= control target key start
LH: loop header
LB: loop body
LE: loop exit
PB: predicated region body
PF: predicated region fallthrough
CT: control target
= control target key end

     0   :  { %vm86_vm0 = vcmask 130048   ;;  %v1027_v10 = vmov 0   ;;  %vm60_vm1 = vcmask 261120   ;;  %vm194_vm2 = vcmask 523264   ;;  %s1497_s10 = inlined_call_operand.vmem [shape: bf16[64,96], index: 10, kind: input, shape index: {}]   ;;  %s1498_s11 = inlined_call_operand.vmem [shape: bf16[32,96], index: 11, kind: input, shape index: {}]   ;;  %s1499_s12 = inlined_call_operand.vmem [shape: bf16[16,96], index: 12, kind: input, shape index: {}]   ;;  %s1500_s2 = inlined_call_operand.vmem [shape: f32[24,16], index: 2, kind: input, shape index: {}]   ;;  %s1501_s3 = inlined_call_operand.vmem [shape: f32[24,32], index: 3, kind: input, shape index: {}]   ;;  %s1502_s0 = inlined_call_operand.vmem [shape: s32[24,1], index: 0, kind: input, shape index: {}]   ;;  %s1503_s4 = inlined_call_operand.vmem [shape: f32[24,64], index: 4, kind: input, shape index: {}]   ;;  %s1504_s5 = inlined_call_operand.vmem [shape: f32[3,24,1], index: 5, kind: input, shape index: {}]   ;;  %s1505_s13 = inlined_call_operand.vmem [shape: f32[1,96], index: 13, kind: input, shape index: {}]   ;;  %s1506_s1 = inlined_call_operand.vmem [shape: s32[24,1], index: 1, kind: input, shape index: {}]   ;;  %s1507_s9 = inlined_call_operand.vmem [shape: f32[1,96], index: 9, kind: input, shape index: {}]   ;;  %s1508_s8 = inlined_call_operand.vmem [shape: bf16[16,96], index: 8, kind: input, shape index: {}]   ;;  %s1509_s6 = inlined_call_operand.vmem [shape: f32[16,96], index: 6, kind: input, shape index: {}]   ;;  %s1510_s14 = inlined_call_operand.vmem [shape: bf16[96,96], index: 14, kind: input, shape index: {}]   ;;  %s1511_s7 = inlined_call_operand.vmem [shape: f32[3,16,32], index: 7, kind: input, shape index: {}]   ;;  %s1512_s15 = inlined_call_operand.vmem [shape: f32[1,96], index: 15, kind: input, shape index: {}]   ;;  %s1513_s16 = inlined_call_operand.vmem [shape: f32[16,32], index: 16, kind: output, shape index: {0}]   ;;  %s1514_s17 = inlined_call_operand.vmem [shape: f32[3,16,32], index: 17, kind: output, shape index: {1}]  }
   0x1   :  { %1517 = sst [smem:[#allocation2_spill]] %s1497_s10  ;;  %v995_v2 = vld [vmem:[%s1499_s12] sm:$0xff]  ;;  %v70_v5 = vld [vmem:[%s1500_s2 + $0x8] sm:$0xff]  ;;  %1009 = vset.pattern.permute.xlu0 %v1027_v10  ;;  %1010 = vset.pattern.permute.xlu1 %v1027_v10  ;;  %v401_v14 = vld [vmem:[%s1502_s0 + $0x10] sm:$0xff]  ;;  %v397_v30 = vlaneseq  ;;  %v1028_v35 = vmov 0.0   ;;  %vm369_vm14 = vcmask 785408  }
   0x2   :  { %1518 = sst [smem:[#allocation3_spill]] %s1498_s11  ;;  %v69_v3 = vld [vmem:[%s1500_s2] sm:$0xff]  ;;  %234 = vmatpush.bf16.msra.mxu3 %v995_v2  ;;  %v125_v9 = vld [vmem:[%s1501_s3 + $0x8] sm:$0xff]  ;;  %1011 = vset.pattern.permute.xlu2 %v1027_v10  ;;  %v597_v20 = vld [vmem:[%s1504_s5 + $0x10] sm:$0xff]  ;;  %61 = vst.msk [vmem:[%s1513_s16] sm:$0xff] %vm60_vm1, %v1028_v35 }
   0x3   :  { %1519 = sst [smem:[#allocation4_spill]] %s1507_s9  ;;  %v72_v6 = vpack.c.bf16 %v70_v5, %v69_v3  ;;  %v124_v8 = vld [vmem:[%s1501_s3] sm:$0xff]  ;;  %409 = vperm.xlu1 %1010, %v401_v14   ;;  %v112_v17 = vld [vmem:[%s1503_s4 + $0x8] sm:$0xff]  ;;  %v71_v21 = vld [vmem:[%s1500_s2 + $0x10] sm:$0xff]  ;;  %v1200_v32 = vand.u32 127, %v397_v30  ;;  %62 = vst.msk [vmem:[%s1513_s16 + $0x8] sm:$0xff] %vm60_vm1, %v1028_v35 }
   0x4   :  { %s1520_s26 = sld [smem:[#allocation2_spill]]  ;;  %v399_v11 = vld [vmem:[%s1502_s0] sm:$0xff]  ;;  %v127_v13 = vpack.c.bf16 %v125_v9, %v124_v8  ;;  %v400_v18 = vld [vmem:[%s1502_s0 + $0x8] sm:$0xff]  ;;  %v73_v22 = vpack.c.bf16 %v71_v21, %v71_v21  ;;  %v126_v23 = vld [vmem:[%s1501_s3 + $0x10] sm:$0xff]  ;;  %63 = vst.msk [vmem:[%s1514_s17] sm:$0xff] %vm60_vm1, %v1028_v35 }
   0x5   :  { %s1521_s9 = sld [smem:[#allocation3_spill]]  ;;  %913 = vmatmul.msk.bf16.vlgmr.msra.gmra.mxu3 %vm86_vm0, %v72_v6  ;;  %403 = vperm.xlu0 %1009, %v399_v11   ;;  %v111_v16 = vld [vmem:[%s1503_s4] sm:$0xff]  ;;  %v421_v25 = vld [vmem:[%s1506_s1 + $0x8] sm:$0xff]  ;;  %v128_v26 = vpack.c.bf16 %v126_v23, %v126_v23  ;;  %v113_v27 = vld [vmem:[%s1503_s4 + $0x10] sm:$0xff]  ;;  %64 = vst.msk [vmem:[%s1514_s17 + $0x8] sm:$0xff] %vm60_vm1, %v1028_v35 }
   0x6   :  { %v114_v19 = vpack.c.bf16 %v112_v17, %v111_v16  ;;  %v420_v24 = vld [vmem:[%s1506_s1] sm:$0xff]  ;;  %v115_v28 = vpack.c.bf16 %v113_v27, %v113_v27  ;;  %v442_v31 = vld [vmem:[%s1509_s6 + $0x8] sm:$0xff]  ;;  %v999_v47 = vld [vmem:[%s1510_s14 + $0x18] sm:$0xff]  ;;  %s1522_s25 = sld [smem:[#allocation4_spill]]  ;;  %65 = vst.msk [vmem:[%s1514_s17 + $0x10] sm:$0xff] %vm60_vm1, %v1028_v35 }
   0x7   :  { %v988_v29 = vld [vmem:[%s1508_s8] sm:$0xff]  ;;  %466 = vmatpush.msrb.mxu3 %v442_v31  ;;  %v1001_v41 = vld [vmem:[%s1510_s14 + $0x28] sm:$0xff]  ;;  %v961_v52 = vld [vmem:[%s1511_s7 + $0x18] sm:$0xff]  ;;  %66 = vst.msk [vmem:[%s1514_s17 + $0x18] sm:$0xff] %vm60_vm1, %v1028_v35 }
   0x8   :  { %100 = vmatpush.bf16.msra.mxu0 %v988_v29  ;;  %v441_v34 = vld [vmem:[%s1509_s6] sm:$0xff]  ;;  %v553_v51 = vld [vmem:[%s1511_s7 + $0x8] sm:$0xff]  ;;  %v998_v53 = vld [vmem:[%s1510_s14 + $0x10] sm:$0xff]  ;;  %67 = vst.msk [vmem:[%s1514_s17 + $0x20] sm:$0xff] %vm60_vm1, %v1028_v35 }
   0x9   :  { %467 = vmatpush.msrb.mxu3 %v441_v34  ;;  %v1000_v43 = vld [vmem:[%s1510_s14 + $0x20] sm:$0xff]  ;;  %v960_v57 = vld [vmem:[%s1511_s7 + $0x10] sm:$0xff]  ;;  %v997_v60 = vld [vmem:[%s1510_s14 + $0x8] sm:$0xff]  ;;  %68 = vst.msk [vmem:[%s1514_s17 + $0x28] sm:$0xff] %vm60_vm1, %v1028_v35 }
   0xa   :  { %v992_v0 = vld [vmem:[%s1520_s26 + $0x18] sm:$0xff]  ;;  %v991_v4 = vld [vmem:[%s1520_s26 + $0x10] sm:$0xff]  ;;  %v990_v12 = vld [vmem:[%s1520_s26 + $0x8] sm:$0xff] }
   0xb   :  { %v994_v1 = vld [vmem:[%s1521_s9 + $0x8] sm:$0xff]  ;;  %205 = vmatpush.bf16.msra.mxu2 %v992_v0  ;;  %v993_v7 = vld [vmem:[%s1521_s9] sm:$0xff]  ;;  %610 = vperm.xlu1 %1010, %v597_v20  }
   0xc   :  { %158 = vmatpush.bf16.msra.mxu1 %v994_v1  ;;  %v989_v15 = vld [vmem:[%s1520_s26] sm:$0xff]  ;;  %879 = vmatmul.msk.bf16.vlgmr.msra.gmra.mxu0 %vm86_vm0, %v72_v6  ;;  %v596_v21 = vld [vmem:[%s1504_s5 + $0x8] sm:$0xff] }
   0xd   :  { %406 = vperm.xlu0 %1009, %v400_v18   ;;  %378 = vmatpush.bf16.msrb.mxu0 %v1001_v41  ;;  %v1012_v50 = vld [vmem:[%s1505_s13] ss:$0 sm:$0xff] }
   0xe   :  { %680 = vmatpush.msra.mxu3 %v961_v52  ;;  %v552_v56 = vld [vmem:[%s1511_s7] sm:$0xff]  ;;  %605 = vperm.xlu2 %1011, %v596_v21  }
   0xf   :  { %206 = vmatpush.bf16.msra.mxu2 %v991_v4  ;;  %v996_v0 = vld [vmem:[%s1510_s14] sm:$0xff] }
  0x10   :  { %159 = vmatpush.bf16.msra.mxu1 %v993_v7  ;;  %681 = vmatpush.msra.mxu3 %v960_v57  ;;  %v595_v34 = vld [vmem:[%s1504_s5] sm:$0xff] }
  0x11   :  { %379 = vmatpush.bf16.msrb.mxu0 %v1000_v43 }
  0x13   :  { %207 = vmatpush.bf16.msra.mxu2 %v990_v12  ;;  %889 = vmatmul.msk.bf16.vlgmr.msra.gmra.mxu1 %vm60_vm1, %v127_v13 }
  0x14   :  { %427 = vperm.xlu1 %1010, %v421_v25  }
  0x15   :  { %914 = vmatmul.msk.bf16.gmra.mxu3 %vm86_vm0, %v73_v22  ;;  %424 = vperm.xlu0 %1009, %v420_v24  }
  0x16   :  { %380 = vmatpush.bf16.msrb.mxu0 %v999_v47  ;;  %600 = vperm.xlu2 %1011, %v595_v34   ;;  %v980_v34 = vld [vmem:[%s1504_s5 + $0x38] sm:$0xff] }
  0x17   :  { %208 = vmatpush.bf16.msra.mxu2 %v989_v15 }
  0x1a   :  { %907 = vmatmul.msk.bf16.vlgmr.msra.gmra.mxu2 %vm194_vm2, %v114_v19  ;;  %381 = vmatpush.bf16.msrb.mxu0 %v998_v53 }
  0x1b   :  { %568 = vmatpush.msrb.mxu2 %v553_v51 }
  0x1c   :  { %880 = vmatmul.msk.bf16.gmra.mxu0 %vm86_vm0, %v73_v22 }
  0x1d   :  { %569 = vmatpush.msrb.mxu2 %v552_v56 }
  0x1e   :  { %382 = vmatpush.bf16.msrb.mxu0 %v997_v60  ;;  %v422_v60 = vld [vmem:[%s1506_s1 + $0x10] sm:$0xff]  ;;  %s1029_s1 = smov 96  }
  0x1f   :  { %430 = vperm.xlu2 %1011, %v422_v60  }
  0x22   :  { %383 = vmatpush.bf16.msrb.mxu0 %v996_v0 }
  0x23   :  { %890 = vmatmul.msk.bf16.gmra.mxu1 %vm60_vm1, %v128_v26 }
  0x2a   :  { %908 = vmatmul.msk.bf16.gmra.mxu2 %vm194_vm2, %v115_v28 }
  0x75   :  { %v410_v42 = vpop.permute.xlu1 %409 }
  0x76   :  { %vm413_vm5 = vcmp.eq.s32.totalorder %v410_v42, %v1200_v32 }
  0x77   :  { %v404_v33 = vpop.permute.xlu0 %403  ;;  %v1226_v45 = vsel %vm413_vm5, 1.0, %v1028_v35 }
  0x78   :  { %vm411_vm3 = vcmp.eq.s32.totalorder %v404_v33, %v1200_v32 }
  0x79   :  { %v1207_v36 = vsel %vm411_vm3, 1.0, %v1028_v35 }
  0x7a   :  { %950 = vmatmul.msk.f32.vlgmr.msrb.gmra.mxu3 %vm86_vm0, %v1207_v36  ;;  %955 = vmatmul.msk.f32.vlgmr.msrb.gmra.mxu2 %vm86_vm0, %v1207_v36 }
  0x7f   :  { %v407_v37 = vpop.permute.xlu0 %406 }
  0x80   :  { %vm412_vm4 = vcmp.eq.s32.totalorder %v407_v37, %v1200_v32 }
  0x81   :  { %v1213_v39 = vsel %vm412_vm4, 1.0, %v1028_v35 }
  0x82   :  { %951 = vmatmul.msk.f32.gmra.mxu3 %vm86_vm0, %v1213_v39  ;;  %956 = vmatmul.msk.f32.gmra.mxu2 %vm86_vm0, %v1213_v39 }
  0x88   :  { %v236_v40 = vpop.f32.mrf.mxu3 }
  0x8a   :  { %952 = vmatmul.msk.f32.gmra.mxu3 %vm86_vm0, %v1226_v45  ;;  %957 = vmatmul.msk.f32.gmra.mxu2 %vm86_vm0, %v1226_v45 }
  0x90   :  { %v161_v38 = vpop.f32.mrf.mxu1  ;;  %v238_v46 = vpop.f32.mrf.mxu3 }
  0x92   :  { %962 = vmatmul.msk.f32.vlgmr.msra.gmra.mxu3 %vm86_vm0, %v1207_v36 }
  0x98   :  { %v163_v44 = vpop.f32.mrf.mxu1  ;;  %v241_v59 = vpop.f32.mrf.mxu3 }
  0x9a   :  { %963 = vmatmul.msk.f32.gmra.mxu3 %vm86_vm0, %v1213_v39 }
  0x9d   :  { %v210_v48 = vpop.f32.mrf.mxu2 }
  0x9e   :  { %v211_v49 = vadd.f32 %v210_v48, %v161_v38 }
  0xa0   :  { %v245_v54 = vadd.f32 %v236_v40, %v211_v49  ;;  %v166_v55 = vpop.f32.mrf.mxu1  ;;  %v243_v4 = vpop.f32.mrf.mxu3 }
  0xa2   :  { %v1251_v58 = vadd.f32 %v1012_v50, %v245_v54  ;;  %964 = vmatmul.msk.f32.gmra.mxu3 %vm86_vm0, %v1226_v45 }
  0xa4   :  { %v915_v61 = vmul.f32 -1.442695, %v1251_v58 }
  0xa5   :  { %v212_v62 = vpop.f32.mrf.mxu2 }
  0xa6   :  { %1015 = vpow2.f32 %v915_v61  ;;  %v213_v63 = vadd.f32 %v212_v62, %v163_v44  ;;  %v102_v61 = vpop.f32.mrf.mxu0 }
  0xa8   :  { %v246_v1 = vadd.f32 %v238_v46, %v213_v63  ;;  %v168_v2 = vpop.f32.mrf.mxu1 }
  0xa9   :  { %v1014_v2 = vld [vmem:[%s1512_s15] ss:$0 sm:$0xff]  ;;  %s1030_s15 = smov 64  }
  0xaa   :  { %v253_v3 = vadd.f32 %v1012_v50, %v246_v1  ;;  %v1013_v1 = vld [vmem:[%s1522_s25] ss:$0 sm:$0xff] }
  0xac   :  { %v1016_v5 = vpop.eup %1015  ;;  %v916_v6 = vmul.f32 -1.442695, %v253_v3 }
  0xad   :  { %v264_v7 = vadd.f32 1.0, %v1016_v5  ;;  %v215_v8 = vpop.f32.mrf.mxu2  ;;  %v103_v5 = vadd.f32 %v1013_v1, %v102_v61 }
  0xae   :  { %1017 = vpow2.f32 %v916_v6  ;;  %v216_v9 = vadd.f32 %v215_v8, %v166_v55  ;;  %v104_v62 = vpop.f32.mrf.mxu0 }
  0xaf   :  { %1019 = vrcp.f32 %v264_v7  ;;  %v278_v26 = vand.u32 2147483648, %v264_v7  ;;  %vm272_vm7 = vweird.f32 %v264_v7  ;;  %v276_v27 = vand.u32 2147483647, %v264_v7 }
  0xb0   :  { %v247_v10 = vadd.f32 %v241_v59, %v216_v9 }
  0xb1   :  { %v279_v37 = vor.u32 1.1754944e-38, %v278_v26  ;;  %vm277_vm10 = vcmp.eq.f32.partialorder %v276_v27, 8.507059e+37 }
  0xb2   :  { %v1268_v11 = vadd.f32 %v1012_v50, %v247_v10 }
  0xb4   :  { %v1018_v12 = vpop.eup %1017  ;;  %v917_v13 = vmul.f32 -1.442695, %v1268_v11 }
  0xb5   :  { %v1020_v14 = vpop.eup %1019  ;;  %v265_v15 = vadd.f32 1.0, %v1018_v12  ;;  %v217_v16 = vpop.f32.mrf.mxu2 }
  0xb6   :  { %v268_v17 = vmul.f32 %v1020_v14, %v264_v7  ;;  %1021 = vpow2.f32 %v917_v13  ;;  %vm273_vm6 = vweird.f32 %v1020_v14  ;;  %v107_v63 = vpop.f32.mrf.mxu0 }
  0xb7   :  { %1023 = vrcp.f32 %v265_v15  ;;  %vm274_vm8 = vmor %vm272_vm7, %vm273_vm6  ;;  %v293_v29 = vand.u32 2147483648, %v265_v15  ;;  %v291_v33 = vand.u32 2147483647, %v265_v15  ;;  %vm287_vm11 = vweird.f32 %v265_v15 }
  0xb8   :  { %v269_v18 = vsub.f32 1.0, %v268_v17 }
  0xb9   :  { %v294_v42 = vor.u32 1.1754944e-38, %v293_v29  ;;  %vm292_vm13 = vcmp.eq.f32.partialorder %v291_v33, 8.507059e+37  ;;  %v979_v33 = vld [vmem:[%s1504_s5 + $0x30] sm:$0xff] }
  0xba   :  { %v270_v19 = vmul.f32 %v1020_v14, %v269_v18  ;;  %v108_v18 = vadd.f32 %v1013_v1, %v107_v63 }
  0xbc   :  { %v1022_v20 = vpop.eup %1021  ;;  %v271_v24 = vadd.f32 %v1020_v14, %v270_v19 }
  0xbd   :  { %v1024_v22 = vpop.eup %1023  ;;  %v266_v23 = vadd.f32 1.0, %v1022_v20  ;;  %v606_v20 = vpop.permute.xlu2 %605 }
  0xbe   :  { %v283_v25 = vmul.f32 %v1024_v22, %v265_v15  ;;  %v275_v30 = vsel %vm274_vm8, %v1020_v14, %v271_v24  ;;  %vm288_vm9 = vweird.f32 %v1024_v22  ;;  %v109_v0 = vpop.f32.mrf.mxu0  ;;  %v611_v24 = vpop.permute.xlu1 %610  ;;  %vm518_vm8 = vcmask 195584  }
  0xbf   :  { %1025 = vrcp.f32 %v266_v23  ;;  %v280_v41 = vsel %vm277_vm10, %v279_v37, %v275_v30  ;;  %vm289_vm12 = vmor %vm287_vm11, %vm288_vm9  ;;  %vm302_vm15 = vweird.f32 %v266_v23  ;;  %v308_v53 = vand.u32 2147483648, %v266_v23  ;;  %v981_v30 = vld [vmem:[%s1504_s5 + $0x40] sm:$0xff] }
  0xc0   :  { %v284_v28 = vsub.f32 1.0, %v283_v25  ;;  %v312_v47 = vmul.f32 %v280_v41, %v1251_v58  ;;  %v306_v54 = vand.u32 2147483647, %v266_v23  ;;  %v966_v37 = vld [vmem:[%s1504_s5 + $0x20] sm:$0xff]  ;;  %v965_v41 = vld [vmem:[%s1504_s5 + $0x18] sm:$0xff] }
  0xc1   :  { %v309_v56 = vor.u32 1.1754944e-38, %v308_v53 }
  0xc2   :  { %v285_v31 = vmul.f32 %v1024_v22, %v284_v28  ;;  %vm307_vm4 = vcmp.eq.f32.partialorder %v306_v54, 8.507059e+37 }
  0xc4   :  { %v286_v38 = vadd.f32 %v1024_v22, %v285_v31 }
  0xc5   :  { %v1026_v40 = vpop.eup %1025  ;;  %v601_v29 = vpop.permute.xlu2 %600 }
  0xc6   :  { %v290_v43 = vsel %vm289_vm12, %v1024_v22, %v286_v38  ;;  %v298_v44 = vmul.f32 %v1026_v40, %v266_v23  ;;  %vm303_vm2 = vweird.f32 %v1026_v40  ;;  %v967_v38 = vld [vmem:[%s1504_s5 + $0x28] sm:$0xff] }
  0xc7   :  { %v295_v46 = vsel %vm292_vm13, %v294_v42, %v290_v43  ;;  %vm304_vm3 = vmor %vm302_vm15, %vm303_vm2  ;;  %v428_v43 = vpop.permute.xlu1 %427 }
  0xc8   :  { %v313_v48 = vmul.f32 %v295_v46, %v253_v3  ;;  %v299_v49 = vsub.f32 1.0, %v298_v44  ;;  %vm433_vm6 = vcmp.eq.s32.totalorder %v428_v43, %v1200_v32 }
  0xc9   :  { %v948_v44 = vsel %vm433_vm6, 1.0, %v1028_v35 }
  0xca   :  { %v315_v50 = vpack.c.bf16 %v313_v48, %v312_v47  ;;  %v300_v51 = vmul.f32 %v1026_v40, %v299_v49 }
  0xcc   :  { %942 = vmatmul.msk.bf16.vlgmr.msrb.gmra.mxu0 %vm369_vm14, %v315_v50  ;;  %v301_v52 = vadd.f32 %v1026_v40, %v300_v51 }
  0xcd   :  { %v431_v46 = vpop.permute.xlu2 %430 }
  0xce   :  { %v305_v55 = vsel %vm304_vm3, %v1026_v40, %v301_v52  ;;  %v425_v40 = vpop.permute.xlu0 %424  ;;  %vm434_vm7 = vcmp.eq.s32.totalorder %v431_v46, %v1200_v32 }
  0xcf   :  { %v310_v57 = vsel %vm307_vm4, %v309_v56, %v305_v55  ;;  %vm432_vm5 = vcmp.eq.s32.totalorder %v425_v40, %v1200_v32  ;;  %v949_v47 = vsel %vm434_vm7, 1.0, %v1028_v35 }
  0xd0   :  { %v314_v59 = vmul.f32 %v310_v57, %v1268_v11  ;;  %v105_v11 = vadd.f32 %v1013_v1, %v104_v62  ;;  %v947_v42 = vsel %vm432_vm5, 1.0, %v1028_v35 }
  0xd2   :  { %v316_v58 = vpack.c.bf16 %v314_v59, %v314_v59 }
  0xdc   :  { %943 = vmatmul.msk.bf16.gmra.mxu0 %vm369_vm14, %v316_v58 }
  0xfd   :  { %v469_v3 = vpop.f32.mrf.mxu3  ;;  %v571_v49 = vpop.f32.mrf.mxu2 }
 0x105   :  { %v472_v13 = vpop.f32.mrf.mxu3  ;;  %v574_v54 = vpop.f32.mrf.mxu2 }
 0x10d   :  { %v475_v22 = vpop.f32.mrf.mxu3  ;;  %v577_v59 = vpop.f32.mrf.mxu2 }
 0x149   :  { %v385_v4 = vpop.f32.mrf.mxu0 }
 0x14a   :  { %v386_v6 = vadd.f32 %v1014_v2, %v385_v4 }
 0x14c   :  { %v394_v7 = vmul.f32 %v386_v6, %v103_v5 }
 0x14e   :  { %v1294_v8 = vmul.f32 %v469_v3, %v394_v7 }
 0x150   :  { %v481_v9 = vmul.f32 0.57735026, %v1294_v8  ;;  %v613_v31 = vmul.f32 %v601_v29, %v1294_v8 }
 0x151   :  { %v387_v10 = vpop.f32.mrf.mxu0 }
 0x152   :  { %v388_v12 = vadd.f32 %v1014_v2, %v387_v10  ;;  %583 = vrot.lane.b32.xlu0 %v481_v9, %s1029_s1 }
 0x154   :  { %v395_v14 = vmul.f32 %v388_v12, %v105_v11 }
 0x156   :  { %v1297_v15 = vmul.f32 %v472_v13, %v395_v14 }
 0x158   :  { %v482_v16 = vmul.f32 0.57735026, %v1297_v15  ;;  %v614_v25 = vmul.f32 %v606_v20, %v1297_v15  ;;  %v975_v20 = vld [vmem:[%s1511_s7 + $0x28] sm:$0xff] }
 0x159   :  { %v390_v17 = vpop.f32.mrf.mxu0 }
 0x15a   :  { %v391_v19 = vadd.f32 %v1014_v2, %v390_v17  ;;  %585 = vrot.lane.b32.xlu1 %v482_v16, %s1029_s1 }
 0x15c   :  { %v396_v21 = vmul.f32 %v391_v19, %v108_v18 }
 0x15e   :  { %v1300_v23 = vmul.f32 %v475_v22, %v396_v21 }
 0x160   :  { %538 = vmatpush.msra.mxu0 %v1300_v23  ;;  %1002 = vmatpush.msrb.mxu1 %v1300_v23  ;;  %v615_v26 = vmul.f32 %v611_v24, %v1300_v23  ;;  %v483_v27 = vmul.f32 0.57735026, %v1300_v23 }
 0x161   :  { %v392_v28 = vpop.f32.mrf.mxu0 }
 0x162   :  { %621 = vrot.lane.b32.xlu1 %v614_v25, %s1030_s15  ;;  %623 = vrot.lane.b32.xlu2 %v615_v26, %s1030_s15 }
 0x163   :  { %539 = vmatpush.msra.mxu0 %v1297_v15  ;;  %1003 = vmatpush.msrb.mxu1 %v1297_v15 }
 0x164   :  { %587 = vrot.lane.b32.xlu0 %v483_v27, %s1029_s1 }
 0x165   :  { %540 = vmatpush.msra.mxu0 %v1294_v8  ;;  %1004 = vmatpush.msrb.mxu1 %v1294_v8 }
 0x16a   :  { %813 = vperm.xlu1 %1010, %v981_v30   ;;  %619 = vrot.lane.b32.xlu2 %v613_v31, %s1030_s15 }
 0x172   :  { %803 = vperm.xlu1 %1010, %v979_v33   ;;  %808 = vperm.xlu2 %1011, %v980_v34  }
 0x17a   :  { %706 = vperm.xlu1 %1010, %v966_v37   ;;  %711 = vperm.xlu2 %1011, %v967_v38   ;;  %v485_v37 = vld [vmem:[%s1513_s16 + $0x8] sm:$0xff] }
 0x182   :  { %701 = vperm.xlu2 %1011, %v965_v41   ;;  %v634_v41 = vld [vmem:[%s1514_s17] sm:$0xff] }
 0x186   :  { %486 = vxpose.xlu0.b32.start [1/3] (short) (narrow) %v947_v42, 16 }
 0x18e   :  { %487 = vxpose.xlu0.b32.cont [2/3] (short) (narrow) %v948_v44, 16  ;;  %v635_v44 = vld [vmem:[%s1514_s17 + $0x8] sm:$0xff] }
 0x196   :  { %488 = vxpose.xlu0.b32.end [3/3] (short) (narrow) %v949_v47, 16 }
 0x1bc   :  { %v624_v48 = vpop.permute.xlu2 %623 }
 0x1c4   :  { %v620_v50 = vpop.permute.xlu2 %619  ;;  %v1342_v55 = vpop.permute.xlu0 %583 }
 0x1c5   :  { %v592_v60 = vmul.f32 %v1342_v55, %v571_v49 }
 0x1c7   :  { %v628_v2 = vadd.f32 %v620_v50, %v592_v60 }
 0x1c9   :  { %v631_v7 = vmul.f32 0.17677669, %v628_v2 }
 0x1cc   :  { %v1339_v51 = vpop.permute.xlu1 %585  ;;  %v809_v52 = vpop.permute.xlu2 %808 }
 0x1cd   :  { %v817_v53 = vmul.f32 %v809_v52, %v1297_v15  ;;  %v593_v61 = vmul.f32 %v1339_v51, %v574_v54 }
 0x1cf   :  { %824 = vrot.lane.b32.xlu2 %v817_v53, %s1030_s15 }
 0x1d4   :  { %v622_v56 = vpop.permute.xlu1 %621  ;;  %v712_v57 = vpop.permute.xlu2 %711 }
 0x1d5   :  { %v716_v32 = vmul.f32 %v712_v57, %v1300_v23  ;;  %v629_v63 = vadd.f32 %v622_v56, %v593_v61 }
 0x1d6   :  { %v1346_v58 = vpop.permute.xlu0 %587 }
 0x1d7   :  { %v594_v62 = vmul.f32 %v1346_v58, %v577_v59  ;;  %724 = vrot.lane.b32.xlu2 %v716_v32, %s1030_s15  ;;  %v632_v5 = vmul.f32 0.17677669, %v629_v63 }
 0x1d9   :  { %v630_v0 = vadd.f32 %v624_v48, %v594_v62  ;;  %v969_v62 = vld [vmem:[%s1514_s17 + $0x18] sm:$0xff] }
 0x1db   :  { %v633_v1 = vmul.f32 0.17677669, %v630_v0 }
 0x1dc   :  { %v814_v3 = vpop.permute.xlu1 %813  ;;  %v702_v4 = vpop.permute.xlu2 %701 }
 0x1dd   :  { %649 = vmatpush.msra.mxu1 %v633_v1  ;;  %v714_v6 = vmul.f32 %v702_v4, %v1294_v8  ;;  %v818_v11 = vmul.f32 %v814_v3, %v1300_v23  ;;  %v974_v23 = vld [vmem:[%s1511_s7 + $0x20] sm:$0xff]  ;;  %v983_v4 = vld [vmem:[%s1514_s17 + $0x28] sm:$0xff] }
 0x1de   :  { %v982_v1 = vld [vmem:[%s1514_s17 + $0x20] sm:$0xff] }
 0x1df   :  { %650 = vmatpush.msra.mxu1 %v632_v5  ;;  %720 = vrot.lane.b32.xlu2 %v714_v6, %s1030_s15 }
 0x1e1   :  { %651 = vmatpush.msra.mxu1 %v631_v7 }
 0x1e4   :  { %v804_v9 = vpop.permute.xlu1 %803 }
 0x1e5   :  { %v816_v10 = vmul.f32 %v804_v9, %v1294_v8  ;;  %v683_v8 = vpop.f32.mrf.mxu3 }
 0x1e6   :  { %v692_v35 = vmul.f32 %v683_v8, %v1342_v55 }
 0x1e7   :  { %822 = vrot.lane.b32.xlu1 %v816_v10, %s1030_s15 }
 0x1ec   :  { %v707_v12 = vpop.permute.xlu1 %706 }
 0x1ed   :  { %v715_v13 = vmul.f32 %v707_v12, %v1297_v15  ;;  %v686_v14 = vpop.f32.mrf.mxu3 }
 0x1ee   :  { %v693_v28 = vmul.f32 %v686_v14, %v1339_v51 }
 0x1ef   :  { %826 = vrot.lane.b32.xlu1 %v818_v11, %s1030_s15 }
 0x1f5   :  { %v689_v17 = vpop.f32.mrf.mxu3 }
 0x1f6   :  { %v694_v18 = vmul.f32 %v689_v17, %v1346_v58 }
 0x1f7   :  { %722 = vrot.lane.b32.xlu1 %v715_v13, %s1030_s15 }
 0x229   :  { %v1370_v16 = vpop.permute.xlu2 %824 }
 0x22a   :  { %v1372_v15 = vpop.trf.xlu0 }
 0x22b   :  { %953 = vmatmul.msk.f32.vlgmr.msra.gmra.mxu0 %vm518_vm8, %v1372_v15 }
 0x231   :  { %v725_v19 = vpop.permute.xlu2 %724 }
 0x232   :  { %v1385_v21 = vpop.trf.xlu0  ;;  %v731_v22 = vadd.f32 %v725_v19, %v694_v18 }
 0x233   :  { %954 = vmatmul.msk.f32.vlgmr.msrb.gmra.mxu1 %vm518_vm8, %v1385_v21 }
 0x234   :  { %v734_v24 = vmul.f32 0.17677669, %v731_v22  ;;  %782 = vmatpush.msrb.mxu1 %v975_v20 }
 0x236   :  { %751 = vmatpush.msrb.mxu0 %v734_v24  ;;  %783 = vmatpush.msrb.mxu1 %v974_v23 }
 0x239   :  { %v721_v27 = vpop.permute.xlu2 %720 }
 0x23a   :  { %v729_v30 = vadd.f32 %v721_v27, %v692_v35 }
 0x23b   :  { %958 = vmatmul.msk.f32.vlgmr.msra.gmra.mxu1 %vm518_vm8, %v1372_v15 }
 0x23c   :  { %v732_v34 = vmul.f32 0.17677669, %v729_v30 }
 0x243   :  { %959 = vmatmul.msk.f32.gmra.mxu1 %vm518_vm8, %v1385_v21 }
 0x24b   :  { %976 = vmatmul.msk.f32.vlgmr.msrb.gmra.mxu1 %vm86_vm0, %v1207_v36  ;;  %v484_v36 = vld [vmem:[%s1513_s16] sm:$0xff] }
 0x253   :  { %977 = vmatmul.msk.f32.gmra.mxu1 %vm86_vm0, %v1213_v39 }
 0x259   :  { %v823_v25 = vpop.permute.xlu1 %822 }
 0x25b   :  { %978 = vmatmul.msk.f32.gmra.mxu1 %vm86_vm0, %v1226_v45 }
 0x261   :  { %v827_v26 = vpop.permute.xlu1 %826 }
 0x269   :  { %v723_v29 = vpop.permute.xlu1 %722 }
 0x26a   :  { %v730_v31 = vadd.f32 %v723_v29, %v693_v28 }
 0x26c   :  { %v733_v33 = vmul.f32 0.17677669, %v730_v31 }
 0x26e   :  { %752 = vmatpush.msrb.mxu0 %v733_v33 }
 0x270   :  { %753 = vmatpush.msrb.mxu0 %v732_v34 }
 0x271   :  { %970 = vmatmul.msk.f32.vlgmr.msrb.gmra.mxu0 %vm518_vm8, %v1372_v15 }
 0x279   :  { %971 = vmatmul.msk.f32.gmra.mxu0 %vm518_vm8, %v1385_v21 }
 0x2a8   :  { %v542_v39 = vpop.f32.mrf.mxu0 }
 0x2a9   :  { %v548_v45 = vadd.f32 %v542_v39, %v484_v36 }
 0x2ab   :  { %550 = vst.msk [vmem:[%s1513_s16] sm:$0xff] %vm60_vm1, %v548_v45 }
 0x2b0   :  { %v545_v38 = vpop.f32.mrf.mxu1 }
 0x2b1   :  { %v549_v40 = vadd.f32 %v545_v38, %v485_v37 }
 0x2b3   :  { %551 = vst.msk [vmem:[%s1513_s16 + $0x8] sm:$0xff] %vm60_vm1, %v549_v40 }
 0x2b8   :  { %v653_v42 = vpop.f32.mrf.mxu1 }
 0x2b9   :  { %v659_v43 = vadd.f32 %v653_v42, %v634_v41 }
 0x2bb   :  { %661 = vst.msk [vmem:[%s1514_s17] sm:$0xff] %vm60_vm1, %v659_v43 }
 0x2c0   :  { %v656_v46 = vpop.f32.mrf.mxu1 }
 0x2c1   :  { %v660_v47 = vadd.f32 %v656_v46, %v635_v44 }
 0x2c3   :  { %662 = vst.msk [vmem:[%s1514_s17 + $0x8] sm:$0xff] %vm60_vm1, %v660_v47 }
 0x2c8   :  { %v785_v48 = vpop.f32.mrf.mxu1 }
 0x2c9   :  { %v794_v53 = vmul.f32 %v785_v48, %v1342_v55 }
 0x2cb   :  { %v831_v32 = vadd.f32 %v823_v25, %v794_v53 }
 0x2cd   :  { %v834_v61 = vmul.f32 0.17677669, %v831_v32 }
 0x2d0   :  { %v788_v49 = vpop.f32.mrf.mxu1 }
 0x2d1   :  { %v795_v50 = vmul.f32 %v788_v49, %v1339_v51  ;;  %v968_v51 = vld [vmem:[%s1514_s17 + $0x10] sm:$0xff] }
 0x2d3   :  { %v832_v56 = vadd.f32 %v1370_v16, %v795_v50 }
 0x2d5   :  { %v835_v60 = vmul.f32 0.17677669, %v832_v56 }
 0x2d8   :  { %v791_v52 = vpop.f32.mrf.mxu1 }
 0x2d9   :  { %v796_v54 = vmul.f32 %v791_v52, %v1346_v58 }
 0x2db   :  { %v833_v57 = vadd.f32 %v827_v26, %v796_v54 }
 0x2dd   :  { %v836_v59 = vmul.f32 0.17677669, %v833_v57 }
 0x2df   :  { %853 = vmatpush.msra.mxu2 %v836_v59 }
 0x2e1   :  { %854 = vmatpush.msra.mxu2 %v835_v60 }
 0x2e3   :  { %855 = vmatpush.msra.mxu2 %v834_v61 }
 0x2e4   :  { %984 = vmatmul.msk.f32.vlgmr.msra.gmra.mxu2 %vm518_vm8, %v1372_v15 }
 0x2ec   :  { %985 = vmatmul.msk.f32.gmra.mxu2 %vm518_vm8, %v1385_v21 }
 0x2ee   :  { %v755_v55 = vpop.f32.mrf.mxu0 }
 0x2ef   :  { %v761_v58 = vadd.f32 %v968_v51, %v755_v55 }
 0x2f1   :  { %972 = vst.msk [vmem:[%s1514_s17 + $0x10] sm:$0xff] %vm60_vm1, %v761_v58 }
 0x2f6   :  { %v758_v63 = vpop.f32.mrf.mxu0 }
 0x2f7   :  { %v762_v0 = vadd.f32 %v969_v62, %v758_v63 }
 0x2f9   :  { %973 = vst.msk [vmem:[%s1514_s17 + $0x18] sm:$0xff] %vm60_vm1, %v762_v0 }
 0x367   :  { %v857_v2 = vpop.f32.mrf.mxu2 }
 0x368   :  { %v863_v3 = vadd.f32 %v982_v1, %v857_v2 }
 0x36a   :  { %986 = vst.msk [vmem:[%s1514_s17 + $0x20] sm:$0xff] %vm60_vm1, %v863_v3 }
 0x36f   :  { %v860_v5 = vpop.f32.mrf.mxu2 }
 0x370   :  { %v864_v6 = vadd.f32 %v983_v4, %v860_v5 }
 0x372   :  { %987 = vst.msk [vmem:[%s1514_s17 + $0x28] sm:$0xff] %vm60_vm1, %v864_v6 }

// kernel: leftnet_forward.23
= control target key start
LH: loop header
LB: loop body
LE: loop exit
PB: predicated region body
PF: predicated region fallthrough
CT: control target
= control target key end

     0   :  { %v158_v0 = vmov 0   ;;  %vm35_vm0 = vcmask 261120   ;;  %v67_v9 = vlaneseq  ;;  %v159_v12 = vmov 0.0   ;;  %s221_s0 = inlined_call_operand.vmem [shape: s32[16,1], index: 0, kind: input, shape index: {}]   ;;  %s222_s2 = inlined_call_operand.vmem [shape: f32[32,1], index: 2, kind: input, shape index: {}]   ;;  %s223_s1 = inlined_call_operand.vmem [shape: f32[16,32], index: 1, kind: input, shape index: {}]   ;;  %s224_s3 = inlined_call_operand.<no memory space> [shape: f32[1,1], index: 3, kind: input, shape index: {}]   ;;  %s225_s4 = inlined_call_operand.vmem [shape: f32[2,1], index: 4, kind: output, shape index: {}]  }
   0x1   :  { %156 = vset.pattern.permute.xlu0 %v158_v0  ;;  %v65_v1 = vld [vmem:[%s221_s0] sm:$0xff]  ;;  %v66_v2 = vld [vmem:[%s221_s0 + $0x8] sm:$0xff]  ;;  %v30_v3 = vld [vmem:[%s222_s2 + $0x18] sm:$0xff]  ;;  %v9_v16 = vstv %s224_s3  ;;  %vm23_vm3 = vcmask 1024   ;;  %vm114_vm4 = vcmask 130048  }
   0x2   :  { %70 = vperm.xlu0 %156, %v65_v1   ;;  %v29_v4 = vld [vmem:[%s222_s2 + $0x10] sm:$0xff]  ;;  %150 = vmatpush.msra.mxu2 %v30_v3  ;;  %v28_v5 = vld [vmem:[%s222_s2 + $0x8] sm:$0xff]  ;;  %v27_v6 = vld [vmem:[%s222_s2] sm:$0xff]  ;;  %v68_v10 = vand.u32 127, %v67_v9  ;;  %10 = vst [vmem:[#allocation2] sm:$0x1] %v9_v16 }
   0x3   :  { %54 = vmatpush.msra.mxu0 %v30_v3  ;;  %v26_v7 = vld [vmem:[%s223_s1 + $0x8] sm:$0xff]  ;;  %v25_v8 = vld [vmem:[%s223_s1] sm:$0xff]  ;;  %24 = vst.msk [vmem:[%s225_s4] sm:$0x3] %vm23_vm3, %v159_v12 }
   0x4   :  { %151 = vmatpush.msra.mxu2 %v29_v4 }
   0x5   :  { %55 = vmatpush.msra.mxu0 %v29_v4 }
   0x6   :  { %152 = vmatpush.msra.mxu2 %v28_v5 }
   0x7   :  { %56 = vmatpush.msra.mxu0 %v28_v5 }
   0x8   :  { %153 = vmatpush.msra.mxu2 %v27_v6 }
   0x9   :  { %57 = vmatpush.msra.mxu0 %v27_v6  ;;  %146 = vmatmul.msk.f32.vlgmr.msra.gmra.mxu2 %vm35_vm0, %v26_v7  ;;  %v157_v17 = vld [vmem:[#allocation2] ss:$0 sm:$0xff] }
   0xa   :  { %73 = vperm.xlu0 %156, %v66_v2   ;;  %145 = vmatmul.msk.f32.vlgmr.msra.gmra.mxu0 %vm35_vm0, %v25_v8  ;;  %v81_v23 = vld [vmem:[%s225_s4] sm:$0x3] }
  0x74   :  { %v71_v11 = vpop.permute.xlu0 %70 }
  0x75   :  { %vm75_vm1 = vcmp.eq.s32.totalorder %v71_v11, %v68_v10 }
  0x76   :  { %v147_v13 = vsel %vm75_vm1, 1.0, %v159_v12 }
  0x77   :  { %82 = vxpose.xlu1.b32.start [1/2] (short) (narrow) %v147_v13, 8 }
  0x7c   :  { %v74_v14 = vpop.permute.xlu0 %73 }
  0x7d   :  { %vm76_vm2 = vcmp.eq.s32.totalorder %v74_v14, %v68_v10 }
  0x7e   :  { %v148_v15 = vsel %vm76_vm2, 1.0, %v159_v12 }
  0x7f   :  { %83 = vxpose.xlu1.b32.end [2/2] (short) (narrow) %v148_v15, 8 }
  0x87   :  { %v59_v18 = vpop.f32.mrf.mxu0 }
  0x88   :  { %v60_v20 = vadd.f32 %v157_v17, %v59_v18 }
  0x8c   :  { %v62_v19 = vpop.f32.mrf.mxu2 }
  0x8d   :  { %v63_v21 = vadd.f32 %v157_v17, %v62_v19 }
  0x8f   :  { %132 = vmatpush.msra.mxu1 %v63_v21 }
  0x91   :  { %133 = vmatpush.msra.mxu1 %v60_v20 }
 0x11b   :  { %v98_v22 = vpop.trf.xlu1 }
 0x11c   :  { %149 = vmatmul.msk.f32.vlgmr.msra.gmra.mxu1 %vm114_vm4, %v98_v22 }
 0x199   :  { %v135_v24 = vpop.f32.mrf.mxu1 }
 0x19a   :  { %v138_v25 = vadd.f32 %v135_v24, %v81_v23 }
 0x19c   :  { %140 = vst.msk [vmem:[%s225_s4] sm:$0x3] %vm23_vm3, %v138_v25 }

</bundles_post_ra>
